<compile_context>
chip_gen: v7x
topology: tpu7x:2x2x1
jax: 0.10.0
libtpu: 0.0.40
codegen_flags: <defaults>
</compile_context>

<pallas_src>
import jax
import jax.numpy as jnp
from jax.experimental import pallas as pl
from jax.experimental.pallas import tpu as pltpu

LATENT = 100
K_PAD = 128          # latent padded to one full lane group
OUT = 784            # 28 * 28
OUT_PAD = 896        # 784 padded to a multiple of 128 (lane-dense output slab)
HIDDEN = (256, 512, 1024)


def _cdiv(a, b):
    return (a + b - 1) // b


def _round_up(n, m):
    return _cdiv(n, m) * m


def _default_tile_rows():
    """Per-chip batch-tile target: 512 for 256-wide-MXU parts (v6e/v7x/v5p),
    256 for 128-wide-MXU parts (v5e and older)."""
    try:
        kind = jax.devices()[0].device_kind.lower()
    except Exception:
        return 256
    if any(t in kind for t in ("v2", "v3", "v4", "v5 lite", "v5lite", "v5e")):
        return 256
    return 512


# ---------------------------------------------------------------------------
# Kernel: one batch tile through the whole MLP.  Weights (bf16, ~3.2 MB total,
# constant index_map) stay VMEM-resident across grid steps; activations are
# bf16 into each MXU matmul, accumulation + bias + nonlinearity in f32.
# ---------------------------------------------------------------------------
def generator_kernel(x_ref,
                     w1_ref, b1_ref,
                     w2_ref, b2_ref,
                     w3_ref, b3_ref,
                     w4_ref, b4_ref,
                     o_ref):
    h = jnp.dot(x_ref[...], w1_ref[...], preferred_element_type=jnp.float32)
    h = jnp.maximum(h + b1_ref[...], 0.0).astype(jnp.bfloat16)   # bias+ReLU+cast fused
    h = jnp.dot(h, w2_ref[...], preferred_element_type=jnp.float32)
    h = jnp.maximum(h + b2_ref[...], 0.0).astype(jnp.bfloat16)
    h = jnp.dot(h, w3_ref[...], preferred_element_type=jnp.float32)
    h = jnp.maximum(h + b3_ref[...], 0.0).astype(jnp.bfloat16)
    h = jnp.dot(h, w4_ref[...], preferred_element_type=jnp.float32)
    o_ref[...] = jnp.tanh(h + b4_ref[...])                       # Tanh, f32 out


def generator_forward(x, packed_params, *, tm=None):
    """x: (B, 100) f32 latent.  Returns (B, 1, 28, 28) f32 image.

    tm: target batch-tile rows per grid step.  None -> per-chip default
    (512 on v6e/v7x-class, 256 on v5e/older).  The actual TM is re-derived so
    batch padding waste is < 8 rows.
    """
    w1, b1, w2, b2, w3, b3, w4, b4 = packed_params
    B, K = x.shape

    target_tm = _default_tile_rows() if tm is None else int(tm)

    # --- tile selection: even split of the (sublane-padded) batch ----------
    B8 = _round_up(max(B, 1), 8)
    grid_n = _cdiv(B8, target_tm)
    TM = _round_up(_cdiv(B8, grid_n), 8)      # multiple of 8, <= target_tm+7
    grid_n = _cdiv(B8, TM)
    B_pad = grid_n * TM                       # waste < 8 rows beyond B8
    grid = (grid_n,)

    # Latent: zero-pad 100 -> 128 and batch -> B_pad, cast to bf16 (halves x DMA).
    x_pad = jnp.zeros((B_pad, K_PAD), jnp.bfloat16).at[:B, :K].set(
        x.astype(jnp.bfloat16))

    # Small grids are weight-DMA bound: don't shard them across cores (on v7x
    # "parallel" would make each core fetch its own full weight copy).
    semantics = ("parallel",) if grid_n >= 4 else ("arbitrary",)
    vmem_limit = (32 << 20) if TM >= 384 else (24 << 20)

    flops = 2 * B_pad * (K_PAD * 256 + 256 * 512 + 512 * 1024 + 1024 * OUT_PAD)
    bytes_accessed = (
        x_pad.size * x_pad.dtype.itemsize
        + B_pad * OUT_PAD * 4
        + sum(int(p.size) * p.dtype.itemsize for p in packed_params))

    def build_call(single_buffer_weights):
        def wspec(shape):
            # Constant block index -> weights/biases DMA'd once, VMEM-resident.
            if single_buffer_weights:
                return pl.BlockSpec(shape, lambda i: (0, 0),
                                    pipeline_mode=pl.Buffered(1))
            return pl.BlockSpec(shape, lambda i: (0, 0))

        return pl.pallas_call(
            generator_kernel,
            out_shape=jax.ShapeDtypeStruct((B_pad, OUT_PAD), jnp.float32),
            grid=grid,
            in_specs=[
                pl.BlockSpec((TM, K_PAD), lambda i: (i, 0)),   # x: tiled over batch
                wspec((K_PAD, 256)), wspec((1, 256)),          # layer 1
                wspec((256, 512)),   wspec((1, 512)),          # layer 2
                wspec((512, 1024)),  wspec((1, 1024)),         # layer 3
                wspec((1024, OUT_PAD)), wspec((1, OUT_PAD)),   # layer 4
            ],
            out_specs=pl.BlockSpec((TM, OUT_PAD), lambda i: (i, 0)),
            compiler_params=pltpu.CompilerParams(
                dimension_semantics=semantics,
                vmem_limit_bytes=vmem_limit),
            cost_estimate=pl.CostEstimate(
                flops=flops,
                transcendentals=B_pad * OUT_PAD,               # tanh
                bytes_accessed=bytes_accessed),
        )

    args = (x_pad, w1, b1, w2, b2, w3, b3, w4, b4)
    try:
        logits = build_call(single_buffer_weights=True)(*args)
    except Exception:
        # Older JAX versions may reject Buffered(1); default double-buffering
        # is still correct (just ~3 MiB more VMEM).
        logits = build_call(single_buffer_weights=False)(*args)

    # Glue: drop padding, then logits.view(B, 1, 28, 28)
    return logits[:B, :OUT].reshape(B, 1, 28, 28)


# ---------------------------------------------------------------------------
# Parameter init (PyTorch nn.Linear default: U(-1/sqrt(fan_in), +1/sqrt(fan_in))
# for weight and bias), stored as (in, out) f32 matrices + (1, out) biases.
# ---------------------------------------------------------------------------
def init_generator_params(key):
    dims = [(LATENT, 256), (256, 512), (512, 1024), (1024, OUT)]
    params = []
    for (fan_in, fan_out) in dims:
        key, kw, kb = jax.random.split(key, 3)
        bound = 1.0 / jnp.sqrt(jnp.float32(fan_in))
        w = jax.random.uniform(kw, (fan_in, fan_out), jnp.float32,
                               minval=-bound, maxval=bound)
        b = jax.random.uniform(kb, (1, fan_out), jnp.float32,
                               minval=-bound, maxval=bound)
        params.append((w, b))
    return params


def pack_generator_params(params):
    """Pad to lane-aligned shapes and cast weights to bf16 (biases stay f32)."""
    (w1, b1), (w2, b2), (w3, b3), (w4, b4) = params
    w1p = jnp.zeros((K_PAD, 256), jnp.bfloat16).at[:LATENT, :].set(
        w1.astype(jnp.bfloat16))
    w4p = jnp.zeros((1024, OUT_PAD), jnp.bfloat16).at[:, :OUT].set(
        w4.astype(jnp.bfloat16))
    b4p = jnp.zeros((1, OUT_PAD), jnp.float32).at[:, :OUT].set(b4)
    return (w1p, b1.astype(jnp.float32),
            w2.astype(jnp.bfloat16), b2.astype(jnp.float32),
            w3.astype(jnp.bfloat16), b3.astype(jnp.float32),
            w4p, b4p)


if __name__ == "__main__":
    key = jax.random.PRNGKey(0)
    k_params, k_x = jax.random.split(key)

    params = init_generator_params(k_params)
    packed = pack_generator_params(params)

    B = 2
    x = jax.random.normal(k_x, (B, LATENT), dtype=jnp.float32)  # latent vectors

    img = generator_forward(x, packed)
    img = jax.block_until_ready(img)

    assert img.shape == (B, 1, 28, 28)
    assert img.dtype == jnp.float32

    # Reference emulating the kernel's numerics (bf16 matmul operands,
    # f32 accumulation / bias / nonlinearity, bf16 recast after each ReLU).
    h = x.astype(jnp.bfloat16)
    for i, (w, b) in enumerate(params):
        h = jnp.dot(h, w.astype(jnp.bfloat16),
                    preferred_element_type=jnp.float32) + b
        h = jnp.maximum(h, 0.0).astype(jnp.bfloat16) if i < 3 else jnp.tanh(h)
    ref = h.reshape(B, 1, 28, 28)
    assert jnp.allclose(img, ref, atol=2e-2, rtol=2e-2)

    print("KERNEL_OK")
</pallas_src>

<mosaic_0001>
module attributes {stable_mosaic.version = 11 : i64} {
  func.func @generator_kernel(%arg0: i32, %arg1: memref<8x128xbf16, #tpu.memory_space<vmem>>, %arg2: memref<128x256xbf16, #tpu.memory_space<vmem>>, %arg3: memref<1x256xf32, #tpu.memory_space<vmem>>, %arg4: memref<256x512xbf16, #tpu.memory_space<vmem>>, %arg5: memref<1x512xf32, #tpu.memory_space<vmem>>, %arg6: memref<512x1024xbf16, #tpu.memory_space<vmem>>, %arg7: memref<1x1024xf32, #tpu.memory_space<vmem>>, %arg8: memref<1024x896xbf16, #tpu.memory_space<vmem>>, %arg9: memref<1x896xf32, #tpu.memory_space<vmem>>, %arg10: memref<8x896xf32, #tpu.memory_space<vmem>>) attributes {dimension_semantics = [#tpu.dimension_semantics<arbitrary>], iteration_bounds = array<i64: 1>, scalar_prefetch = 0 : i64, scratch_operands = 0 : i64, tpu.core_type = #tpu.core_type<tc>, window_params = [{transform_indices = @transform_0, window_bounds = array<i64: 8, 128>}, {pipeline_mode = #tpu.pipeline_mode<synchronous>, transform_indices = @transform_1, window_bounds = array<i64: 128, 256>}, {pipeline_mode = #tpu.pipeline_mode<synchronous>, transform_indices = @transform_2, window_bounds = array<i64: 1, 256>}, {pipeline_mode = #tpu.pipeline_mode<synchronous>, transform_indices = @transform_3, window_bounds = array<i64: 256, 512>}, {pipeline_mode = #tpu.pipeline_mode<synchronous>, transform_indices = @transform_4, window_bounds = array<i64: 1, 512>}, {pipeline_mode = #tpu.pipeline_mode<synchronous>, transform_indices = @transform_5, window_bounds = array<i64: 512, 1024>}, {pipeline_mode = #tpu.pipeline_mode<synchronous>, transform_indices = @transform_6, window_bounds = array<i64: 1, 1024>}, {pipeline_mode = #tpu.pipeline_mode<synchronous>, transform_indices = @transform_7, window_bounds = array<i64: 1024, 896>}, {pipeline_mode = #tpu.pipeline_mode<synchronous>, transform_indices = @transform_8, window_bounds = array<i64: 1, 896>}, {transform_indices = @transform_9, window_bounds = array<i64: 8, 896>}]} {
    %c0 = arith.constant 0 : index
    %c0_0 = arith.constant 0 : index
    %0 = vector.load %arg1[%c0, %c0_0] : memref<8x128xbf16, #tpu.memory_space<vmem>>, vector<8x128xbf16>
    %c0_1 = arith.constant 0 : index
    %c0_2 = arith.constant 0 : index
    %1 = vector.load %arg2[%c0_1, %c0_2] : memref<128x256xbf16, #tpu.memory_space<vmem>>, vector<128x256xbf16>
    %cst = arith.constant dense<0.000000e+00> : vector<8x256xf32>
    %2 = tpu.matmul %0, %1, %cst {dimension_numbers = #tpu.dot_dimension_numbers<[1], [0], [0], [1], [0, 0, 1, 1], [], []>} : vector<8x128xbf16>, vector<128x256xbf16>, vector<8x256xf32> -> vector<8x256xf32>
    %c0_3 = arith.constant 0 : index
    %c0_4 = arith.constant 0 : index
    %3 = vector.load %arg3[%c0_3, %c0_4] : memref<1x256xf32, #tpu.memory_space<vmem>>, vector<1x256xf32>
    %4 = vector.broadcast %3 : vector<1x256xf32> to vector<8x256xf32>
    %5 = arith.addf %2, %4 : vector<8x256xf32>
    %cst_5 = arith.constant 0.000000e+00 : f32
    %6 = vector.broadcast %cst_5 : f32 to vector<8x256xf32>
    %7 = arith.maximumf %5, %6 : vector<8x256xf32>
    %8 = arith.truncf %7 : vector<8x256xf32> to vector<8x256xbf16>
    %c0_6 = arith.constant 0 : index
    %c0_7 = arith.constant 0 : index
    %9 = vector.load %arg4[%c0_6, %c0_7] : memref<256x512xbf16, #tpu.memory_space<vmem>>, vector<256x512xbf16>
    %cst_8 = arith.constant dense<0.000000e+00> : vector<8x512xf32>
    %10 = tpu.matmul %8, %9, %cst_8 {dimension_numbers = #tpu.dot_dimension_numbers<[1], [0], [0], [1], [0, 0, 1, 1], [], []>} : vector<8x256xbf16>, vector<256x512xbf16>, vector<8x512xf32> -> vector<8x512xf32>
    %c0_9 = arith.constant 0 : index
    %c0_10 = arith.constant 0 : index
    %11 = vector.load %arg5[%c0_9, %c0_10] : memref<1x512xf32, #tpu.memory_space<vmem>>, vector<1x512xf32>
    %12 = vector.broadcast %11 : vector<1x512xf32> to vector<8x512xf32>
    %13 = arith.addf %10, %12 : vector<8x512xf32>
    %cst_11 = arith.constant 0.000000e+00 : f32
    %14 = vector.broadcast %cst_11 : f32 to vector<8x512xf32>
    %15 = arith.maximumf %13, %14 : vector<8x512xf32>
    %16 = arith.truncf %15 : vector<8x512xf32> to vector<8x512xbf16>
    %c0_12 = arith.constant 0 : index
    %c0_13 = arith.constant 0 : index
    %17 = vector.load %arg6[%c0_12, %c0_13] : memref<512x1024xbf16, #tpu.memory_space<vmem>>, vector<512x1024xbf16>
    %cst_14 = arith.constant dense<0.000000e+00> : vector<8x1024xf32>
    %18 = tpu.matmul %16, %17, %cst_14 {dimension_numbers = #tpu.dot_dimension_numbers<[1], [0], [0], [1], [0, 0, 1, 1], [], []>} : vector<8x512xbf16>, vector<512x1024xbf16>, vector<8x1024xf32> -> vector<8x1024xf32>
    %c0_15 = arith.constant 0 : index
    %c0_16 = arith.constant 0 : index
    %19 = vector.load %arg7[%c0_15, %c0_16] : memref<1x1024xf32, #tpu.memory_space<vmem>>, vector<1x1024xf32>
    %20 = vector.broadcast %19 : vector<1x1024xf32> to vector<8x1024xf32>
    %21 = arith.addf %18, %20 : vector<8x1024xf32>
    %cst_17 = arith.constant 0.000000e+00 : f32
    %22 = vector.broadcast %cst_17 : f32 to vector<8x1024xf32>
    %23 = arith.maximumf %21, %22 : vector<8x1024xf32>
    %24 = arith.truncf %23 : vector<8x1024xf32> to vector<8x1024xbf16>
    %c0_18 = arith.constant 0 : index
    %c0_19 = arith.constant 0 : index
    %25 = vector.load %arg8[%c0_18, %c0_19] : memref<1024x896xbf16, #tpu.memory_space<vmem>>, vector<1024x896xbf16>
    %cst_20 = arith.constant dense<0.000000e+00> : vector<8x896xf32>
    %26 = tpu.matmul %24, %25, %cst_20 {dimension_numbers = #tpu.dot_dimension_numbers<[1], [0], [0], [1], [0, 0, 1, 1], [], []>} : vector<8x1024xbf16>, vector<1024x896xbf16>, vector<8x896xf32> -> vector<8x896xf32>
    %c0_21 = arith.constant 0 : index
    %c0_22 = arith.constant 0 : index
    %27 = vector.load %arg9[%c0_21, %c0_22] : memref<1x896xf32, #tpu.memory_space<vmem>>, vector<1x896xf32>
    %28 = vector.broadcast %27 : vector<1x896xf32> to vector<8x896xf32>
    %29 = arith.addf %26, %28 : vector<8x896xf32>
    %30 = math.tanh %29 : vector<8x896xf32>
    %c0_23 = arith.constant 0 : index
    %c0_24 = arith.constant 0 : index
    %31 = vector.load %arg10[%c0_23, %c0_24] : memref<8x896xf32, #tpu.memory_space<vmem>>, vector<8x896xf32>
    tpu.vector_store %arg10[%c0_23, %c0_24], %30 {strides = array<i32>} : memref<8x896xf32, #tpu.memory_space<vmem>>, vector<8x896xf32>,
    return
  }
  func.func @transform_0(%arg0: i32) -> (i32, i32) {
    %c0_i32 = arith.constant 0 : i32
    %c0_i32_0 = arith.constant 0 : i32
    return %arg0, %c0_i32 : i32, i32
  }
  func.func @transform_1(%arg0: i32) -> (i32, i32) {
    %c0_i32 = arith.constant 0 : i32
    %c0_i32_0 = arith.constant 0 : i32
    %c0_i32_1 = arith.constant 0 : i32
    return %c0_i32, %c0_i32_0 : i32, i32
  }
  func.func @transform_2(%arg0: i32) -> (i32, i32) {
    %c0_i32 = arith.constant 0 : i32
    %c0_i32_0 = arith.constant 0 : i32
    %c0_i32_1 = arith.constant 0 : i32
    return %c0_i32, %c0_i32_0 : i32, i32
  }
  func.func @transform_3(%arg0: i32) -> (i32, i32) {
    %c0_i32 = arith.constant 0 : i32
    %c0_i32_0 = arith.constant 0 : i32
    %c0_i32_1 = arith.constant 0 : i32
    return %c0_i32, %c0_i32_0 : i32, i32
  }
  func.func @transform_4(%arg0: i32) -> (i32, i32) {
    %c0_i32 = arith.constant 0 : i32
    %c0_i32_0 = arith.constant 0 : i32
    %c0_i32_1 = arith.constant 0 : i32
    return %c0_i32, %c0_i32_0 : i32, i32
  }
  func.func @transform_5(%arg0: i32) -> (i32, i32) {
    %c0_i32 = arith.constant 0 : i32
    %c0_i32_0 = arith.constant 0 : i32
    %c0_i32_1 = arith.constant 0 : i32
    return %c0_i32, %c0_i32_0 : i32, i32
  }
  func.func @transform_6(%arg0: i32) -> (i32, i32) {
    %c0_i32 = arith.constant 0 : i32
    %c0_i32_0 = arith.constant 0 : i32
    %c0_i32_1 = arith.constant 0 : i32
    return %c0_i32, %c0_i32_0 : i32, i32
  }
  func.func @transform_7(%arg0: i32) -> (i32, i32) {
    %c0_i32 = arith.constant 0 : i32
    %c0_i32_0 = arith.constant 0 : i32
    %c0_i32_1 = arith.constant 0 : i32
    return %c0_i32, %c0_i32_0 : i32, i32
  }
  func.func @transform_8(%arg0: i32) -> (i32, i32) {
    %c0_i32 = arith.constant 0 : i32
    %c0_i32_0 = arith.constant 0 : i32
    %c0_i32_1 = arith.constant 0 : i32
    return %c0_i32, %c0_i32_0 : i32, i32
  }
  func.func @transform_9(%arg0: i32) -> (i32, i32) {
    %c0_i32 = arith.constant 0 : i32
    %c0_i32_0 = arith.constant 0 : i32
    return %arg0, %c0_i32 : i32, i32
  }
}

module attributes {stable_mosaic.version = 11 : i64} {
  func.func @generator_kernel(%arg0: i32, %arg1: memref<8x128xbf16, #tpu.memory_space<vmem>>, %arg2: memref<128x256xbf16, #tpu.memory_space<vmem>>, %arg3: memref<1x256xf32, #tpu.memory_space<vmem>>, %arg4: memref<256x512xbf16, #tpu.memory_space<vmem>>, %arg5: memref<1x512xf32, #tpu.memory_space<vmem>>, %arg6: memref<512x1024xbf16, #tpu.memory_space<vmem>>, %arg7: memref<1x1024xf32, #tpu.memory_space<vmem>>, %arg8: memref<1024x896xbf16, #tpu.memory_space<vmem>>, %arg9: memref<1x896xf32, #tpu.memory_space<vmem>>, %arg10: memref<8x896xf32, #tpu.memory_space<vmem>>) attributes {dimension_semantics = [#tpu.dimension_semantics<arbitrary>], iteration_bounds = array<i64: 1>, scalar_prefetch = 0 : i64, scratch_operands = 0 : i64, tpu.core_type = #tpu.core_type<tc>, window_params = [{transform_indices = @transform_0, window_bounds = array<i64: 8, 128>}, {pipeline_mode = #tpu.pipeline_mode<synchronous>, transform_indices = @transform_1, window_bounds = array<i64: 128, 256>}, {pipeline_mode = #tpu.pipeline_mode<synchronous>, transform_indices = @transform_2, window_bounds = array<i64: 1, 256>}, {pipeline_mode = #tpu.pipeline_mode<synchronous>, transform_indices = @transform_3, window_bounds = array<i64: 256, 512>}, {pipeline_mode = #tpu.pipeline_mode<synchronous>, transform_indices = @transform_4, window_bounds = array<i64: 1, 512>}, {pipeline_mode = #tpu.pipeline_mode<synchronous>, transform_indices = @transform_5, window_bounds = array<i64: 512, 1024>}, {pipeline_mode = #tpu.pipeline_mode<synchronous>, transform_indices = @transform_6, window_bounds = array<i64: 1, 1024>}, {pipeline_mode = #tpu.pipeline_mode<synchronous>, transform_indices = @transform_7, window_bounds = array<i64: 1024, 896>}, {pipeline_mode = #tpu.pipeline_mode<synchronous>, transform_indices = @transform_8, window_bounds = array<i64: 1, 896>}, {transform_indices = @transform_9, window_bounds = array<i64: 8, 896>}]} {
    %c0 = arith.constant 0 : index
    %c0_0 = arith.constant 0 : index
    %0 = vector.load %arg1[%c0, %c0_0] : memref<8x128xbf16, #tpu.memory_space<vmem>>, vector<8x128xbf16>
    %c0_1 = arith.constant 0 : index
    %c0_2 = arith.constant 0 : index
    %1 = vector.load %arg2[%c0_1, %c0_2] : memref<128x256xbf16, #tpu.memory_space<vmem>>, vector<128x256xbf16>
    %cst = arith.constant dense<0.000000e+00> : vector<8x256xf32>
    %2 = tpu.matmul %0, %1, %cst {dimension_numbers = #tpu.dot_dimension_numbers<[1], [0], [0], [1], [0, 0, 1, 1], [], []>} : vector<8x128xbf16>, vector<128x256xbf16>, vector<8x256xf32> -> vector<8x256xf32>
    %c0_3 = arith.constant 0 : index
    %c0_4 = arith.constant 0 : index
    %3 = vector.load %arg3[%c0_3, %c0_4] : memref<1x256xf32, #tpu.memory_space<vmem>>, vector<1x256xf32>
    %4 = vector.broadcast %3 : vector<1x256xf32> to vector<8x256xf32>
    %5 = arith.addf %2, %4 : vector<8x256xf32>
    %cst_5 = arith.constant 0.000000e+00 : f32
    %6 = vector.broadcast %cst_5 : f32 to vector<8x256xf32>
    %7 = arith.maximumf %5, %6 : vector<8x256xf32>
    %8 = arith.truncf %7 : vector<8x256xf32> to vector<8x256xbf16>
    %c0_6 = arith.constant 0 : index
    %c0_7 = arith.constant 0 : index
    %9 = vector.load %arg4[%c0_6, %c0_7] : memref<256x512xbf16, #tpu.memory_space<vmem>>, vector<256x512xbf16>
    %cst_8 = arith.constant dense<0.000000e+00> : vector<8x512xf32>
    %10 = tpu.matmul %8, %9, %cst_8 {dimension_numbers = #tpu.dot_dimension_numbers<[1], [0], [0], [1], [0, 0, 1, 1], [], []>} : vector<8x256xbf16>, vector<256x512xbf16>, vector<8x512xf32> -> vector<8x512xf32>
    %c0_9 = arith.constant 0 : index
    %c0_10 = arith.constant 0 : index
    %11 = vector.load %arg5[%c0_9, %c0_10] : memref<1x512xf32, #tpu.memory_space<vmem>>, vector<1x512xf32>
    %12 = vector.broadcast %11 : vector<1x512xf32> to vector<8x512xf32>
    %13 = arith.addf %10, %12 : vector<8x512xf32>
    %cst_11 = arith.constant 0.000000e+00 : f32
    %14 = vector.broadcast %cst_11 : f32 to vector<8x512xf32>
    %15 = arith.maximumf %13, %14 : vector<8x512xf32>
    %16 = arith.truncf %15 : vector<8x512xf32> to vector<8x512xbf16>
    %c0_12 = arith.constant 0 : index
    %c0_13 = arith.constant 0 : index
    %17 = vector.load %arg6[%c0_12, %c0_13] : memref<512x1024xbf16, #tpu.memory_space<vmem>>, vector<512x1024xbf16>
    %cst_14 = arith.constant dense<0.000000e+00> : vector<8x1024xf32>
    %18 = tpu.matmul %16, %17, %cst_14 {dimension_numbers = #tpu.dot_dimension_numbers<[1], [0], [0], [1], [0, 0, 1, 1], [], []>} : vector<8x512xbf16>, vector<512x1024xbf16>, vector<8x1024xf32> -> vector<8x1024xf32>
    %c0_15 = arith.constant 0 : index
    %c0_16 = arith.constant 0 : index
    %19 = vector.load %arg7[%c0_15, %c0_16] : memref<1x1024xf32, #tpu.memory_space<vmem>>, vector<1x1024xf32>
    %20 = vector.broadcast %19 : vector<1x1024xf32> to vector<8x1024xf32>
    %21 = arith.addf %18, %20 : vector<8x1024xf32>
    %cst_17 = arith.constant 0.000000e+00 : f32
    %22 = vector.broadcast %cst_17 : f32 to vector<8x1024xf32>
    %23 = arith.maximumf %21, %22 : vector<8x1024xf32>
    %24 = arith.truncf %23 : vector<8x1024xf32> to vector<8x1024xbf16>
    %c0_18 = arith.constant 0 : index
    %c0_19 = arith.constant 0 : index
    %25 = vector.load %arg8[%c0_18, %c0_19] : memref<1024x896xbf16, #tpu.memory_space<vmem>>, vector<1024x896xbf16>
    %cst_20 = arith.constant dense<0.000000e+00> : vector<8x896xf32>
    %26 = tpu.matmul %24, %25, %cst_20 {dimension_numbers = #tpu.dot_dimension_numbers<[1], [0], [0], [1], [0, 0, 1, 1], [], []>} : vector<8x1024xbf16>, vector<1024x896xbf16>, vector<8x896xf32> -> vector<8x896xf32>
    %c0_21 = arith.constant 0 : index
    %c0_22 = arith.constant 0 : index
    %27 = vector.load %arg9[%c0_21, %c0_22] : memref<1x896xf32, #tpu.memory_space<vmem>>, vector<1x896xf32>
    %28 = vector.broadcast %27 : vector<1x896xf32> to vector<8x896xf32>
    %29 = arith.addf %26, %28 : vector<8x896xf32>
    %30 = math.tanh %29 : vector<8x896xf32>
    %c0_23 = arith.constant 0 : index
    %c0_24 = arith.constant 0 : index
    %31 = vector.load %arg10[%c0_23, %c0_24] : memref<8x896xf32, #tpu.memory_space<vmem>>, vector<8x896xf32>
    tpu.vector_store %arg10[%c0_23, %c0_24], %30 {strides = array<i32>} : memref<8x896xf32, #tpu.memory_space<vmem>>, vector<8x896xf32>,
    return
  }
  func.func @transform_0(%arg0: i32) -> (i32, i32) {
    %c0_i32 = arith.constant 0 : i32
    %c0_i32_0 = arith.constant 0 : i32
    return %arg0, %c0_i32 : i32, i32
  }
  func.func @transform_1(%arg0: i32) -> (i32, i32) {
    %c0_i32 = arith.constant 0 : i32
    %c0_i32_0 = arith.constant 0 : i32
    %c0_i32_1 = arith.constant 0 : i32
    return %c0_i32, %c0_i32_0 : i32, i32
  }
  func.func @transform_2(%arg0: i32) -> (i32, i32) {
    %c0_i32 = arith.constant 0 : i32
    %c0_i32_0 = arith.constant 0 : i32
    %c0_i32_1 = arith.constant 0 : i32
    return %c0_i32, %c0_i32_0 : i32, i32
  }
  func.func @transform_3(%arg0: i32) -> (i32, i32) {
    %c0_i32 = arith.constant 0 : i32
    %c0_i32_0 = arith.constant 0 : i32
    %c0_i32_1 = arith.constant 0 : i32
    return %c0_i32, %c0_i32_0 : i32, i32
  }
  func.func @transform_4(%arg0: i32) -> (i32, i32) {
    %c0_i32 = arith.constant 0 : i32
    %c0_i32_0 = arith.constant 0 : i32
    %c0_i32_1 = arith.constant 0 : i32
    return %c0_i32, %c0_i32_0 : i32, i32
  }
  func.func @transform_5(%arg0: i32) -> (i32, i32) {
    %c0_i32 = arith.constant 0 : i32
    %c0_i32_0 = arith.constant 0 : i32
    %c0_i32_1 = arith.constant 0 : i32
    return %c0_i32, %c0_i32_0 : i32, i32
  }
  func.func @transform_6(%arg0: i32) -> (i32, i32) {
    %c0_i32 = arith.constant 0 : i32
    %c0_i32_0 = arith.constant 0 : i32
    %c0_i32_1 = arith.constant 0 : i32
    return %c0_i32, %c0_i32_0 : i32, i32
  }
  func.func @transform_7(%arg0: i32) -> (i32, i32) {
    %c0_i32 = arith.constant 0 : i32
    %c0_i32_0 = arith.constant 0 : i32
    %c0_i32_1 = arith.constant 0 : i32
    return %c0_i32, %c0_i32_0 : i32, i32
  }
  func.func @transform_8(%arg0: i32) -> (i32, i32) {
    %c0_i32 = arith.constant 0 : i32
    %c0_i32_0 = arith.constant 0 : i32
    %c0_i32_1 = arith.constant 0 : i32
    return %c0_i32, %c0_i32_0 : i32, i32
  }
  func.func @transform_9(%arg0: i32) -> (i32, i32) {
    %c0_i32 = arith.constant 0 : i32
    %c0_i32_0 = arith.constant 0 : i32
    return %arg0, %c0_i32 : i32, i32
  }
}

</mosaic_0001>

<bundles_post_ra>
// kernel: tpu_custom_call.1
= control target key start
LH: loop header
LB: loop body
LE: loop exit
PB: predicated region body
PF: predicated region fallthrough
CT: control target
= control target key end

     0   :  { %14 = vsyncpa [#allocation3], 0  ;;  %s8581_s0 = inlined_call_operand.hbm [shape: bf16[8,128], index: 0, kind: input, shape index: {}]   ;;  %s8582_s1 = inlined_call_operand.hbm [shape: bf16[128,256], index: 1, kind: input, shape index: {}]   ;;  %s8583_s2 = inlined_call_operand.hbm [shape: f32[1,256], index: 2, kind: input, shape index: {}]   ;;  %s8584_s3 = inlined_call_operand.hbm [shape: bf16[256,512], index: 3, kind: input, shape index: {}]   ;;  %s8585_s4 = inlined_call_operand.hbm [shape: f32[1,512], index: 4, kind: input, shape index: {}]   ;;  %s8586_s5 = inlined_call_operand.hbm [shape: bf16[512,1024], index: 5, kind: input, shape index: {}]   ;;  %s8587_s6 = inlined_call_operand.hbm [shape: f32[1,1024], index: 6, kind: input, shape index: {}]   ;;  %s8588_s7 = inlined_call_operand.hbm [shape: bf16[1024,896], index: 7, kind: input, shape index: {}]   ;;  %s8589_s8 = inlined_call_operand.hbm [shape: f32[1,896], index: 8, kind: input, shape index: {}]   ;;  %s8590_s9 = inlined_call_operand.hbm [shape: f32[8,896], index: 9, kind: output, shape index: {}]  }
   0x1   :  { %15 = vsyncpa [#allocation6], 0 }
   0x2   :  { %16 = vsyncpa [#allocation9], 0 }
   0x3   :  { %17 = vsyncpa [#allocation12], 0 }
   0x4   :  { %18 = vsyncpa [#allocation15], 0 }
   0x5   :  { %19 = vsyncpa [#allocation4], 0  ;;  %s8219_s30 = smov [#allocation5]   ;;  %s7987_s13 = scalar_lea.hbm %s8582_s1, 2048 }
   0x6   :  { %s35_s10 = sshll.u32 %s8219_s30, 4  ;;  %p7988_p0 = scmp.ne.s32.totalorder %s8582_s1, %s7987_s13  ;;  %s36_s10 = int_to_ptr.vmem [resolvable:$true] %s35_s10 }
   0x7   :  { %p7991_p1 = scmp.lt.u32.totalorder %s7987_s13, %s8582_s1 }
   0x9   :  { %p7993_p2 = pnand %p7991_p1, %p7988_p0 }
   0xb   :  { %7996 = shalt.err (!%p7993_p2)
}
   0xc   :  { %s7997_s18 = scalar_lea.vmem %s36_s10, 2048  ;;  %p8002_p4 = scmp.lt.s32.totalorder %s36_s10, %s36_s10 }
   0xd   :  { %p7998_p3 = scmp.ne.s32.totalorder %s36_s10, %s7997_s18  ;;  %p8003_p5 = scmp.lt.s32.totalorder %s7997_s18, %s7997_s18 }
   0xf   :  { %p8004_p6 = por %p8003_p5, %p8002_p4 }
  0x11   :  { %p8005_p7 = pnand %p8004_p6, %p7998_p3 }
  0x13   :  { %8008 = shalt.err (!%p8005_p7)
}
  0x14   :  { %s8220_s19 = smov 128   ;;  %s8221_s20 = smov 8  }
  0x15   :  { %41 = dma.hbm_to_vmem [thread:$0]  %s8582_s1, 2048, %s36_s10, [#allocation6], %s8220_s19, %s8220_s19, %s8221_s20  }
  0x16   :  { %s8222_s23 = smov [#allocation8]   ;;  %s8009_s27 = scalar_lea.hbm %s8584_s3, 8192 }
  0x17   :  { %s57_s24 = sshll.u32 %s8222_s23, 4  ;;  %p8010_p8 = scmp.ne.s32.totalorder %s8584_s3, %s8009_s27  ;;  %s58_s24 = int_to_ptr.vmem [resolvable:$true] %s57_s24 }
  0x18   :  { %p8013_p9 = scmp.lt.u32.totalorder %s8009_s27, %s8584_s3 }
  0x1a   :  { %p8015_p10 = pnand %p8013_p9, %p8010_p8 }
  0x1c   :  { %8018 = shalt.err (!%p8015_p10)
}
  0x1d   :  { %s8019_s12 = scalar_lea.vmem %s58_s24, 8192  ;;  %p8024_p12 = scmp.lt.s32.totalorder %s58_s24, %s58_s24 }
  0x1e   :  { %p8020_p11 = scmp.ne.s32.totalorder %s58_s24, %s8019_s12  ;;  %p8025_p13 = scmp.lt.s32.totalorder %s8019_s12, %s8019_s12 }
  0x20   :  { %p8026_p0 = por %p8025_p13, %p8024_p12 }
  0x22   :  { %p8027_p1 = pnand %p8026_p0, %p8020_p11 }
  0x24   :  { %8030 = shalt.err (!%p8027_p1)
}
  0x25   :  { %s8223_s1 = smov 256   ;;  %s8224_s10 = smov 16  }
  0x26   :  { %63 = dma.hbm_to_vmem [thread:$0]  %s8584_s3, 8192, %s58_s24, [#allocation9], %s8223_s1, %s8223_s1, %s8224_s10  }
  0x27   :  { %s8225_s15 = smov [#allocation11]   ;;  %s8031_s19 = scalar_lea.hbm %s8586_s5, 32768 }
  0x28   :  { %s79_s16 = sshll.u32 %s8225_s15, 4  ;;  %p8032_p2 = scmp.ne.s32.totalorder %s8586_s5, %s8031_s19  ;;  %s80_s16 = int_to_ptr.vmem [resolvable:$true] %s79_s16 }
  0x29   :  { %p8035_p3 = scmp.lt.u32.totalorder %s8031_s19, %s8586_s5 }
  0x2b   :  { %p8037_p4 = pnand %p8035_p3, %p8032_p2 }
  0x2d   :  { %8040 = shalt.err (!%p8037_p4)
}
  0x2e   :  { %s8041_s25 = scalar_lea.vmem %s80_s16, 32768  ;;  %p8046_p6 = scmp.lt.s32.totalorder %s80_s16, %s80_s16 }
  0x2f   :  { %p8042_p5 = scmp.ne.s32.totalorder %s80_s16, %s8041_s25  ;;  %p8047_p7 = scmp.lt.s32.totalorder %s8041_s25, %s8041_s25 }
  0x31   :  { %p8048_p8 = por %p8047_p7, %p8046_p6 }
  0x33   :  { %p8049_p9 = pnand %p8048_p8, %p8042_p5 }
  0x35   :  { %8052 = shalt.err (!%p8049_p9)
}
  0x36   :  { %s8226_s3 = smov 512   ;;  %s8227_s24 = smov 32  }
  0x37   :  { %85 = dma.hbm_to_vmem [thread:$0]  %s8586_s5, 32768, %s80_s16, [#allocation12], %s8226_s3, %s8226_s3, %s8227_s24  }
  0x38   :  { %s8228_s28 = smov [#allocation14]   ;;  %s8053_s12 = scalar_lea.hbm %s8588_s7, 57344 }
  0x39   :  { %s101_s29 = sshll.u32 %s8228_s28, 4  ;;  %p8054_p10 = scmp.ne.s32.totalorder %s8588_s7, %s8053_s12  ;;  %s102_s29 = int_to_ptr.vmem [resolvable:$true] %s101_s29 }
  0x3a   :  { %p8057_p11 = scmp.lt.u32.totalorder %s8053_s12, %s8588_s7 }
  0x3c   :  { %p8059_p12 = pnand %p8057_p11, %p8054_p10 }
  0x3e   :  { %8062 = shalt.err (!%p8059_p12)
}
  0x3f   :  { %s8063_s15 = scalar_lea.vmem %s102_s29, 57344  ;;  %p8068_p0 = scmp.lt.s32.totalorder %s102_s29, %s102_s29 }
  0x40   :  { %p8064_p13 = scmp.ne.s32.totalorder %s102_s29, %s8063_s15  ;;  %p8069_p1 = scmp.lt.s32.totalorder %s8063_s15, %s8063_s15 }
  0x42   :  { %p8070_p2 = por %p8069_p1, %p8068_p0 }
  0x44   :  { %p8071_p3 = pnand %p8070_p2, %p8064_p13 }
  0x46   :  { %8074 = shalt.err (!%p8071_p3)
}
  0x47   :  { %s8229_s5 = smov 448   ;;  %s8230_s16 = smov 28  }
  0x48   :  { %107 = dma.hbm_to_vmem [thread:$0]  %s8588_s7, 57344, %s102_s29, [#allocation15], %s8229_s5, %s8229_s5, %s8230_s16  }
  0x49   :  { %s8231_s19 = smov [#allocation2]   ;;  %s8232_s21 = smov [#allocation7]  }
  0x4a   :  { %s26_s20 = sshll.u32 %s8231_s19, 4  ;;  %s48_s22 = sshll.u32 %s8232_s21, 4  ;;  %s27_s20 = int_to_ptr.vmem [resolvable:$true] %s26_s20  ;;  %s49_s22 = int_to_ptr.vmem [resolvable:$true] %s48_s22 }
  0x4b   :  { %s8075_s3 = scalar_lea.hbm %s8581_s0, 64 }
  0x4c   :  { %p8076_p4 = scmp.ne.s32.totalorder %s8581_s0, %s8075_s3  ;;  %p8079_p5 = scmp.lt.u32.totalorder %s8075_s3, %s8581_s0 }
  0x4e   :  { %p8081_p6 = pnand %p8079_p5, %p8076_p4 }
  0x50   :  { %8084 = shalt.err (!%p8081_p6)
}
  0x51   :  { %s8085_s7 = scalar_lea.vmem %s27_s20, 64  ;;  %p8090_p8 = scmp.lt.s32.totalorder %s27_s20, %s27_s20 }
  0x52   :  { %p8086_p7 = scmp.ne.s32.totalorder %s27_s20, %s8085_s7  ;;  %p8091_p9 = scmp.lt.s32.totalorder %s8085_s7, %s8085_s7 }
  0x54   :  { %p8092_p10 = por %p8091_p9, %p8090_p8 }
  0x56   :  { %p8093_p11 = pnand %p8092_p10, %p8086_p7 }
  0x58   :  { %8096 = shalt.err (!%p8093_p11)
}
  0x59   :  { %29 = dma.hbm_to_vmem [thread:$0]  %s8581_s0, 64, %s27_s20, [#allocation3]  }
  0x5a   :  { %s8097_s1 = scalar_lea.hbm %s8583_s2, 32 }
  0x5b   :  { %p8098_p12 = scmp.ne.s32.totalorder %s8583_s2, %s8097_s1  ;;  %p8101_p13 = scmp.lt.u32.totalorder %s8097_s1, %s8583_s2 }
  0x5d   :  { %p8103_p0 = pnand %p8101_p13, %p8098_p12 }
  0x5f   :  { %8106 = shalt.err (!%p8103_p0)
}
  0x60   :  { %s8107_s5 = scalar_lea.vmem %s49_s22, 32  ;;  %p8112_p2 = scmp.lt.s32.totalorder %s49_s22, %s49_s22 }
  0x61   :  { %p8108_p1 = scmp.ne.s32.totalorder %s49_s22, %s8107_s5  ;;  %p8113_p3 = scmp.lt.s32.totalorder %s8107_s5, %s8107_s5 }
  0x63   :  { %p8114_p4 = por %p8113_p3, %p8112_p2 }
  0x65   :  { %p8115_p5 = pnand %p8114_p4, %p8108_p1 }
  0x67   :  { %8118 = shalt.err (!%p8115_p5)
}
  0x68   :  { %51 = dma.hbm_to_vmem [thread:$0]  %s8583_s2, 32, %s49_s22, [#allocation6]  }
  0x69   :  { %s8233_s17 = smov [#allocation10]   ;;  %s8234_s19 = smov [#allocation13]  }
  0x6a   :  { %s70_s18 = sshll.u32 %s8233_s17, 4  ;;  %s92_s20 = sshll.u32 %s8234_s19, 4  ;;  %s71_s18 = int_to_ptr.vmem [resolvable:$true] %s70_s18  ;;  %s93_s20 = int_to_ptr.vmem [resolvable:$true] %s92_s20 }
  0x6b   :  { %s8119_s25 = scalar_lea.hbm %s8585_s4, 64 }
  0x6c   :  { %p8120_p6 = scmp.ne.s32.totalorder %s8585_s4, %s8119_s25  ;;  %p8123_p7 = scmp.lt.u32.totalorder %s8119_s25, %s8585_s4 }
  0x6e   :  { %p8125_p8 = pnand %p8123_p7, %p8120_p6 }
  0x70   :  { %8128 = shalt.err (!%p8125_p8)
}
  0x71   :  { %s8129_s2 = scalar_lea.vmem %s71_s18, 64  ;;  %p8134_p10 = scmp.lt.s32.totalorder %s71_s18, %s71_s18 }
  0x72   :  { %p8130_p9 = scmp.ne.s32.totalorder %s71_s18, %s8129_s2  ;;  %p8135_p11 = scmp.lt.s32.totalorder %s8129_s2, %s8129_s2 }
  0x74   :  { %p8136_p12 = por %p8135_p11, %p8134_p10 }
  0x76   :  { %p8137_p13 = pnand %p8136_p12, %p8130_p9 }
  0x78   :  { %8140 = shalt.err (!%p8137_p13)
}
  0x79   :  { %73 = dma.hbm_to_vmem [thread:$0]  %s8585_s4, 64, %s71_s18, [#allocation9]  }
  0x7a   :  { %s8141_s30 = scalar_lea.hbm %s8587_s6, 128 }
  0x7b   :  { %p8142_p0 = scmp.ne.s32.totalorder %s8587_s6, %s8141_s30  ;;  %p8145_p1 = scmp.lt.u32.totalorder %s8141_s30, %s8587_s6 }
  0x7d   :  { %p8147_p2 = pnand %p8145_p1, %p8142_p0 }
  0x7f   :  { %8150 = shalt.err (!%p8147_p2)
}
  0x80   :  { %s8151_s13 = scalar_lea.vmem %s93_s20, 128  ;;  %p8156_p4 = scmp.lt.s32.totalorder %s93_s20, %s93_s20 }
  0x81   :  { %p8152_p3 = scmp.ne.s32.totalorder %s93_s20, %s8151_s13  ;;  %p8157_p5 = scmp.lt.s32.totalorder %s8151_s13, %s8151_s13 }
  0x83   :  { %p8158_p6 = por %p8157_p5, %p8156_p4 }
  0x85   :  { %p8159_p7 = pnand %p8158_p6, %p8152_p3 }
  0x87   :  { %8162 = shalt.err (!%p8159_p7)
}
  0x88   :  { %95 = dma.hbm_to_vmem [thread:$0]  %s8587_s6, 128, %s93_s20, [#allocation12]  }
  0x89   :  { %s8235_s15 = smov [#allocation16]   ;;  %s8163_s17 = scalar_lea.hbm %s8589_s8, 112 }
  0x8a   :  { %s114_s5 = sshll.u32 %s8235_s15, 4  ;;  %p8164_p8 = scmp.ne.s32.totalorder %s8589_s8, %s8163_s17  ;;  %s115_s5 = int_to_ptr.vmem [resolvable:$true] %s114_s5 }
  0x8b   :  { %p8167_p9 = scmp.lt.u32.totalorder %s8163_s17, %s8589_s8 }
  0x8d   :  { %p8169_p10 = pnand %p8167_p9, %p8164_p8 }
  0x8f   :  { %8172 = shalt.err (!%p8169_p10)
}
  0x90   :  { %s8173_s25 = scalar_lea.vmem %s115_s5, 112  ;;  %s8177_s6 = scalar_lea.vmem %s115_s5, 128 }
  0x91   :  { %p8174_p11 = scmp.ne.s32.totalorder %s115_s5, %s8173_s25  ;;  %p8178_p12 = scmp.lt.s32.totalorder %s115_s5, %s115_s5 }
  0x92   :  { %p8179_p13 = scmp.lt.s32.totalorder %s8177_s6, %s8173_s25 }
  0x94   :  { %p8180_p0 = por %p8179_p13, %p8178_p12 }
  0x96   :  { %p8181_p1 = pnand %p8180_p0, %p8174_p11 }
  0x98   :  { %8184 = shalt.err (!%p8181_p1)
}
  0x99   :  { %117 = dma.hbm_to_vmem [thread:$0]  %s8589_s8, 112, %s115_s5, [#allocation15]  }
  0x9a   :  { %8207 = dma.done.wait [#allocation3], 64  }
  0x9b   :  { %8208 = vsyncadd [#allocation3], 4294967232 }
  0x9c   :  { %8209 = dma.done.wait [#allocation6], 2080  }
  0x9d   :  { %8210 = vsyncadd [#allocation6], 4294965216 }
  0x9e   :  { %8211 = dma.done.wait [#allocation9], 8256  }
  0x9f   :  { %8212 = vsyncadd [#allocation9], 4294959040 }
  0xa0   :  { %8213 = dma.done.wait [#allocation12], 32896  }
  0xa1   :  { %8214 = vsyncadd [#allocation12], 4294934400 }
  0xa2   :  { %8215 = dma.done.wait [#allocation15], 57456  }
  0xa3   :  { %8216 = vsyncadd [#allocation15], 4294909840  ;;  %v8236_v0 = vmov 0   ;;  %v7213_v1 = vld [vmem:[#allocation5 + $0x4] ss:$8 sps:$4 sm:$0xff]   ;;  %s8237_s8 = smov [#allocation17]  }
  0xa4   :  { %287 = vmatprep.mubr.bf16.mxu0 %v8236_v0  ;;  %v7215_v2 = vld [vmem:[#allocation5] ss:$8 sps:$4 sm:$0xff]   ;;  %255 = vmatprep.subr.bf16.mxu0 %v7213_v1  ;;  %v7216_v3 = vld [vmem:[#allocation5 + $0x14] ss:$8 sps:$4 sm:$0xff]   ;;  %v7218_v4 = vld [vmem:[#allocation5 + $0x10] ss:$8 sps:$4 sm:$0xff]  }
  0xa5   :  { %256 = vmatpush1.bf16.msra.mxu0 %v7215_v2  ;;  %v7219_v5 = vld [vmem:[#allocation5 + $0x24] ss:$8 sps:$4 sm:$0xff]   ;;  %v7221_v6 = vld [vmem:[#allocation5 + $0x20] ss:$8 sps:$4 sm:$0xff]   ;;  %v7222_v7 = vld [vmem:[#allocation5 + $0x34] ss:$8 sps:$4 sm:$0xff]  }
  0xa6   :  { %257 = vmatprep.subr.bf16.mxu0 %v7216_v3  ;;  %v7224_v8 = vld [vmem:[#allocation5 + $0x30] ss:$8 sps:$4 sm:$0xff]   ;;  %v7225_v9 = vld [vmem:[#allocation5 + $0x44] ss:$8 sps:$4 sm:$0xff]   ;;  %v7227_v10 = vld [vmem:[#allocation5 + $0x40] ss:$8 sps:$4 sm:$0xff]  }
  0xa7   :  { %v7228_v11 = vld [vmem:[#allocation5 + $0x54] ss:$8 sps:$4 sm:$0xff]   ;;  %v7230_v12 = vld [vmem:[#allocation5 + $0x50] ss:$8 sps:$4 sm:$0xff]   ;;  %v7231_v13 = vld [vmem:[#allocation5 + $0x64] ss:$8 sps:$4 sm:$0xff]  }
  0xa8   :  { %v7233_v14 = vld [vmem:[#allocation5 + $0x60] ss:$8 sps:$4 sm:$0xff]   ;;  %v7234_v15 = vld [vmem:[#allocation5 + $0x74] ss:$8 sps:$4 sm:$0xff]   ;;  %v7236_v16 = vld [vmem:[#allocation5 + $0x70] ss:$8 sps:$4 sm:$0xff]  }
  0xa9   :  { %258 = vmatpush1.bf16.msra.mxu0 %v7218_v4  ;;  %v7239_v17 = vld [vmem:[#allocation8 + $0x4] ss:$16 sps:$4 sm:$0xff]   ;;  %v146_v18 = vld [vmem:[#allocation2] sm:$0xf]  ;;  %v7237_v19 = vld [vmem:[#allocation8] ss:$16 sps:$4 sm:$0xff]  }
  0xaa   :  { %259 = vmatprep.subr.bf16.mxu0 %v7219_v5  ;;  %v7242_v20 = vld [vmem:[#allocation8 + $0x24] ss:$16 sps:$4 sm:$0xff]   ;;  %v7240_v21 = vld [vmem:[#allocation8 + $0x20] ss:$16 sps:$4 sm:$0xff]   ;;  %v7287_v50 = vld [vmem:[#allocation8 + $0xc] ss:$16 sps:$4 sm:$0xff]  }
  0xab   :  { %v7245_v22 = vld [vmem:[#allocation8 + $0x44] ss:$16 sps:$4 sm:$0xff]   ;;  %v7243_v23 = vld [vmem:[#allocation8 + $0x40] ss:$16 sps:$4 sm:$0xff]   ;;  %s6243_s24 = sshll.u32 %s8237_s8, 4  ;;  %s6244_s24 = int_to_ptr.vmem [resolvable:$true] %s6243_s24 }
  0xac   :  { %v7248_v24 = vld [vmem:[#allocation8 + $0x64] ss:$16 sps:$4 sm:$0xff]   ;;  %v7246_v25 = vld [vmem:[#allocation8 + $0x60] ss:$16 sps:$4 sm:$0xff]   ;;  %s8185_s26 = scalar_lea.vmem %s6244_s24, 896  ;;  %p8190_p3 = scmp.lt.s32.totalorder %s6244_s24, %s6244_s24 }
  0xad   :  { %260 = vmatpush1.bf16.msra.mxu0 %v7221_v6  ;;  %v7251_v26 = vld [vmem:[#allocation8 + $0x84] ss:$16 sps:$4 sm:$0xff]   ;;  %v7249_v27 = vld [vmem:[#allocation8 + $0x80] ss:$16 sps:$4 sm:$0xff]   ;;  %p8186_p2 = scmp.ne.s32.totalorder %s6244_s24, %s8185_s26  ;;  %p8191_p4 = scmp.lt.s32.totalorder %s8185_s26, %s8185_s26 }
  0xae   :  { %261 = vmatprep.subr.bf16.mxu0 %v7222_v7  ;;  %v7254_v28 = vld [vmem:[#allocation8 + $0xa4] ss:$16 sps:$4 sm:$0xff]   ;;  %v7252_v29 = vld [vmem:[#allocation8 + $0xa0] ss:$16 sps:$4 sm:$0xff]  }
  0xaf   :  { %v7257_v30 = vld [vmem:[#allocation8 + $0xc4] ss:$16 sps:$4 sm:$0xff]   ;;  %v7255_v31 = vld [vmem:[#allocation8 + $0xc0] ss:$16 sps:$4 sm:$0xff]   ;;  %p8192_p5 = por %p8191_p4, %p8190_p3 }
  0xb0   :  { %v7260_v32 = vld [vmem:[#allocation8 + $0xe4] ss:$16 sps:$4 sm:$0xff]   ;;  %v7258_v33 = vld [vmem:[#allocation8 + $0xe0] ss:$16 sps:$4 sm:$0xff]  }
  0xb1   :  { %262 = vmatpush1.bf16.msra.mxu0 %v7224_v8  ;;  %v7263_v34 = vld [vmem:[#allocation8 + $0x104] ss:$16 sps:$4 sm:$0xff]   ;;  %v7261_v35 = vld [vmem:[#allocation8 + $0x100] ss:$16 sps:$4 sm:$0xff]   ;;  %p8193_p6 = pnand %p8192_p5, %p8186_p2 }
  0xb2   :  { %263 = vmatprep.subr.bf16.mxu0 %v7225_v9  ;;  %v7266_v36 = vld [vmem:[#allocation8 + $0x124] ss:$16 sps:$4 sm:$0xff]   ;;  %v7264_v37 = vld [vmem:[#allocation8 + $0x120] ss:$16 sps:$4 sm:$0xff]  }
  0xb3   :  { %v7269_v38 = vld [vmem:[#allocation8 + $0x144] ss:$16 sps:$4 sm:$0xff]   ;;  %v7267_v39 = vld [vmem:[#allocation8 + $0x140] ss:$16 sps:$4 sm:$0xff]  }
  0xb4   :  { %v7272_v40 = vld [vmem:[#allocation8 + $0x164] ss:$16 sps:$4 sm:$0xff]   ;;  %v7270_v41 = vld [vmem:[#allocation8 + $0x160] ss:$16 sps:$4 sm:$0xff]  }
  0xb5   :  { %264 = vmatpush1.bf16.msra.mxu0 %v7227_v10  ;;  %v7275_v42 = vld [vmem:[#allocation8 + $0x184] ss:$16 sps:$4 sm:$0xff]   ;;  %v7273_v43 = vld [vmem:[#allocation8 + $0x180] ss:$16 sps:$4 sm:$0xff]  }
  0xb6   :  { %265 = vmatprep.subr.bf16.mxu0 %v7228_v11  ;;  %v7278_v44 = vld [vmem:[#allocation8 + $0x1a4] ss:$16 sps:$4 sm:$0xff]   ;;  %v7276_v45 = vld [vmem:[#allocation8 + $0x1a0] ss:$16 sps:$4 sm:$0xff]  }
  0xb7   :  { %v7281_v46 = vld [vmem:[#allocation8 + $0x1c4] ss:$16 sps:$4 sm:$0xff]   ;;  %v7279_v47 = vld [vmem:[#allocation8 + $0x1c0] ss:$16 sps:$4 sm:$0xff]  }
  0xb8   :  { %v7284_v48 = vld [vmem:[#allocation8 + $0x1e4] ss:$16 sps:$4 sm:$0xff]   ;;  %v7282_v49 = vld [vmem:[#allocation8 + $0x1e0] ss:$16 sps:$4 sm:$0xff]  }
  0xb9   :  { %266 = vmatpush1.bf16.msra.mxu0 %v7230_v12  ;;  %v796_v51 = vld [vmem:[#allocation11] sm:$0xff] }
  0xba   :  { %267 = vmatprep.subr.bf16.mxu0 %v7231_v13  ;;  %v800_v52 = vld [vmem:[#allocation11 + $0x20] sm:$0xff] }
  0xbb   :  { %v6337_v53 = vcombine.high %v796_v51, %v800_v52  ;;  %v6336_v54 = vcombine.low %v796_v51, %v800_v52  ;;  %v804_v55 = vld [vmem:[#allocation11 + $0x40] sm:$0xff] }
  0xbc   :  { %v808_v56 = vld [vmem:[#allocation11 + $0x60] sm:$0xff] }
  0xbd   :  { %268 = vmatpush1.bf16.msra.mxu0 %v7233_v14  ;;  %v6345_v57 = vcombine.high %v804_v55, %v808_v56  ;;  %2374 = vmatprep.subr.bf16.mxu1 %v6337_v53  ;;  %v6344_v58 = vcombine.low %v804_v55, %v808_v56  ;;  %v812_v59 = vld [vmem:[#allocation11 + $0x80] sm:$0xff] }
  0xbe   :  { %269 = vmatprep.subr.bf16.mxu0 %v7234_v15  ;;  %2375 = vmatpush1.bf16.msra.mxu1 %v6336_v54  ;;  %v816_v60 = vld [vmem:[#allocation11 + $0xa0] sm:$0xff] }
  0xbf   :  { %2376 = vmatprep.subr.bf16.mxu1 %v6345_v57  ;;  %v6353_v61 = vcombine.high %v812_v59, %v816_v60  ;;  %v6352_v62 = vcombine.low %v812_v59, %v816_v60  ;;  %v820_v63 = vld [vmem:[#allocation11 + $0xc0] sm:$0xff] }
  0xc0   :  { %v824_v0 = vld [vmem:[#allocation11 + $0xe0] sm:$0xff] }
  0xc1   :  { %270 = vmatpush1.bf16.msra.mxu0 %v7236_v16  ;;  %v6361_v1 = vcombine.high %v820_v63, %v824_v0  ;;  %v6360_v2 = vcombine.low %v820_v63, %v824_v0  ;;  %v828_v3 = vld [vmem:[#allocation11 + $0x100] sm:$0xff]  ;;  %v7293_v63 = vld [vmem:[#allocation8 + $0x4c] ss:$16 sps:$4 sm:$0xff]  }
  0xc2   :  { %706 = vmatprep.subr.bf16.mxu0 %v7239_v17  ;;  %2377 = vmatpush1.bf16.msra.mxu1 %v6344_v58  ;;  %v832_v4 = vld [vmem:[#allocation11 + $0x120] sm:$0xff] }
  0xc3   :  { %2378 = vmatprep.subr.bf16.mxu1 %v6353_v61  ;;  %v6369_v5 = vcombine.high %v828_v3, %v832_v4  ;;  %v6368_v6 = vcombine.low %v828_v3, %v832_v4  ;;  %v836_v7 = vld [vmem:[#allocation11 + $0x140] sm:$0xff]  ;;  %v7290_v61 = vld [vmem:[#allocation8 + $0x2c] ss:$16 sps:$4 sm:$0xff]  }
  0xc4   :  { %288 = vmatmul.mubr.bf16.vlgmr.msra.gmra.mrb[0].mxu0 %v146_v18  ;;  %v840_v8 = vld [vmem:[#allocation11 + $0x160] sm:$0xff]  ;;  %v7299_v3 = vld [vmem:[#allocation8 + $0x8c] ss:$16 sps:$4 sm:$0xff]  }
  0xc5   :  { %707 = vmatpush1.bf16.msra.mxu0 %v7237_v19  ;;  %v6377_v9 = vcombine.high %v836_v7, %v840_v8  ;;  %v6376_v10 = vcombine.low %v836_v7, %v840_v8  ;;  %v844_v11 = vld [vmem:[#allocation11 + $0x180] sm:$0xff]  ;;  %v7305_v7 = vld [vmem:[#allocation8 + $0xcc] ss:$16 sps:$4 sm:$0xff]  }
  0xc6   :  { %708 = vmatprep.subr.bf16.mxu0 %v7242_v20  ;;  %2379 = vmatpush1.bf16.msra.mxu1 %v6352_v62  ;;  %v848_v12 = vld [vmem:[#allocation11 + $0x1a0] sm:$0xff] }
  0xc7   :  { %2380 = vmatprep.subr.bf16.mxu1 %v6361_v1  ;;  %v6385_v13 = vcombine.high %v844_v11, %v848_v12  ;;  %v6384_v14 = vcombine.low %v844_v11, %v848_v12  ;;  %v852_v15 = vld [vmem:[#allocation11 + $0x1c0] sm:$0xff]  ;;  %v7296_v1 = vld [vmem:[#allocation8 + $0x6c] ss:$16 sps:$4 sm:$0xff]  }
  0xc8   :  { %v856_v16 = vld [vmem:[#allocation11 + $0x1e0] sm:$0xff]  ;;  %v7311_v11 = vld [vmem:[#allocation8 + $0x10c] ss:$16 sps:$4 sm:$0xff]  }
  0xc9   :  { %709 = vmatpush1.bf16.msra.mxu0 %v7240_v21  ;;  %v6393_v17 = vcombine.high %v852_v15, %v856_v16  ;;  %v6392_v18 = vcombine.low %v852_v15, %v856_v16  ;;  %v860_v19 = vld [vmem:[#allocation11 + $0x200] sm:$0xff]  ;;  %v7317_v15 = vld [vmem:[#allocation8 + $0x14c] ss:$16 sps:$4 sm:$0xff]  }
  0xca   :  { %710 = vmatprep.subr.bf16.mxu0 %v7245_v22  ;;  %2381 = vmatpush1.bf16.msra.mxu1 %v6360_v2  ;;  %v864_v20 = vld [vmem:[#allocation11 + $0x220] sm:$0xff] }
  0xcb   :  { %2382 = vmatprep.subr.bf16.mxu1 %v6369_v5  ;;  %v6401_v21 = vcombine.high %v860_v19, %v864_v20  ;;  %v6400_v22 = vcombine.low %v860_v19, %v864_v20  ;;  %v7285_v59 = vld [vmem:[#allocation8 + $0x8] ss:$16 sps:$4 sm:$0xff]   ;;  %v7302_v5 = vld [vmem:[#allocation8 + $0xac] ss:$16 sps:$4 sm:$0xff]  }
  0xcc   :  { %v7288_v62 = vld [vmem:[#allocation8 + $0x28] ss:$16 sps:$4 sm:$0xff]   ;;  %v7323_v19 = vld [vmem:[#allocation8 + $0x18c] ss:$16 sps:$4 sm:$0xff]  }
  0xcd   :  { %711 = vmatpush1.bf16.msra.mxu0 %v7243_v23  ;;  %v868_v23 = vld [vmem:[#allocation11 + $0x240] sm:$0xff] }
  0xce   :  { %712 = vmatprep.subr.bf16.mxu0 %v7248_v24  ;;  %2383 = vmatpush1.bf16.msra.mxu1 %v6368_v6  ;;  %v872_v24 = vld [vmem:[#allocation11 + $0x260] sm:$0xff] }
  0xcf   :  { %2384 = vmatprep.subr.bf16.mxu1 %v6377_v9  ;;  %v7291_v0 = vld [vmem:[#allocation8 + $0x48] ss:$16 sps:$4 sm:$0xff]   ;;  %v7308_v9 = vld [vmem:[#allocation8 + $0xec] ss:$16 sps:$4 sm:$0xff]  }
  0xd0   :  { %v7294_v2 = vld [vmem:[#allocation8 + $0x68] ss:$16 sps:$4 sm:$0xff]  }
  0xd1   :  { %713 = vmatpush1.bf16.msra.mxu0 %v7246_v25  ;;  %v6409_v25 = vcombine.high %v868_v23, %v872_v24  ;;  %v7297_v4 = vld [vmem:[#allocation8 + $0x88] ss:$16 sps:$4 sm:$0xff]  }
  0xd2   :  { %714 = vmatprep.subr.bf16.mxu0 %v7251_v26  ;;  %2385 = vmatpush1.bf16.msra.mxu1 %v6376_v10  ;;  %v6408_v26 = vcombine.low %v868_v23, %v872_v24  ;;  %v7300_v6 = vld [vmem:[#allocation8 + $0xa8] ss:$16 sps:$4 sm:$0xff]   ;;  %v7329_v23 = vld [vmem:[#allocation8 + $0x1cc] ss:$16 sps:$4 sm:$0xff]  }
  0xd3   :  { %2386 = vmatprep.subr.bf16.mxu1 %v6385_v13  ;;  %v7303_v8 = vld [vmem:[#allocation8 + $0xc8] ss:$16 sps:$4 sm:$0xff]   ;;  %v7314_v13 = vld [vmem:[#allocation8 + $0x12c] ss:$16 sps:$4 sm:$0xff]  }
  0xd4   :  { %v7306_v10 = vld [vmem:[#allocation8 + $0xe8] ss:$16 sps:$4 sm:$0xff]  }
  0xd5   :  { %715 = vmatpush1.bf16.msra.mxu0 %v7249_v27  ;;  %v876_v27 = vld [vmem:[#allocation11 + $0x280] sm:$0xff] }
  0xd6   :  { %716 = vmatprep.subr.bf16.mxu0 %v7254_v28  ;;  %2387 = vmatpush1.bf16.msra.mxu1 %v6384_v14  ;;  %v880_v28 = vld [vmem:[#allocation11 + $0x2a0] sm:$0xff] }
  0xd7   :  { %2388 = vmatprep.subr.bf16.mxu1 %v6393_v17  ;;  %v7309_v12 = vld [vmem:[#allocation8 + $0x108] ss:$16 sps:$4 sm:$0xff]   ;;  %v7320_v17 = vld [vmem:[#allocation8 + $0x16c] ss:$16 sps:$4 sm:$0xff]  }
  0xd8   :  { %v7312_v14 = vld [vmem:[#allocation8 + $0x128] ss:$16 sps:$4 sm:$0xff]  }
  0xd9   :  { %717 = vmatpush1.bf16.msra.mxu0 %v7252_v29  ;;  %v6417_v29 = vcombine.high %v876_v27, %v880_v28  ;;  %v7315_v16 = vld [vmem:[#allocation8 + $0x148] ss:$16 sps:$4 sm:$0xff]  }
  0xda   :  { %718 = vmatprep.subr.bf16.mxu0 %v7257_v30  ;;  %2389 = vmatpush1.bf16.msra.mxu1 %v6392_v18  ;;  %v165_v30 = vlaneseq  ;;  %v7318_v18 = vld [vmem:[#allocation8 + $0x168] ss:$16 sps:$4 sm:$0xff]  }
  0xdb   :  { %2390 = vmatprep.subr.bf16.mxu1 %v6401_v21  ;;  %v7321_v20 = vld [vmem:[#allocation8 + $0x188] ss:$16 sps:$4 sm:$0xff]   ;;  %v7326_v21 = vld [vmem:[#allocation8 + $0x1ac] ss:$16 sps:$4 sm:$0xff]  }
  0xdc   :  { %v7327_v24 = vld [vmem:[#allocation8 + $0x1c8] ss:$16 sps:$4 sm:$0xff]  }
  0xdd   :  { %719 = vmatpush1.bf16.msra.mxu0 %v7255_v31  ;;  %v6416_v31 = vcombine.low %v876_v27, %v880_v28  ;;  %v801_v27 = vld [vmem:[#allocation11 + $0x28] sm:$0xff]  ;;  %v7330_v28 = vld [vmem:[#allocation8 + $0x1e8] ss:$16 sps:$4 sm:$0xff]  }
  0xde   :  { %720 = vmatprep.subr.bf16.mxu0 %v7260_v32  ;;  %2391 = vmatpush1.bf16.msra.mxu1 %v6400_v22  ;;  %v884_v32 = vld [vmem:[#allocation11 + $0x2c0] sm:$0xff] }
  0xdf   :  { %2392 = vmatprep.subr.bf16.mxu1 %v6409_v25  ;;  %v7324_v22 = vld [vmem:[#allocation8 + $0x1a8] ss:$16 sps:$4 sm:$0xff]   ;;  %v7332_v25 = vld [vmem:[#allocation8 + $0x1ec] ss:$16 sps:$4 sm:$0xff]  }
  0xe1   :  { %721 = vmatpush1.bf16.msra.mxu0 %v7258_v33  ;;  %v888_v33 = vld [vmem:[#allocation11 + $0x2e0] sm:$0xff] }
  0xe2   :  { %722 = vmatprep.subr.bf16.mxu0 %v7263_v34  ;;  %2393 = vmatpush1.bf16.msra.mxu1 %v6408_v26  ;;  %v6425_v34 = vcombine.high %v884_v32, %v888_v33  ;;  %v797_v26 = vld [vmem:[#allocation11 + $0x8] sm:$0xff] }
  0xe3   :  { %2394 = vmatprep.subr.bf16.mxu1 %v6417_v29  ;;  %v6339_v29 = vcombine.high %v797_v26, %v801_v27 }
  0xe5   :  { %723 = vmatpush1.bf16.msra.mxu0 %v7261_v35  ;;  %v8396_v35 = vshrl.u32 %v165_v30, 7  ;;  %v805_v30 = vld [vmem:[#allocation11 + $0x48] sm:$0xff] }
  0xe6   :  { %724 = vmatprep.subr.bf16.mxu0 %v7266_v36  ;;  %2395 = vmatpush1.bf16.msra.mxu1 %v6416_v31  ;;  %v6424_v36 = vcombine.low %v884_v32, %v888_v33  ;;  %v809_v31 = vld [vmem:[#allocation11 + $0x68] sm:$0xff]  ;;  %v6338_v32 = vcombine.low %v797_v26, %v801_v27 }
  0xe7   :  { %2396 = vmatprep.subr.bf16.mxu1 %v6425_v34  ;;  %v6347_v33 = vcombine.high %v805_v30, %v809_v31  ;;  %v813_v34 = vld [vmem:[#allocation11 + $0x88] sm:$0xff] }
  0xe9   :  { %725 = vmatpush1.bf16.msra.mxu0 %v7264_v37  ;;  %v892_v37 = vld [vmem:[#allocation11 + $0x300] sm:$0xff] }
  0xea   :  { %726 = vmatprep.subr.bf16.mxu0 %v7269_v38  ;;  %v896_v38 = vld [vmem:[#allocation11 + $0x320] sm:$0xff]  ;;  %2397 = vmatpush1.bf16.msra.mxu1 %v6424_v36  ;;  %v817_v36 = vld [vmem:[#allocation11 + $0xa8] sm:$0xff] }
  0xed   :  { %727 = vmatpush1.bf16.msra.mxu0 %v7267_v39  ;;  %v6433_v39 = vcombine.high %v892_v37, %v896_v38 }
  0xee   :  { %728 = vmatprep.subr.bf16.mxu0 %v7272_v40  ;;  %v8399_v40 = vsub.s32 0, %v8396_v35 }
  0xef   :  { %2398 = vmatprep.subr.bf16.mxu1 %v6433_v39  ;;  %v821_v39 = vld [vmem:[#allocation11 + $0xc8] sm:$0xff] }
  0xf1   :  { %729 = vmatpush1.bf16.msra.mxu0 %v7270_v41  ;;  %v6432_v41 = vcombine.low %v892_v37, %v896_v38  ;;  %v6346_v37 = vcombine.low %v805_v30, %v809_v31  ;;  %v6355_v38 = vcombine.high %v813_v34, %v817_v36 }
  0xf2   :  { %730 = vmatprep.subr.bf16.mxu0 %v7275_v42  ;;  %v163_v42 = vld [vmem:[#allocation7] sm:$0x3] }
  0xf3   :  { %2399 = vmatpush1.bf16.msra.mxu1 %v6432_v41  ;;  %v825_v41 = vld [vmem:[#allocation11 + $0xe8] sm:$0xff] }
  0xf5   :  { %731 = vmatpush1.bf16.msra.mxu0 %v7273_v43  ;;  %v8402_v43 = vsub.s32 1, %v8396_v35 }
  0xf6   :  { %732 = vmatprep.subr.bf16.mxu0 %v7278_v44  ;;  %v900_v44 = vld [vmem:[#allocation11 + $0x340] sm:$0xff] }
  0xf9   :  { %733 = vmatpush1.bf16.msra.mxu0 %v7276_v45  ;;  %v904_v45 = vld [vmem:[#allocation11 + $0x360] sm:$0xff] }
  0xfa   :  { %734 = vmatprep.subr.bf16.mxu0 %v7281_v46  ;;  %v6441_v46 = vcombine.high %v900_v44, %v904_v45 }
  0xfc   :  { %2400 = vmatprep.subr.bf16.mxu1 %v6441_v46  ;;  %v833_v46 = vld [vmem:[#allocation11 + $0x128] sm:$0xff] }
  0xfd   :  { %735 = vmatpush1.bf16.msra.mxu0 %v7279_v47  ;;  %v168_v47 = vrot.slane %v163_v42, %v8399_v40 }
  0xfe   :  { %736 = vmatprep.subr.bf16.mxu0 %v7284_v48  ;;  %v6440_v48 = vcombine.low %v900_v44, %v904_v45  ;;  %v6363_v44 = vcombine.high %v821_v39, %v825_v41  ;;  %v829_v45 = vld [vmem:[#allocation11 + $0x108] sm:$0xff] }
 0x100   :  { %2401 = vmatpush1.bf16.msra.mxu1 %v6440_v48  ;;  %v6371_v48 = vcombine.high %v829_v45, %v833_v46 }
 0x101   :  { %737 = vmatpush1.bf16.msra.mxu0 %v7282_v49  ;;  %v172_v49 = vrot.slane %v163_v42, %v8402_v43  ;;  %v6354_v42 = vcombine.low %v813_v34, %v817_v36 }
 0x102   :  { %747 = vmatprep.subr.bf16.mxu0 %v7287_v50 }
 0x197   :  { %v289_v50 = vpop.f32.mrb[0].mxu0 }
 0x198   :  { %v290_v51 = vadd.f32 %v289_v50, %v168_v47  ;;  %v291_v52 = vpop.f32.mrb[1].mxu0  ;;  %v6362_v47 = vcombine.low %v821_v39, %v825_v41  ;;  %v841_v50 = vld [vmem:[#allocation11 + $0x168] sm:$0xff] }
 0x199   :  { %v292_v53 = vadd.f32 %v291_v52, %v172_v49  ;;  %v293_v54 = vpop.f32.mrb[2].mxu0  ;;  %v837_v49 = vld [vmem:[#allocation11 + $0x148] sm:$0xff] }
 0x19a   :  { %v296_v55 = vmax.f32 %v290_v51, 0.0  ;;  %v294_v56 = vpop.f32.mrb[3].mxu0  ;;  %v6370_v51 = vcombine.low %v829_v45, %v833_v46  ;;  %v6379_v52 = vcombine.high %v837_v49, %v841_v50  ;;  %v849_v54 = vld [vmem:[#allocation11 + $0x1a8] sm:$0xff] }
 0x19b   :  { %v297_v57 = vmax.f32 %v292_v53, 0.0  ;;  %v845_v53 = vld [vmem:[#allocation11 + $0x188] sm:$0xff]  ;;  %v908_v56 = vld [vmem:[#allocation11 + $0x380] sm:$0xff] }
 0x19c   :  { %v8406_v60 = vpack.c.bf16 %v296_v55, %v296_v55  ;;  %v6378_v55 = vcombine.low %v837_v49, %v841_v50  ;;  %v8426_v49 = vld [vmem:[#allocation10] sm:$0xf] }
 0x19d   :  { %v299_v58 = vpack.c.bf16 %v297_v57, %v297_v57  ;;  %v912_v57 = vld [vmem:[#allocation11 + $0x3a0] sm:$0xff]  ;;  %v369_v50 = vrot.slane %v8426_v49, %v8399_v40 }
 0x19f   :  { %738 = vmatprep.mubr.bf16.mxu0 %v299_v58 }
 0x1a0   :  { %739 = vmatmul.mubr.bf16.vlgmr.msra.gmra.mrb[4].mxu0 %v8406_v60 }
 0x1a1   :  { %748 = vmatpush1.bf16.msra.mxu0 %v7285_v59  ;;  %779 = vmatprep.mubr.bf16.mxu0 %v299_v58  ;;  %v6387_v58 = vcombine.high %v845_v53, %v849_v54  ;;  %v6449_v59 = vcombine.high %v908_v56, %v912_v57 }
 0x1a2   :  { %749 = vmatprep.subr.bf16.mxu0 %v7290_v61  ;;  %v857_v61 = vld [vmem:[#allocation11 + $0x1e8] sm:$0xff] }
 0x1a3   :  { %2402 = vmatprep.subr.bf16.mxu1 %v6449_v59  ;;  %v932_v59 = vld [vmem:[#allocation11 + $0x440] sm:$0xff] }
 0x1a5   :  { %750 = vmatpush1.bf16.msra.mxu0 %v7288_v62  ;;  %v6448_v62 = vcombine.low %v908_v56, %v912_v57 }
 0x1a6   :  { %751 = vmatprep.subr.bf16.mxu0 %v7293_v63  ;;  %v6386_v63 = vcombine.low %v845_v53, %v849_v54 }
 0x1a7   :  { %2403 = vmatpush1.bf16.msra.mxu1 %v6448_v62  ;;  %v933_v62 = vld [vmem:[#allocation11 + $0x448] sm:$0xff] }
 0x1a9   :  { %752 = vmatpush1.bf16.msra.mxu0 %v7291_v0  ;;  %v916_v0 = vld [vmem:[#allocation11 + $0x3c0] sm:$0xff] }
 0x1aa   :  { %753 = vmatprep.subr.bf16.mxu0 %v7296_v1  ;;  %v920_v1 = vld [vmem:[#allocation11 + $0x3e0] sm:$0xff] }
 0x1ad   :  { %754 = vmatpush1.bf16.msra.mxu0 %v7294_v2 }
 0x1ae   :  { %755 = vmatprep.subr.bf16.mxu0 %v7299_v3  ;;  %v6457_v3 = vcombine.high %v916_v0, %v920_v1 }
 0x1b0   :  { %2404 = vmatprep.subr.bf16.mxu1 %v6457_v3 }
 0x1b1   :  { %756 = vmatpush1.bf16.msra.mxu0 %v7297_v4  ;;  %v861_v4 = vld [vmem:[#allocation11 + $0x208] sm:$0xff] }
 0x1b2   :  { %757 = vmatprep.subr.bf16.mxu0 %v7302_v5  ;;  %v865_v5 = vld [vmem:[#allocation11 + $0x228] sm:$0xff] }
 0x1b5   :  { %758 = vmatpush1.bf16.msra.mxu0 %v7300_v6  ;;  %v6456_v6 = vcombine.low %v916_v0, %v920_v1 }
 0x1b6   :  { %759 = vmatprep.subr.bf16.mxu0 %v7305_v7 }
 0x1b7   :  { %2405 = vmatpush1.bf16.msra.mxu1 %v6456_v6  ;;  %v941_v6 = vld [vmem:[#allocation11 + $0x488] sm:$0xff] }
 0x1b9   :  { %760 = vmatpush1.bf16.msra.mxu0 %v7303_v8  ;;  %v8410_v8 = vld [vmem:[#allocation11 + $0x400] sm:$0xff] }
 0x1ba   :  { %761 = vmatprep.subr.bf16.mxu0 %v7308_v9  ;;  %v8412_v9 = vld [vmem:[#allocation11 + $0x420] sm:$0xff] }
 0x1bd   :  { %762 = vmatpush1.bf16.msra.mxu0 %v7306_v10  ;;  %v8414_v10 = vld [vmem:[#allocation11 + $0x408] sm:$0xff] }
 0x1be   :  { %763 = vmatprep.subr.bf16.mxu0 %v7311_v11  ;;  %v6403_v11 = vcombine.high %v861_v4, %v865_v5 }
 0x1c1   :  { %764 = vmatpush1.bf16.msra.mxu0 %v7309_v12  ;;  %v6465_v12 = vcombine.high %v8410_v8, %v8412_v9 }
 0x1c2   :  { %765 = vmatprep.subr.bf16.mxu0 %v7314_v13  ;;  %v8418_v13 = vld [vmem:[#allocation11 + $0x428] sm:$0xff] }
 0x1c3   :  { %2415 = vmatprep.subr.bf16.mxu1 %v6465_v12 }
 0x1c5   :  { %766 = vmatpush1.bf16.msra.mxu0 %v7312_v14  ;;  %v869_v14 = vld [vmem:[#allocation11 + $0x248] sm:$0xff] }
 0x1c6   :  { %767 = vmatprep.subr.bf16.mxu0 %v7317_v15  ;;  %v873_v15 = vld [vmem:[#allocation11 + $0x268] sm:$0xff] }
 0x1c9   :  { %768 = vmatpush1.bf16.msra.mxu0 %v7315_v16  ;;  %v6464_v16 = vcombine.low %v8410_v8, %v8412_v9 }
 0x1ca   :  { %769 = vmatprep.subr.bf16.mxu0 %v7320_v17  ;;  %v6466_v17 = vcombine.low %v8414_v10, %v8418_v13 }
 0x1cd   :  { %770 = vmatpush1.bf16.msra.mxu0 %v7318_v18  ;;  %v6402_v18 = vcombine.low %v861_v4, %v865_v5  ;;  %v940_v4 = vld [vmem:[#allocation11 + $0x480] sm:$0xff] }
 0x1ce   :  { %771 = vmatprep.subr.bf16.mxu0 %v7323_v19  ;;  %v6411_v19 = vcombine.high %v869_v14, %v873_v15  ;;  %v944_v5 = vld [vmem:[#allocation11 + $0x4a0] sm:$0xff] }
 0x1d1   :  { %772 = vmatpush1.bf16.msra.mxu0 %v7321_v20  ;;  %v877_v20 = vld [vmem:[#allocation11 + $0x288] sm:$0xff] }
 0x1d2   :  { %773 = vmatprep.subr.bf16.mxu0 %v7326_v21  ;;  %v881_v21 = vld [vmem:[#allocation11 + $0x2a8] sm:$0xff] }
 0x1d3   :  { %v6418_v26 = vcombine.low %v877_v20, %v881_v21 }
 0x1d5   :  { %774 = vmatpush1.bf16.msra.mxu0 %v7324_v22  ;;  %v6410_v22 = vcombine.low %v869_v14, %v873_v15  ;;  %v6481_v14 = vcombine.high %v940_v4, %v944_v5 }
 0x1d6   :  { %775 = vmatprep.subr.bf16.mxu0 %v7329_v23  ;;  %v6419_v23 = vcombine.high %v877_v20, %v881_v21  ;;  %v949_v20 = vld [vmem:[#allocation11 + $0x4c8] sm:$0xff] }
 0x1d7   :  { %v953_v21 = vld [vmem:[#allocation11 + $0x4e8] sm:$0xff] }
 0x1d8   :  { %v6491_v9 = vcombine.high %v949_v20, %v953_v21 }
 0x1d9   :  { %776 = vmatpush1.bf16.msra.mxu0 %v7327_v24  ;;  %v885_v24 = vld [vmem:[#allocation11 + $0x2c8] sm:$0xff] }
 0x1da   :  { %777 = vmatprep.subr.bf16.mxu0 %v7332_v25  ;;  %v889_v25 = vld [vmem:[#allocation11 + $0x2e8] sm:$0xff] }
 0x1db   :  { %v6427_v27 = vcombine.high %v885_v24, %v889_v25  ;;  %v6426_v30 = vcombine.low %v885_v24, %v889_v25  ;;  %v6490_v25 = vcombine.low %v949_v20, %v953_v21 }
 0x1dd   :  { %778 = vmatpush1.bf16.msra.mxu0 %v7330_v28  ;;  %v893_v28 = vld [vmem:[#allocation11 + $0x308] sm:$0xff] }
 0x1de   :  { %2456 = vmatprep.subr.bf16.mxu0 %v6339_v29  ;;  %v897_v29 = vld [vmem:[#allocation11 + $0x328] sm:$0xff] }
 0x1df   :  { %v6435_v31 = vcombine.high %v893_v28, %v897_v29  ;;  %v6434_v34 = vcombine.low %v893_v28, %v897_v29  ;;  %v964_v28 = vld [vmem:[#allocation11 + $0x540] sm:$0xff] }
 0x1e0   :  { %780 = vmatmul.mubr.bf16.vlgmr.msra.gmra.mrb[8].mxu0 %v8406_v60  ;;  %v853_v60 = vld [vmem:[#allocation11 + $0x1c8] sm:$0xff]  ;;  %v968_v29 = vld [vmem:[#allocation11 + $0x560] sm:$0xff] }
 0x1e1   :  { %2457 = vmatpush1.bf16.msra.mxu0 %v6338_v32  ;;  %v6395_v2 = vcombine.high %v853_v60, %v857_v61  ;;  %v6394_v7 = vcombine.low %v853_v60, %v857_v61  ;;  %v901_v32 = vld [vmem:[#allocation11 + $0x348] sm:$0xff]  ;;  %v936_v61 = vld [vmem:[#allocation11 + $0x460] sm:$0xff] }
 0x1e2   :  { %2458 = vmatprep.subr.bf16.mxu0 %v6347_v33  ;;  %v905_v33 = vld [vmem:[#allocation11 + $0x368] sm:$0xff] }
 0x1e3   :  { %v6443_v36 = vcombine.high %v901_v32, %v905_v33  ;;  %v6442_v39 = vcombine.low %v901_v32, %v905_v33 }
 0x1e5   :  { %2459 = vmatpush1.bf16.msra.mxu0 %v6346_v37  ;;  %v909_v37 = vld [vmem:[#allocation11 + $0x388] sm:$0xff] }
 0x1e6   :  { %2460 = vmatprep.subr.bf16.mxu0 %v6355_v38  ;;  %v913_v38 = vld [vmem:[#allocation11 + $0x3a8] sm:$0xff] }
 0x1e7   :  { %v6451_v41 = vcombine.high %v909_v37, %v913_v38  ;;  %v6450_v45 = vcombine.low %v909_v37, %v913_v38  ;;  %v972_v37 = vld [vmem:[#allocation11 + $0x580] sm:$0xff] }
 0x1e8   :  { %v976_v38 = vld [vmem:[#allocation11 + $0x5a0] sm:$0xff] }
 0x1e9   :  { %2461 = vmatpush1.bf16.msra.mxu0 %v6354_v42  ;;  %v917_v42 = vld [vmem:[#allocation11 + $0x3c8] sm:$0xff] }
 0x1ea   :  { %2462 = vmatprep.subr.bf16.mxu0 %v6363_v44  ;;  %v921_v44 = vld [vmem:[#allocation11 + $0x3e8] sm:$0xff] }
 0x1eb   :  { %v6459_v46 = vcombine.high %v917_v42, %v921_v44 }
 0x1ed   :  { %2463 = vmatpush1.bf16.msra.mxu0 %v6362_v47  ;;  %v6458_v47 = vcombine.low %v917_v42, %v921_v44  ;;  %v6504_v42 = vcombine.low %v964_v28, %v968_v29 }
 0x1ee   :  { %2464 = vmatprep.subr.bf16.mxu0 %v6371_v48  ;;  %v6467_v48 = vcombine.high %v8414_v10, %v8418_v13  ;;  %v956_v10 = vld [vmem:[#allocation11 + $0x500] sm:$0xff] }
 0x1ef   :  { %v960_v13 = vld [vmem:[#allocation11 + $0x520] sm:$0xff] }
 0x1f0   :  { %v6496_v32 = vcombine.low %v956_v10, %v960_v13 }
 0x1f1   :  { %2465 = vmatpush1.bf16.msra.mxu0 %v6370_v51  ;;  %v373_v51 = vrot.slane %v8426_v49, %v8402_v43 }
 0x1f2   :  { %2466 = vmatprep.subr.bf16.mxu0 %v6379_v52 }
 0x1f5   :  { %2467 = vmatpush1.bf16.msra.mxu0 %v6378_v55 }
 0x1f6   :  { %2468 = vmatprep.subr.bf16.mxu0 %v6387_v58 }
 0x1f9   :  { %2469 = vmatpush1.bf16.msra.mxu0 %v6386_v63  ;;  %v937_v63 = vld [vmem:[#allocation11 + $0x468] sm:$0xff] }
 0x1fa   :  { %2470 = vmatprep.subr.bf16.mxu0 %v6395_v2  ;;  %v6473_v2 = vcombine.high %v932_v59, %v936_v61  ;;  %v6475_v3 = vcombine.high %v933_v62, %v937_v63  ;;  %v6474_v12 = vcombine.low %v933_v62, %v937_v63 }
 0x1fd   :  { %2471 = vmatpush1.bf16.msra.mxu0 %v6394_v7  ;;  %v945_v7 = vld [vmem:[#allocation11 + $0x4a8] sm:$0xff] }
 0x1fe   :  { %2472 = vmatprep.subr.bf16.mxu0 %v6403_v11  ;;  %v6472_v11 = vcombine.low %v932_v59, %v936_v61  ;;  %v6483_v15 = vcombine.high %v941_v6, %v945_v7  ;;  %v993_v59 = vld [vmem:[#allocation11 + $0x628] sm:$0xff] }
 0x201   :  { %2473 = vmatpush1.bf16.msra.mxu0 %v6402_v18  ;;  %v948_v18 = vld [vmem:[#allocation11 + $0x4c0] sm:$0xff] }
 0x202   :  { %2474 = vmatprep.subr.bf16.mxu0 %v6411_v19  ;;  %v952_v19 = vld [vmem:[#allocation11 + $0x4e0] sm:$0xff] }
 0x203   :  { %v6489_v8 = vcombine.high %v948_v18, %v952_v19  ;;  %v6488_v24 = vcombine.low %v948_v18, %v952_v19  ;;  %v1005_v18 = vld [vmem:[#allocation11 + $0x688] sm:$0xff] }
 0x204   :  { %v1009_v19 = vld [vmem:[#allocation11 + $0x6a8] sm:$0xff] }
 0x205   :  { %2475 = vmatpush1.bf16.msra.mxu0 %v6410_v22  ;;  %v6480_v22 = vcombine.low %v940_v4, %v944_v5  ;;  %v997_v4 = vld [vmem:[#allocation11 + $0x648] sm:$0xff] }
 0x206   :  { %2476 = vmatprep.subr.bf16.mxu0 %v6419_v23  ;;  %v6482_v23 = vcombine.low %v941_v6, %v945_v7  ;;  %v1001_v5 = vld [vmem:[#allocation11 + $0x668] sm:$0xff] }
 0x207   :  { %v6538_v21 = vcombine.low %v997_v4, %v1001_v5 }
 0x209   :  { %2477 = vmatpush1.bf16.msra.mxu0 %v6418_v26  ;;  %v6497_v26 = vcombine.high %v956_v10, %v960_v13  ;;  %v1013_v10 = vld [vmem:[#allocation11 + $0x6c8] sm:$0xff] }
 0x20a   :  { %2478 = vmatprep.subr.bf16.mxu0 %v6427_v27  ;;  %v1017_v13 = vld [vmem:[#allocation11 + $0x6e8] sm:$0xff] }
 0x20d   :  { %2479 = vmatpush1.bf16.msra.mxu0 %v6426_v30  ;;  %v965_v30 = vld [vmem:[#allocation11 + $0x548] sm:$0xff] }
 0x20e   :  { %2480 = vmatprep.subr.bf16.mxu0 %v6435_v31  ;;  %v969_v31 = vld [vmem:[#allocation11 + $0x568] sm:$0xff] }
 0x20f   :  { %v6506_v44 = vcombine.low %v965_v30, %v969_v31 }
 0x211   :  { %2481 = vmatpush1.bf16.msra.mxu0 %v6434_v34  ;;  %v6505_v34 = vcombine.high %v964_v28, %v968_v29  ;;  %v1021_v28 = vld [vmem:[#allocation11 + $0x708] sm:$0xff] }
 0x212   :  { %2482 = vmatprep.subr.bf16.mxu0 %v6443_v36  ;;  %v6507_v36 = vcombine.high %v965_v30, %v969_v31  ;;  %v1025_v29 = vld [vmem:[#allocation11 + $0x728] sm:$0xff]  ;;  %v6554_v31 = vcombine.low %v1013_v10, %v1017_v13 }
 0x215   :  { %2483 = vmatpush1.bf16.msra.mxu0 %v6442_v39  ;;  %v973_v39 = vld [vmem:[#allocation11 + $0x588] sm:$0xff] }
 0x216   :  { %2484 = vmatprep.subr.bf16.mxu0 %v6451_v41  ;;  %v977_v41 = vld [vmem:[#allocation11 + $0x5a8] sm:$0xff] }
 0x219   :  { %2485 = vmatpush1.bf16.msra.mxu0 %v6450_v45  ;;  %v6513_v45 = vcombine.high %v972_v37, %v976_v38 }
 0x21a   :  { %2486 = vmatprep.subr.bf16.mxu0 %v6459_v46  ;;  %v6515_v46 = vcombine.high %v973_v39, %v977_v41 }
 0x21d   :  { %2487 = vmatpush1.bf16.msra.mxu0 %v6458_v47  ;;  %v980_v47 = vld [vmem:[#allocation11 + $0x5c0] sm:$0xff] }
 0x21e   :  { %2497 = vmatprep.subr.bf16.mxu0 %v6467_v48  ;;  %v984_v48 = vld [vmem:[#allocation11 + $0x5e0] sm:$0xff] }
 0x273   :  { %v740_v52 = vpop.f32.mrb[4].mxu0 }
 0x274   :  { %v741_v53 = vadd.f32 %v740_v52, %v369_v50  ;;  %v742_v54 = vpop.f32.mrb[5].mxu0  ;;  %v981_v50 = vld [vmem:[#allocation11 + $0x5c8] sm:$0xff]  ;;  %v6512_v52 = vcombine.low %v972_v37, %v976_v38 }
 0x275   :  { %v743_v55 = vadd.f32 %v742_v54, %v373_v51  ;;  %v744_v56 = vpop.f32.mrb[6].mxu0  ;;  %v985_v51 = vld [vmem:[#allocation11 + $0x5e8] sm:$0xff]  ;;  %v6521_v54 = vcombine.high %v980_v47, %v984_v48 }
 0x276   :  { %v788_v57 = vmax.f32 %v741_v53, 0.0  ;;  %v745_v58 = vpop.f32.mrb[7].mxu0  ;;  %v6514_v53 = vcombine.low %v973_v39, %v977_v41  ;;  %v988_v56 = vld [vmem:[#allocation11 + $0x600] sm:$0xff]  ;;  %v6522_v61 = vcombine.low %v981_v50, %v985_v51  ;;  %v1029_v37 = vld [vmem:[#allocation11 + $0x748] sm:$0xff]  ;;  %v6562_v41 = vcombine.low %v1021_v28, %v1025_v29 }
 0x277   :  { %v789_v60 = vmax.f32 %v743_v55, 0.0  ;;  %v6523_v55 = vcombine.high %v981_v50, %v985_v51  ;;  %v989_v58 = vld [vmem:[#allocation11 + $0x608] sm:$0xff]  ;;  %v8447_v50 = vsub.s32 2, %v8396_v35 }
 0x278   :  { %v8434_v1 = vpack.c.bf16 %v788_v57, %v788_v57  ;;  %v992_v57 = vld [vmem:[#allocation11 + $0x620] sm:$0xff]  ;;  %v6531_v63 = vcombine.high %v989_v58, %v993_v59  ;;  %v6530_v7 = vcombine.low %v989_v58, %v993_v59  ;;  %v1033_v38 = vld [vmem:[#allocation11 + $0x768] sm:$0xff] }
 0x279   :  { %v8432_v0 = vpack.c.bf16 %v789_v60, %v789_v60  ;;  %v6520_v60 = vcombine.low %v980_v47, %v984_v48  ;;  %v6529_v62 = vcombine.high %v988_v56, %v992_v57  ;;  %v6528_v6 = vcombine.low %v988_v56, %v992_v57  ;;  %v1037_v47 = vld [vmem:[#allocation11 + $0x788] sm:$0xff]  ;;  %v1044_v56 = vld [vmem:[#allocation11 + $0x7c0] sm:$0xff] }
 0x27a   :  { %v1041_v48 = vld [vmem:[#allocation11 + $0x7a8] sm:$0xff]  ;;  %v1048_v57 = vld [vmem:[#allocation11 + $0x7e0] sm:$0xff] }
 0x27b   :  { %2406 = vmatprep.mubr.bf16.mxu1 %v8432_v0  ;;  %2488 = vmatprep.mubr.bf16.mxu0 %v8432_v0  ;;  %v1045_v58 = vld [vmem:[#allocation11 + $0x7c8] sm:$0xff] }
 0x27c   :  { %2407 = vmatmul.mubr.bf16.vlgmr.msra.gmra.mrb[0].mxu1 %v8434_v1  ;;  %2489 = vmatmul.mubr.bf16.vlgmr.msra.gmra.mrb[12].mxu0 %v8434_v1  ;;  %v1049_v59 = vld [vmem:[#allocation11 + $0x7e8] sm:$0xff] }
 0x27d   :  { %2416 = vmatpush1.bf16.msra.mxu1 %v6464_v16  ;;  %2498 = vmatpush1.bf16.msra.mxu0 %v6466_v17  ;;  %v957_v16 = vld [vmem:[#allocation11 + $0x508] sm:$0xff] }
 0x27e   :  { %2417 = vmatprep.subr.bf16.mxu1 %v6473_v2  ;;  %2499 = vmatprep.subr.bf16.mxu0 %v6475_v3  ;;  %v961_v17 = vld [vmem:[#allocation11 + $0x528] sm:$0xff]  ;;  %v996_v2 = vld [vmem:[#allocation11 + $0x640] sm:$0xff] }
 0x27f   :  { %v6499_v27 = vcombine.high %v957_v16, %v961_v17  ;;  %v6498_v33 = vcombine.low %v957_v16, %v961_v17  ;;  %v1000_v3 = vld [vmem:[#allocation11 + $0x660] sm:$0xff]  ;;  %v6546_v17 = vcombine.low %v1005_v18, %v1009_v19 }
 0x280   :  { %v6536_v20 = vcombine.low %v996_v2, %v1000_v3 }
 0x281   :  { %2418 = vmatpush1.bf16.msra.mxu1 %v6472_v11  ;;  %2500 = vmatpush1.bf16.msra.mxu0 %v6474_v12  ;;  %v6537_v11 = vcombine.high %v996_v2, %v1000_v3  ;;  %v6539_v12 = vcombine.high %v997_v4, %v1001_v5  ;;  %v6585_v2 = vcombine.high %v1044_v56, %v1048_v57  ;;  %v798_v4 = vld [vmem:[#allocation11 + $0x10] sm:$0xff] }
 0x282   :  { %2419 = vmatprep.subr.bf16.mxu1 %v6481_v14  ;;  %2501 = vmatprep.subr.bf16.mxu0 %v6483_v15  ;;  %v1004_v14 = vld [vmem:[#allocation11 + $0x680] sm:$0xff]  ;;  %v6587_v3 = vcombine.high %v1045_v58, %v1049_v59 }
 0x283   :  { %v1008_v15 = vld [vmem:[#allocation11 + $0x6a0] sm:$0xff] }
 0x284   :  { %v6544_v16 = vcombine.low %v1004_v14, %v1008_v15 }
 0x285   :  { %2420 = vmatpush1.bf16.msra.mxu1 %v6480_v22  ;;  %2502 = vmatpush1.bf16.msra.mxu0 %v6482_v23  ;;  %v6545_v22 = vcombine.high %v1004_v14, %v1008_v15  ;;  %v6547_v23 = vcombine.high %v1005_v18, %v1009_v19  ;;  %v6584_v19 = vcombine.low %v1044_v56, %v1048_v57 }
 0x286   :  { %2421 = vmatprep.subr.bf16.mxu1 %v6489_v8  ;;  %2503 = vmatprep.subr.bf16.mxu0 %v6491_v9  ;;  %v1012_v8 = vld [vmem:[#allocation11 + $0x6c0] sm:$0xff] }
 0x287   :  { %v1016_v9 = vld [vmem:[#allocation11 + $0x6e0] sm:$0xff] }
 0x288   :  { %v6552_v30 = vcombine.low %v1012_v8, %v1016_v9 }
 0x289   :  { %2422 = vmatpush1.bf16.msra.mxu1 %v6488_v24  ;;  %2504 = vmatpush1.bf16.msra.mxu0 %v6490_v25  ;;  %v6553_v24 = vcombine.high %v1012_v8, %v1016_v9  ;;  %v6555_v25 = vcombine.high %v1013_v10, %v1017_v13  ;;  %v806_v9 = vld [vmem:[#allocation11 + $0x50] sm:$0xff]  ;;  %v807_v13 = vld [vmem:[#allocation11 + $0x58] sm:$0xff] }
 0x28a   :  { %2423 = vmatprep.subr.bf16.mxu1 %v6497_v26  ;;  %2505 = vmatprep.subr.bf16.mxu0 %v6499_v27  ;;  %v1020_v26 = vld [vmem:[#allocation11 + $0x700] sm:$0xff]  ;;  %v810_v10 = vld [vmem:[#allocation11 + $0x70] sm:$0xff] }
 0x28b   :  { %v1024_v27 = vld [vmem:[#allocation11 + $0x720] sm:$0xff] }
 0x28c   :  { %v6560_v39 = vcombine.low %v1020_v26, %v1024_v27 }
 0x28d   :  { %2424 = vmatpush1.bf16.msra.mxu1 %v6496_v32  ;;  %2506 = vmatpush1.bf16.msra.mxu0 %v6498_v33  ;;  %v6561_v32 = vcombine.high %v1020_v26, %v1024_v27  ;;  %v6563_v33 = vcombine.high %v1021_v28, %v1025_v29  ;;  %v6349_v27 = vcombine.high %v806_v9, %v810_v10  ;;  %v814_v29 = vld [vmem:[#allocation11 + $0x90] sm:$0xff] }
 0x28e   :  { %2425 = vmatprep.subr.bf16.mxu1 %v6505_v34  ;;  %2507 = vmatprep.subr.bf16.mxu0 %v6507_v36  ;;  %v1028_v34 = vld [vmem:[#allocation11 + $0x740] sm:$0xff] }
 0x28f   :  { %v1032_v36 = vld [vmem:[#allocation11 + $0x760] sm:$0xff] }
 0x290   :  { %v6568_v51 = vcombine.low %v1028_v34, %v1032_v36 }
 0x291   :  { %2426 = vmatpush1.bf16.msra.mxu1 %v6504_v42  ;;  %2508 = vmatpush1.bf16.msra.mxu0 %v6506_v44  ;;  %v6569_v42 = vcombine.high %v1028_v34, %v1032_v36  ;;  %v6571_v44 = vcombine.high %v1029_v37, %v1033_v38 }
 0x292   :  { %2427 = vmatprep.subr.bf16.mxu1 %v6513_v45  ;;  %2509 = vmatprep.subr.bf16.mxu0 %v6515_v46  ;;  %v1036_v45 = vld [vmem:[#allocation11 + $0x780] sm:$0xff] }
 0x293   :  { %v1040_v46 = vld [vmem:[#allocation11 + $0x7a0] sm:$0xff] }
 0x295   :  { %2428 = vmatpush1.bf16.msra.mxu1 %v6512_v52  ;;  %2510 = vmatpush1.bf16.msra.mxu0 %v6514_v53  ;;  %v6570_v52 = vcombine.low %v1029_v37, %v1033_v38  ;;  %v8450_v53 = vsub.s32 3, %v8396_v35  ;;  %v822_v38 = vld [vmem:[#allocation11 + $0xd0] sm:$0xff] }
 0x296   :  { %2429 = vmatprep.subr.bf16.mxu1 %v6521_v54  ;;  %2511 = vmatprep.subr.bf16.mxu0 %v6523_v55  ;;  %v6577_v54 = vcombine.high %v1036_v45, %v1040_v46  ;;  %v6579_v55 = vcombine.high %v1037_v47, %v1041_v48 }
 0x299   :  { %2430 = vmatpush1.bf16.msra.mxu1 %v6520_v60  ;;  %2512 = vmatpush1.bf16.msra.mxu0 %v6522_v61  ;;  %v377_v60 = vrot.slane %v8426_v49, %v8447_v50  ;;  %v381_v61 = vrot.slane %v8426_v49, %v8450_v53 }
 0x29a   :  { %2431 = vmatprep.subr.bf16.mxu1 %v6529_v62  ;;  %2513 = vmatprep.subr.bf16.mxu0 %v6531_v63  ;;  %v6576_v62 = vcombine.low %v1036_v45, %v1040_v46  ;;  %v6578_v63 = vcombine.low %v1037_v47, %v1041_v48  ;;  %v830_v48 = vld [vmem:[#allocation11 + $0x110] sm:$0xff] }
 0x29d   :  { %2432 = vmatpush1.bf16.msra.mxu1 %v6528_v6  ;;  %2514 = vmatpush1.bf16.msra.mxu0 %v6530_v7  ;;  %v802_v6 = vld [vmem:[#allocation11 + $0x30] sm:$0xff]  ;;  %v799_v7 = vld [vmem:[#allocation11 + $0x18] sm:$0xff] }
 0x29e   :  { %2433 = vmatprep.subr.bf16.mxu1 %v6537_v11  ;;  %2515 = vmatprep.subr.bf16.mxu0 %v6539_v12  ;;  %v803_v11 = vld [vmem:[#allocation11 + $0x38] sm:$0xff] }
 0x29f   :  { %v6342_v26 = vcombine.low %v799_v7, %v803_v11 }
 0x2a1   :  { %2434 = vmatpush1.bf16.msra.mxu1 %v6536_v20  ;;  %2516 = vmatpush1.bf16.msra.mxu0 %v6538_v21  ;;  %v6586_v20 = vcombine.low %v1045_v58, %v1049_v59  ;;  %v838_v58 = vld [vmem:[#allocation11 + $0x150] sm:$0xff] }
 0x2a2   :  { %2435 = vmatprep.subr.bf16.mxu1 %v6545_v22  ;;  %2517 = vmatprep.subr.bf16.mxu0 %v6547_v23  ;;  %v6341_v22 = vcombine.high %v798_v4, %v802_v6  ;;  %v6343_v23 = vcombine.high %v799_v7, %v803_v11  ;;  %v842_v59 = vld [vmem:[#allocation11 + $0x170] sm:$0xff]  ;;  %v851_v7 = vld [vmem:[#allocation11 + $0x1b8] sm:$0xff] }
 0x2a3   :  { %v6380_v11 = vcombine.low %v838_v58, %v842_v59 }
 0x2a5   :  { %2436 = vmatpush1.bf16.msra.mxu1 %v6544_v16  ;;  %2518 = vmatpush1.bf16.msra.mxu0 %v6546_v17  ;;  %v811_v16 = vld [vmem:[#allocation11 + $0x78] sm:$0xff] }
 0x2a6   :  { %2437 = vmatprep.subr.bf16.mxu1 %v6553_v24  ;;  %2519 = vmatprep.subr.bf16.mxu0 %v6555_v25  ;;  %v6340_v24 = vcombine.low %v798_v4, %v802_v6  ;;  %v6351_v28 = vcombine.high %v807_v13, %v811_v16  ;;  %v6350_v34 = vcombine.low %v807_v13, %v811_v16  ;;  %v846_v4 = vld [vmem:[#allocation11 + $0x190] sm:$0xff]  ;;  %v847_v6 = vld [vmem:[#allocation11 + $0x198] sm:$0xff] }
 0x2a7   :  { %v863_v13 = vld [vmem:[#allocation11 + $0x218] sm:$0xff] }
 0x2a8   :  { %v867_v16 = vld [vmem:[#allocation11 + $0x238] sm:$0xff] }
 0x2a9   :  { %2438 = vmatpush1.bf16.msra.mxu1 %v6552_v30  ;;  %2520 = vmatpush1.bf16.msra.mxu0 %v6554_v31  ;;  %v818_v30 = vld [vmem:[#allocation11 + $0xb0] sm:$0xff]  ;;  %v815_v31 = vld [vmem:[#allocation11 + $0x98] sm:$0xff] }
 0x2aa   :  { %2439 = vmatprep.subr.bf16.mxu1 %v6561_v32  ;;  %2521 = vmatprep.subr.bf16.mxu0 %v6563_v33  ;;  %v819_v32 = vld [vmem:[#allocation11 + $0xb8] sm:$0xff]  ;;  %v6348_v33 = vcombine.low %v806_v9, %v810_v10  ;;  %v6357_v36 = vcombine.high %v814_v29, %v818_v30  ;;  %v862_v9 = vld [vmem:[#allocation11 + $0x210] sm:$0xff] }
 0x2ab   :  { %v6359_v37 = vcombine.high %v815_v31, %v819_v32  ;;  %v6358_v45 = vcombine.low %v815_v31, %v819_v32  ;;  %v866_v10 = vld [vmem:[#allocation11 + $0x230] sm:$0xff]  ;;  %v871_v31 = vld [vmem:[#allocation11 + $0x258] sm:$0xff] }
 0x2ac   :  { %v875_v32 = vld [vmem:[#allocation11 + $0x278] sm:$0xff] }
 0x2ad   :  { %2440 = vmatpush1.bf16.msra.mxu1 %v6560_v39  ;;  %2522 = vmatpush1.bf16.msra.mxu0 %v6562_v41  ;;  %v826_v39 = vld [vmem:[#allocation11 + $0xf0] sm:$0xff]  ;;  %v823_v41 = vld [vmem:[#allocation11 + $0xd8] sm:$0xff] }
 0x2ae   :  { %2441 = vmatprep.subr.bf16.mxu1 %v6569_v42  ;;  %2523 = vmatprep.subr.bf16.mxu0 %v6571_v44  ;;  %v827_v42 = vld [vmem:[#allocation11 + $0xf8] sm:$0xff]  ;;  %v6356_v44 = vcombine.low %v814_v29, %v818_v30  ;;  %v6365_v46 = vcombine.high %v822_v38, %v826_v39  ;;  %v870_v29 = vld [vmem:[#allocation11 + $0x250] sm:$0xff] }
 0x2af   :  { %v6367_v47 = vcombine.high %v823_v41, %v827_v42  ;;  %v874_v30 = vld [vmem:[#allocation11 + $0x270] sm:$0xff] }
 0x2b1   :  { %2442 = vmatpush1.bf16.msra.mxu1 %v6568_v51  ;;  %2524 = vmatpush1.bf16.msra.mxu0 %v6570_v52  ;;  %v834_v51 = vld [vmem:[#allocation11 + $0x130] sm:$0xff]  ;;  %v835_v52 = vld [vmem:[#allocation11 + $0x138] sm:$0xff] }
 0x2b2   :  { %2443 = vmatprep.subr.bf16.mxu1 %v6577_v54  ;;  %2525 = vmatprep.subr.bf16.mxu0 %v6579_v55  ;;  %v6364_v54 = vcombine.low %v822_v38, %v826_v39  ;;  %v6366_v55 = vcombine.low %v823_v41, %v827_v42  ;;  %v6373_v56 = vcombine.high %v830_v48, %v834_v51  ;;  %v878_v38 = vld [vmem:[#allocation11 + $0x290] sm:$0xff]  ;;  %v879_v41 = vld [vmem:[#allocation11 + $0x298] sm:$0xff] }
 0x2b3   :  { %v781_v5 = vpop.f32.mrb[8].mxu0  ;;  %v882_v39 = vld [vmem:[#allocation11 + $0x2b0] sm:$0xff]  ;;  %v883_v42 = vld [vmem:[#allocation11 + $0x2b8] sm:$0xff] }
 0x2b4   :  { %v782_v12 = vadd.f32 %v781_v5, %v377_v60  ;;  %v783_v14 = vpop.f32.mrb[9].mxu0  ;;  %v839_v60 = vld [vmem:[#allocation11 + $0x158] sm:$0xff]  ;;  %v850_v5 = vld [vmem:[#allocation11 + $0x1b0] sm:$0xff] }
 0x2b5   :  { %v784_v15 = vadd.f32 %v783_v14, %v381_v61  ;;  %v785_v18 = vpop.f32.mrb[10].mxu0  ;;  %2444 = vmatpush1.bf16.msra.mxu1 %v6576_v62  ;;  %2526 = vmatpush1.bf16.msra.mxu0 %v6578_v63  ;;  %v843_v61 = vld [vmem:[#allocation11 + $0x178] sm:$0xff]  ;;  %v6372_v62 = vcombine.low %v830_v48, %v834_v51  ;;  %v6389_v14 = vcombine.high %v846_v4, %v850_v5  ;;  %v886_v48 = vld [vmem:[#allocation11 + $0x2d0] sm:$0xff] }
 0x2b6   :  { %v790_v49 = vmax.f32 %v782_v12, 0.0  ;;  %v786_v21 = vpop.f32.mrb[11].mxu0  ;;  %2445 = vmatprep.subr.bf16.mxu1 %v6585_v2  ;;  %2527 = vmatprep.subr.bf16.mxu0 %v6587_v3  ;;  %v6381_v2 = vcombine.high %v838_v58, %v842_v59  ;;  %v6383_v3 = vcombine.high %v839_v60, %v843_v61  ;;  %v6382_v12 = vcombine.low %v839_v60, %v843_v61  ;;  %v854_v18 = vld [vmem:[#allocation11 + $0x1d0] sm:$0xff]  ;;  %v895_v60 = vld [vmem:[#allocation11 + $0x318] sm:$0xff] }
 0x2b7   :  { %v791_v8 = vmax.f32 %v784_v15, 0.0  ;;  %v6391_v15 = vcombine.high %v847_v6, %v851_v7  ;;  %v6388_v21 = vcombine.low %v846_v4, %v850_v5  ;;  %v890_v51 = vld [vmem:[#allocation11 + $0x2f0] sm:$0xff]  ;;  %v899_v61 = vld [vmem:[#allocation11 + $0x338] sm:$0xff] }
 0x2b8   :  { %v8458_v25 = vpack.c.bf16 %v790_v49, %v790_v49  ;;  %v859_v49 = vld [vmem:[#allocation11 + $0x1f8] sm:$0xff]  ;;  %v894_v58 = vld [vmem:[#allocation11 + $0x310] sm:$0xff] }
 0x2b9   :  { %v8456_v17 = vpack.c.bf16 %v791_v8, %v791_v8  ;;  %2446 = vmatpush1.bf16.msra.mxu1 %v6584_v19  ;;  %2528 = vmatpush1.bf16.msra.mxu0 %v6586_v20  ;;  %v858_v19 = vld [vmem:[#allocation11 + $0x1f0] sm:$0xff]  ;;  %v855_v20 = vld [vmem:[#allocation11 + $0x1d8] sm:$0xff] }
 0x2ba   :  { %2538 = vmatprep.subr.bf16.mxu1 %v6341_v22  ;;  %2620 = vmatprep.subr.bf16.mxu0 %v6343_v23  ;;  %v6390_v22 = vcombine.low %v847_v6, %v851_v7  ;;  %v6397_v23 = vcombine.high %v854_v18, %v858_v19  ;;  %v6399_v8 = vcombine.high %v855_v20, %v859_v49  ;;  %v898_v59 = vld [vmem:[#allocation11 + $0x330] sm:$0xff]  ;;  %v903_v6 = vld [vmem:[#allocation11 + $0x358] sm:$0xff] }
 0x2bb   :  { %2447 = vmatprep.mubr.bf16.mxu1 %v8456_v17  ;;  %2529 = vmatprep.mubr.bf16.mxu0 %v8456_v17  ;;  %v902_v4 = vld [vmem:[#allocation11 + $0x350] sm:$0xff]  ;;  %v907_v7 = vld [vmem:[#allocation11 + $0x378] sm:$0xff] }
 0x2bc   :  { %2448 = vmatmul.mubr.bf16.vlgmr.msra.gmra.mrb[0].mxu1 %v8458_v25  ;;  %2530 = vmatmul.mubr.bf16.vlgmr.msra.gmra.mrb[12].mxu0 %v8458_v25  ;;  %v906_v5 = vld [vmem:[#allocation11 + $0x370] sm:$0xff] }
 0x2bd   :  { %2539 = vmatpush1.bf16.msra.mxu1 %v6340_v24  ;;  %2570 = vmatprep.mubr.bf16.mxu1 %v8432_v0  ;;  %v6396_v24 = vcombine.low %v854_v18, %v858_v19  ;;  %v910_v18 = vld [vmem:[#allocation11 + $0x390] sm:$0xff] }
 0x2be   :  { %2621 = vmatpush1.bf16.msra.mxu0 %v6342_v26  ;;  %2652 = vmatprep.mubr.bf16.mxu0 %v8432_v0  ;;  %v831_v0 = vld [vmem:[#allocation11 + $0x118] sm:$0xff]  ;;  %v6398_v26 = vcombine.low %v855_v20, %v859_v49  ;;  %v914_v19 = vld [vmem:[#allocation11 + $0x3b0] sm:$0xff] }
 0x2bf   :  { %2540 = vmatprep.subr.bf16.mxu1 %v6349_v27  ;;  %2622 = vmatprep.subr.bf16.mxu0 %v6351_v28  ;;  %v6375_v57 = vcombine.high %v831_v0, %v835_v52  ;;  %v6374_v63 = vcombine.low %v831_v0, %v835_v52  ;;  %v6405_v27 = vcombine.high %v862_v9, %v866_v10  ;;  %v887_v0 = vld [vmem:[#allocation11 + $0x2d8] sm:$0xff] }
 0x2c0   :  { %v6407_v28 = vcombine.high %v863_v13, %v867_v16  ;;  %v891_v52 = vld [vmem:[#allocation11 + $0x2f8] sm:$0xff] }
 0x2c1   :  { %2541 = vmatpush1.bf16.msra.mxu1 %v6348_v33  ;;  %v6404_v33 = vcombine.low %v862_v9, %v866_v10  ;;  %v911_v20 = vld [vmem:[#allocation11 + $0x398] sm:$0xff]  ;;  %v918_v9 = vld [vmem:[#allocation11 + $0x3d0] sm:$0xff] }
 0x2c2   :  { %2623 = vmatpush1.bf16.msra.mxu0 %v6350_v34  ;;  %2542 = vmatprep.subr.bf16.mxu1 %v6357_v36  ;;  %v6406_v34 = vcombine.low %v863_v13, %v867_v16  ;;  %v6413_v36 = vcombine.high %v870_v29, %v874_v30  ;;  %v915_v49 = vld [vmem:[#allocation11 + $0x3b8] sm:$0xff]  ;;  %v922_v10 = vld [vmem:[#allocation11 + $0x3f0] sm:$0xff] }
 0x2c3   :  { %2624 = vmatprep.subr.bf16.mxu0 %v6359_v37  ;;  %v6415_v37 = vcombine.high %v871_v31, %v875_v32  ;;  %v919_v13 = vld [vmem:[#allocation11 + $0x3d8] sm:$0xff] }
 0x2c4   :  { %v923_v16 = vld [vmem:[#allocation11 + $0x3f8] sm:$0xff] }
 0x2c5   :  { %2543 = vmatpush1.bf16.msra.mxu1 %v6356_v44  ;;  %v6412_v44 = vcombine.low %v870_v29, %v874_v30  ;;  %v926_v29 = vld [vmem:[#allocation11 + $0x410] sm:$0xff] }
 0x2c6   :  { %2625 = vmatpush1.bf16.msra.mxu0 %v6358_v45  ;;  %2544 = vmatprep.subr.bf16.mxu1 %v6365_v46  ;;  %v6414_v45 = vcombine.low %v871_v31, %v875_v32  ;;  %v6421_v46 = vcombine.high %v878_v38, %v882_v39  ;;  %v930_v30 = vld [vmem:[#allocation11 + $0x430] sm:$0xff]  ;;  %v927_v31 = vld [vmem:[#allocation11 + $0x418] sm:$0xff] }
 0x2c7   :  { %2626 = vmatprep.subr.bf16.mxu0 %v6367_v47  ;;  %v6423_v47 = vcombine.high %v879_v41, %v883_v42  ;;  %v931_v32 = vld [vmem:[#allocation11 + $0x438] sm:$0xff] }
 0x2c9   :  { %2545 = vmatpush1.bf16.msra.mxu1 %v6364_v54  ;;  %v6420_v54 = vcombine.low %v878_v38, %v882_v39  ;;  %v934_v38 = vld [vmem:[#allocation11 + $0x450] sm:$0xff] }
 0x2ca   :  { %2627 = vmatpush1.bf16.msra.mxu0 %v6366_v55  ;;  %2546 = vmatprep.subr.bf16.mxu1 %v6373_v56  ;;  %v6422_v55 = vcombine.low %v879_v41, %v883_v42  ;;  %v6429_v56 = vcombine.high %v886_v48, %v890_v51  ;;  %v938_v39 = vld [vmem:[#allocation11 + $0x470] sm:$0xff]  ;;  %v6468_v41 = vcombine.low %v926_v29, %v930_v30  ;;  %v935_v42 = vld [vmem:[#allocation11 + $0x458] sm:$0xff] }
 0x2cb   :  { %2628 = vmatprep.subr.bf16.mxu0 %v6375_v57  ;;  %v6431_v57 = vcombine.high %v887_v0, %v891_v52 }
 0x2cd   :  { %2547 = vmatpush1.bf16.msra.mxu1 %v6372_v62  ;;  %v6428_v62 = vcombine.low %v886_v48, %v890_v51  ;;  %v946_v48 = vld [vmem:[#allocation11 + $0x4b0] sm:$0xff] }
 0x2ce   :  { %2629 = vmatpush1.bf16.msra.mxu0 %v6374_v63  ;;  %2548 = vmatprep.subr.bf16.mxu1 %v6381_v2  ;;  %v6430_v63 = vcombine.low %v887_v0, %v891_v52  ;;  %v6437_v2 = vcombine.high %v894_v58, %v898_v59  ;;  %v943_v0 = vld [vmem:[#allocation11 + $0x498] sm:$0xff] }
 0x2cf   :  { %2630 = vmatprep.subr.bf16.mxu0 %v6383_v3  ;;  %v6439_v3 = vcombine.high %v895_v60, %v899_v61  ;;  %v947_v52 = vld [vmem:[#allocation11 + $0x4b8] sm:$0xff] }
 0x2d1   :  { %2549 = vmatpush1.bf16.msra.mxu1 %v6380_v11  ;;  %v6436_v11 = vcombine.low %v894_v58, %v898_v59  ;;  %v950_v58 = vld [vmem:[#allocation11 + $0x4d0] sm:$0xff] }
 0x2d2   :  { %2631 = vmatpush1.bf16.msra.mxu0 %v6382_v12  ;;  %2550 = vmatprep.subr.bf16.mxu1 %v6389_v14  ;;  %v6438_v12 = vcombine.low %v895_v60, %v899_v61  ;;  %v6445_v14 = vcombine.high %v902_v4, %v906_v5  ;;  %v954_v59 = vld [vmem:[#allocation11 + $0x4f0] sm:$0xff]  ;;  %v951_v60 = vld [vmem:[#allocation11 + $0x4d8] sm:$0xff] }
 0x2d3   :  { %2632 = vmatprep.subr.bf16.mxu0 %v6391_v15  ;;  %v6447_v15 = vcombine.high %v903_v6, %v907_v7  ;;  %v955_v61 = vld [vmem:[#allocation11 + $0x4f8] sm:$0xff] }
 0x2d5   :  { %2551 = vmatpush1.bf16.msra.mxu1 %v6388_v21  ;;  %v6444_v21 = vcombine.low %v902_v4, %v906_v5  ;;  %v962_v4 = vld [vmem:[#allocation11 + $0x530] sm:$0xff]  ;;  %v959_v5 = vld [vmem:[#allocation11 + $0x518] sm:$0xff] }
 0x2d6   :  { %2633 = vmatpush1.bf16.msra.mxu0 %v6390_v22  ;;  %2552 = vmatprep.subr.bf16.mxu1 %v6397_v23  ;;  %v6446_v22 = vcombine.low %v903_v6, %v907_v7  ;;  %v6453_v23 = vcombine.high %v910_v18, %v914_v19  ;;  %v963_v6 = vld [vmem:[#allocation11 + $0x538] sm:$0xff]  ;;  %v6494_v7 = vcombine.low %v951_v60, %v955_v61 }
 0x2d7   :  { %2634 = vmatprep.subr.bf16.mxu0 %v6399_v8  ;;  %v6455_v8 = vcombine.high %v911_v20, %v915_v49 }
 0x2d9   :  { %2553 = vmatpush1.bf16.msra.mxu1 %v6396_v24  ;;  %v6452_v24 = vcombine.low %v910_v18, %v914_v19  ;;  %v967_v18 = vld [vmem:[#allocation11 + $0x558] sm:$0xff] }
 0x2da   :  { %2635 = vmatpush1.bf16.msra.mxu0 %v6398_v26  ;;  %2554 = vmatprep.subr.bf16.mxu1 %v6405_v27  ;;  %v6454_v26 = vcombine.low %v911_v20, %v915_v49  ;;  %v6461_v27 = vcombine.high %v918_v9, %v922_v10  ;;  %v971_v19 = vld [vmem:[#allocation11 + $0x578] sm:$0xff]  ;;  %v6502_v49 = vcombine.low %v959_v5, %v963_v6 }
 0x2db   :  { %2636 = vmatprep.subr.bf16.mxu0 %v6407_v28  ;;  %v6463_v28 = vcombine.high %v919_v13, %v923_v16 }
 0x2dd   :  { %2555 = vmatpush1.bf16.msra.mxu1 %v6404_v33  ;;  %v6460_v33 = vcombine.low %v918_v9, %v922_v10  ;;  %v975_v9 = vld [vmem:[#allocation11 + $0x598] sm:$0xff] }
 0x2de   :  { %2637 = vmatpush1.bf16.msra.mxu0 %v6406_v34  ;;  %2556 = vmatprep.subr.bf16.mxu1 %v6413_v36  ;;  %v6462_v34 = vcombine.low %v919_v13, %v923_v16  ;;  %v6469_v36 = vcombine.high %v926_v29, %v930_v30  ;;  %v979_v10 = vld [vmem:[#allocation11 + $0x5b8] sm:$0xff]  ;;  %v6510_v16 = vcombine.low %v967_v18, %v971_v19 }
 0x2df   :  { %2638 = vmatprep.subr.bf16.mxu0 %v6415_v37  ;;  %v6471_v37 = vcombine.high %v927_v31, %v931_v32  ;;  %v983_v29 = vld [vmem:[#allocation11 + $0x5d8] sm:$0xff] }
 0x2e0   :  { %v987_v30 = vld [vmem:[#allocation11 + $0x5f8] sm:$0xff] }
 0x2e1   :  { %2557 = vmatpush1.bf16.msra.mxu1 %v6412_v44  ;;  %v939_v44 = vld [vmem:[#allocation11 + $0x478] sm:$0xff] }
 0x2e2   :  { %2639 = vmatpush1.bf16.msra.mxu0 %v6414_v45  ;;  %2558 = vmatprep.subr.bf16.mxu1 %v6421_v46  ;;  %v6470_v45 = vcombine.low %v927_v31, %v931_v32  ;;  %v6477_v46 = vcombine.high %v934_v38, %v938_v39  ;;  %v6479_v51 = vcombine.high %v935_v42, %v939_v44 }
 0x2e3   :  { %2640 = vmatprep.subr.bf16.mxu0 %v6423_v47  ;;  %v942_v47 = vld [vmem:[#allocation11 + $0x490] sm:$0xff]  ;;  %v6518_v32 = vcombine.low %v975_v9, %v979_v10 }
 0x2e5   :  { %2559 = vmatpush1.bf16.msra.mxu1 %v6420_v54  ;;  %v6476_v54 = vcombine.low %v934_v38, %v938_v39  ;;  %v991_v38 = vld [vmem:[#allocation11 + $0x618] sm:$0xff] }
 0x2e6   :  { %2641 = vmatpush1.bf16.msra.mxu0 %v6422_v55  ;;  %2560 = vmatprep.subr.bf16.mxu1 %v6429_v56  ;;  %v6478_v55 = vcombine.low %v935_v42, %v939_v44  ;;  %v6485_v56 = vcombine.high %v942_v47, %v946_v48  ;;  %v995_v39 = vld [vmem:[#allocation11 + $0x638] sm:$0xff]  ;;  %v6526_v42 = vcombine.low %v983_v29, %v987_v30 }
 0x2e7   :  { %2642 = vmatprep.subr.bf16.mxu0 %v6431_v57  ;;  %v6487_v57 = vcombine.high %v943_v0, %v947_v52 }
 0x2e9   :  { %2561 = vmatpush1.bf16.msra.mxu1 %v6428_v62  ;;  %v6484_v62 = vcombine.low %v942_v47, %v946_v48  ;;  %v1002_v47 = vld [vmem:[#allocation11 + $0x670] sm:$0xff]  ;;  %v999_v48 = vld [vmem:[#allocation11 + $0x658] sm:$0xff] }
 0x2ea   :  { %2643 = vmatpush1.bf16.msra.mxu0 %v6430_v63  ;;  %2562 = vmatprep.subr.bf16.mxu1 %v6437_v2  ;;  %v6493_v63 = vcombine.high %v950_v58, %v954_v59  ;;  %v6495_v2 = vcombine.high %v951_v60, %v955_v61 }
 0x2eb   :  { %2644 = vmatprep.subr.bf16.mxu0 %v6439_v3  ;;  %v958_v3 = vld [vmem:[#allocation11 + $0x510] sm:$0xff] }
 0x2ec   :  { %v6500_v20 = vcombine.low %v958_v3, %v962_v4 }
 0x2ed   :  { %2563 = vmatpush1.bf16.msra.mxu1 %v6436_v11  ;;  %v6501_v11 = vcombine.high %v958_v3, %v962_v4  ;;  %v1015_v3 = vld [vmem:[#allocation11 + $0x6d8] sm:$0xff] }
 0x2ee   :  { %2645 = vmatpush1.bf16.msra.mxu0 %v6438_v12  ;;  %2564 = vmatprep.subr.bf16.mxu1 %v6445_v14  ;;  %v6503_v12 = vcombine.high %v959_v5, %v963_v6  ;;  %v966_v14 = vld [vmem:[#allocation11 + $0x550] sm:$0xff]  ;;  %v1019_v4 = vld [vmem:[#allocation11 + $0x6f8] sm:$0xff] }
 0x2ef   :  { %2646 = vmatprep.subr.bf16.mxu0 %v6447_v15  ;;  %v970_v15 = vld [vmem:[#allocation11 + $0x570] sm:$0xff] }
 0x2f0   :  { %v6508_v13 = vcombine.low %v966_v14, %v970_v15 }
 0x2f1   :  { %2565 = vmatpush1.bf16.msra.mxu1 %v6444_v21  ;;  %v6509_v21 = vcombine.high %v966_v14, %v970_v15  ;;  %v1023_v14 = vld [vmem:[#allocation11 + $0x718] sm:$0xff] }
 0x2f2   :  { %2647 = vmatpush1.bf16.msra.mxu0 %v6446_v22  ;;  %2566 = vmatprep.subr.bf16.mxu1 %v6453_v23  ;;  %v6511_v22 = vcombine.high %v967_v18, %v971_v19  ;;  %v974_v23 = vld [vmem:[#allocation11 + $0x590] sm:$0xff]  ;;  %v1027_v15 = vld [vmem:[#allocation11 + $0x738] sm:$0xff]  ;;  %v6558_v19 = vcombine.low %v1015_v3, %v1019_v4 }
 0x2f3   :  { %2648 = vmatprep.subr.bf16.mxu0 %v6455_v8  ;;  %v978_v8 = vld [vmem:[#allocation11 + $0x5b0] sm:$0xff] }
 0x2f4   :  { %v6516_v31 = vcombine.low %v974_v23, %v978_v8 }
 0x2f5   :  { %2567 = vmatpush1.bf16.msra.mxu1 %v6452_v24  ;;  %v6517_v24 = vcombine.high %v974_v23, %v978_v8  ;;  %v1031_v23 = vld [vmem:[#allocation11 + $0x758] sm:$0xff] }
 0x2f6   :  { %2649 = vmatpush1.bf16.msra.mxu0 %v6454_v26  ;;  %2568 = vmatprep.subr.bf16.mxu1 %v6461_v27  ;;  %v6519_v26 = vcombine.high %v975_v9, %v979_v10  ;;  %v982_v27 = vld [vmem:[#allocation11 + $0x5d0] sm:$0xff]  ;;  %v1035_v8 = vld [vmem:[#allocation11 + $0x778] sm:$0xff]  ;;  %v6566_v10 = vcombine.low %v1023_v14, %v1027_v15 }
 0x2f7   :  { %2650 = vmatprep.subr.bf16.mxu0 %v6463_v28  ;;  %v986_v28 = vld [vmem:[#allocation11 + $0x5f0] sm:$0xff] }
 0x2f9   :  { %2569 = vmatpush1.bf16.msra.mxu1 %v6460_v33  ;;  %v6525_v33 = vcombine.high %v982_v27, %v986_v28 }
 0x2fa   :  { %2651 = vmatpush1.bf16.msra.mxu0 %v6462_v34  ;;  %2579 = vmatprep.subr.bf16.mxu1 %v6469_v36  ;;  %v6527_v34 = vcombine.high %v983_v29, %v987_v30  ;;  %v990_v36 = vld [vmem:[#allocation11 + $0x610] sm:$0xff]  ;;  %v6574_v30 = vcombine.low %v1031_v23, %v1035_v8 }
 0x2fb   :  { %2661 = vmatprep.subr.bf16.mxu0 %v6471_v37  ;;  %v994_v37 = vld [vmem:[#allocation11 + $0x630] sm:$0xff] }
 0x2fc   :  { %2571 = vmatmul.mubr.bf16.vlgmr.msra.gmra.mrb[4].mxu1 %v8434_v1  ;;  %v6533_v44 = vcombine.high %v990_v36, %v994_v37 }
 0x2fd   :  { %2653 = vmatmul.mubr.bf16.vlgmr.msra.gmra.mrb[16].mxu0 %v8434_v1  ;;  %2580 = vmatpush1.bf16.msra.mxu1 %v6468_v41  ;;  %v6486_v1 = vcombine.low %v943_v0, %v947_v52  ;;  %v6524_v41 = vcombine.low %v982_v27, %v986_v28  ;;  %v6532_v0 = vcombine.low %v990_v36, %v994_v37  ;;  %v1039_v27 = vld [vmem:[#allocation11 + $0x798] sm:$0xff] }
 0x2fe   :  { %2611 = vmatprep.mubr.bf16.mxu1 %v8456_v17  ;;  %2662 = vmatpush1.bf16.msra.mxu0 %v6470_v45  ;;  %v6535_v45 = vcombine.high %v991_v38, %v995_v39  ;;  %v6534_v52 = vcombine.low %v991_v38, %v995_v39  ;;  %v1043_v28 = vld [vmem:[#allocation11 + $0x7b8] sm:$0xff] }
 0x2ff   :  { %2693 = vmatprep.mubr.bf16.mxu0 %v8456_v17  ;;  %2581 = vmatprep.subr.bf16.mxu1 %v6477_v46  ;;  %v6492_v17 = vcombine.low %v950_v58, %v954_v59  ;;  %v998_v46 = vld [vmem:[#allocation11 + $0x650] sm:$0xff]  ;;  %v1007_v58 = vld [vmem:[#allocation11 + $0x698] sm:$0xff]  ;;  %v6582_v39 = vcombine.low %v1039_v27, %v1043_v28 }
 0x300   :  { %2663 = vmatprep.subr.bf16.mxu0 %v6479_v51  ;;  %v1003_v51 = vld [vmem:[#allocation11 + $0x678] sm:$0xff]  ;;  %v6540_v60 = vcombine.low %v998_v46, %v1002_v47 }
 0x301   :  { %2582 = vmatpush1.bf16.msra.mxu1 %v6476_v54  ;;  %v6541_v54 = vcombine.high %v998_v46, %v1002_v47  ;;  %v1011_v59 = vld [vmem:[#allocation11 + $0x6b8] sm:$0xff]  ;;  %v6542_v61 = vcombine.low %v999_v48, %v1003_v51  ;;  %v7335_v46 = vld [vmem:[#allocation14 + $0x4] ss:$28 sps:$4 sm:$0xff]   ;;  %v7338_v47 = vld [vmem:[#allocation14 + $0xc] ss:$28 sps:$4 sm:$0xff]  }
 0x302   :  { %2664 = vmatpush1.bf16.msra.mxu0 %v6478_v55  ;;  %2583 = vmatprep.subr.bf16.mxu1 %v6485_v56  ;;  %v6543_v55 = vcombine.high %v999_v48, %v1003_v51  ;;  %v1006_v56 = vld [vmem:[#allocation11 + $0x690] sm:$0xff]  ;;  %v6550_v6 = vcombine.low %v1007_v58, %v1011_v59  ;;  %v1047_v36 = vld [vmem:[#allocation11 + $0x7d8] sm:$0xff]  ;;  %v7333_v48 = vld [vmem:[#allocation14] ss:$28 sps:$4 sm:$0xff]  }
 0x303   :  { %2665 = vmatprep.subr.bf16.mxu0 %v6487_v57  ;;  %v1010_v57 = vld [vmem:[#allocation11 + $0x6b0] sm:$0xff]  ;;  %v1051_v37 = vld [vmem:[#allocation11 + $0x7f8] sm:$0xff] }
 0x304   :  { %v6548_v5 = vcombine.low %v1006_v56, %v1010_v57  ;;  %v7336_v51 = vld [vmem:[#allocation14 + $0x8] ss:$28 sps:$4 sm:$0xff]  }
 0x305   :  { %2584 = vmatpush1.bf16.msra.mxu1 %v6484_v62  ;;  %v6549_v62 = vcombine.high %v1006_v56, %v1010_v57  ;;  %v7347_v56 = vld [vmem:[#allocation14 + $0x74] ss:$28 sps:$4 sm:$0xff]   ;;  %v7350_v57 = vld [vmem:[#allocation14 + $0x7c] ss:$28 sps:$4 sm:$0xff]  }
 0x306   :  { %2666 = vmatpush1.bf16.msra.mxu0 %v6486_v1  ;;  %2585 = vmatprep.subr.bf16.mxu1 %v6493_v63  ;;  %v6551_v1 = vcombine.high %v1007_v58, %v1011_v59  ;;  %v1014_v63 = vld [vmem:[#allocation11 + $0x6d0] sm:$0xff]  ;;  %v7348_v59 = vld [vmem:[#allocation14 + $0x78] ss:$28 sps:$4 sm:$0xff]  }
 0x307   :  { %2667 = vmatprep.subr.bf16.mxu0 %v6495_v2  ;;  %v1018_v2 = vld [vmem:[#allocation11 + $0x6f0] sm:$0xff] }
 0x308   :  { %v6556_v18 = vcombine.low %v1014_v63, %v1018_v2  ;;  %v7345_v58 = vld [vmem:[#allocation14 + $0x70] ss:$28 sps:$4 sm:$0xff]  }
 0x309   :  { %2586 = vmatpush1.bf16.msra.mxu1 %v6492_v17  ;;  %v6557_v17 = vcombine.high %v1014_v63, %v1018_v2  ;;  %v7362_v63 = vld [vmem:[#allocation14 + $0xec] ss:$28 sps:$4 sm:$0xff]   ;;  %v7357_v2 = vld [vmem:[#allocation14 + $0xe0] ss:$28 sps:$4 sm:$0xff]  }
 0x30a   :  { %2668 = vmatpush1.bf16.msra.mxu0 %v6494_v7  ;;  %2587 = vmatprep.subr.bf16.mxu1 %v6501_v11  ;;  %v6559_v7 = vcombine.high %v1015_v3, %v1019_v4  ;;  %v1022_v11 = vld [vmem:[#allocation11 + $0x710] sm:$0xff]  ;;  %v7365_v4 = vld [vmem:[#allocation14 + $0x11c] ss:$28 sps:$4 sm:$0xff]  }
 0x30b   :  { %2669 = vmatprep.subr.bf16.mxu0 %v6503_v12  ;;  %v1026_v12 = vld [vmem:[#allocation11 + $0x730] sm:$0xff] }
 0x30c   :  { %v6564_v9 = vcombine.low %v1022_v11, %v1026_v12  ;;  %v7360_v3 = vld [vmem:[#allocation14 + $0xe8] ss:$28 sps:$4 sm:$0xff]  }
 0x30d   :  { %2588 = vmatpush1.bf16.msra.mxu1 %v6500_v20  ;;  %v6565_v20 = vcombine.high %v1022_v11, %v1026_v12  ;;  %v7374_v11 = vld [vmem:[#allocation14 + $0x15c] ss:$28 sps:$4 sm:$0xff]   ;;  %v7369_v12 = vld [vmem:[#allocation14 + $0x150] ss:$28 sps:$4 sm:$0xff]  }
 0x30e   :  { %2670 = vmatpush1.bf16.msra.mxu0 %v6502_v49  ;;  %2589 = vmatprep.subr.bf16.mxu1 %v6509_v21  ;;  %v6567_v49 = vcombine.high %v1023_v14, %v1027_v15  ;;  %v1030_v21 = vld [vmem:[#allocation11 + $0x750] sm:$0xff]  ;;  %v7372_v14 = vld [vmem:[#allocation14 + $0x158] ss:$28 sps:$4 sm:$0xff]  }
 0x30f   :  { %2671 = vmatprep.subr.bf16.mxu0 %v6511_v22  ;;  %v1034_v22 = vld [vmem:[#allocation11 + $0x770] sm:$0xff] }
 0x310   :  { %v6572_v29 = vcombine.low %v1030_v21, %v1034_v22  ;;  %v7377_v15 = vld [vmem:[#allocation14 + $0x18c] ss:$28 sps:$4 sm:$0xff]  }
 0x311   :  { %2590 = vmatpush1.bf16.msra.mxu1 %v6508_v13  ;;  %v6573_v13 = vcombine.high %v1030_v21, %v1034_v22  ;;  %v7386_v21 = vld [vmem:[#allocation14 + $0x1cc] ss:$28 sps:$4 sm:$0xff]   ;;  %v7381_v22 = vld [vmem:[#allocation14 + $0x1c0] ss:$28 sps:$4 sm:$0xff]  }
 0x312   :  { %2672 = vmatpush1.bf16.msra.mxu0 %v6510_v16  ;;  %2591 = vmatprep.subr.bf16.mxu1 %v6517_v24  ;;  %v6575_v16 = vcombine.high %v1031_v23, %v1035_v8  ;;  %v1038_v24 = vld [vmem:[#allocation11 + $0x790] sm:$0xff]  ;;  %v7389_v8 = vld [vmem:[#allocation14 + $0x1fc] ss:$28 sps:$4 sm:$0xff]  }
 0x313   :  { %2673 = vmatprep.subr.bf16.mxu0 %v6519_v26  ;;  %v1042_v26 = vld [vmem:[#allocation11 + $0x7b0] sm:$0xff] }
 0x314   :  { %v6580_v38 = vcombine.low %v1038_v24, %v1042_v26  ;;  %v7384_v23 = vld [vmem:[#allocation14 + $0x1c8] ss:$28 sps:$4 sm:$0xff]  }
 0x315   :  { %2592 = vmatpush1.bf16.msra.mxu1 %v6516_v31  ;;  %v6581_v31 = vcombine.high %v1038_v24, %v1042_v26  ;;  %v7398_v24 = vld [vmem:[#allocation14 + $0x23c] ss:$28 sps:$4 sm:$0xff]   ;;  %v7393_v26 = vld [vmem:[#allocation14 + $0x230] ss:$28 sps:$4 sm:$0xff]  }
 0x316   :  { %2674 = vmatpush1.bf16.msra.mxu0 %v6518_v32  ;;  %2593 = vmatprep.subr.bf16.mxu1 %v6525_v33  ;;  %v6583_v32 = vcombine.high %v1039_v27, %v1043_v28  ;;  %v1046_v33 = vld [vmem:[#allocation11 + $0x7d0] sm:$0xff]  ;;  %v7396_v27 = vld [vmem:[#allocation14 + $0x238] ss:$28 sps:$4 sm:$0xff]  }
 0x317   :  { %2675 = vmatprep.subr.bf16.mxu0 %v6527_v34  ;;  %v1050_v34 = vld [vmem:[#allocation11 + $0x7f0] sm:$0xff] }
 0x318   :  { %v7401_v28 = vld [vmem:[#allocation14 + $0x26c] ss:$28 sps:$4 sm:$0xff]  }
 0x319   :  { %2594 = vmatpush1.bf16.msra.mxu1 %v6524_v41  ;;  %v6589_v41 = vcombine.high %v1046_v33, %v1050_v34 }
 0x31a   :  { %2676 = vmatpush1.bf16.msra.mxu0 %v6526_v42  ;;  %2595 = vmatprep.subr.bf16.mxu1 %v6533_v44  ;;  %v6591_v42 = vcombine.high %v1047_v36, %v1051_v37  ;;  %v6588_v44 = vcombine.low %v1046_v33, %v1050_v34  ;;  %v7410_v33 = vld [vmem:[#allocation14 + $0x2ac] ss:$28 sps:$4 sm:$0xff]   ;;  %v7405_v34 = vld [vmem:[#allocation14 + $0x2a0] ss:$28 sps:$4 sm:$0xff]  }
 0x31b   :  { %2677 = vmatprep.subr.bf16.mxu0 %v6535_v45  ;;  %v6590_v45 = vcombine.low %v1047_v36, %v1051_v37  ;;  %v7408_v36 = vld [vmem:[#allocation14 + $0x2a8] ss:$28 sps:$4 sm:$0xff]   ;;  %v7413_v37 = vld [vmem:[#allocation14 + $0x2dc] ss:$28 sps:$4 sm:$0xff]  }
 0x31d   :  { %2596 = vmatpush1.bf16.msra.mxu1 %v6532_v0  ;;  %v7341_v0 = vld [vmem:[#allocation14 + $0x3c] ss:$28 sps:$4 sm:$0xff]  }
 0x31e   :  { %2678 = vmatpush1.bf16.msra.mxu0 %v6534_v52  ;;  %2597 = vmatprep.subr.bf16.mxu1 %v6541_v54  ;;  %v7344_v52 = vld [vmem:[#allocation14 + $0x44] ss:$28 sps:$4 sm:$0xff]   ;;  %v7339_v54 = vld [vmem:[#allocation14 + $0x38] ss:$28 sps:$4 sm:$0xff]  }
 0x31f   :  { %2679 = vmatprep.subr.bf16.mxu0 %v6543_v55  ;;  %v7342_v55 = vld [vmem:[#allocation14 + $0x40] ss:$28 sps:$4 sm:$0xff]  }
 0x321   :  { %2598 = vmatpush1.bf16.msra.mxu1 %v6540_v60  ;;  %v7353_v60 = vld [vmem:[#allocation14 + $0xac] ss:$28 sps:$4 sm:$0xff]  }
 0x322   :  { %2680 = vmatpush1.bf16.msra.mxu0 %v6542_v61  ;;  %2599 = vmatprep.subr.bf16.mxu1 %v6549_v62  ;;  %v7356_v61 = vld [vmem:[#allocation14 + $0xb4] ss:$28 sps:$4 sm:$0xff]   ;;  %v7351_v62 = vld [vmem:[#allocation14 + $0xa8] ss:$28 sps:$4 sm:$0xff]  }
 0x323   :  { %2681 = vmatprep.subr.bf16.mxu0 %v6551_v1  ;;  %v7359_v1 = vld [vmem:[#allocation14 + $0xe4] ss:$28 sps:$4 sm:$0xff]  }
 0x325   :  { %2600 = vmatpush1.bf16.msra.mxu1 %v6548_v5  ;;  %v7368_v5 = vld [vmem:[#allocation14 + $0x124] ss:$28 sps:$4 sm:$0xff]  }
 0x326   :  { %2682 = vmatpush1.bf16.msra.mxu0 %v6550_v6  ;;  %2601 = vmatprep.subr.bf16.mxu1 %v6557_v17  ;;  %v7363_v6 = vld [vmem:[#allocation14 + $0x118] ss:$28 sps:$4 sm:$0xff]   ;;  %v7366_v17 = vld [vmem:[#allocation14 + $0x120] ss:$28 sps:$4 sm:$0xff]  }
 0x327   :  { %2683 = vmatprep.subr.bf16.mxu0 %v6559_v7  ;;  %v7371_v7 = vld [vmem:[#allocation14 + $0x154] ss:$28 sps:$4 sm:$0xff]  }
 0x329   :  { %2602 = vmatpush1.bf16.msra.mxu1 %v6556_v18  ;;  %v7380_v18 = vld [vmem:[#allocation14 + $0x194] ss:$28 sps:$4 sm:$0xff]  }
 0x32a   :  { %2684 = vmatpush1.bf16.msra.mxu0 %v6558_v19  ;;  %2603 = vmatprep.subr.bf16.mxu1 %v6565_v20  ;;  %v7375_v19 = vld [vmem:[#allocation14 + $0x188] ss:$28 sps:$4 sm:$0xff]   ;;  %v7378_v20 = vld [vmem:[#allocation14 + $0x190] ss:$28 sps:$4 sm:$0xff]  }
 0x32b   :  { %2685 = vmatprep.subr.bf16.mxu0 %v6567_v49  ;;  %v7383_v49 = vld [vmem:[#allocation14 + $0x1c4] ss:$28 sps:$4 sm:$0xff]  }
 0x32d   :  { %2604 = vmatpush1.bf16.msra.mxu1 %v6564_v9  ;;  %v7392_v9 = vld [vmem:[#allocation14 + $0x204] ss:$28 sps:$4 sm:$0xff]  }
 0x32e   :  { %2686 = vmatpush1.bf16.msra.mxu0 %v6566_v10  ;;  %2605 = vmatprep.subr.bf16.mxu1 %v6573_v13  ;;  %v7387_v10 = vld [vmem:[#allocation14 + $0x1f8] ss:$28 sps:$4 sm:$0xff]   ;;  %v7390_v13 = vld [vmem:[#allocation14 + $0x200] ss:$28 sps:$4 sm:$0xff]  }
 0x32f   :  { %2687 = vmatprep.subr.bf16.mxu0 %v6575_v16  ;;  %v7395_v16 = vld [vmem:[#allocation14 + $0x234] ss:$28 sps:$4 sm:$0xff]  }
 0x331   :  { %2606 = vmatpush1.bf16.msra.mxu1 %v6572_v29  ;;  %v7404_v29 = vld [vmem:[#allocation14 + $0x274] ss:$28 sps:$4 sm:$0xff]  }
 0x332   :  { %2688 = vmatpush1.bf16.msra.mxu0 %v6574_v30  ;;  %2607 = vmatprep.subr.bf16.mxu1 %v6581_v31  ;;  %v7399_v30 = vld [vmem:[#allocation14 + $0x268] ss:$28 sps:$4 sm:$0xff]   ;;  %v7402_v31 = vld [vmem:[#allocation14 + $0x270] ss:$28 sps:$4 sm:$0xff]  }
 0x333   :  { %2689 = vmatprep.subr.bf16.mxu0 %v6583_v32  ;;  %v7407_v32 = vld [vmem:[#allocation14 + $0x2a4] ss:$28 sps:$4 sm:$0xff]  }
 0x335   :  { %2608 = vmatpush1.bf16.msra.mxu1 %v6580_v38  ;;  %v7416_v38 = vld [vmem:[#allocation14 + $0x2e4] ss:$28 sps:$4 sm:$0xff]  }
 0x336   :  { %2690 = vmatpush1.bf16.msra.mxu0 %v6582_v39  ;;  %2609 = vmatprep.subr.bf16.mxu1 %v6589_v41  ;;  %v7411_v39 = vld [vmem:[#allocation14 + $0x2d8] ss:$28 sps:$4 sm:$0xff]   ;;  %v7414_v41 = vld [vmem:[#allocation14 + $0x2e0] ss:$28 sps:$4 sm:$0xff]  }
 0x337   :  { %2691 = vmatprep.subr.bf16.mxu0 %v6591_v42  ;;  %v7419_v42 = vld [vmem:[#allocation14 + $0x314] ss:$28 sps:$4 sm:$0xff]  }
 0x339   :  { %2610 = vmatpush1.bf16.msra.mxu1 %v6588_v44  ;;  %v7422_v44 = vld [vmem:[#allocation14 + $0x31c] ss:$28 sps:$4 sm:$0xff]  }
 0x33a   :  { %2692 = vmatpush1.bf16.msra.mxu0 %v6590_v45  ;;  %5571 = vmatprep.subr.bf16.mxu1 %v7335_v46  ;;  %v7417_v45 = vld [vmem:[#allocation14 + $0x310] ss:$28 sps:$4 sm:$0xff]   ;;  %v7420_v46 = vld [vmem:[#allocation14 + $0x318] ss:$28 sps:$4 sm:$0xff]  }
 0x33b   :  { %5735 = vmatprep.subr.bf16.mxu0 %v7338_v47  ;;  %v7425_v47 = vld [vmem:[#allocation14 + $0x34c] ss:$28 sps:$4 sm:$0xff]  }
 0x33c   :  { %2612 = vmatmul.mubr.bf16.vlgmr.msra.gmra.mrb[4].mxu1 %v8458_v25 }
 0x33d   :  { %2694 = vmatmul.mubr.bf16.vlgmr.msra.gmra.mrb[16].mxu0 %v8458_v25  ;;  %5572 = vmatpush1.bf16.msra.mxu1 %v7333_v48  ;;  %v7354_v25 = vld [vmem:[#allocation14 + $0xb0] ss:$28 sps:$4 sm:$0xff]  }
 0x33e   :  { %5736 = vmatpush1.bf16.msra.mxu0 %v7336_v51  ;;  %5573 = vmatprep.subr.bf16.mxu1 %v7341_v0  ;;  %v7428_v48 = vld [vmem:[#allocation14 + $0x354] ss:$28 sps:$4 sm:$0xff]   ;;  %v7423_v51 = vld [vmem:[#allocation14 + $0x348] ss:$28 sps:$4 sm:$0xff]  }
 0x33f   :  { %5737 = vmatprep.subr.bf16.mxu0 %v7344_v52  ;;  %v7426_v0 = vld [vmem:[#allocation14 + $0x350] ss:$28 sps:$4 sm:$0xff]   ;;  %v7431_v52 = vld [vmem:[#allocation14 + $0x384] ss:$28 sps:$4 sm:$0xff]  }
 0x341   :  { %5574 = vmatpush1.bf16.msra.mxu1 %v7339_v54  ;;  %v7434_v54 = vld [vmem:[#allocation14 + $0x38c] ss:$28 sps:$4 sm:$0xff]  }
 0x342   :  { %5738 = vmatpush1.bf16.msra.mxu0 %v7342_v55  ;;  %5575 = vmatprep.subr.bf16.mxu1 %v7347_v56  ;;  %v8472_v55 = vld [vmem:[#allocation13] sm:$0xff] }
 0x343   :  { %5739 = vmatprep.subr.bf16.mxu0 %v7350_v57  ;;  %v1057_v56 = vrot.slane %v8472_v55, %v8399_v40  ;;  %v1061_v57 = vrot.slane %v8472_v55, %v8402_v43 }
 0x345   :  { %5576 = vmatpush1.bf16.msra.mxu1 %v7345_v58  ;;  %v1069_v58 = vrot.slane %v8472_v55, %v8450_v53 }
 0x346   :  { %5740 = vmatpush1.bf16.msra.mxu0 %v7348_v59  ;;  %5577 = vmatprep.subr.bf16.mxu1 %v7353_v60 }
 0x347   :  { %5741 = vmatprep.subr.bf16.mxu0 %v7356_v61 }
 0x349   :  { %5578 = vmatpush1.bf16.msra.mxu1 %v7351_v62 }
 0x34a   :  { %5742 = vmatpush1.bf16.msra.mxu0 %v7354_v25  ;;  %5579 = vmatprep.subr.bf16.mxu1 %v7359_v1 }
 0x34b   :  { %5743 = vmatprep.subr.bf16.mxu0 %v7362_v63 }
 0x34d   :  { %5580 = vmatpush1.bf16.msra.mxu1 %v7357_v2 }
 0x34e   :  { %5744 = vmatpush1.bf16.msra.mxu0 %v7360_v3  ;;  %5581 = vmatprep.subr.bf16.mxu1 %v7365_v4 }
 0x34f   :  { %5745 = vmatprep.subr.bf16.mxu0 %v7368_v5 }
 0x351   :  { %5582 = vmatpush1.bf16.msra.mxu1 %v7363_v6 }
 0x352   :  { %5746 = vmatpush1.bf16.msra.mxu0 %v7366_v17  ;;  %5583 = vmatprep.subr.bf16.mxu1 %v7371_v7 }
 0x353   :  { %5747 = vmatprep.subr.bf16.mxu0 %v7374_v11 }
 0x355   :  { %5584 = vmatpush1.bf16.msra.mxu1 %v7369_v12  ;;  %v7429_v12 = vld [vmem:[#allocation14 + $0x380] ss:$28 sps:$4 sm:$0xff]  }
 0x356   :  { %5748 = vmatpush1.bf16.msra.mxu0 %v7372_v14  ;;  %5585 = vmatprep.subr.bf16.mxu1 %v7377_v15  ;;  %v7432_v14 = vld [vmem:[#allocation14 + $0x388] ss:$28 sps:$4 sm:$0xff]  }
 0x357   :  { %5749 = vmatprep.subr.bf16.mxu0 %v7380_v18  ;;  %v7437_v18 = vld [vmem:[#allocation14 + $0x3bc] ss:$28 sps:$4 sm:$0xff]  }
 0x359   :  { %5586 = vmatpush1.bf16.msra.mxu1 %v7375_v19  ;;  %v7440_v19 = vld [vmem:[#allocation14 + $0x3c4] ss:$28 sps:$4 sm:$0xff]  }
 0x35a   :  { %5750 = vmatpush1.bf16.msra.mxu0 %v7378_v20  ;;  %5587 = vmatprep.subr.bf16.mxu1 %v7383_v49  ;;  %v7435_v49 = vld [vmem:[#allocation14 + $0x3b8] ss:$28 sps:$4 sm:$0xff]  }
 0x35b   :  { %5751 = vmatprep.subr.bf16.mxu0 %v7386_v21  ;;  %v7438_v21 = vld [vmem:[#allocation14 + $0x3c0] ss:$28 sps:$4 sm:$0xff]  }
 0x35d   :  { %5588 = vmatpush1.bf16.msra.mxu1 %v7381_v22  ;;  %v7443_v22 = vld [vmem:[#allocation14 + $0x3f4] ss:$28 sps:$4 sm:$0xff]  }
 0x35e   :  { %5752 = vmatpush1.bf16.msra.mxu0 %v7384_v23  ;;  %5589 = vmatprep.subr.bf16.mxu1 %v7389_v8  ;;  %v7446_v23 = vld [vmem:[#allocation14 + $0x3fc] ss:$28 sps:$4 sm:$0xff]   ;;  %v7441_v8 = vld [vmem:[#allocation14 + $0x3f0] ss:$28 sps:$4 sm:$0xff]  }
 0x35f   :  { %5753 = vmatprep.subr.bf16.mxu0 %v7392_v9  ;;  %v7444_v9 = vld [vmem:[#allocation14 + $0x3f8] ss:$28 sps:$4 sm:$0xff]  }
 0x361   :  { %5590 = vmatpush1.bf16.msra.mxu1 %v7387_v10  ;;  %v7449_v10 = vld [vmem:[#allocation14 + $0x42c] ss:$28 sps:$4 sm:$0xff]  }
 0x362   :  { %5754 = vmatpush1.bf16.msra.mxu0 %v7390_v13  ;;  %5591 = vmatprep.subr.bf16.mxu1 %v7395_v16  ;;  %v7452_v13 = vld [vmem:[#allocation14 + $0x434] ss:$28 sps:$4 sm:$0xff]   ;;  %v7447_v16 = vld [vmem:[#allocation14 + $0x428] ss:$28 sps:$4 sm:$0xff]  }
 0x363   :  { %5755 = vmatprep.subr.bf16.mxu0 %v7398_v24  ;;  %v7450_v24 = vld [vmem:[#allocation14 + $0x430] ss:$28 sps:$4 sm:$0xff]  }
 0x365   :  { %5592 = vmatpush1.bf16.msra.mxu1 %v7393_v26  ;;  %v7455_v26 = vld [vmem:[#allocation14 + $0x464] ss:$28 sps:$4 sm:$0xff]  }
 0x366   :  { %5756 = vmatpush1.bf16.msra.mxu0 %v7396_v27  ;;  %5593 = vmatprep.subr.bf16.mxu1 %v7401_v28  ;;  %v7458_v27 = vld [vmem:[#allocation14 + $0x46c] ss:$28 sps:$4 sm:$0xff]   ;;  %v7453_v28 = vld [vmem:[#allocation14 + $0x460] ss:$28 sps:$4 sm:$0xff]  }
 0x367   :  { %5757 = vmatprep.subr.bf16.mxu0 %v7404_v29  ;;  %v7456_v29 = vld [vmem:[#allocation14 + $0x468] ss:$28 sps:$4 sm:$0xff]  }
 0x369   :  { %5594 = vmatpush1.bf16.msra.mxu1 %v7399_v30  ;;  %v7461_v30 = vld [vmem:[#allocation14 + $0x49c] ss:$28 sps:$4 sm:$0xff]  }
 0x36a   :  { %5758 = vmatpush1.bf16.msra.mxu0 %v7402_v31  ;;  %5595 = vmatprep.subr.bf16.mxu1 %v7407_v32  ;;  %v7464_v31 = vld [vmem:[#allocation14 + $0x4a4] ss:$28 sps:$4 sm:$0xff]   ;;  %v7459_v32 = vld [vmem:[#allocation14 + $0x498] ss:$28 sps:$4 sm:$0xff]  }
 0x36b   :  { %5759 = vmatprep.subr.bf16.mxu0 %v7410_v33  ;;  %v7462_v33 = vld [vmem:[#allocation14 + $0x4a0] ss:$28 sps:$4 sm:$0xff]  }
 0x36d   :  { %5596 = vmatpush1.bf16.msra.mxu1 %v7405_v34  ;;  %v7467_v34 = vld [vmem:[#allocation14 + $0x4d4] ss:$28 sps:$4 sm:$0xff]  }
 0x36e   :  { %5760 = vmatpush1.bf16.msra.mxu0 %v7408_v36  ;;  %5597 = vmatprep.subr.bf16.mxu1 %v7413_v37  ;;  %v7470_v36 = vld [vmem:[#allocation14 + $0x4dc] ss:$28 sps:$4 sm:$0xff]   ;;  %v7465_v37 = vld [vmem:[#allocation14 + $0x4d0] ss:$28 sps:$4 sm:$0xff]  }
 0x36f   :  { %5761 = vmatprep.subr.bf16.mxu0 %v7416_v38  ;;  %v7468_v38 = vld [vmem:[#allocation14 + $0x4d8] ss:$28 sps:$4 sm:$0xff]  }
 0x371   :  { %5598 = vmatpush1.bf16.msra.mxu1 %v7411_v39  ;;  %v7473_v39 = vld [vmem:[#allocation14 + $0x50c] ss:$28 sps:$4 sm:$0xff]  }
 0x372   :  { %5762 = vmatpush1.bf16.msra.mxu0 %v7414_v41  ;;  %5599 = vmatprep.subr.bf16.mxu1 %v7419_v42  ;;  %v7476_v41 = vld [vmem:[#allocation14 + $0x514] ss:$28 sps:$4 sm:$0xff]   ;;  %v7471_v42 = vld [vmem:[#allocation14 + $0x508] ss:$28 sps:$4 sm:$0xff]  }
 0x373   :  { %5763 = vmatprep.subr.bf16.mxu0 %v7422_v44  ;;  %v7474_v44 = vld [vmem:[#allocation14 + $0x510] ss:$28 sps:$4 sm:$0xff]  }
 0x375   :  { %5600 = vmatpush1.bf16.msra.mxu1 %v7417_v45  ;;  %v7479_v45 = vld [vmem:[#allocation14 + $0x544] ss:$28 sps:$4 sm:$0xff]  }
 0x376   :  { %5764 = vmatpush1.bf16.msra.mxu0 %v7420_v46  ;;  %5601 = vmatprep.subr.bf16.mxu1 %v7425_v47  ;;  %v7482_v46 = vld [vmem:[#allocation14 + $0x54c] ss:$28 sps:$4 sm:$0xff]   ;;  %v7477_v47 = vld [vmem:[#allocation14 + $0x540] ss:$28 sps:$4 sm:$0xff]  }
 0x377   :  { %5765 = vmatprep.subr.bf16.mxu0 %v7428_v48  ;;  %v7480_v48 = vld [vmem:[#allocation14 + $0x548] ss:$28 sps:$4 sm:$0xff]  }
 0x379   :  { %5602 = vmatpush1.bf16.msra.mxu1 %v7423_v51  ;;  %v7485_v51 = vld [vmem:[#allocation14 + $0x57c] ss:$28 sps:$4 sm:$0xff]  }
 0x37a   :  { %5766 = vmatpush1.bf16.msra.mxu0 %v7426_v0  ;;  %5612 = vmatprep.subr.bf16.mxu1 %v7431_v52  ;;  %v7488_v0 = vld [vmem:[#allocation14 + $0x584] ss:$28 sps:$4 sm:$0xff]   ;;  %v7483_v52 = vld [vmem:[#allocation14 + $0x578] ss:$28 sps:$4 sm:$0xff]  }
 0x37b   :  { %5776 = vmatprep.subr.bf16.mxu0 %v7434_v54  ;;  %v7486_v54 = vld [vmem:[#allocation14 + $0x580] ss:$28 sps:$4 sm:$0xff]  }
 0x38f   :  { %v2449_v59 = vpop.f32.mrb[0].mxu1  ;;  %v8480_v60 = vpop.f32.mrb[12].mxu0 }
 0x390   :  { %v7128_v61 = vadd.f32 %v2449_v59, %v1057_v56  ;;  %v2451_v62 = vpop.f32.mrb[1].mxu1  ;;  %v2533_v25 = vpop.f32.mrb[13].mxu0  ;;  %v7491_v56 = vld [vmem:[#allocation14 + $0x5b4] ss:$28 sps:$4 sm:$0xff]  }
 0x391   :  { %v7129_v1 = vadd.f32 %v2451_v62, %v1061_v57  ;;  %v7131_v63 = vadd.f32 %v2533_v25, %v1069_v58  ;;  %v2453_v2 = vpop.f32.mrb[2].mxu1  ;;  %v2535_v3 = vpop.f32.mrb[14].mxu0  ;;  %v7494_v57 = vld [vmem:[#allocation14 + $0x5bc] ss:$28 sps:$4 sm:$0xff]   ;;  %v7489_v58 = vld [vmem:[#allocation14 + $0x5b0] ss:$28 sps:$4 sm:$0xff]  }
 0x392   :  { %v2702_v4 = vmax.f32 %v7128_v61, 0.0  ;;  %v2454_v5 = vpop.f32.mrb[3].mxu1  ;;  %v2536_v6 = vpop.f32.mrb[15].mxu0  ;;  %v7492_v59 = vld [vmem:[#allocation14 + $0x5b8] ss:$28 sps:$4 sm:$0xff]  }
 0x393   :  { %v2703_v17 = vmax.f32 %v7129_v1, 0.0  ;;  %v2705_v7 = vmax.f32 %v7131_v63, 0.0  ;;  %v7497_v61 = vld [vmem:[#allocation14 + $0x5ec] ss:$28 sps:$4 sm:$0xff]   ;;  %v7500_v62 = vld [vmem:[#allocation14 + $0x5f4] ss:$28 sps:$4 sm:$0xff]  }
 0x394   :  { %v8484_v15 = vpack.c.bf16 %v2702_v4, %v2702_v4  ;;  %v7495_v25 = vld [vmem:[#allocation14 + $0x5e8] ss:$28 sps:$4 sm:$0xff]   ;;  %v7498_v1 = vld [vmem:[#allocation14 + $0x5f0] ss:$28 sps:$4 sm:$0xff]   ;;  %v7501_v3 = vld [vmem:[#allocation14 + $0x620] ss:$28 sps:$4 sm:$0xff]  }
 0x395   :  { %v8482_v11 = vpack.c.bf16 %v2703_v17, %v2703_v17  ;;  %v8488_v20 = vpack.c.bf16 %v2705_v7, %v2705_v7  ;;  %v7503_v63 = vld [vmem:[#allocation14 + $0x624] ss:$28 sps:$4 sm:$0xff]   ;;  %v7506_v2 = vld [vmem:[#allocation14 + $0x62c] ss:$28 sps:$4 sm:$0xff]   ;;  %v7509_v5 = vld [vmem:[#allocation14 + $0x65c] ss:$28 sps:$4 sm:$0xff]  }
 0x396   :  { %v7504_v4 = vld [vmem:[#allocation14 + $0x628] ss:$28 sps:$4 sm:$0xff]   ;;  %v7507_v17 = vld [vmem:[#allocation14 + $0x658] ss:$28 sps:$4 sm:$0xff]   ;;  %v7510_v7 = vld [vmem:[#allocation14 + $0x660] ss:$28 sps:$4 sm:$0xff]  }
 0x397   :  { %5603 = vmatprep.mubr.bf16.mxu1 %v8482_v11  ;;  %5767 = vmatprep.mubr.bf16.mxu0 %v8482_v11  ;;  %v7512_v6 = vld [vmem:[#allocation14 + $0x664] ss:$28 sps:$4 sm:$0xff]  }
 0x398   :  { %5604 = vmatmul.mubr.bf16.vlgmr.msra.gmra.mrb[8].mxu1 %v8484_v15  ;;  %5768 = vmatmul.mubr.bf16.vlgmr.msra.gmra.mrb[20].mxu0 %v8484_v15 }
 0x399   :  { %5613 = vmatpush1.bf16.msra.mxu1 %v7429_v12  ;;  %5777 = vmatpush1.bf16.msra.mxu0 %v7432_v14  ;;  %v1065_v12 = vrot.slane %v8472_v55, %v8447_v50  ;;  %v7515_v14 = vld [vmem:[#allocation14 + $0x694] ss:$28 sps:$4 sm:$0xff]  }
 0x39a   :  { %5644 = vmatprep.mubr.bf16.mxu1 %v8488_v20  ;;  %5808 = vmatprep.mubr.bf16.mxu0 %v8488_v20 }
 0x39b   :  { %5614 = vmatprep.subr.bf16.mxu1 %v7437_v18  ;;  %5778 = vmatprep.subr.bf16.mxu0 %v7440_v19  ;;  %v7518_v18 = vld [vmem:[#allocation14 + $0x69c] ss:$28 sps:$4 sm:$0xff]   ;;  %v7513_v19 = vld [vmem:[#allocation14 + $0x690] ss:$28 sps:$4 sm:$0xff]  }
 0x39d   :  { %5615 = vmatpush1.bf16.msra.mxu1 %v7435_v49  ;;  %5779 = vmatpush1.bf16.msra.mxu0 %v7438_v21  ;;  %v7516_v49 = vld [vmem:[#allocation14 + $0x698] ss:$28 sps:$4 sm:$0xff]   ;;  %v7130_v21 = vadd.f32 %v8480_v60, %v1065_v12 }
 0x39e   :  { %5616 = vmatprep.subr.bf16.mxu1 %v7443_v22  ;;  %5780 = vmatprep.subr.bf16.mxu0 %v7446_v23  ;;  %v7521_v22 = vld [vmem:[#allocation14 + $0x6cc] ss:$28 sps:$4 sm:$0xff]   ;;  %v7524_v23 = vld [vmem:[#allocation14 + $0x6d4] ss:$28 sps:$4 sm:$0xff]   ;;  %v7533_v60 = vld [vmem:[#allocation14 + $0x73c] ss:$28 sps:$4 sm:$0xff]  }
 0x39f   :  { %v7588_v12 = vld [vmem:[#allocation14 + $0x938] ss:$28 sps:$4 sm:$0xff]  }
 0x3a1   :  { %5617 = vmatpush1.bf16.msra.mxu1 %v7441_v8  ;;  %5781 = vmatpush1.bf16.msra.mxu0 %v7444_v9  ;;  %v7519_v8 = vld [vmem:[#allocation14 + $0x6c8] ss:$28 sps:$4 sm:$0xff]   ;;  %v7522_v9 = vld [vmem:[#allocation14 + $0x6d0] ss:$28 sps:$4 sm:$0xff]  }
 0x3a2   :  { %5618 = vmatprep.subr.bf16.mxu1 %v7449_v10  ;;  %5782 = vmatprep.subr.bf16.mxu0 %v7452_v13  ;;  %v2704_v10 = vmax.f32 %v7130_v21, 0.0  ;;  %v7527_v13 = vld [vmem:[#allocation14 + $0x704] ss:$28 sps:$4 sm:$0xff]  }
 0x3a3   :  { %v7599_v21 = vld [vmem:[#allocation14 + $0x9a4] ss:$28 sps:$4 sm:$0xff]  }
 0x3a5   :  { %5619 = vmatpush1.bf16.msra.mxu1 %v7447_v16  ;;  %5783 = vmatpush1.bf16.msra.mxu0 %v7450_v24  ;;  %v7530_v16 = vld [vmem:[#allocation14 + $0x70c] ss:$28 sps:$4 sm:$0xff]   ;;  %v7525_v24 = vld [vmem:[#allocation14 + $0x700] ss:$28 sps:$4 sm:$0xff]  }
 0x3a6   :  { %5620 = vmatprep.subr.bf16.mxu1 %v7455_v26  ;;  %5784 = vmatprep.subr.bf16.mxu0 %v7458_v27  ;;  %v7528_v26 = vld [vmem:[#allocation14 + $0x708] ss:$28 sps:$4 sm:$0xff]   ;;  %v8497_v27 = vpack.c.bf16 %v2704_v10, %v2704_v10 }
 0x3a7   :  { %v7608_v10 = vld [vmem:[#allocation14 + $0x9e4] ss:$28 sps:$4 sm:$0xff]  }
 0x3a9   :  { %5621 = vmatpush1.bf16.msra.mxu1 %v7453_v28  ;;  %5785 = vmatpush1.bf16.msra.mxu0 %v7456_v29  ;;  %v7536_v28 = vld [vmem:[#allocation14 + $0x744] ss:$28 sps:$4 sm:$0xff]   ;;  %v7531_v29 = vld [vmem:[#allocation14 + $0x738] ss:$28 sps:$4 sm:$0xff]  }
 0x3aa   :  { %5622 = vmatprep.subr.bf16.mxu1 %v7461_v30  ;;  %5786 = vmatprep.subr.bf16.mxu0 %v7464_v31  ;;  %v7534_v30 = vld [vmem:[#allocation14 + $0x740] ss:$28 sps:$4 sm:$0xff]   ;;  %v7539_v31 = vld [vmem:[#allocation14 + $0x774] ss:$28 sps:$4 sm:$0xff]  }
 0x3ad   :  { %5623 = vmatpush1.bf16.msra.mxu1 %v7459_v32  ;;  %5787 = vmatpush1.bf16.msra.mxu0 %v7462_v33  ;;  %v7542_v32 = vld [vmem:[#allocation14 + $0x77c] ss:$28 sps:$4 sm:$0xff]   ;;  %v7537_v33 = vld [vmem:[#allocation14 + $0x770] ss:$28 sps:$4 sm:$0xff]  }
 0x3ae   :  { %5624 = vmatprep.subr.bf16.mxu1 %v7467_v34  ;;  %5788 = vmatprep.subr.bf16.mxu0 %v7470_v36  ;;  %v7540_v34 = vld [vmem:[#allocation14 + $0x778] ss:$28 sps:$4 sm:$0xff]   ;;  %v7545_v36 = vld [vmem:[#allocation14 + $0x7ac] ss:$28 sps:$4 sm:$0xff]  }
 0x3b1   :  { %5625 = vmatpush1.bf16.msra.mxu1 %v7465_v37  ;;  %5789 = vmatpush1.bf16.msra.mxu0 %v7468_v38  ;;  %v7548_v37 = vld [vmem:[#allocation14 + $0x7b4] ss:$28 sps:$4 sm:$0xff]   ;;  %v7543_v38 = vld [vmem:[#allocation14 + $0x7a8] ss:$28 sps:$4 sm:$0xff]  }
 0x3b2   :  { %5626 = vmatprep.subr.bf16.mxu1 %v7473_v39  ;;  %5790 = vmatprep.subr.bf16.mxu0 %v7476_v41  ;;  %v7546_v39 = vld [vmem:[#allocation14 + $0x7b0] ss:$28 sps:$4 sm:$0xff]   ;;  %v7551_v41 = vld [vmem:[#allocation14 + $0x7e4] ss:$28 sps:$4 sm:$0xff]  }
 0x3b5   :  { %5627 = vmatpush1.bf16.msra.mxu1 %v7471_v42  ;;  %5791 = vmatpush1.bf16.msra.mxu0 %v7474_v44  ;;  %v7554_v42 = vld [vmem:[#allocation14 + $0x7ec] ss:$28 sps:$4 sm:$0xff]   ;;  %v7549_v44 = vld [vmem:[#allocation14 + $0x7e0] ss:$28 sps:$4 sm:$0xff]  }
 0x3b6   :  { %5628 = vmatprep.subr.bf16.mxu1 %v7479_v45  ;;  %5792 = vmatprep.subr.bf16.mxu0 %v7482_v46  ;;  %v7552_v45 = vld [vmem:[#allocation14 + $0x7e8] ss:$28 sps:$4 sm:$0xff]   ;;  %v7557_v46 = vld [vmem:[#allocation14 + $0x81c] ss:$28 sps:$4 sm:$0xff]  }
 0x3b9   :  { %5629 = vmatpush1.bf16.msra.mxu1 %v7477_v47  ;;  %5793 = vmatpush1.bf16.msra.mxu0 %v7480_v48  ;;  %v7560_v47 = vld [vmem:[#allocation14 + $0x824] ss:$28 sps:$4 sm:$0xff]   ;;  %v7555_v48 = vld [vmem:[#allocation14 + $0x818] ss:$28 sps:$4 sm:$0xff]  }
 0x3ba   :  { %5630 = vmatprep.subr.bf16.mxu1 %v7485_v51  ;;  %5794 = vmatprep.subr.bf16.mxu0 %v7488_v0  ;;  %v7558_v51 = vld [vmem:[#allocation14 + $0x820] ss:$28 sps:$4 sm:$0xff]   ;;  %v7563_v0 = vld [vmem:[#allocation14 + $0x854] ss:$28 sps:$4 sm:$0xff]  }
 0x3bd   :  { %5631 = vmatpush1.bf16.msra.mxu1 %v7483_v52  ;;  %5795 = vmatpush1.bf16.msra.mxu0 %v7486_v54  ;;  %v7566_v52 = vld [vmem:[#allocation14 + $0x85c] ss:$28 sps:$4 sm:$0xff]   ;;  %v7561_v54 = vld [vmem:[#allocation14 + $0x850] ss:$28 sps:$4 sm:$0xff]  }
 0x3be   :  { %5632 = vmatprep.subr.bf16.mxu1 %v7491_v56  ;;  %5796 = vmatprep.subr.bf16.mxu0 %v7494_v57  ;;  %v7564_v56 = vld [vmem:[#allocation14 + $0x858] ss:$28 sps:$4 sm:$0xff]   ;;  %v7569_v57 = vld [vmem:[#allocation14 + $0x88c] ss:$28 sps:$4 sm:$0xff]  }
 0x3c1   :  { %5633 = vmatpush1.bf16.msra.mxu1 %v7489_v58  ;;  %5797 = vmatpush1.bf16.msra.mxu0 %v7492_v59  ;;  %v7572_v58 = vld [vmem:[#allocation14 + $0x894] ss:$28 sps:$4 sm:$0xff]   ;;  %v7567_v59 = vld [vmem:[#allocation14 + $0x888] ss:$28 sps:$4 sm:$0xff]  }
 0x3c2   :  { %5634 = vmatprep.subr.bf16.mxu1 %v7497_v61  ;;  %5798 = vmatprep.subr.bf16.mxu0 %v7500_v62  ;;  %v7570_v61 = vld [vmem:[#allocation14 + $0x890] ss:$28 sps:$4 sm:$0xff]   ;;  %v7575_v62 = vld [vmem:[#allocation14 + $0x8c4] ss:$28 sps:$4 sm:$0xff]  }
 0x3c5   :  { %5635 = vmatpush1.bf16.msra.mxu1 %v7495_v25  ;;  %5799 = vmatpush1.bf16.msra.mxu0 %v7498_v1  ;;  %v7578_v25 = vld [vmem:[#allocation14 + $0x8cc] ss:$28 sps:$4 sm:$0xff]   ;;  %v7573_v1 = vld [vmem:[#allocation14 + $0x8c0] ss:$28 sps:$4 sm:$0xff]  }
 0x3c6   :  { %5636 = vmatprep.subr.bf16.mxu1 %v7503_v63  ;;  %5800 = vmatprep.subr.bf16.mxu0 %v7506_v2  ;;  %v7576_v63 = vld [vmem:[#allocation14 + $0x8c8] ss:$28 sps:$4 sm:$0xff]   ;;  %v7581_v2 = vld [vmem:[#allocation14 + $0x8fc] ss:$28 sps:$4 sm:$0xff]  }
 0x3c9   :  { %5637 = vmatpush1.bf16.msra.mxu1 %v7501_v3  ;;  %5801 = vmatpush1.bf16.msra.mxu0 %v7504_v4  ;;  %v7584_v3 = vld [vmem:[#allocation14 + $0x904] ss:$28 sps:$4 sm:$0xff]   ;;  %v7579_v4 = vld [vmem:[#allocation14 + $0x8f8] ss:$28 sps:$4 sm:$0xff]  }
 0x3ca   :  { %5638 = vmatprep.subr.bf16.mxu1 %v7509_v5  ;;  %5802 = vmatprep.subr.bf16.mxu0 %v7512_v6  ;;  %v7582_v5 = vld [vmem:[#allocation14 + $0x900] ss:$28 sps:$4 sm:$0xff]   ;;  %v7587_v6 = vld [vmem:[#allocation14 + $0x934] ss:$28 sps:$4 sm:$0xff]  }
 0x3cd   :  { %5639 = vmatpush1.bf16.msra.mxu1 %v7507_v17  ;;  %5803 = vmatpush1.bf16.msra.mxu0 %v7510_v7  ;;  %v7590_v17 = vld [vmem:[#allocation14 + $0x93c] ss:$28 sps:$4 sm:$0xff]   ;;  %v7585_v7 = vld [vmem:[#allocation14 + $0x930] ss:$28 sps:$4 sm:$0xff]  }
 0x3ce   :  { %5640 = vmatprep.subr.bf16.mxu1 %v7515_v14  ;;  %5804 = vmatprep.subr.bf16.mxu0 %v7518_v18  ;;  %v7593_v14 = vld [vmem:[#allocation14 + $0x96c] ss:$28 sps:$4 sm:$0xff]   ;;  %v7596_v18 = vld [vmem:[#allocation14 + $0x974] ss:$28 sps:$4 sm:$0xff]  }
 0x3d1   :  { %5641 = vmatpush1.bf16.msra.mxu1 %v7513_v19  ;;  %5805 = vmatpush1.bf16.msra.mxu0 %v7516_v49  ;;  %v7591_v19 = vld [vmem:[#allocation14 + $0x968] ss:$28 sps:$4 sm:$0xff]   ;;  %v7594_v49 = vld [vmem:[#allocation14 + $0x970] ss:$28 sps:$4 sm:$0xff]  }
 0x3d2   :  { %5642 = vmatprep.subr.bf16.mxu1 %v7521_v22  ;;  %5806 = vmatprep.subr.bf16.mxu0 %v7524_v23  ;;  %v7602_v22 = vld [vmem:[#allocation14 + $0x9ac] ss:$28 sps:$4 sm:$0xff]   ;;  %v7597_v23 = vld [vmem:[#allocation14 + $0x9a0] ss:$28 sps:$4 sm:$0xff]  }
 0x3d5   :  { %5643 = vmatpush1.bf16.msra.mxu1 %v7519_v8  ;;  %5807 = vmatpush1.bf16.msra.mxu0 %v7522_v9  ;;  %v7600_v8 = vld [vmem:[#allocation14 + $0x9a8] ss:$28 sps:$4 sm:$0xff]   ;;  %v7605_v9 = vld [vmem:[#allocation14 + $0x9dc] ss:$28 sps:$4 sm:$0xff]  }
 0x3d6   :  { %5653 = vmatprep.subr.bf16.mxu1 %v7527_v13  ;;  %5817 = vmatprep.subr.bf16.mxu0 %v7530_v16  ;;  %v1072_v13 = vsub.s32 4, %v8396_v35  ;;  %v7603_v16 = vld [vmem:[#allocation14 + $0x9d8] ss:$28 sps:$4 sm:$0xff]  }
 0x3d8   :  { %5645 = vmatmul.mubr.bf16.vlgmr.msra.gmra.mrb[8].mxu1 %v8497_v27  ;;  %5809 = vmatmul.mubr.bf16.vlgmr.msra.gmra.mrb[20].mxu0 %v8497_v27 }
 0x3d9   :  { %5654 = vmatpush1.bf16.msra.mxu1 %v7525_v24  ;;  %5818 = vmatpush1.bf16.msra.mxu0 %v7528_v26  ;;  %v7606_v24 = vld [vmem:[#allocation14 + $0x9e0] ss:$28 sps:$4 sm:$0xff]   ;;  %v1076_v26 = vsub.s32 5, %v8396_v35 }
 0x3da   :  { %5655 = vmatprep.subr.bf16.mxu1 %v7533_v60  ;;  %5819 = vmatprep.subr.bf16.mxu0 %v7536_v28  ;;  %v7611_v60 = vld [vmem:[#allocation14 + $0xa14] ss:$28 sps:$4 sm:$0xff]   ;;  %v7614_v28 = vld [vmem:[#allocation14 + $0xa1c] ss:$28 sps:$4 sm:$0xff]  }
 0x3dd   :  { %5656 = vmatpush1.bf16.msra.mxu1 %v7531_v29  ;;  %5820 = vmatpush1.bf16.msra.mxu0 %v7534_v30  ;;  %v1084_v29 = vsub.s32 7, %v8396_v35  ;;  %v1073_v30 = vrot.slane %v8472_v55, %v1072_v13 }
 0x3de   :  { %5657 = vmatprep.subr.bf16.mxu1 %v7539_v31  ;;  %5821 = vmatprep.subr.bf16.mxu0 %v7542_v32  ;;  %v7609_v31 = vld [vmem:[#allocation14 + $0xa10] ss:$28 sps:$4 sm:$0xff]   ;;  %v7612_v32 = vld [vmem:[#allocation14 + $0xa18] ss:$28 sps:$4 sm:$0xff]  }
 0x3e1   :  { %5658 = vmatpush1.bf16.msra.mxu1 %v7537_v33  ;;  %5822 = vmatpush1.bf16.msra.mxu0 %v7540_v34  ;;  %v1077_v33 = vrot.slane %v8472_v55, %v1076_v26  ;;  %v1085_v34 = vrot.slane %v8472_v55, %v1084_v29  ;;  %v7662_v29 = vld [vmem:[#allocation14 + $0xbdc] ss:$28 sps:$4 sm:$0xff]  }
 0x3e2   :  { %5659 = vmatprep.subr.bf16.mxu1 %v7545_v36  ;;  %5823 = vmatprep.subr.bf16.mxu0 %v7548_v37  ;;  %v7617_v36 = vld [vmem:[#allocation14 + $0xa4c] ss:$28 sps:$4 sm:$0xff]   ;;  %v7620_v37 = vld [vmem:[#allocation14 + $0xa54] ss:$28 sps:$4 sm:$0xff]  }
 0x3e5   :  { %5660 = vmatpush1.bf16.msra.mxu1 %v7543_v38  ;;  %5824 = vmatpush1.bf16.msra.mxu0 %v7546_v39 }
 0x3e6   :  { %5661 = vmatprep.subr.bf16.mxu1 %v7551_v41  ;;  %5825 = vmatprep.subr.bf16.mxu0 %v7554_v42 }
 0x3e9   :  { %5662 = vmatpush1.bf16.msra.mxu1 %v7549_v44  ;;  %5826 = vmatpush1.bf16.msra.mxu0 %v7552_v45  ;;  %v7615_v44 = vld [vmem:[#allocation14 + $0xa48] ss:$28 sps:$4 sm:$0xff]  }
 0x3ea   :  { %5663 = vmatprep.subr.bf16.mxu1 %v7557_v46  ;;  %5827 = vmatprep.subr.bf16.mxu0 %v7560_v47 }
 0x3ed   :  { %5664 = vmatpush1.bf16.msra.mxu1 %v7555_v48  ;;  %5828 = vmatpush1.bf16.msra.mxu0 %v7558_v51  ;;  %v7618_v48 = vld [vmem:[#allocation14 + $0xa50] ss:$28 sps:$4 sm:$0xff]   ;;  %v7623_v51 = vld [vmem:[#allocation14 + $0xa84] ss:$28 sps:$4 sm:$0xff]  }
 0x3ee   :  { %5665 = vmatprep.subr.bf16.mxu1 %v7563_v0  ;;  %5829 = vmatprep.subr.bf16.mxu0 %v7566_v52 }
 0x3f1   :  { %5666 = vmatpush1.bf16.msra.mxu1 %v7561_v54  ;;  %5830 = vmatpush1.bf16.msra.mxu0 %v7564_v56 }
 0x3f2   :  { %5667 = vmatprep.subr.bf16.mxu1 %v7569_v57  ;;  %5831 = vmatprep.subr.bf16.mxu0 %v7572_v58  ;;  %v7626_v57 = vld [vmem:[#allocation14 + $0xa8c] ss:$28 sps:$4 sm:$0xff]  }
 0x3f5   :  { %5668 = vmatpush1.bf16.msra.mxu1 %v7567_v59  ;;  %5832 = vmatpush1.bf16.msra.mxu0 %v7570_v61 }
 0x3f6   :  { %5669 = vmatprep.subr.bf16.mxu1 %v7575_v62  ;;  %5833 = vmatprep.subr.bf16.mxu0 %v7578_v25  ;;  %v7621_v25 = vld [vmem:[#allocation14 + $0xa80] ss:$28 sps:$4 sm:$0xff]  }
 0x3f9   :  { %5670 = vmatpush1.bf16.msra.mxu1 %v7573_v1  ;;  %5834 = vmatpush1.bf16.msra.mxu0 %v7576_v63  ;;  %v7624_v1 = vld [vmem:[#allocation14 + $0xa88] ss:$28 sps:$4 sm:$0xff]  }
 0x3fa   :  { %5671 = vmatprep.subr.bf16.mxu1 %v7581_v2  ;;  %5835 = vmatprep.subr.bf16.mxu0 %v7584_v3  ;;  %v7629_v2 = vld [vmem:[#allocation14 + $0xabc] ss:$28 sps:$4 sm:$0xff]   ;;  %v7632_v3 = vld [vmem:[#allocation14 + $0xac4] ss:$28 sps:$4 sm:$0xff]  }
 0x3fd   :  { %5672 = vmatpush1.bf16.msra.mxu1 %v7579_v4  ;;  %5836 = vmatpush1.bf16.msra.mxu0 %v7582_v5  ;;  %v7627_v5 = vld [vmem:[#allocation14 + $0xab8] ss:$28 sps:$4 sm:$0xff]  }
 0x3fe   :  { %5673 = vmatprep.subr.bf16.mxu1 %v7587_v6  ;;  %5837 = vmatprep.subr.bf16.mxu0 %v7590_v17  ;;  %v7630_v6 = vld [vmem:[#allocation14 + $0xac0] ss:$28 sps:$4 sm:$0xff]   ;;  %v7635_v17 = vld [vmem:[#allocation14 + $0xaf4] ss:$28 sps:$4 sm:$0xff]  }
 0x401   :  { %5674 = vmatpush1.bf16.msra.mxu1 %v7585_v7  ;;  %5838 = vmatpush1.bf16.msra.mxu0 %v7588_v12  ;;  %v7638_v7 = vld [vmem:[#allocation14 + $0xafc] ss:$28 sps:$4 sm:$0xff]   ;;  %v7633_v12 = vld [vmem:[#allocation14 + $0xaf0] ss:$28 sps:$4 sm:$0xff]  }
 0x402   :  { %5675 = vmatprep.subr.bf16.mxu1 %v7593_v14  ;;  %5839 = vmatprep.subr.bf16.mxu0 %v7596_v18  ;;  %v7636_v14 = vld [vmem:[#allocation14 + $0xaf8] ss:$28 sps:$4 sm:$0xff]   ;;  %v7641_v18 = vld [vmem:[#allocation14 + $0xb2c] ss:$28 sps:$4 sm:$0xff]  }
 0x405   :  { %5676 = vmatpush1.bf16.msra.mxu1 %v7591_v19  ;;  %5840 = vmatpush1.bf16.msra.mxu0 %v7594_v49  ;;  %v7644_v19 = vld [vmem:[#allocation14 + $0xb34] ss:$28 sps:$4 sm:$0xff]   ;;  %v7639_v49 = vld [vmem:[#allocation14 + $0xb28] ss:$28 sps:$4 sm:$0xff]  }
 0x406   :  { %5677 = vmatprep.subr.bf16.mxu1 %v7599_v21  ;;  %5841 = vmatprep.subr.bf16.mxu0 %v7602_v22  ;;  %v7642_v21 = vld [vmem:[#allocation14 + $0xb30] ss:$28 sps:$4 sm:$0xff]   ;;  %v7647_v22 = vld [vmem:[#allocation14 + $0xb64] ss:$28 sps:$4 sm:$0xff]  }
 0x409   :  { %5678 = vmatpush1.bf16.msra.mxu1 %v7597_v23  ;;  %5842 = vmatpush1.bf16.msra.mxu0 %v7600_v8  ;;  %v7650_v23 = vld [vmem:[#allocation14 + $0xb6c] ss:$28 sps:$4 sm:$0xff]   ;;  %v7645_v8 = vld [vmem:[#allocation14 + $0xb60] ss:$28 sps:$4 sm:$0xff]  }
 0x40a   :  { %5679 = vmatprep.subr.bf16.mxu1 %v7605_v9  ;;  %5843 = vmatprep.subr.bf16.mxu0 %v7608_v10  ;;  %v7648_v9 = vld [vmem:[#allocation14 + $0xb68] ss:$28 sps:$4 sm:$0xff]   ;;  %v7653_v10 = vld [vmem:[#allocation14 + $0xb9c] ss:$28 sps:$4 sm:$0xff]  }
 0x40d   :  { %5680 = vmatpush1.bf16.msra.mxu1 %v7603_v16  ;;  %5844 = vmatpush1.bf16.msra.mxu0 %v7606_v24  ;;  %v7656_v16 = vld [vmem:[#allocation14 + $0xba4] ss:$28 sps:$4 sm:$0xff]   ;;  %v7651_v24 = vld [vmem:[#allocation14 + $0xb98] ss:$28 sps:$4 sm:$0xff]  }
 0x40e   :  { %5681 = vmatprep.subr.bf16.mxu1 %v7611_v60  ;;  %5845 = vmatprep.subr.bf16.mxu0 %v7614_v28  ;;  %v7654_v60 = vld [vmem:[#allocation14 + $0xba0] ss:$28 sps:$4 sm:$0xff]   ;;  %v7659_v28 = vld [vmem:[#allocation14 + $0xbd4] ss:$28 sps:$4 sm:$0xff]  }
 0x40f   :  { %v2613_v38 = vpop.f32.mrb[4].mxu1 }
 0x410   :  { %v7132_v39 = vadd.f32 %v2613_v38, %v1073_v30  ;;  %v8511_v41 = vpop.f32.mrb[16].mxu0  ;;  %v2615_v42 = vpop.f32.mrb[5].mxu1  ;;  %v7657_v30 = vld [vmem:[#allocation14 + $0xbd0] ss:$28 sps:$4 sm:$0xff]  }
 0x411   :  { %v7133_v45 = vadd.f32 %v2615_v42, %v1077_v33  ;;  %v2697_v46 = vpop.f32.mrb[17].mxu0  ;;  %5682 = vmatpush1.bf16.msra.mxu1 %v7609_v31  ;;  %5846 = vmatpush1.bf16.msra.mxu0 %v7612_v32  ;;  %v2617_v47 = vpop.f32.mrb[6].mxu1  ;;  %v7660_v31 = vld [vmem:[#allocation14 + $0xbd8] ss:$28 sps:$4 sm:$0xff]   ;;  %v7665_v32 = vld [vmem:[#allocation14 + $0xc0c] ss:$28 sps:$4 sm:$0xff]  }
 0x412   :  { %v2706_v0 = vmax.f32 %v7132_v39, 0.0  ;;  %v7135_v52 = vadd.f32 %v2697_v46, %v1085_v34  ;;  %v2699_v54 = vpop.f32.mrb[18].mxu0  ;;  %v2618_v56 = vpop.f32.mrb[7].mxu1  ;;  %5683 = vmatprep.subr.bf16.mxu1 %v7617_v36  ;;  %5847 = vmatprep.subr.bf16.mxu0 %v7620_v37  ;;  %v7668_v33 = vld [vmem:[#allocation14 + $0xc14] ss:$28 sps:$4 sm:$0xff]  }
 0x413   :  { %v2707_v58 = vmax.f32 %v7133_v45, 0.0  ;;  %v2700_v59 = vpop.f32.mrb[19].mxu0  ;;  %v7663_v34 = vld [vmem:[#allocation14 + $0xc08] ss:$28 sps:$4 sm:$0xff]   ;;  %v7666_v36 = vld [vmem:[#allocation14 + $0xc10] ss:$28 sps:$4 sm:$0xff]  }
 0x414   :  { %v2709_v61 = vmax.f32 %v7135_v52, 0.0  ;;  %v8515_v63 = vpack.c.bf16 %v2706_v0, %v2706_v0  ;;  %v7671_v37 = vld [vmem:[#allocation14 + $0xc44] ss:$28 sps:$4 sm:$0xff]   ;;  %v7674_v38 = vld [vmem:[#allocation14 + $0xc4c] ss:$28 sps:$4 sm:$0xff]  }
 0x415   :  { %v8513_v62 = vpack.c.bf16 %v2707_v58, %v2707_v58  ;;  %5684 = vmatpush1.bf16.msra.mxu1 %v7615_v44  ;;  %5848 = vmatpush1.bf16.msra.mxu0 %v7618_v48  ;;  %v7669_v39 = vld [vmem:[#allocation14 + $0xc40] ss:$28 sps:$4 sm:$0xff]   ;;  %v7672_v42 = vld [vmem:[#allocation14 + $0xc48] ss:$28 sps:$4 sm:$0xff]   ;;  %v7675_v46 = vld [vmem:[#allocation14 + $0xc78] ss:$28 sps:$4 sm:$0xff]  }
 0x416   :  { %5694 = vmatprep.subr.bf16.mxu1 %v7623_v51  ;;  %5858 = vmatprep.subr.bf16.mxu0 %v7626_v57  ;;  %v8519_v4 = vpack.c.bf16 %v2709_v61, %v2709_v61  ;;  %v7677_v44 = vld [vmem:[#allocation14 + $0xc7c] ss:$28 sps:$4 sm:$0xff]   ;;  %v7680_v45 = vld [vmem:[#allocation14 + $0xc84] ss:$28 sps:$4 sm:$0xff]   ;;  %v7683_v48 = vld [vmem:[#allocation14 + $0xcb4] ss:$28 sps:$4 sm:$0xff]  }
 0x417   :  { %5685 = vmatprep.mubr.bf16.mxu1 %v8513_v62  ;;  %5849 = vmatprep.mubr.bf16.mxu0 %v8513_v62  ;;  %v7678_v47 = vld [vmem:[#allocation14 + $0xc80] ss:$28 sps:$4 sm:$0xff]   ;;  %v7681_v0 = vld [vmem:[#allocation14 + $0xcb0] ss:$28 sps:$4 sm:$0xff]   ;;  %v7684_v52 = vld [vmem:[#allocation14 + $0xcb8] ss:$28 sps:$4 sm:$0xff]  }
 0x418   :  { %5686 = vmatmul.mubr.bf16.vlgmr.msra.gmra.mrb[8].mxu1 %v8515_v63  ;;  %5850 = vmatmul.mubr.bf16.vlgmr.msra.gmra.mrb[20].mxu0 %v8515_v63  ;;  %v7686_v51 = vld [vmem:[#allocation14 + $0xcbc] ss:$28 sps:$4 sm:$0xff]   ;;  %v7689_v54 = vld [vmem:[#allocation14 + $0xcec] ss:$28 sps:$4 sm:$0xff]   ;;  %v7692_v56 = vld [vmem:[#allocation14 + $0xcf4] ss:$28 sps:$4 sm:$0xff]  }
 0x419   :  { %5695 = vmatpush1.bf16.msra.mxu1 %v7621_v25  ;;  %5859 = vmatpush1.bf16.msra.mxu0 %v7624_v1  ;;  %v7687_v57 = vld [vmem:[#allocation14 + $0xce8] ss:$28 sps:$4 sm:$0xff]   ;;  %v7690_v58 = vld [vmem:[#allocation14 + $0xcf0] ss:$28 sps:$4 sm:$0xff]   ;;  %v7693_v25 = vld [vmem:[#allocation14 + $0xd20] ss:$28 sps:$4 sm:$0xff]  }
 0x41a   :  { %5726 = vmatprep.mubr.bf16.mxu1 %v8519_v4  ;;  %5890 = vmatprep.mubr.bf16.mxu0 %v8519_v4  ;;  %v7695_v59 = vld [vmem:[#allocation14 + $0xd24] ss:$28 sps:$4 sm:$0xff]   ;;  %v7698_v61 = vld [vmem:[#allocation14 + $0xd2c] ss:$28 sps:$4 sm:$0xff]  }
 0x41b   :  { %5696 = vmatprep.subr.bf16.mxu1 %v7629_v2  ;;  %5860 = vmatprep.subr.bf16.mxu0 %v7632_v3  ;;  %v7696_v1 = vld [vmem:[#allocation14 + $0xd28] ss:$28 sps:$4 sm:$0xff]   ;;  %v1080_v2 = vsub.s32 6, %v8396_v35  ;;  %v7701_v3 = vld [vmem:[#allocation14 + $0xd5c] ss:$28 sps:$4 sm:$0xff]  }
 0x41d   :  { %5697 = vmatpush1.bf16.msra.mxu1 %v7627_v5  ;;  %5861 = vmatpush1.bf16.msra.mxu0 %v7630_v6  ;;  %v7704_v5 = vld [vmem:[#allocation14 + $0xd64] ss:$28 sps:$4 sm:$0xff]   ;;  %v7699_v6 = vld [vmem:[#allocation14 + $0xd58] ss:$28 sps:$4 sm:$0xff]  }
 0x41e   :  { %5698 = vmatprep.subr.bf16.mxu1 %v7635_v17  ;;  %5862 = vmatprep.subr.bf16.mxu0 %v7638_v7  ;;  %v7702_v17 = vld [vmem:[#allocation14 + $0xd60] ss:$28 sps:$4 sm:$0xff]   ;;  %v1081_v7 = vrot.slane %v8472_v55, %v1080_v2  ;;  %v7719_v55 = vld [vmem:[#allocation14 + $0x14] ss:$28 sps:$4 sm:$0xff]  }
 0x421   :  { %5699 = vmatpush1.bf16.msra.mxu1 %v7633_v12  ;;  %5863 = vmatpush1.bf16.msra.mxu0 %v7636_v14  ;;  %v7707_v12 = vld [vmem:[#allocation14 + $0xd94] ss:$28 sps:$4 sm:$0xff]   ;;  %v7710_v14 = vld [vmem:[#allocation14 + $0xd9c] ss:$28 sps:$4 sm:$0xff]  }
 0x422   :  { %5700 = vmatprep.subr.bf16.mxu1 %v7641_v18  ;;  %5864 = vmatprep.subr.bf16.mxu0 %v7644_v19  ;;  %v7705_v18 = vld [vmem:[#allocation14 + $0xd90] ss:$28 sps:$4 sm:$0xff]   ;;  %v7708_v19 = vld [vmem:[#allocation14 + $0xd98] ss:$28 sps:$4 sm:$0xff]  }
 0x425   :  { %5701 = vmatpush1.bf16.msra.mxu1 %v7639_v49  ;;  %5865 = vmatpush1.bf16.msra.mxu0 %v7642_v21  ;;  %v7134_v49 = vadd.f32 %v8511_v41, %v1081_v7  ;;  %v7713_v21 = vld [vmem:[#allocation14 + $0xdcc] ss:$28 sps:$4 sm:$0xff]   ;;  %v7721_v41 = vld [vmem:[#allocation14 + $0x18] ss:$28 sps:$4 sm:$0xff]  }
 0x426   :  { %5702 = vmatprep.subr.bf16.mxu1 %v7647_v22  ;;  %5866 = vmatprep.subr.bf16.mxu0 %v7650_v23  ;;  %v7716_v22 = vld [vmem:[#allocation14 + $0xdd4] ss:$28 sps:$4 sm:$0xff]   ;;  %v7711_v23 = vld [vmem:[#allocation14 + $0xdc8] ss:$28 sps:$4 sm:$0xff]  }
 0x427   :  { %v7762_v7 = vld [vmem:[#allocation14 + $0x208] ss:$28 sps:$4 sm:$0xff]  }
 0x429   :  { %5703 = vmatpush1.bf16.msra.mxu1 %v7645_v8  ;;  %5867 = vmatpush1.bf16.msra.mxu0 %v7648_v9  ;;  %v7714_v8 = vld [vmem:[#allocation14 + $0xdd0] ss:$28 sps:$4 sm:$0xff]   ;;  %v2708_v9 = vmax.f32 %v7134_v49, 0.0  ;;  %v7771_v49 = vld [vmem:[#allocation14 + $0x408] ss:$28 sps:$4 sm:$0xff]  }
 0x42a   :  { %5704 = vmatprep.subr.bf16.mxu1 %v7653_v10  ;;  %5868 = vmatprep.subr.bf16.mxu0 %v7656_v16  ;;  %v7720_v10 = vld [vmem:[#allocation14 + $0x1d8] ss:$28 sps:$4 sm:$0xff]   ;;  %v7717_v16 = vld [vmem:[#allocation14 + $0x10] ss:$28 sps:$4 sm:$0xff]  }
 0x42d   :  { %5705 = vmatpush1.bf16.msra.mxu1 %v7651_v24  ;;  %5869 = vmatpush1.bf16.msra.mxu0 %v7654_v60  ;;  %v8530_v24 = vpack.c.bf16 %v2708_v9, %v2708_v9  ;;  %v7724_v60 = vld [vmem:[#allocation14 + $0x4c] ss:$28 sps:$4 sm:$0xff]   ;;  %v7779_v9 = vld [vmem:[#allocation14 + $0x2b4] ss:$28 sps:$4 sm:$0xff]  }
 0x42e   :  { %5706 = vmatprep.subr.bf16.mxu1 %v7659_v28  ;;  %5870 = vmatprep.subr.bf16.mxu0 %v7662_v29  ;;  %v7725_v28 = vld [vmem:[#allocation14 + $0x210] ss:$28 sps:$4 sm:$0xff]   ;;  %v7722_v29 = vld [vmem:[#allocation14 + $0x48] ss:$28 sps:$4 sm:$0xff]  }
 0x431   :  { %5707 = vmatpush1.bf16.msra.mxu1 %v7657_v30  ;;  %5871 = vmatpush1.bf16.msra.mxu0 %v7660_v31  ;;  %v7726_v30 = vld [vmem:[#allocation14 + $0x50] ss:$28 sps:$4 sm:$0xff]   ;;  %v7729_v31 = vld [vmem:[#allocation14 + $0x84] ss:$28 sps:$4 sm:$0xff]  }
 0x432   :  { %5708 = vmatprep.subr.bf16.mxu1 %v7665_v32  ;;  %5872 = vmatprep.subr.bf16.mxu0 %v7668_v33  ;;  %v7730_v32 = vld [vmem:[#allocation14 + $0x248] ss:$28 sps:$4 sm:$0xff]   ;;  %v7727_v33 = vld [vmem:[#allocation14 + $0x80] ss:$28 sps:$4 sm:$0xff]  }
 0x435   :  { %5709 = vmatpush1.bf16.msra.mxu1 %v7663_v34  ;;  %5873 = vmatpush1.bf16.msra.mxu0 %v7666_v36  ;;  %v7731_v34 = vld [vmem:[#allocation14 + $0x88] ss:$28 sps:$4 sm:$0xff]   ;;  %v7734_v36 = vld [vmem:[#allocation14 + $0xbc] ss:$28 sps:$4 sm:$0xff]  }
 0x436   :  { %5710 = vmatprep.subr.bf16.mxu1 %v7671_v37  ;;  %5874 = vmatprep.subr.bf16.mxu0 %v7674_v38  ;;  %v7735_v37 = vld [vmem:[#allocation14 + $0x280] ss:$28 sps:$4 sm:$0xff]   ;;  %v7732_v38 = vld [vmem:[#allocation14 + $0xb8] ss:$28 sps:$4 sm:$0xff]  }
 0x439   :  { %5711 = vmatpush1.bf16.msra.mxu1 %v7669_v39  ;;  %5875 = vmatpush1.bf16.msra.mxu0 %v7672_v42  ;;  %v7736_v39 = vld [vmem:[#allocation14 + $0xc0] ss:$28 sps:$4 sm:$0xff]   ;;  %v7739_v42 = vld [vmem:[#allocation14 + $0xf4] ss:$28 sps:$4 sm:$0xff]  }
 0x43a   :  { %5712 = vmatprep.subr.bf16.mxu1 %v7677_v44  ;;  %5876 = vmatprep.subr.bf16.mxu0 %v7680_v45  ;;  %v7737_v44 = vld [vmem:[#allocation14 + $0xf0] ss:$28 sps:$4 sm:$0xff]   ;;  %v7741_v45 = vld [vmem:[#allocation14 + $0xf8] ss:$28 sps:$4 sm:$0xff]  }
 0x43d   :  { %5713 = vmatpush1.bf16.msra.mxu1 %v7675_v46  ;;  %5877 = vmatpush1.bf16.msra.mxu0 %v7678_v47  ;;  %v7744_v46 = vld [vmem:[#allocation14 + $0x12c] ss:$28 sps:$4 sm:$0xff]  }
 0x43e   :  { %5714 = vmatprep.subr.bf16.mxu1 %v7683_v48  ;;  %5878 = vmatprep.subr.bf16.mxu0 %v7686_v51  ;;  %v7745_v47 = vld [vmem:[#allocation14 + $0x2f0] ss:$28 sps:$4 sm:$0xff]   ;;  %v7742_v48 = vld [vmem:[#allocation14 + $0x128] ss:$28 sps:$4 sm:$0xff]  }
 0x43f   :  { %v7746_v51 = vld [vmem:[#allocation14 + $0x130] ss:$28 sps:$4 sm:$0xff]  }
 0x441   :  { %5715 = vmatpush1.bf16.msra.mxu1 %v7681_v0  ;;  %5879 = vmatpush1.bf16.msra.mxu0 %v7684_v52  ;;  %v7749_v0 = vld [vmem:[#allocation14 + $0x164] ss:$28 sps:$4 sm:$0xff]  }
 0x442   :  { %5716 = vmatprep.subr.bf16.mxu1 %v7689_v54  ;;  %5880 = vmatprep.subr.bf16.mxu0 %v7692_v56  ;;  %v7750_v52 = vld [vmem:[#allocation14 + $0x328] ss:$28 sps:$4 sm:$0xff]   ;;  %v7747_v54 = vld [vmem:[#allocation14 + $0x160] ss:$28 sps:$4 sm:$0xff]  }
 0x443   :  { %v7751_v56 = vld [vmem:[#allocation14 + $0x168] ss:$28 sps:$4 sm:$0xff]  }
 0x445   :  { %5717 = vmatpush1.bf16.msra.mxu1 %v7687_v57  ;;  %5881 = vmatpush1.bf16.msra.mxu0 %v7690_v58  ;;  %v7754_v57 = vld [vmem:[#allocation14 + $0x19c] ss:$28 sps:$4 sm:$0xff]  }
 0x446   :  { %5718 = vmatprep.subr.bf16.mxu1 %v7695_v59  ;;  %5882 = vmatprep.subr.bf16.mxu0 %v7698_v61  ;;  %v7755_v58 = vld [vmem:[#allocation14 + $0x360] ss:$28 sps:$4 sm:$0xff]   ;;  %v7752_v59 = vld [vmem:[#allocation14 + $0x198] ss:$28 sps:$4 sm:$0xff]  }
 0x447   :  { %v7756_v61 = vld [vmem:[#allocation14 + $0x1a0] ss:$28 sps:$4 sm:$0xff]  }
 0x449   :  { %5719 = vmatpush1.bf16.msra.mxu1 %v7693_v25  ;;  %5883 = vmatpush1.bf16.msra.mxu0 %v7696_v1  ;;  %v7759_v25 = vld [vmem:[#allocation14 + $0x1d4] ss:$28 sps:$4 sm:$0xff]  }
 0x44a   :  { %5720 = vmatprep.subr.bf16.mxu1 %v7701_v3  ;;  %5884 = vmatprep.subr.bf16.mxu0 %v7704_v5  ;;  %v7760_v1 = vld [vmem:[#allocation14 + $0x558] ss:$28 sps:$4 sm:$0xff]   ;;  %v7757_v3 = vld [vmem:[#allocation14 + $0x1d0] ss:$28 sps:$4 sm:$0xff]  }
 0x44b   :  { %v7761_v5 = vld [vmem:[#allocation14 + $0x398] ss:$28 sps:$4 sm:$0xff]  }
 0x44d   :  { %5721 = vmatpush1.bf16.msra.mxu1 %v7699_v6  ;;  %5885 = vmatpush1.bf16.msra.mxu0 %v7702_v17  ;;  %v7764_v6 = vld [vmem:[#allocation14 + $0x20c] ss:$28 sps:$4 sm:$0xff]  }
 0x44e   :  { %5722 = vmatprep.subr.bf16.mxu1 %v7707_v12  ;;  %5886 = vmatprep.subr.bf16.mxu0 %v7710_v14  ;;  %v7765_v17 = vld [vmem:[#allocation14 + $0x590] ss:$28 sps:$4 sm:$0xff]   ;;  %v7769_v14 = vld [vmem:[#allocation14 + $0x244] ss:$28 sps:$4 sm:$0xff]  }
 0x44f   :  { %v7766_v12 = vld [vmem:[#allocation14 + $0x3d0] ss:$28 sps:$4 sm:$0xff]  }
 0x451   :  { %5723 = vmatpush1.bf16.msra.mxu1 %v7705_v18  ;;  %5887 = vmatpush1.bf16.msra.mxu0 %v7708_v19  ;;  %v7770_v18 = vld [vmem:[#allocation14 + $0x5c8] ss:$28 sps:$4 sm:$0xff]   ;;  %v7767_v19 = vld [vmem:[#allocation14 + $0x240] ss:$28 sps:$4 sm:$0xff]  }
 0x452   :  { %5724 = vmatprep.subr.bf16.mxu1 %v7713_v21  ;;  %5888 = vmatprep.subr.bf16.mxu0 %v7716_v22  ;;  %v7774_v21 = vld [vmem:[#allocation14 + $0x27c] ss:$28 sps:$4 sm:$0xff]  }
 0x453   :  { %v7775_v22 = vld [vmem:[#allocation14 + $0x600] ss:$28 sps:$4 sm:$0xff]  }
 0x455   :  { %5725 = vmatpush1.bf16.msra.mxu1 %v7711_v23  ;;  %5889 = vmatpush1.bf16.msra.mxu0 %v7714_v8  ;;  %v7772_v23 = vld [vmem:[#allocation14 + $0x278] ss:$28 sps:$4 sm:$0xff]   ;;  %v7776_v8 = vld [vmem:[#allocation14 + $0x440] ss:$28 sps:$4 sm:$0xff]  }
 0x456   :  { %5899 = vmatprep.subr.bf16.mxu1 %v7719_v55  ;;  %7040 = vmatprep.subr.bf16.mxu0 %v7720_v10  ;;  %v7780_v55 = vld [vmem:[#allocation14 + $0x638] ss:$28 sps:$4 sm:$0xff]   ;;  %v7777_v10 = vld [vmem:[#allocation14 + $0x2b0] ss:$28 sps:$4 sm:$0xff]  }
 0x458   :  { %5727 = vmatmul.mubr.bf16.vlgmr.msra.gmra.mrb[8].mxu1 %v8530_v24  ;;  %5891 = vmatmul.mubr.bf16.vlgmr.msra.gmra.mrb[20].mxu0 %v8530_v24 }
 0x459   :  { %5900 = vmatpush1.bf16.msra.mxu1 %v7717_v16  ;;  %5931 = vmatprep.mubr.bf16.mxu1 %v8482_v11  ;;  %v7781_v16 = vld [vmem:[#allocation14 + $0x478] ss:$28 sps:$4 sm:$0xff]  }
 0x45a   :  { %7041 = vmatpush3.bf16.msra.mxu0 %v7721_v41  ;;  %6095 = vmatprep.mubr.bf16.mxu0 %v8482_v11  ;;  %v7740_v11 = vld [vmem:[#allocation14 + $0x2b8] ss:$28 sps:$4 sm:$0xff]   ;;  %v7784_v41 = vld [vmem:[#allocation14 + $0x2ec] ss:$28 sps:$4 sm:$0xff]  }
 0x45b   :  { %5901 = vmatprep.subr.bf16.mxu1 %v7724_v60  ;;  %7042 = vmatprep.subr.bf16.mxu0 %v7725_v28  ;;  %v7785_v60 = vld [vmem:[#allocation14 + $0x670] ss:$28 sps:$4 sm:$0xff]   ;;  %v7782_v28 = vld [vmem:[#allocation14 + $0x2e8] ss:$28 sps:$4 sm:$0xff]  }
 0x45d   :  { %5902 = vmatpush1.bf16.msra.mxu1 %v7722_v29  ;;  %v7786_v29 = vld [vmem:[#allocation14 + $0x4b0] ss:$28 sps:$4 sm:$0xff]  }
 0x45e   :  { %7043 = vmatpush3.bf16.msra.mxu0 %v7726_v30  ;;  %5903 = vmatprep.subr.bf16.mxu1 %v7729_v31  ;;  %v7789_v30 = vld [vmem:[#allocation14 + $0x324] ss:$28 sps:$4 sm:$0xff]  }
 0x45f   :  { %7044 = vmatprep.subr.bf16.mxu0 %v7730_v32  ;;  %v7790_v31 = vld [vmem:[#allocation14 + $0x6a8] ss:$28 sps:$4 sm:$0xff]   ;;  %v7787_v32 = vld [vmem:[#allocation14 + $0x320] ss:$28 sps:$4 sm:$0xff]  }
 0x461   :  { %5904 = vmatpush1.bf16.msra.mxu1 %v7727_v33  ;;  %v7791_v33 = vld [vmem:[#allocation14 + $0x4e8] ss:$28 sps:$4 sm:$0xff]  }
 0x462   :  { %7045 = vmatpush3.bf16.msra.mxu0 %v7731_v34  ;;  %5905 = vmatprep.subr.bf16.mxu1 %v7734_v36  ;;  %v7794_v34 = vld [vmem:[#allocation14 + $0x35c] ss:$28 sps:$4 sm:$0xff]  }
 0x463   :  { %7046 = vmatprep.subr.bf16.mxu0 %v7735_v37  ;;  %v7795_v36 = vld [vmem:[#allocation14 + $0x6e0] ss:$28 sps:$4 sm:$0xff]   ;;  %v7792_v37 = vld [vmem:[#allocation14 + $0x358] ss:$28 sps:$4 sm:$0xff]  }
 0x465   :  { %5906 = vmatpush1.bf16.msra.mxu1 %v7732_v38  ;;  %v7796_v38 = vld [vmem:[#allocation14 + $0x520] ss:$28 sps:$4 sm:$0xff]  }
 0x466   :  { %7047 = vmatpush3.bf16.msra.mxu0 %v7736_v39  ;;  %5907 = vmatprep.subr.bf16.mxu1 %v7739_v42  ;;  %v7799_v39 = vld [vmem:[#allocation14 + $0x394] ss:$28 sps:$4 sm:$0xff]  }
 0x467   :  { %7048 = vmatprep.subr.bf16.mxu0 %v7740_v11  ;;  %v7800_v42 = vld [vmem:[#allocation14 + $0x8d8] ss:$28 sps:$4 sm:$0xff]   ;;  %v7797_v11 = vld [vmem:[#allocation14 + $0x390] ss:$28 sps:$4 sm:$0xff]  }
 0x469   :  { %5908 = vmatpush1.bf16.msra.mxu1 %v7737_v44  ;;  %v7801_v44 = vld [vmem:[#allocation14 + $0x718] ss:$28 sps:$4 sm:$0xff]  }
 0x46a   :  { %7049 = vmatpush3.bf16.msra.mxu0 %v7741_v45  ;;  %5909 = vmatprep.subr.bf16.mxu1 %v7744_v46  ;;  %v7804_v45 = vld [vmem:[#allocation14 + $0x3cc] ss:$28 sps:$4 sm:$0xff]  }
 0x46b   :  { %7050 = vmatprep.subr.bf16.mxu0 %v7745_v47  ;;  %v7805_v46 = vld [vmem:[#allocation14 + $0x910] ss:$28 sps:$4 sm:$0xff]   ;;  %v7802_v47 = vld [vmem:[#allocation14 + $0x3c8] ss:$28 sps:$4 sm:$0xff]  }
 0x46d   :  { %5910 = vmatpush1.bf16.msra.mxu1 %v7742_v48  ;;  %v7806_v48 = vld [vmem:[#allocation14 + $0x750] ss:$28 sps:$4 sm:$0xff]  }
 0x46e   :  { %7051 = vmatpush3.bf16.msra.mxu0 %v7746_v51  ;;  %5911 = vmatprep.subr.bf16.mxu1 %v7749_v0  ;;  %v7809_v51 = vld [vmem:[#allocation14 + $0x404] ss:$28 sps:$4 sm:$0xff]  }
 0x46f   :  { %7052 = vmatprep.subr.bf16.mxu0 %v7750_v52  ;;  %v7810_v0 = vld [vmem:[#allocation14 + $0x948] ss:$28 sps:$4 sm:$0xff]   ;;  %v7807_v52 = vld [vmem:[#allocation14 + $0x400] ss:$28 sps:$4 sm:$0xff]  }
 0x471   :  { %5912 = vmatpush1.bf16.msra.mxu1 %v7747_v54  ;;  %v7814_v54 = vld [vmem:[#allocation14 + $0x43c] ss:$28 sps:$4 sm:$0xff]  }
 0x472   :  { %7053 = vmatpush3.bf16.msra.mxu0 %v7751_v56  ;;  %5913 = vmatprep.subr.bf16.mxu1 %v7754_v57  ;;  %v7815_v56 = vld [vmem:[#allocation14 + $0x980] ss:$28 sps:$4 sm:$0xff]   ;;  %v7812_v57 = vld [vmem:[#allocation14 + $0x438] ss:$28 sps:$4 sm:$0xff]  }
 0x473   :  { %7054 = vmatprep.subr.bf16.mxu0 %v7755_v58  ;;  %v7819_v58 = vld [vmem:[#allocation14 + $0x474] ss:$28 sps:$4 sm:$0xff]  }
 0x475   :  { %5914 = vmatpush1.bf16.msra.mxu1 %v7752_v59  ;;  %v7820_v59 = vld [vmem:[#allocation14 + $0x9b8] ss:$28 sps:$4 sm:$0xff]  }
 0x476   :  { %7055 = vmatpush3.bf16.msra.mxu0 %v7756_v61  ;;  %5915 = vmatprep.subr.bf16.mxu1 %v7759_v25  ;;  %v7817_v61 = vld [vmem:[#allocation14 + $0x470] ss:$28 sps:$4 sm:$0xff]   ;;  %v7821_v25 = vld [vmem:[#allocation14 + $0x7f8] ss:$28 sps:$4 sm:$0xff]  }
 0x477   :  { %7062 = vmatprep.subr.bf16.mxu0 %v7760_v1  ;;  %v7824_v1 = vld [vmem:[#allocation14 + $0x4ac] ss:$28 sps:$4 sm:$0xff]  }
 0x479   :  { %6096 = vmatmul.mubr.bf16.vlgmr.msra.gmra.mrb[24].mxu0 %v8484_v15  ;;  %5916 = vmatpush1.bf16.msra.mxu1 %v7757_v3  ;;  %v7825_v3 = vld [vmem:[#allocation14 + $0x9f0] ss:$28 sps:$4 sm:$0xff]  }
 0x47a   :  { %7063 = vmatpush3.bf16.msra.mxu0 %v7761_v5  ;;  %6135 = vmatprep.mubr.bf16.mxu0 %v8488_v20  ;;  %v7822_v5 = vld [vmem:[#allocation14 + $0x4a8] ss:$28 sps:$4 sm:$0xff]  }
 0x47b   :  { %5917 = vmatprep.subr.bf16.mxu1 %v7764_v6  ;;  %7064 = vmatprep.subr.bf16.mxu0 %v7765_v17  ;;  %v7826_v6 = vld [vmem:[#allocation14 + $0x830] ss:$28 sps:$4 sm:$0xff]   ;;  %v7829_v17 = vld [vmem:[#allocation14 + $0x4e4] ss:$28 sps:$4 sm:$0xff]  }
 0x47d   :  { %5918 = vmatpush1.bf16.msra.mxu1 %v7762_v7  ;;  %v7830_v7 = vld [vmem:[#allocation14 + $0xa28] ss:$28 sps:$4 sm:$0xff]  }
 0x47e   :  { %7065 = vmatpush3.bf16.msra.mxu0 %v7766_v12  ;;  %5919 = vmatprep.subr.bf16.mxu1 %v7769_v14  ;;  %v7827_v12 = vld [vmem:[#allocation14 + $0x4e0] ss:$28 sps:$4 sm:$0xff]   ;;  %v7831_v14 = vld [vmem:[#allocation14 + $0x868] ss:$28 sps:$4 sm:$0xff]  }
 0x47f   :  { %7066 = vmatprep.subr.bf16.mxu0 %v7770_v18  ;;  %v7834_v18 = vld [vmem:[#allocation14 + $0x51c] ss:$28 sps:$4 sm:$0xff]  }
 0x481   :  { %5920 = vmatpush1.bf16.msra.mxu1 %v7767_v19  ;;  %v7835_v19 = vld [vmem:[#allocation14 + $0xa60] ss:$28 sps:$4 sm:$0xff]  }
 0x482   :  { %7067 = vmatpush3.bf16.msra.mxu0 %v7771_v49  ;;  %5921 = vmatprep.subr.bf16.mxu1 %v7774_v21  ;;  %v7832_v49 = vld [vmem:[#allocation14 + $0x518] ss:$28 sps:$4 sm:$0xff]   ;;  %v7836_v21 = vld [vmem:[#allocation14 + $0x8a0] ss:$28 sps:$4 sm:$0xff]  }
 0x483   :  { %7068 = vmatprep.subr.bf16.mxu0 %v7775_v22  ;;  %v7839_v22 = vld [vmem:[#allocation14 + $0x554] ss:$28 sps:$4 sm:$0xff]  }
 0x485   :  { %5922 = vmatpush1.bf16.msra.mxu1 %v7772_v23  ;;  %v7840_v23 = vld [vmem:[#allocation14 + $0xc58] ss:$28 sps:$4 sm:$0xff]  }
 0x486   :  { %7069 = vmatpush3.bf16.msra.mxu0 %v7776_v8  ;;  %5923 = vmatprep.subr.bf16.mxu1 %v7779_v9  ;;  %v7837_v8 = vld [vmem:[#allocation14 + $0x550] ss:$28 sps:$4 sm:$0xff]   ;;  %v7841_v9 = vld [vmem:[#allocation14 + $0xa98] ss:$28 sps:$4 sm:$0xff]  }
 0x487   :  { %7070 = vmatprep.subr.bf16.mxu0 %v7780_v55  ;;  %v7844_v55 = vld [vmem:[#allocation14 + $0x58c] ss:$28 sps:$4 sm:$0xff]  }
 0x489   :  { %5924 = vmatpush1.bf16.msra.mxu1 %v7777_v10  ;;  %v7845_v10 = vld [vmem:[#allocation14 + $0xc90] ss:$28 sps:$4 sm:$0xff]  }
 0x48a   :  { %7071 = vmatpush3.bf16.msra.mxu0 %v7781_v16  ;;  %5925 = vmatprep.subr.bf16.mxu1 %v7784_v41  ;;  %v7842_v16 = vld [vmem:[#allocation14 + $0x588] ss:$28 sps:$4 sm:$0xff]   ;;  %v7846_v41 = vld [vmem:[#allocation14 + $0xad0] ss:$28 sps:$4 sm:$0xff]  }
 0x48b   :  { %7072 = vmatprep.subr.bf16.mxu0 %v7785_v60  ;;  %v7849_v60 = vld [vmem:[#allocation14 + $0x5c4] ss:$28 sps:$4 sm:$0xff]  }
 0x48d   :  { %5926 = vmatpush1.bf16.msra.mxu1 %v7782_v28  ;;  %v7850_v28 = vld [vmem:[#allocation14 + $0xcc8] ss:$28 sps:$4 sm:$0xff]  }
 0x48e   :  { %7073 = vmatpush3.bf16.msra.mxu0 %v7786_v29  ;;  %5927 = vmatprep.subr.bf16.mxu1 %v7789_v30  ;;  %v7847_v29 = vld [vmem:[#allocation14 + $0x5c0] ss:$28 sps:$4 sm:$0xff]   ;;  %v7851_v30 = vld [vmem:[#allocation14 + $0xb08] ss:$28 sps:$4 sm:$0xff]  }
 0x48f   :  { %7074 = vmatprep.subr.bf16.mxu0 %v7790_v31  ;;  %v7854_v31 = vld [vmem:[#allocation14 + $0x5fc] ss:$28 sps:$4 sm:$0xff]  }
 0x491   :  { %5928 = vmatpush1.bf16.msra.mxu1 %v7787_v32  ;;  %v7855_v32 = vld [vmem:[#allocation14 + $0xd00] ss:$28 sps:$4 sm:$0xff]  }
 0x492   :  { %7075 = vmatpush3.bf16.msra.mxu0 %v7791_v33  ;;  %5929 = vmatprep.subr.bf16.mxu1 %v7794_v34  ;;  %v7852_v33 = vld [vmem:[#allocation14 + $0x5f8] ss:$28 sps:$4 sm:$0xff]   ;;  %v7856_v34 = vld [vmem:[#allocation14 + $0xb40] ss:$28 sps:$4 sm:$0xff]  }
 0x493   :  { %7076 = vmatprep.subr.bf16.mxu0 %v7795_v36  ;;  %v7859_v36 = vld [vmem:[#allocation14 + $0x634] ss:$28 sps:$4 sm:$0xff]  }
 0x495   :  { %5930 = vmatpush1.bf16.msra.mxu1 %v7792_v37  ;;  %v7860_v37 = vld [vmem:[#allocation14 + $0xd38] ss:$28 sps:$4 sm:$0xff]  }
 0x496   :  { %7077 = vmatpush3.bf16.msra.mxu0 %v7796_v38  ;;  %5940 = vmatprep.subr.bf16.mxu1 %v7799_v39  ;;  %v7857_v38 = vld [vmem:[#allocation14 + $0x630] ss:$28 sps:$4 sm:$0xff]   ;;  %v7861_v39 = vld [vmem:[#allocation14 + $0xb78] ss:$28 sps:$4 sm:$0xff]  }
 0x497   :  { %7084 = vmatprep.subr.bf16.mxu0 %v7800_v42  ;;  %v7864_v42 = vld [vmem:[#allocation14 + $0x66c] ss:$28 sps:$4 sm:$0xff]  }
 0x498   :  { %5932 = vmatmul.mubr.bf16.vlgmr.msra.gmra.mrb[12].mxu1 %v8484_v15  ;;  %v7811_v15 = vld [vmem:[#allocation14 + $0x788] ss:$28 sps:$4 sm:$0xff]  }
 0x499   :  { %6136 = vmatmul.mubr.bf16.vlgmr.msra.gmra.mrb[28].mxu0 %v8497_v27  ;;  %5941 = vmatpush1.bf16.msra.mxu1 %v7797_v11  ;;  %v7865_v11 = vld [vmem:[#allocation14 + $0xd70] ss:$28 sps:$4 sm:$0xff]  }
 0x49a   :  { %5972 = vmatprep.mubr.bf16.mxu1 %v8488_v20  ;;  %7085 = vmatpush3.bf16.msra.mxu0 %v7801_v44  ;;  %v7816_v20 = vld [vmem:[#allocation14 + $0x7c0] ss:$28 sps:$4 sm:$0xff]   ;;  %v7862_v44 = vld [vmem:[#allocation14 + $0x668] ss:$28 sps:$4 sm:$0xff]  }
 0x49b   :  { %6175 = vmatprep.mubr.bf16.mxu0 %v8513_v62  ;;  %5942 = vmatprep.subr.bf16.mxu1 %v7804_v45  ;;  %v7866_v45 = vld [vmem:[#allocation14 + $0xbb0] ss:$28 sps:$4 sm:$0xff]  }
 0x49c   :  { %7086 = vmatprep.subr.bf16.mxu0 %v7805_v46  ;;  %v7869_v46 = vld [vmem:[#allocation14 + $0x6a4] ss:$28 sps:$4 sm:$0xff]  }
 0x49d   :  { %5943 = vmatpush1.bf16.msra.mxu1 %v7802_v47  ;;  %v7870_v47 = vld [vmem:[#allocation14 + $0xda8] ss:$28 sps:$4 sm:$0xff]  }
 0x49e   :  { %7087 = vmatpush3.bf16.msra.mxu0 %v7806_v48  ;;  %5944 = vmatprep.subr.bf16.mxu1 %v7809_v51  ;;  %v7867_v48 = vld [vmem:[#allocation14 + $0x6a0] ss:$28 sps:$4 sm:$0xff]   ;;  %v7871_v51 = vld [vmem:[#allocation14 + $0xbe8] ss:$28 sps:$4 sm:$0xff]  }
 0x49f   :  { %7088 = vmatprep.subr.bf16.mxu0 %v7810_v0  ;;  %v7874_v0 = vld [vmem:[#allocation14 + $0x6dc] ss:$28 sps:$4 sm:$0xff]  }
 0x4a1   :  { %5945 = vmatpush1.bf16.msra.mxu1 %v7807_v52  ;;  %v7875_v52 = vld [vmem:[#allocation14 + $0xde0] ss:$28 sps:$4 sm:$0xff]  }
 0x4a2   :  { %7089 = vmatpush3.bf16.msra.mxu0 %v7811_v15  ;;  %5946 = vmatprep.subr.bf16.mxu1 %v7814_v54  ;;  %v7872_v15 = vld [vmem:[#allocation14 + $0x6d8] ss:$28 sps:$4 sm:$0xff]   ;;  %v7876_v54 = vld [vmem:[#allocation14 + $0xc20] ss:$28 sps:$4 sm:$0xff]  }
 0x4a3   :  { %7090 = vmatprep.subr.bf16.mxu0 %v7815_v56  ;;  %v7879_v56 = vld [vmem:[#allocation14 + $0x714] ss:$28 sps:$4 sm:$0xff]  }
 0x4a5   :  { %5947 = vmatpush1.bf16.msra.mxu1 %v7812_v57  ;;  %v7877_v57 = vld [vmem:[#allocation14 + $0x710] ss:$28 sps:$4 sm:$0xff]  }
 0x4a6   :  { %7091 = vmatpush3.bf16.msra.mxu0 %v7816_v20  ;;  %5948 = vmatprep.subr.bf16.mxu1 %v7819_v58  ;;  %v7882_v20 = vld [vmem:[#allocation14 + $0x74c] ss:$28 sps:$4 sm:$0xff]  }
 0x4a7   :  { %7092 = vmatprep.subr.bf16.mxu0 %v7820_v59  ;;  %v7880_v58 = vld [vmem:[#allocation14 + $0x748] ss:$28 sps:$4 sm:$0xff]  }
 0x4a8   :  { %v7885_v59 = vld [vmem:[#allocation14 + $0x784] ss:$28 sps:$4 sm:$0xff]  }
 0x4a9   :  { %5949 = vmatpush1.bf16.msra.mxu1 %v7817_v61  ;;  %v7883_v61 = vld [vmem:[#allocation14 + $0x780] ss:$28 sps:$4 sm:$0xff]  }
 0x4aa   :  { %7093 = vmatpush3.bf16.msra.mxu0 %v7821_v25  ;;  %5950 = vmatprep.subr.bf16.mxu1 %v7824_v1  ;;  %v7888_v25 = vld [vmem:[#allocation14 + $0x7bc] ss:$28 sps:$4 sm:$0xff]  }
 0x4ab   :  { %7094 = vmatprep.subr.bf16.mxu0 %v7825_v3  ;;  %v7886_v1 = vld [vmem:[#allocation14 + $0x7b8] ss:$28 sps:$4 sm:$0xff]  }
 0x4ac   :  { %v7891_v3 = vld [vmem:[#allocation14 + $0x7f4] ss:$28 sps:$4 sm:$0xff]  }
 0x4ad   :  { %5951 = vmatpush1.bf16.msra.mxu1 %v7822_v5  ;;  %v7889_v5 = vld [vmem:[#allocation14 + $0x7f0] ss:$28 sps:$4 sm:$0xff]  }
 0x4ae   :  { %7095 = vmatpush3.bf16.msra.mxu0 %v7826_v6  ;;  %5952 = vmatprep.subr.bf16.mxu1 %v7829_v17  ;;  %v7892_v6 = vld [vmem:[#allocation14 + $0x828] ss:$28 sps:$4 sm:$0xff]  }
 0x4af   :  { %7096 = vmatprep.subr.bf16.mxu0 %v7830_v7  ;;  %v7897_v17 = vld [vmem:[#allocation14 + $0x864] ss:$28 sps:$4 sm:$0xff]   ;;  %v7900_v7 = vld [vmem:[#allocation14 + $0x89c] ss:$28 sps:$4 sm:$0xff]  }
 0x4b1   :  { %5953 = vmatpush1.bf16.msra.mxu1 %v7827_v12  ;;  %v7898_v12 = vld [vmem:[#allocation14 + $0x898] ss:$28 sps:$4 sm:$0xff]  }
 0x4b2   :  { %7097 = vmatpush3.bf16.msra.mxu0 %v7831_v14  ;;  %5954 = vmatprep.subr.bf16.mxu1 %v7834_v18  ;;  %v7903_v14 = vld [vmem:[#allocation14 + $0x8d4] ss:$28 sps:$4 sm:$0xff]  }
 0x4b3   :  { %7098 = vmatprep.subr.bf16.mxu0 %v7835_v19  ;;  %v7901_v18 = vld [vmem:[#allocation14 + $0x8d0] ss:$28 sps:$4 sm:$0xff]  }
 0x4b4   :  { %v7906_v19 = vld [vmem:[#allocation14 + $0x90c] ss:$28 sps:$4 sm:$0xff]  }
 0x4b5   :  { %5955 = vmatpush1.bf16.msra.mxu1 %v7832_v49  ;;  %v7904_v49 = vld [vmem:[#allocation14 + $0x908] ss:$28 sps:$4 sm:$0xff]  }
 0x4b6   :  { %7099 = vmatpush3.bf16.msra.mxu0 %v7836_v21  ;;  %5956 = vmatprep.subr.bf16.mxu1 %v7839_v22  ;;  %v7909_v21 = vld [vmem:[#allocation14 + $0x944] ss:$28 sps:$4 sm:$0xff]  }
 0x4b7   :  { %7106 = vmatprep.subr.bf16.mxu0 %v7840_v23  ;;  %v7907_v22 = vld [vmem:[#allocation14 + $0x940] ss:$28 sps:$4 sm:$0xff]  }
 0x4b8   :  { %v7912_v23 = vld [vmem:[#allocation14 + $0x97c] ss:$28 sps:$4 sm:$0xff]  }
 0x4b9   :  { %6176 = vmatmul.mubr.bf16.vlgmr.msra.gmra.mrb[32].mxu0 %v8515_v63  ;;  %5957 = vmatpush1.bf16.msra.mxu1 %v7837_v8  ;;  %v7910_v8 = vld [vmem:[#allocation14 + $0x978] ss:$28 sps:$4 sm:$0xff]  }
 0x4ba   :  { %7107 = vmatpush3.bf16.msra.mxu0 %v7841_v9  ;;  %6215 = vmatprep.mubr.bf16.mxu0 %v8519_v4  ;;  %v7915_v9 = vld [vmem:[#allocation14 + $0x9b4] ss:$28 sps:$4 sm:$0xff]  }
 0x4bb   :  { %5958 = vmatprep.subr.bf16.mxu1 %v7844_v55  ;;  %7108 = vmatprep.subr.bf16.mxu0 %v7845_v10  ;;  %v7913_v55 = vld [vmem:[#allocation14 + $0x9b0] ss:$28 sps:$4 sm:$0xff]  }
 0x4bc   :  { %v7918_v10 = vld [vmem:[#allocation14 + $0x9ec] ss:$28 sps:$4 sm:$0xff]  }
 0x4bd   :  { %5959 = vmatpush1.bf16.msra.mxu1 %v7842_v16  ;;  %v7916_v16 = vld [vmem:[#allocation14 + $0x9e8] ss:$28 sps:$4 sm:$0xff]  }
 0x4be   :  { %7109 = vmatpush3.bf16.msra.mxu0 %v7846_v41  ;;  %5960 = vmatprep.subr.bf16.mxu1 %v7849_v60  ;;  %v7921_v41 = vld [vmem:[#allocation14 + $0xa24] ss:$28 sps:$4 sm:$0xff]  }
 0x4bf   :  { %7110 = vmatprep.subr.bf16.mxu0 %v7850_v28  ;;  %v7919_v60 = vld [vmem:[#allocation14 + $0xa20] ss:$28 sps:$4 sm:$0xff]  }
 0x4c0   :  { %v7924_v28 = vld [vmem:[#allocation14 + $0xa5c] ss:$28 sps:$4 sm:$0xff]  }
 0x4c1   :  { %5961 = vmatpush1.bf16.msra.mxu1 %v7847_v29  ;;  %v7922_v29 = vld [vmem:[#allocation14 + $0xa58] ss:$28 sps:$4 sm:$0xff]  }
 0x4c2   :  { %7111 = vmatpush3.bf16.msra.mxu0 %v7851_v30  ;;  %5962 = vmatprep.subr.bf16.mxu1 %v7854_v31  ;;  %v7927_v30 = vld [vmem:[#allocation14 + $0xa94] ss:$28 sps:$4 sm:$0xff]  }
 0x4c3   :  { %7112 = vmatprep.subr.bf16.mxu0 %v7855_v32  ;;  %v7925_v31 = vld [vmem:[#allocation14 + $0xa90] ss:$28 sps:$4 sm:$0xff]  }
 0x4c4   :  { %v7930_v32 = vld [vmem:[#allocation14 + $0xacc] ss:$28 sps:$4 sm:$0xff]  }
 0x4c5   :  { %5963 = vmatpush1.bf16.msra.mxu1 %v7852_v33  ;;  %v7928_v33 = vld [vmem:[#allocation14 + $0xac8] ss:$28 sps:$4 sm:$0xff]  }
 0x4c6   :  { %7113 = vmatpush3.bf16.msra.mxu0 %v7856_v34  ;;  %5964 = vmatprep.subr.bf16.mxu1 %v7859_v36  ;;  %v7933_v34 = vld [vmem:[#allocation14 + $0xb04] ss:$28 sps:$4 sm:$0xff]  }
 0x4c7   :  { %7114 = vmatprep.subr.bf16.mxu0 %v7860_v37  ;;  %v7931_v36 = vld [vmem:[#allocation14 + $0xb00] ss:$28 sps:$4 sm:$0xff]  }
 0x4c8   :  { %v7936_v37 = vld [vmem:[#allocation14 + $0xb3c] ss:$28 sps:$4 sm:$0xff]  }
 0x4c9   :  { %5965 = vmatpush1.bf16.msra.mxu1 %v7857_v38  ;;  %v7934_v38 = vld [vmem:[#allocation14 + $0xb38] ss:$28 sps:$4 sm:$0xff]  }
 0x4ca   :  { %7115 = vmatpush3.bf16.msra.mxu0 %v7861_v39  ;;  %5966 = vmatprep.subr.bf16.mxu1 %v7864_v42  ;;  %v7939_v39 = vld [vmem:[#allocation14 + $0xb74] ss:$28 sps:$4 sm:$0xff]  }
 0x4cb   :  { %7116 = vmatprep.subr.bf16.mxu0 %v7865_v11  ;;  %v7937_v42 = vld [vmem:[#allocation14 + $0xb70] ss:$28 sps:$4 sm:$0xff]   ;;  %v8549_v11 = vld [vmem:[#allocation16] sm:$0xff] }
 0x4cd   :  { %5967 = vmatpush1.bf16.msra.mxu1 %v7862_v44  ;;  %v3243_v44 = vrot.slane %v8549_v11, %v8447_v50 }
 0x4ce   :  { %7117 = vmatpush3.bf16.msra.mxu0 %v7866_v45  ;;  %5968 = vmatprep.subr.bf16.mxu1 %v7869_v46  ;;  %v3239_v45 = vrot.slane %v8549_v11, %v8402_v43  ;;  %v3247_v46 = vrot.slane %v8549_v11, %v8450_v53  ;;  %v7948_v53 = vld [vmem:[#allocation14 + $0xc1c] ss:$28 sps:$4 sm:$0xff]  }
 0x4cf   :  { %7118 = vmatprep.subr.bf16.mxu0 %v7870_v47  ;;  %v7940_v47 = vld [vmem:[#allocation14 + $0xba8] ss:$28 sps:$4 sm:$0xff]  }
 0x4d1   :  { %5969 = vmatpush1.bf16.msra.mxu1 %v7867_v48  ;;  %v7945_v48 = vld [vmem:[#allocation14 + $0xbe4] ss:$28 sps:$4 sm:$0xff]  }
 0x4d2   :  { %7119 = vmatpush3.bf16.msra.mxu0 %v7871_v51  ;;  %5970 = vmatprep.subr.bf16.mxu1 %v7874_v0 }
 0x4d3   :  { %7120 = vmatprep.subr.bf16.mxu0 %v7875_v52 }
 0x4d5   :  { %5971 = vmatpush1.bf16.msra.mxu1 %v7872_v15 }
 0x4d6   :  { %7121 = vmatpush3.bf16.msra.mxu0 %v7876_v54  ;;  %5981 = vmatprep.subr.bf16.mxu1 %v7879_v56 }
 0x4d8   :  { %5973 = vmatmul.mubr.bf16.vlgmr.msra.gmra.mrb[12].mxu1 %v8497_v27  ;;  %v7894_v27 = vld [vmem:[#allocation14 + $0x82c] ss:$28 sps:$4 sm:$0xff]  }
 0x4d9   :  { %6216 = vmatmul.mubr.bf16.vlgmr.msra.gmra.mrb[36].mxu0 %v8530_v24  ;;  %5982 = vmatpush1.bf16.msra.mxu1 %v7877_v57 }
 0x4da   :  { %6013 = vmatprep.mubr.bf16.mxu1 %v8513_v62  ;;  %5983 = vmatprep.subr.bf16.mxu1 %v7882_v20  ;;  %v7895_v62 = vld [vmem:[#allocation14 + $0x860] ss:$28 sps:$4 sm:$0xff]  }
 0x4dd   :  { %5984 = vmatpush1.bf16.msra.mxu1 %v7880_v58  ;;  %v7943_v58 = vld [vmem:[#allocation14 + $0xbe0] ss:$28 sps:$4 sm:$0xff]  }
 0x4de   :  { %5985 = vmatprep.subr.bf16.mxu1 %v7885_v59 }
 0x4e1   :  { %5986 = vmatpush1.bf16.msra.mxu1 %v7883_v61  ;;  %v7946_v61 = vld [vmem:[#allocation14 + $0xc18] ss:$28 sps:$4 sm:$0xff]  }
 0x4e2   :  { %5987 = vmatprep.subr.bf16.mxu1 %v7888_v25  ;;  %v7951_v25 = vld [vmem:[#allocation14 + $0xc54] ss:$28 sps:$4 sm:$0xff]  }
 0x4e5   :  { %5988 = vmatpush1.bf16.msra.mxu1 %v7886_v1  ;;  %v7949_v1 = vld [vmem:[#allocation14 + $0xc50] ss:$28 sps:$4 sm:$0xff]  }
 0x4e6   :  { %5989 = vmatprep.subr.bf16.mxu1 %v7891_v3  ;;  %v7954_v3 = vld [vmem:[#allocation14 + $0xc8c] ss:$28 sps:$4 sm:$0xff]  }
 0x4e9   :  { %5990 = vmatpush1.bf16.msra.mxu1 %v7889_v5 }
 0x4ea   :  { %5991 = vmatprep.subr.bf16.mxu1 %v7894_v27 }
 0x4ed   :  { %5992 = vmatpush1.bf16.msra.mxu1 %v7892_v6  ;;  %v7952_v6 = vld [vmem:[#allocation14 + $0xc88] ss:$28 sps:$4 sm:$0xff]  }
 0x4ee   :  { %5993 = vmatprep.subr.bf16.mxu1 %v7897_v17 }
 0x4f1   :  { %5994 = vmatpush1.bf16.msra.mxu1 %v7895_v62  ;;  %v7957_v62 = vld [vmem:[#allocation14 + $0xcc4] ss:$28 sps:$4 sm:$0xff]  }
 0x4f2   :  { %5995 = vmatprep.subr.bf16.mxu1 %v7900_v7 }
 0x4f5   :  { %5996 = vmatpush1.bf16.msra.mxu1 %v7898_v12  ;;  %v7955_v12 = vld [vmem:[#allocation14 + $0xcc0] ss:$28 sps:$4 sm:$0xff]  }
 0x4f6   :  { %5997 = vmatprep.subr.bf16.mxu1 %v7903_v14  ;;  %v7960_v14 = vld [vmem:[#allocation14 + $0xcfc] ss:$28 sps:$4 sm:$0xff]  }
 0x4f9   :  { %5998 = vmatpush1.bf16.msra.mxu1 %v7901_v18  ;;  %v7958_v18 = vld [vmem:[#allocation14 + $0xcf8] ss:$28 sps:$4 sm:$0xff]  }
 0x4fa   :  { %5999 = vmatprep.subr.bf16.mxu1 %v7906_v19  ;;  %v7963_v19 = vld [vmem:[#allocation14 + $0xd34] ss:$28 sps:$4 sm:$0xff]  }
 0x4fd   :  { %6000 = vmatpush1.bf16.msra.mxu1 %v7904_v49  ;;  %v7961_v49 = vld [vmem:[#allocation14 + $0xd30] ss:$28 sps:$4 sm:$0xff]  }
 0x4fe   :  { %6001 = vmatprep.subr.bf16.mxu1 %v7909_v21  ;;  %v7966_v21 = vld [vmem:[#allocation14 + $0xd6c] ss:$28 sps:$4 sm:$0xff]  }
 0x501   :  { %6002 = vmatpush1.bf16.msra.mxu1 %v7907_v22  ;;  %v7964_v22 = vld [vmem:[#allocation14 + $0xd68] ss:$28 sps:$4 sm:$0xff]  }
 0x502   :  { %6003 = vmatprep.subr.bf16.mxu1 %v7912_v23  ;;  %v7969_v23 = vld [vmem:[#allocation14 + $0xda4] ss:$28 sps:$4 sm:$0xff]  }
 0x505   :  { %6004 = vmatpush1.bf16.msra.mxu1 %v7910_v8 }
 0x506   :  { %6005 = vmatprep.subr.bf16.mxu1 %v7915_v9 }
 0x509   :  { %6006 = vmatpush1.bf16.msra.mxu1 %v7913_v55  ;;  %v7967_v55 = vld [vmem:[#allocation14 + $0xda0] ss:$28 sps:$4 sm:$0xff]  }
 0x50a   :  { %6007 = vmatprep.subr.bf16.mxu1 %v7918_v10 }
 0x50d   :  { %6008 = vmatpush1.bf16.msra.mxu1 %v7916_v16 }
 0x50e   :  { %6009 = vmatprep.subr.bf16.mxu1 %v7921_v41  ;;  %v7972_v41 = vld [vmem:[#allocation14 + $0xddc] ss:$28 sps:$4 sm:$0xff]  }
 0x511   :  { %6010 = vmatpush1.bf16.msra.mxu1 %v7919_v60 }
 0x512   :  { %6011 = vmatprep.subr.bf16.mxu1 %v7924_v28  ;;  %v7970_v28 = vld [vmem:[#allocation14 + $0xdd8] ss:$28 sps:$4 sm:$0xff]  }
 0x515   :  { %6012 = vmatpush1.bf16.msra.mxu1 %v7922_v29  ;;  %v3259_v29 = vrot.slane %v8549_v11, %v1080_v2 }
 0x516   :  { %6022 = vmatprep.subr.bf16.mxu1 %v7927_v30 }
 0x518   :  { %6014 = vmatmul.mubr.bf16.vlgmr.msra.gmra.mrb[12].mxu1 %v8515_v63  ;;  %v7942_v63 = vld [vmem:[#allocation14 + $0xbac] ss:$28 sps:$4 sm:$0xff]  }
 0x519   :  { %6023 = vmatpush1.bf16.msra.mxu1 %v7925_v31  ;;  %6054 = vmatprep.mubr.bf16.mxu1 %v8519_v4  ;;  %v3235_v4 = vrot.slane %v8549_v11, %v8399_v40 }
 0x51a   :  { %6024 = vmatprep.subr.bf16.mxu1 %v7930_v32 }
 0x51d   :  { %6025 = vmatpush1.bf16.msra.mxu1 %v7928_v33 }
 0x51e   :  { %6026 = vmatprep.subr.bf16.mxu1 %v7933_v34 }
 0x521   :  { %6027 = vmatpush1.bf16.msra.mxu1 %v7931_v36 }
 0x522   :  { %6028 = vmatprep.subr.bf16.mxu1 %v7936_v37 }
 0x525   :  { %6029 = vmatpush1.bf16.msra.mxu1 %v7934_v38 }
 0x526   :  { %6030 = vmatprep.subr.bf16.mxu1 %v7939_v39 }
 0x529   :  { %6031 = vmatpush1.bf16.msra.mxu1 %v7937_v42 }
 0x52a   :  { %6032 = vmatprep.subr.bf16.mxu1 %v7942_v63 }
 0x52b   :  { %v5728_v51 = vpop.f32.mrb[8].mxu1  ;;  %v5892_v0 = vpop.f32.mrb[20].mxu0 }
 0x52c   :  { %v7136_v52 = vadd.f32 %v5728_v51, %v3235_v4  ;;  %v7138_v15 = vadd.f32 %v5892_v0, %v3243_v44  ;;  %v5730_v54 = vpop.f32.mrb[9].mxu1  ;;  %v5894_v56 = vpop.f32.mrb[21].mxu0  ;;  %v3251_v0 = vrot.slane %v8549_v11, %v1072_v13 }
 0x52d   :  { %v7137_v40 = vadd.f32 %v5730_v54, %v3239_v45  ;;  %v7139_v57 = vadd.f32 %v5894_v56, %v3247_v46  ;;  %v5732_v20 = vpop.f32.mrb[10].mxu1  ;;  %v5896_v50 = vpop.f32.mrb[22].mxu0  ;;  %6033 = vmatpush1.bf16.msra.mxu1 %v7940_v47 }
 0x52e   :  { %7973 = vtanh.f32 %v7136_v52  ;;  %v5733_v43 = vpop.f32.mrb[11].mxu1  ;;  %v5897_v59 = vpop.f32.mrb[23].mxu0  ;;  %6034 = vmatprep.subr.bf16.mxu1 %v7945_v48  ;;  %v3255_v52 = vrot.slane %v8549_v11, %v1076_v26 }
 0x52f   :  { %7975 = vtanh.f32 %v7138_v15 }
 0x530   :  { %7977 = vtanh.f32 %v7137_v40 }
 0x531   :  { %7979 = vtanh.f32 %v7139_v57  ;;  %6035 = vmatpush1.bf16.msra.mxu1 %v7943_v58 }
 0x532   :  { %6036 = vmatprep.subr.bf16.mxu1 %v7948_v53 }
 0x535   :  { %6037 = vmatpush1.bf16.msra.mxu1 %v7946_v61 }
 0x536   :  { %6038 = vmatprep.subr.bf16.mxu1 %v7951_v25 }
 0x538   :  { %v7974_v5 = vpop.eup %7973 }
 0x539   :  { %v7976_v27 = vpop.eup %7975  ;;  %6230 = vst [vmem:[#allocation17] sm:$0xff] %v7974_v5  ;;  %6039 = vmatpush1.bf16.msra.mxu1 %v7949_v1 }
 0x53a   :  { %v7978_v17 = vpop.eup %7977  ;;  %6232 = vst [vmem:[#allocation17 + $0x10] sm:$0xff] %v7976_v27  ;;  %6040 = vmatprep.subr.bf16.mxu1 %v7954_v3 }
 0x53b   :  { %v7980_v7 = vpop.eup %7979  ;;  %6231 = vst [vmem:[#allocation17 + $0x8] sm:$0xff] %v7978_v17 }
 0x53c   :  { %6233 = vst [vmem:[#allocation17 + $0x18] sm:$0xff] %v7980_v7 }
 0x53d   :  { %6041 = vmatpush1.bf16.msra.mxu1 %v7952_v6 }
 0x53e   :  { %6042 = vmatprep.subr.bf16.mxu1 %v7957_v62 }
 0x541   :  { %6043 = vmatpush1.bf16.msra.mxu1 %v7955_v12 }
 0x542   :  { %6044 = vmatprep.subr.bf16.mxu1 %v7960_v14 }
 0x545   :  { %6045 = vmatpush1.bf16.msra.mxu1 %v7958_v18 }
 0x546   :  { %6046 = vmatprep.subr.bf16.mxu1 %v7963_v19 }
 0x549   :  { %6047 = vmatpush1.bf16.msra.mxu1 %v7961_v49 }
 0x54a   :  { %6048 = vmatprep.subr.bf16.mxu1 %v7966_v21 }
 0x54c   :  { %v7056_v8 = vpop.f32.mrb[24].mxu0 }
 0x54d   :  { %v7057_v9 = vpop.f32.mrb[25].mxu0  ;;  %6049 = vmatpush1.bf16.msra.mxu1 %v7964_v22 }
 0x54e   :  { %v7058_v10 = vadd.f32 %v7057_v9, %v7056_v8  ;;  %v7059_v16 = vpop.f32.mrb[26].mxu0  ;;  %6050 = vmatprep.subr.bf16.mxu1 %v7969_v23 }
 0x54f   :  { %v7060_v60 = vpop.f32.mrb[27].mxu0 }
 0x550   :  { %v6098_v32 = vadd.f32 %v7058_v10, %v3259_v29 }
 0x551   :  { %6051 = vmatpush1.bf16.msra.mxu1 %v7967_v55 }
 0x552   :  { %6052 = vmatprep.subr.bf16.mxu1 %v7972_v41 }
 0x555   :  { %6053 = vmatpush1.bf16.msra.mxu1 %v7970_v28 }
 0x558   :  { %6055 = vmatmul.mubr.bf16.vlgmr.msra.gmra.mrb[12].mxu1 %v8530_v24 }
 0x56c   :  { %v7078_v30 = vpop.f32.mrb[28].mxu0 }
 0x56d   :  { %v7079_v31 = vpop.f32.mrb[29].mxu0 }
 0x56e   :  { %v7080_v33 = vadd.f32 %v7079_v31, %v7078_v30  ;;  %v7081_v34 = vpop.f32.mrb[30].mxu0 }
 0x56f   :  { %v7082_v36 = vpop.f32.mrb[31].mxu0 }
 0x570   :  { %v6138_v37 = vadd.f32 %v7080_v33, %v6098_v32 }
 0x58c   :  { %v7100_v38 = vpop.f32.mrb[32].mxu0 }
 0x58d   :  { %v7101_v39 = vpop.f32.mrb[33].mxu0 }
 0x58e   :  { %v7102_v42 = vadd.f32 %v7101_v39, %v7100_v38  ;;  %v7103_v63 = vpop.f32.mrb[34].mxu0 }
 0x58f   :  { %v7104_v4 = vpop.f32.mrb[35].mxu0 }
 0x590   :  { %v6178_v44 = vadd.f32 %v7102_v42, %v6138_v37 }
 0x5ac   :  { %v7122_v45 = vpop.f32.mrb[36].mxu0 }
 0x5ad   :  { %v7123_v46 = vpop.f32.mrb[37].mxu0 }
 0x5ae   :  { %v7124_v24 = vadd.f32 %v7123_v46, %v7122_v45  ;;  %v7125_v47 = vpop.f32.mrb[38].mxu0 }
 0x5af   :  { %v7126_v48 = vpop.f32.mrb[39].mxu0 }
 0x5b0   :  { %v6218_v51 = vadd.f32 %v7124_v24, %v6178_v44 }
 0x5b2   :  { %7981 = vtanh.f32 %v6218_v51 }
 0x5bc   :  { %v7982_v2 = vpop.eup %7981 }
 0x5bd   :  { %6236 = vst [vmem:[#allocation17 + $0x30] sm:$0xff] %v7982_v2 }
 0x62b   :  { %v6056_v15 = vpop.f32.mrb[12].mxu1 }
 0x62c   :  { %v7140_v54 = vadd.f32 %v6056_v15, %v3251_v0  ;;  %v6058_v56 = vpop.f32.mrb[13].mxu1 }
 0x62d   :  { %v7141_v40 = vadd.f32 %v6058_v56, %v3255_v52  ;;  %v6060_v57 = vpop.f32.mrb[14].mxu1 }
 0x62e   :  { %7983 = vtanh.f32 %v7140_v54  ;;  %v6061_v20 = vpop.f32.mrb[15].mxu1 }
 0x62f   :  { %7985 = vtanh.f32 %v7141_v40 }
 0x638   :  { %v7984_v50 = vpop.eup %7983 }
 0x639   :  { %v7986_v58 = vpop.eup %7985  ;;  %6234 = vst [vmem:[#allocation17 + $0x20] sm:$0xff] %v7984_v50 }
 0x63a   :  { %6235 = vst [vmem:[#allocation17 + $0x28] sm:$0xff] %v7986_v58 }
 0x63b   :  { %8196 = shalt.err (!%p8193_p6)
}
 0x63c   :  { %s8197_s22 = scalar_lea.hbm %s8590_s9, 896 }
 0x63d   :  { %p8198_p7 = scmp.ne.s32.totalorder %s8590_s9, %s8197_s22  ;;  %p8201_p8 = scmp.lt.u32.totalorder %s8197_s22, %s8590_s9 }
 0x63f   :  { %p8203_p9 = pnand %p8201_p8, %p8198_p7 }
 0x641   :  { %8206 = shalt.err (!%p8203_p9)
}
 0x642   :  { %6246 = dma.vmem_to_hbm [thread:$0]  %s6244_s24, 896, %s8590_s9, [#allocation4]  }
 0x643   :  { %8217 = dma.done.wait [#allocation4], 896  }
 0x644   :  { %8218 = vsyncadd [#allocation4], 4294966400 }
 0x645   :  { %6250 = vsyncpa [#allocation3], 1 }
 0x646   :  { %6251 = vsyncpa [#allocation6], 1 }
 0x647   :  { %6252 = vsyncpa [#allocation9], 1 }
 0x648   :  { %6253 = vsyncpa [#allocation12], 1 }
 0x649   :  { %6254 = vsyncpa [#allocation15], 1 }
 0x64a   :  { %6255 = vsyncpa [#allocation4], 1 }

// kernel: tpu_custom_call.1
= control target key start
LH: loop header
LB: loop body
LE: loop exit
PB: predicated region body
PF: predicated region fallthrough
CT: control target
= control target key end

     0   :  { %14 = vsyncpa [#allocation3], 0  ;;  %s8581_s0 = inlined_call_operand.hbm [shape: bf16[8,128], index: 0, kind: input, shape index: {}]   ;;  %s8582_s1 = inlined_call_operand.hbm [shape: bf16[128,256], index: 1, kind: input, shape index: {}]   ;;  %s8583_s2 = inlined_call_operand.hbm [shape: f32[1,256], index: 2, kind: input, shape index: {}]   ;;  %s8584_s3 = inlined_call_operand.hbm [shape: bf16[256,512], index: 3, kind: input, shape index: {}]   ;;  %s8585_s4 = inlined_call_operand.hbm [shape: f32[1,512], index: 4, kind: input, shape index: {}]   ;;  %s8586_s5 = inlined_call_operand.hbm [shape: bf16[512,1024], index: 5, kind: input, shape index: {}]   ;;  %s8587_s6 = inlined_call_operand.hbm [shape: f32[1,1024], index: 6, kind: input, shape index: {}]   ;;  %s8588_s7 = inlined_call_operand.hbm [shape: bf16[1024,896], index: 7, kind: input, shape index: {}]   ;;  %s8589_s8 = inlined_call_operand.hbm [shape: f32[1,896], index: 8, kind: input, shape index: {}]   ;;  %s8590_s9 = inlined_call_operand.hbm [shape: f32[8,896], index: 9, kind: output, shape index: {}]  }
   0x1   :  { %15 = vsyncpa [#allocation6], 0 }
   0x2   :  { %16 = vsyncpa [#allocation9], 0 }
   0x3   :  { %17 = vsyncpa [#allocation12], 0 }
   0x4   :  { %18 = vsyncpa [#allocation15], 0 }
   0x5   :  { %19 = vsyncpa [#allocation4], 0  ;;  %s8219_s30 = smov [#allocation5]   ;;  %s7987_s13 = scalar_lea.hbm %s8582_s1, 2048 }
   0x6   :  { %s35_s10 = sshll.u32 %s8219_s30, 4  ;;  %p7988_p0 = scmp.ne.s32.totalorder %s8582_s1, %s7987_s13  ;;  %s36_s10 = int_to_ptr.vmem [resolvable:$true] %s35_s10 }
   0x7   :  { %p7991_p1 = scmp.lt.u32.totalorder %s7987_s13, %s8582_s1 }
   0x9   :  { %p7993_p2 = pnand %p7991_p1, %p7988_p0 }
   0xb   :  { %7996 = shalt.err (!%p7993_p2)
}
   0xc   :  { %s7997_s18 = scalar_lea.vmem %s36_s10, 2048  ;;  %p8002_p4 = scmp.lt.s32.totalorder %s36_s10, %s36_s10 }
   0xd   :  { %p7998_p3 = scmp.ne.s32.totalorder %s36_s10, %s7997_s18  ;;  %p8003_p5 = scmp.lt.s32.totalorder %s7997_s18, %s7997_s18 }
   0xf   :  { %p8004_p6 = por %p8003_p5, %p8002_p4 }
  0x11   :  { %p8005_p7 = pnand %p8004_p6, %p7998_p3 }
  0x13   :  { %8008 = shalt.err (!%p8005_p7)
}
  0x14   :  { %s8220_s19 = smov 128   ;;  %s8221_s20 = smov 8  }
  0x15   :  { %41 = dma.hbm_to_vmem [thread:$0]  %s8582_s1, 2048, %s36_s10, [#allocation6], %s8220_s19, %s8220_s19, %s8221_s20  }
  0x16   :  { %s8222_s23 = smov [#allocation8]   ;;  %s8009_s27 = scalar_lea.hbm %s8584_s3, 8192 }
  0x17   :  { %s57_s24 = sshll.u32 %s8222_s23, 4  ;;  %p8010_p8 = scmp.ne.s32.totalorder %s8584_s3, %s8009_s27  ;;  %s58_s24 = int_to_ptr.vmem [resolvable:$true] %s57_s24 }
  0x18   :  { %p8013_p9 = scmp.lt.u32.totalorder %s8009_s27, %s8584_s3 }
  0x1a   :  { %p8015_p10 = pnand %p8013_p9, %p8010_p8 }
  0x1c   :  { %8018 = shalt.err (!%p8015_p10)
}
  0x1d   :  { %s8019_s12 = scalar_lea.vmem %s58_s24, 8192  ;;  %p8024_p12 = scmp.lt.s32.totalorder %s58_s24, %s58_s24 }
  0x1e   :  { %p8020_p11 = scmp.ne.s32.totalorder %s58_s24, %s8019_s12  ;;  %p8025_p13 = scmp.lt.s32.totalorder %s8019_s12, %s8019_s12 }
  0x20   :  { %p8026_p0 = por %p8025_p13, %p8024_p12 }
  0x22   :  { %p8027_p1 = pnand %p8026_p0, %p8020_p11 }
  0x24   :  { %8030 = shalt.err (!%p8027_p1)
}
  0x25   :  { %s8223_s1 = smov 256   ;;  %s8224_s10 = smov 16  }
  0x26   :  { %63 = dma.hbm_to_vmem [thread:$0]  %s8584_s3, 8192, %s58_s24, [#allocation9], %s8223_s1, %s8223_s1, %s8224_s10  }
  0x27   :  { %s8225_s15 = smov [#allocation11]   ;;  %s8031_s19 = scalar_lea.hbm %s8586_s5, 32768 }
  0x28   :  { %s79_s16 = sshll.u32 %s8225_s15, 4  ;;  %p8032_p2 = scmp.ne.s32.totalorder %s8586_s5, %s8031_s19  ;;  %s80_s16 = int_to_ptr.vmem [resolvable:$true] %s79_s16 }
  0x29   :  { %p8035_p3 = scmp.lt.u32.totalorder %s8031_s19, %s8586_s5 }
  0x2b   :  { %p8037_p4 = pnand %p8035_p3, %p8032_p2 }
  0x2d   :  { %8040 = shalt.err (!%p8037_p4)
}
  0x2e   :  { %s8041_s25 = scalar_lea.vmem %s80_s16, 32768  ;;  %p8046_p6 = scmp.lt.s32.totalorder %s80_s16, %s80_s16 }
  0x2f   :  { %p8042_p5 = scmp.ne.s32.totalorder %s80_s16, %s8041_s25  ;;  %p8047_p7 = scmp.lt.s32.totalorder %s8041_s25, %s8041_s25 }
  0x31   :  { %p8048_p8 = por %p8047_p7, %p8046_p6 }
  0x33   :  { %p8049_p9 = pnand %p8048_p8, %p8042_p5 }
  0x35   :  { %8052 = shalt.err (!%p8049_p9)
}
  0x36   :  { %s8226_s3 = smov 512   ;;  %s8227_s24 = smov 32  }
  0x37   :  { %85 = dma.hbm_to_vmem [thread:$0]  %s8586_s5, 32768, %s80_s16, [#allocation12], %s8226_s3, %s8226_s3, %s8227_s24  }
  0x38   :  { %s8228_s28 = smov [#allocation14]   ;;  %s8053_s12 = scalar_lea.hbm %s8588_s7, 57344 }
  0x39   :  { %s101_s29 = sshll.u32 %s8228_s28, 4  ;;  %p8054_p10 = scmp.ne.s32.totalorder %s8588_s7, %s8053_s12  ;;  %s102_s29 = int_to_ptr.vmem [resolvable:$true] %s101_s29 }
  0x3a   :  { %p8057_p11 = scmp.lt.u32.totalorder %s8053_s12, %s8588_s7 }
  0x3c   :  { %p8059_p12 = pnand %p8057_p11, %p8054_p10 }
  0x3e   :  { %8062 = shalt.err (!%p8059_p12)
}
  0x3f   :  { %s8063_s15 = scalar_lea.vmem %s102_s29, 57344  ;;  %p8068_p0 = scmp.lt.s32.totalorder %s102_s29, %s102_s29 }
  0x40   :  { %p8064_p13 = scmp.ne.s32.totalorder %s102_s29, %s8063_s15  ;;  %p8069_p1 = scmp.lt.s32.totalorder %s8063_s15, %s8063_s15 }
  0x42   :  { %p8070_p2 = por %p8069_p1, %p8068_p0 }
  0x44   :  { %p8071_p3 = pnand %p8070_p2, %p8064_p13 }
  0x46   :  { %8074 = shalt.err (!%p8071_p3)
}
  0x47   :  { %s8229_s5 = smov 448   ;;  %s8230_s16 = smov 28  }
  0x48   :  { %107 = dma.hbm_to_vmem [thread:$0]  %s8588_s7, 57344, %s102_s29, [#allocation15], %s8229_s5, %s8229_s5, %s8230_s16  }
  0x49   :  { %s8231_s19 = smov [#allocation2]   ;;  %s8232_s21 = smov [#allocation7]  }
  0x4a   :  { %s26_s20 = sshll.u32 %s8231_s19, 4  ;;  %s48_s22 = sshll.u32 %s8232_s21, 4  ;;  %s27_s20 = int_to_ptr.vmem [resolvable:$true] %s26_s20  ;;  %s49_s22 = int_to_ptr.vmem [resolvable:$true] %s48_s22 }
  0x4b   :  { %s8075_s3 = scalar_lea.hbm %s8581_s0, 64 }
  0x4c   :  { %p8076_p4 = scmp.ne.s32.totalorder %s8581_s0, %s8075_s3  ;;  %p8079_p5 = scmp.lt.u32.totalorder %s8075_s3, %s8581_s0 }
  0x4e   :  { %p8081_p6 = pnand %p8079_p5, %p8076_p4 }
  0x50   :  { %8084 = shalt.err (!%p8081_p6)
}
  0x51   :  { %s8085_s7 = scalar_lea.vmem %s27_s20, 64  ;;  %p8090_p8 = scmp.lt.s32.totalorder %s27_s20, %s27_s20 }
  0x52   :  { %p8086_p7 = scmp.ne.s32.totalorder %s27_s20, %s8085_s7  ;;  %p8091_p9 = scmp.lt.s32.totalorder %s8085_s7, %s8085_s7 }
  0x54   :  { %p8092_p10 = por %p8091_p9, %p8090_p8 }
  0x56   :  { %p8093_p11 = pnand %p8092_p10, %p8086_p7 }
  0x58   :  { %8096 = shalt.err (!%p8093_p11)
}
  0x59   :  { %29 = dma.hbm_to_vmem [thread:$0]  %s8581_s0, 64, %s27_s20, [#allocation3]  }
  0x5a   :  { %s8097_s1 = scalar_lea.hbm %s8583_s2, 32 }
  0x5b   :  { %p8098_p12 = scmp.ne.s32.totalorder %s8583_s2, %s8097_s1  ;;  %p8101_p13 = scmp.lt.u32.totalorder %s8097_s1, %s8583_s2 }
  0x5d   :  { %p8103_p0 = pnand %p8101_p13, %p8098_p12 }
  0x5f   :  { %8106 = shalt.err (!%p8103_p0)
}
  0x60   :  { %s8107_s5 = scalar_lea.vmem %s49_s22, 32  ;;  %p8112_p2 = scmp.lt.s32.totalorder %s49_s22, %s49_s22 }
  0x61   :  { %p8108_p1 = scmp.ne.s32.totalorder %s49_s22, %s8107_s5  ;;  %p8113_p3 = scmp.lt.s32.totalorder %s8107_s5, %s8107_s5 }
  0x63   :  { %p8114_p4 = por %p8113_p3, %p8112_p2 }
  0x65   :  { %p8115_p5 = pnand %p8114_p4, %p8108_p1 }
  0x67   :  { %8118 = shalt.err (!%p8115_p5)
}
  0x68   :  { %51 = dma.hbm_to_vmem [thread:$0]  %s8583_s2, 32, %s49_s22, [#allocation6]  }
  0x69   :  { %s8233_s17 = smov [#allocation10]   ;;  %s8234_s19 = smov [#allocation13]  }
  0x6a   :  { %s70_s18 = sshll.u32 %s8233_s17, 4  ;;  %s92_s20 = sshll.u32 %s8234_s19, 4  ;;  %s71_s18 = int_to_ptr.vmem [resolvable:$true] %s70_s18  ;;  %s93_s20 = int_to_ptr.vmem [resolvable:$true] %s92_s20 }
  0x6b   :  { %s8119_s25 = scalar_lea.hbm %s8585_s4, 64 }
  0x6c   :  { %p8120_p6 = scmp.ne.s32.totalorder %s8585_s4, %s8119_s25  ;;  %p8123_p7 = scmp.lt.u32.totalorder %s8119_s25, %s8585_s4 }
  0x6e   :  { %p8125_p8 = pnand %p8123_p7, %p8120_p6 }
  0x70   :  { %8128 = shalt.err (!%p8125_p8)
}
  0x71   :  { %s8129_s2 = scalar_lea.vmem %s71_s18, 64  ;;  %p8134_p10 = scmp.lt.s32.totalorder %s71_s18, %s71_s18 }
  0x72   :  { %p8130_p9 = scmp.ne.s32.totalorder %s71_s18, %s8129_s2  ;;  %p8135_p11 = scmp.lt.s32.totalorder %s8129_s2, %s8129_s2 }
  0x74   :  { %p8136_p12 = por %p8135_p11, %p8134_p10 }
  0x76   :  { %p8137_p13 = pnand %p8136_p12, %p8130_p9 }
  0x78   :  { %8140 = shalt.err (!%p8137_p13)
}
  0x79   :  { %73 = dma.hbm_to_vmem [thread:$0]  %s8585_s4, 64, %s71_s18, [#allocation9]  }
  0x7a   :  { %s8141_s30 = scalar_lea.hbm %s8587_s6, 128 }
  0x7b   :  { %p8142_p0 = scmp.ne.s32.totalorder %s8587_s6, %s8141_s30  ;;  %p8145_p1 = scmp.lt.u32.totalorder %s8141_s30, %s8587_s6 }
  0x7d   :  { %p8147_p2 = pnand %p8145_p1, %p8142_p0 }
  0x7f   :  { %8150 = shalt.err (!%p8147_p2)
}
  0x80   :  { %s8151_s13 = scalar_lea.vmem %s93_s20, 128  ;;  %p8156_p4 = scmp.lt.s32.totalorder %s93_s20, %s93_s20 }
  0x81   :  { %p8152_p3 = scmp.ne.s32.totalorder %s93_s20, %s8151_s13  ;;  %p8157_p5 = scmp.lt.s32.totalorder %s8151_s13, %s8151_s13 }
  0x83   :  { %p8158_p6 = por %p8157_p5, %p8156_p4 }
  0x85   :  { %p8159_p7 = pnand %p8158_p6, %p8152_p3 }
  0x87   :  { %8162 = shalt.err (!%p8159_p7)
}
  0x88   :  { %95 = dma.hbm_to_vmem [thread:$0]  %s8587_s6, 128, %s93_s20, [#allocation12]  }
  0x89   :  { %s8235_s15 = smov [#allocation16]   ;;  %s8163_s17 = scalar_lea.hbm %s8589_s8, 112 }
  0x8a   :  { %s114_s5 = sshll.u32 %s8235_s15, 4  ;;  %p8164_p8 = scmp.ne.s32.totalorder %s8589_s8, %s8163_s17  ;;  %s115_s5 = int_to_ptr.vmem [resolvable:$true] %s114_s5 }
  0x8b   :  { %p8167_p9 = scmp.lt.u32.totalorder %s8163_s17, %s8589_s8 }
  0x8d   :  { %p8169_p10 = pnand %p8167_p9, %p8164_p8 }
  0x8f   :  { %8172 = shalt.err (!%p8169_p10)
}
  0x90   :  { %s8173_s25 = scalar_lea.vmem %s115_s5, 112  ;;  %s8177_s6 = scalar_lea.vmem %s115_s5, 128 }
  0x91   :  { %p8174_p11 = scmp.ne.s32.totalorder %s115_s5, %s8173_s25  ;;  %p8178_p12 = scmp.lt.s32.totalorder %s115_s5, %s115_s5 }
  0x92   :  { %p8179_p13 = scmp.lt.s32.totalorder %s8177_s6, %s8173_s25 }
  0x94   :  { %p8180_p0 = por %p8179_p13, %p8178_p12 }
  0x96   :  { %p8181_p1 = pnand %p8180_p0, %p8174_p11 }
  0x98   :  { %8184 = shalt.err (!%p8181_p1)
}
  0x99   :  { %117 = dma.hbm_to_vmem [thread:$0]  %s8589_s8, 112, %s115_s5, [#allocation15]  }
  0x9a   :  { %8207 = dma.done.wait [#allocation3], 64  }
  0x9b   :  { %8208 = vsyncadd [#allocation3], 4294967232 }
  0x9c   :  { %8209 = dma.done.wait [#allocation6], 2080  }
  0x9d   :  { %8210 = vsyncadd [#allocation6], 4294965216 }
  0x9e   :  { %8211 = dma.done.wait [#allocation9], 8256  }
  0x9f   :  { %8212 = vsyncadd [#allocation9], 4294959040 }
  0xa0   :  { %8213 = dma.done.wait [#allocation12], 32896  }
  0xa1   :  { %8214 = vsyncadd [#allocation12], 4294934400 }
  0xa2   :  { %8215 = dma.done.wait [#allocation15], 57456  }
  0xa3   :  { %8216 = vsyncadd [#allocation15], 4294909840  ;;  %v8236_v0 = vmov 0   ;;  %v7213_v1 = vld [vmem:[#allocation5 + $0x4] ss:$8 sps:$4 sm:$0xff]   ;;  %s8237_s8 = smov [#allocation17]  }
  0xa4   :  { %287 = vmatprep.mubr.bf16.mxu0 %v8236_v0  ;;  %v7215_v2 = vld [vmem:[#allocation5] ss:$8 sps:$4 sm:$0xff]   ;;  %255 = vmatprep.subr.bf16.mxu0 %v7213_v1  ;;  %v7216_v3 = vld [vmem:[#allocation5 + $0x14] ss:$8 sps:$4 sm:$0xff]   ;;  %v7218_v4 = vld [vmem:[#allocation5 + $0x10] ss:$8 sps:$4 sm:$0xff]  }
  0xa5   :  { %256 = vmatpush1.bf16.msra.mxu0 %v7215_v2  ;;  %v7219_v5 = vld [vmem:[#allocation5 + $0x24] ss:$8 sps:$4 sm:$0xff]   ;;  %v7221_v6 = vld [vmem:[#allocation5 + $0x20] ss:$8 sps:$4 sm:$0xff]   ;;  %v7222_v7 = vld [vmem:[#allocation5 + $0x34] ss:$8 sps:$4 sm:$0xff]  }
  0xa6   :  { %257 = vmatprep.subr.bf16.mxu0 %v7216_v3  ;;  %v7224_v8 = vld [vmem:[#allocation5 + $0x30] ss:$8 sps:$4 sm:$0xff]   ;;  %v7225_v9 = vld [vmem:[#allocation5 + $0x44] ss:$8 sps:$4 sm:$0xff]   ;;  %v7227_v10 = vld [vmem:[#allocation5 + $0x40] ss:$8 sps:$4 sm:$0xff]  }
  0xa7   :  { %v7228_v11 = vld [vmem:[#allocation5 + $0x54] ss:$8 sps:$4 sm:$0xff]   ;;  %v7230_v12 = vld [vmem:[#allocation5 + $0x50] ss:$8 sps:$4 sm:$0xff]   ;;  %v7231_v13 = vld [vmem:[#allocation5 + $0x64] ss:$8 sps:$4 sm:$0xff]  }
  0xa8   :  { %v7233_v14 = vld [vmem:[#allocation5 + $0x60] ss:$8 sps:$4 sm:$0xff]   ;;  %v7234_v15 = vld [vmem:[#allocation5 + $0x74] ss:$8 sps:$4 sm:$0xff]   ;;  %v7236_v16 = vld [vmem:[#allocation5 + $0x70] ss:$8 sps:$4 sm:$0xff]  }
  0xa9   :  { %258 = vmatpush1.bf16.msra.mxu0 %v7218_v4  ;;  %v7239_v17 = vld [vmem:[#allocation8 + $0x4] ss:$16 sps:$4 sm:$0xff]   ;;  %v146_v18 = vld [vmem:[#allocation2] sm:$0xf]  ;;  %v7237_v19 = vld [vmem:[#allocation8] ss:$16 sps:$4 sm:$0xff]  }
  0xaa   :  { %259 = vmatprep.subr.bf16.mxu0 %v7219_v5  ;;  %v7242_v20 = vld [vmem:[#allocation8 + $0x24] ss:$16 sps:$4 sm:$0xff]   ;;  %v7240_v21 = vld [vmem:[#allocation8 + $0x20] ss:$16 sps:$4 sm:$0xff]   ;;  %v7287_v50 = vld [vmem:[#allocation8 + $0xc] ss:$16 sps:$4 sm:$0xff]  }
  0xab   :  { %v7245_v22 = vld [vmem:[#allocation8 + $0x44] ss:$16 sps:$4 sm:$0xff]   ;;  %v7243_v23 = vld [vmem:[#allocation8 + $0x40] ss:$16 sps:$4 sm:$0xff]   ;;  %s6243_s24 = sshll.u32 %s8237_s8, 4  ;;  %s6244_s24 = int_to_ptr.vmem [resolvable:$true] %s6243_s24 }
  0xac   :  { %v7248_v24 = vld [vmem:[#allocation8 + $0x64] ss:$16 sps:$4 sm:$0xff]   ;;  %v7246_v25 = vld [vmem:[#allocation8 + $0x60] ss:$16 sps:$4 sm:$0xff]   ;;  %s8185_s26 = scalar_lea.vmem %s6244_s24, 896  ;;  %p8190_p3 = scmp.lt.s32.totalorder %s6244_s24, %s6244_s24 }
  0xad   :  { %260 = vmatpush1.bf16.msra.mxu0 %v7221_v6  ;;  %v7251_v26 = vld [vmem:[#allocation8 + $0x84] ss:$16 sps:$4 sm:$0xff]   ;;  %v7249_v27 = vld [vmem:[#allocation8 + $0x80] ss:$16 sps:$4 sm:$0xff]   ;;  %p8186_p2 = scmp.ne.s32.totalorder %s6244_s24, %s8185_s26  ;;  %p8191_p4 = scmp.lt.s32.totalorder %s8185_s26, %s8185_s26 }
  0xae   :  { %261 = vmatprep.subr.bf16.mxu0 %v7222_v7  ;;  %v7254_v28 = vld [vmem:[#allocation8 + $0xa4] ss:$16 sps:$4 sm:$0xff]   ;;  %v7252_v29 = vld [vmem:[#allocation8 + $0xa0] ss:$16 sps:$4 sm:$0xff]  }
  0xaf   :  { %v7257_v30 = vld [vmem:[#allocation8 + $0xc4] ss:$16 sps:$4 sm:$0xff]   ;;  %v7255_v31 = vld [vmem:[#allocation8 + $0xc0] ss:$16 sps:$4 sm:$0xff]   ;;  %p8192_p5 = por %p8191_p4, %p8190_p3 }
  0xb0   :  { %v7260_v32 = vld [vmem:[#allocation8 + $0xe4] ss:$16 sps:$4 sm:$0xff]   ;;  %v7258_v33 = vld [vmem:[#allocation8 + $0xe0] ss:$16 sps:$4 sm:$0xff]  }
  0xb1   :  { %262 = vmatpush1.bf16.msra.mxu0 %v7224_v8  ;;  %v7263_v34 = vld [vmem:[#allocation8 + $0x104] ss:$16 sps:$4 sm:$0xff]   ;;  %v7261_v35 = vld [vmem:[#allocation8 + $0x100] ss:$16 sps:$4 sm:$0xff]   ;;  %p8193_p6 = pnand %p8192_p5, %p8186_p2 }
  0xb2   :  { %263 = vmatprep.subr.bf16.mxu0 %v7225_v9  ;;  %v7266_v36 = vld [vmem:[#allocation8 + $0x124] ss:$16 sps:$4 sm:$0xff]   ;;  %v7264_v37 = vld [vmem:[#allocation8 + $0x120] ss:$16 sps:$4 sm:$0xff]  }
  0xb3   :  { %v7269_v38 = vld [vmem:[#allocation8 + $0x144] ss:$16 sps:$4 sm:$0xff]   ;;  %v7267_v39 = vld [vmem:[#allocation8 + $0x140] ss:$16 sps:$4 sm:$0xff]  }
  0xb4   :  { %v7272_v40 = vld [vmem:[#allocation8 + $0x164] ss:$16 sps:$4 sm:$0xff]   ;;  %v7270_v41 = vld [vmem:[#allocation8 + $0x160] ss:$16 sps:$4 sm:$0xff]  }
  0xb5   :  { %264 = vmatpush1.bf16.msra.mxu0 %v7227_v10  ;;  %v7275_v42 = vld [vmem:[#allocation8 + $0x184] ss:$16 sps:$4 sm:$0xff]   ;;  %v7273_v43 = vld [vmem:[#allocation8 + $0x180] ss:$16 sps:$4 sm:$0xff]  }
  0xb6   :  { %265 = vmatprep.subr.bf16.mxu0 %v7228_v11  ;;  %v7278_v44 = vld [vmem:[#allocation8 + $0x1a4] ss:$16 sps:$4 sm:$0xff]   ;;  %v7276_v45 = vld [vmem:[#allocation8 + $0x1a0] ss:$16 sps:$4 sm:$0xff]  }
  0xb7   :  { %v7281_v46 = vld [vmem:[#allocation8 + $0x1c4] ss:$16 sps:$4 sm:$0xff]   ;;  %v7279_v47 = vld [vmem:[#allocation8 + $0x1c0] ss:$16 sps:$4 sm:$0xff]  }
  0xb8   :  { %v7284_v48 = vld [vmem:[#allocation8 + $0x1e4] ss:$16 sps:$4 sm:$0xff]   ;;  %v7282_v49 = vld [vmem:[#allocation8 + $0x1e0] ss:$16 sps:$4 sm:$0xff]  }
  0xb9   :  { %266 = vmatpush1.bf16.msra.mxu0 %v7230_v12  ;;  %v796_v51 = vld [vmem:[#allocation11] sm:$0xff] }
  0xba   :  { %267 = vmatprep.subr.bf16.mxu0 %v7231_v13  ;;  %v800_v52 = vld [vmem:[#allocation11 + $0x20] sm:$0xff] }
  0xbb   :  { %v6337_v53 = vcombine.high %v796_v51, %v800_v52  ;;  %v6336_v54 = vcombine.low %v796_v51, %v800_v52  ;;  %v804_v55 = vld [vmem:[#allocation11 + $0x40] sm:$0xff] }
  0xbc   :  { %v808_v56 = vld [vmem:[#allocation11 + $0x60] sm:$0xff] }
  0xbd   :  { %268 = vmatpush1.bf16.msra.mxu0 %v7233_v14  ;;  %v6345_v57 = vcombine.high %v804_v55, %v808_v56  ;;  %2374 = vmatprep.subr.bf16.mxu1 %v6337_v53  ;;  %v6344_v58 = vcombine.low %v804_v55, %v808_v56  ;;  %v812_v59 = vld [vmem:[#allocation11 + $0x80] sm:$0xff] }
  0xbe   :  { %269 = vmatprep.subr.bf16.mxu0 %v7234_v15  ;;  %2375 = vmatpush1.bf16.msra.mxu1 %v6336_v54  ;;  %v816_v60 = vld [vmem:[#allocation11 + $0xa0] sm:$0xff] }
  0xbf   :  { %2376 = vmatprep.subr.bf16.mxu1 %v6345_v57  ;;  %v6353_v61 = vcombine.high %v812_v59, %v816_v60  ;;  %v6352_v62 = vcombine.low %v812_v59, %v816_v60  ;;  %v820_v63 = vld [vmem:[#allocation11 + $0xc0] sm:$0xff] }
  0xc0   :  { %v824_v0 = vld [vmem:[#allocation11 + $0xe0] sm:$0xff] }
  0xc1   :  { %270 = vmatpush1.bf16.msra.mxu0 %v7236_v16  ;;  %v6361_v1 = vcombine.high %v820_v63, %v824_v0  ;;  %v6360_v2 = vcombine.low %v820_v63, %v824_v0  ;;  %v828_v3 = vld [vmem:[#allocation11 + $0x100] sm:$0xff]  ;;  %v7293_v63 = vld [vmem:[#allocation8 + $0x4c] ss:$16 sps:$4 sm:$0xff]  }
  0xc2   :  { %706 = vmatprep.subr.bf16.mxu0 %v7239_v17  ;;  %2377 = vmatpush1.bf16.msra.mxu1 %v6344_v58  ;;  %v832_v4 = vld [vmem:[#allocation11 + $0x120] sm:$0xff] }
  0xc3   :  { %2378 = vmatprep.subr.bf16.mxu1 %v6353_v61  ;;  %v6369_v5 = vcombine.high %v828_v3, %v832_v4  ;;  %v6368_v6 = vcombine.low %v828_v3, %v832_v4  ;;  %v836_v7 = vld [vmem:[#allocation11 + $0x140] sm:$0xff]  ;;  %v7290_v61 = vld [vmem:[#allocation8 + $0x2c] ss:$16 sps:$4 sm:$0xff]  }
  0xc4   :  { %288 = vmatmul.mubr.bf16.vlgmr.msra.gmra.mrb[0].mxu0 %v146_v18  ;;  %v840_v8 = vld [vmem:[#allocation11 + $0x160] sm:$0xff]  ;;  %v7299_v3 = vld [vmem:[#allocation8 + $0x8c] ss:$16 sps:$4 sm:$0xff]  }
  0xc5   :  { %707 = vmatpush1.bf16.msra.mxu0 %v7237_v19  ;;  %v6377_v9 = vcombine.high %v836_v7, %v840_v8  ;;  %v6376_v10 = vcombine.low %v836_v7, %v840_v8  ;;  %v844_v11 = vld [vmem:[#allocation11 + $0x180] sm:$0xff]  ;;  %v7305_v7 = vld [vmem:[#allocation8 + $0xcc] ss:$16 sps:$4 sm:$0xff]  }
  0xc6   :  { %708 = vmatprep.subr.bf16.mxu0 %v7242_v20  ;;  %2379 = vmatpush1.bf16.msra.mxu1 %v6352_v62  ;;  %v848_v12 = vld [vmem:[#allocation11 + $0x1a0] sm:$0xff] }
  0xc7   :  { %2380 = vmatprep.subr.bf16.mxu1 %v6361_v1  ;;  %v6385_v13 = vcombine.high %v844_v11, %v848_v12  ;;  %v6384_v14 = vcombine.low %v844_v11, %v848_v12  ;;  %v852_v15 = vld [vmem:[#allocation11 + $0x1c0] sm:$0xff]  ;;  %v7296_v1 = vld [vmem:[#allocation8 + $0x6c] ss:$16 sps:$4 sm:$0xff]  }
  0xc8   :  { %v856_v16 = vld [vmem:[#allocation11 + $0x1e0] sm:$0xff]  ;;  %v7311_v11 = vld [vmem:[#allocation8 + $0x10c] ss:$16 sps:$4 sm:$0xff]  }
  0xc9   :  { %709 = vmatpush1.bf16.msra.mxu0 %v7240_v21  ;;  %v6393_v17 = vcombine.high %v852_v15, %v856_v16  ;;  %v6392_v18 = vcombine.low %v852_v15, %v856_v16  ;;  %v860_v19 = vld [vmem:[#allocation11 + $0x200] sm:$0xff]  ;;  %v7317_v15 = vld [vmem:[#allocation8 + $0x14c] ss:$16 sps:$4 sm:$0xff]  }
  0xca   :  { %710 = vmatprep.subr.bf16.mxu0 %v7245_v22  ;;  %2381 = vmatpush1.bf16.msra.mxu1 %v6360_v2  ;;  %v864_v20 = vld [vmem:[#allocation11 + $0x220] sm:$0xff] }
  0xcb   :  { %2382 = vmatprep.subr.bf16.mxu1 %v6369_v5  ;;  %v6401_v21 = vcombine.high %v860_v19, %v864_v20  ;;  %v6400_v22 = vcombine.low %v860_v19, %v864_v20  ;;  %v7285_v59 = vld [vmem:[#allocation8 + $0x8] ss:$16 sps:$4 sm:$0xff]   ;;  %v7302_v5 = vld [vmem:[#allocation8 + $0xac] ss:$16 sps:$4 sm:$0xff]  }
  0xcc   :  { %v7288_v62 = vld [vmem:[#allocation8 + $0x28] ss:$16 sps:$4 sm:$0xff]   ;;  %v7323_v19 = vld [vmem:[#allocation8 + $0x18c] ss:$16 sps:$4 sm:$0xff]  }
  0xcd   :  { %711 = vmatpush1.bf16.msra.mxu0 %v7243_v23  ;;  %v868_v23 = vld [vmem:[#allocation11 + $0x240] sm:$0xff] }
  0xce   :  { %712 = vmatprep.subr.bf16.mxu0 %v7248_v24  ;;  %2383 = vmatpush1.bf16.msra.mxu1 %v6368_v6  ;;  %v872_v24 = vld [vmem:[#allocation11 + $0x260] sm:$0xff] }
  0xcf   :  { %2384 = vmatprep.subr.bf16.mxu1 %v6377_v9  ;;  %v7291_v0 = vld [vmem:[#allocation8 + $0x48] ss:$16 sps:$4 sm:$0xff]   ;;  %v7308_v9 = vld [vmem:[#allocation8 + $0xec] ss:$16 sps:$4 sm:$0xff]  }
  0xd0   :  { %v7294_v2 = vld [vmem:[#allocation8 + $0x68] ss:$16 sps:$4 sm:$0xff]  }
  0xd1   :  { %713 = vmatpush1.bf16.msra.mxu0 %v7246_v25  ;;  %v6409_v25 = vcombine.high %v868_v23, %v872_v24  ;;  %v7297_v4 = vld [vmem:[#allocation8 + $0x88] ss:$16 sps:$4 sm:$0xff]  }
  0xd2   :  { %714 = vmatprep.subr.bf16.mxu0 %v7251_v26  ;;  %2385 = vmatpush1.bf16.msra.mxu1 %v6376_v10  ;;  %v6408_v26 = vcombine.low %v868_v23, %v872_v24  ;;  %v7300_v6 = vld [vmem:[#allocation8 + $0xa8] ss:$16 sps:$4 sm:$0xff]   ;;  %v7329_v23 = vld [vmem:[#allocation8 + $0x1cc] ss:$16 sps:$4 sm:$0xff]  }
  0xd3   :  { %2386 = vmatprep.subr.bf16.mxu1 %v6385_v13  ;;  %v7303_v8 = vld [vmem:[#allocation8 + $0xc8] ss:$16 sps:$4 sm:$0xff]   ;;  %v7314_v13 = vld [vmem:[#allocation8 + $0x12c] ss:$16 sps:$4 sm:$0xff]  }
  0xd4   :  { %v7306_v10 = vld [vmem:[#allocation8 + $0xe8] ss:$16 sps:$4 sm:$0xff]  }
  0xd5   :  { %715 = vmatpush1.bf16.msra.mxu0 %v7249_v27  ;;  %v876_v27 = vld [vmem:[#allocation11 + $0x280] sm:$0xff] }
  0xd6   :  { %716 = vmatprep.subr.bf16.mxu0 %v7254_v28  ;;  %2387 = vmatpush1.bf16.msra.mxu1 %v6384_v14  ;;  %v880_v28 = vld [vmem:[#allocation11 + $0x2a0] sm:$0xff] }
  0xd7   :  { %2388 = vmatprep.subr.bf16.mxu1 %v6393_v17  ;;  %v7309_v12 = vld [vmem:[#allocation8 + $0x108] ss:$16 sps:$4 sm:$0xff]   ;;  %v7320_v17 = vld [vmem:[#allocation8 + $0x16c] ss:$16 sps:$4 sm:$0xff]  }
  0xd8   :  { %v7312_v14 = vld [vmem:[#allocation8 + $0x128] ss:$16 sps:$4 sm:$0xff]  }
  0xd9   :  { %717 = vmatpush1.bf16.msra.mxu0 %v7252_v29  ;;  %v6417_v29 = vcombine.high %v876_v27, %v880_v28  ;;  %v7315_v16 = vld [vmem:[#allocation8 + $0x148] ss:$16 sps:$4 sm:$0xff]  }
  0xda   :  { %718 = vmatprep.subr.bf16.mxu0 %v7257_v30  ;;  %2389 = vmatpush1.bf16.msra.mxu1 %v6392_v18  ;;  %v165_v30 = vlaneseq  ;;  %v7318_v18 = vld [vmem:[#allocation8 + $0x168] ss:$16 sps:$4 sm:$0xff]  }
  0xdb   :  { %2390 = vmatprep.subr.bf16.mxu1 %v6401_v21  ;;  %v7321_v20 = vld [vmem:[#allocation8 + $0x188] ss:$16 sps:$4 sm:$0xff]   ;;  %v7326_v21 = vld [vmem:[#allocation8 + $0x1ac] ss:$16 sps:$4 sm:$0xff]  }
  0xdc   :  { %v7327_v24 = vld [vmem:[#allocation8 + $0x1c8] ss:$16 sps:$4 sm:$0xff]  }
  0xdd   :  { %719 = vmatpush1.bf16.msra.mxu0 %v7255_v31  ;;  %v6416_v31 = vcombine.low %v876_v27, %v880_v28  ;;  %v801_v27 = vld [vmem:[#allocation11 + $0x28] sm:$0xff]  ;;  %v7330_v28 = vld [vmem:[#allocation8 + $0x1e8] ss:$16 sps:$4 sm:$0xff]  }
  0xde   :  { %720 = vmatprep.subr.bf16.mxu0 %v7260_v32  ;;  %2391 = vmatpush1.bf16.msra.mxu1 %v6400_v22  ;;  %v884_v32 = vld [vmem:[#allocation11 + $0x2c0] sm:$0xff] }
  0xdf   :  { %2392 = vmatprep.subr.bf16.mxu1 %v6409_v25  ;;  %v7324_v22 = vld [vmem:[#allocation8 + $0x1a8] ss:$16 sps:$4 sm:$0xff]   ;;  %v7332_v25 = vld [vmem:[#allocation8 + $0x1ec] ss:$16 sps:$4 sm:$0xff]  }
  0xe1   :  { %721 = vmatpush1.bf16.msra.mxu0 %v7258_v33  ;;  %v888_v33 = vld [vmem:[#allocation11 + $0x2e0] sm:$0xff] }
  0xe2   :  { %722 = vmatprep.subr.bf16.mxu0 %v7263_v34  ;;  %2393 = vmatpush1.bf16.msra.mxu1 %v6408_v26  ;;  %v6425_v34 = vcombine.high %v884_v32, %v888_v33  ;;  %v797_v26 = vld [vmem:[#allocation11 + $0x8] sm:$0xff] }
  0xe3   :  { %2394 = vmatprep.subr.bf16.mxu1 %v6417_v29  ;;  %v6339_v29 = vcombine.high %v797_v26, %v801_v27 }
  0xe5   :  { %723 = vmatpush1.bf16.msra.mxu0 %v7261_v35  ;;  %v8396_v35 = vshrl.u32 %v165_v30, 7  ;;  %v805_v30 = vld [vmem:[#allocation11 + $0x48] sm:$0xff] }
  0xe6   :  { %724 = vmatprep.subr.bf16.mxu0 %v7266_v36  ;;  %2395 = vmatpush1.bf16.msra.mxu1 %v6416_v31  ;;  %v6424_v36 = vcombine.low %v884_v32, %v888_v33  ;;  %v809_v31 = vld [vmem:[#allocation11 + $0x68] sm:$0xff]  ;;  %v6338_v32 = vcombine.low %v797_v26, %v801_v27 }
  0xe7   :  { %2396 = vmatprep.subr.bf16.mxu1 %v6425_v34  ;;  %v6347_v33 = vcombine.high %v805_v30, %v809_v31  ;;  %v813_v34 = vld [vmem:[#allocation11 + $0x88] sm:$0xff] }
  0xe9   :  { %725 = vmatpush1.bf16.msra.mxu0 %v7264_v37  ;;  %v892_v37 = vld [vmem:[#allocation11 + $0x300] sm:$0xff] }
  0xea   :  { %726 = vmatprep.subr.bf16.mxu0 %v7269_v38  ;;  %v896_v38 = vld [vmem:[#allocation11 + $0x320] sm:$0xff]  ;;  %2397 = vmatpush1.bf16.msra.mxu1 %v6424_v36  ;;  %v817_v36 = vld [vmem:[#allocation11 + $0xa8] sm:$0xff] }
  0xed   :  { %727 = vmatpush1.bf16.msra.mxu0 %v7267_v39  ;;  %v6433_v39 = vcombine.high %v892_v37, %v896_v38 }
  0xee   :  { %728 = vmatprep.subr.bf16.mxu0 %v7272_v40  ;;  %v8399_v40 = vsub.s32 0, %v8396_v35 }
  0xef   :  { %2398 = vmatprep.subr.bf16.mxu1 %v6433_v39  ;;  %v821_v39 = vld [vmem:[#allocation11 + $0xc8] sm:$0xff] }
  0xf1   :  { %729 = vmatpush1.bf16.msra.mxu0 %v7270_v41  ;;  %v6432_v41 = vcombine.low %v892_v37, %v896_v38  ;;  %v6346_v37 = vcombine.low %v805_v30, %v809_v31  ;;  %v6355_v38 = vcombine.high %v813_v34, %v817_v36 }
  0xf2   :  { %730 = vmatprep.subr.bf16.mxu0 %v7275_v42  ;;  %v163_v42 = vld [vmem:[#allocation7] sm:$0x3] }
  0xf3   :  { %2399 = vmatpush1.bf16.msra.mxu1 %v6432_v41  ;;  %v825_v41 = vld [vmem:[#allocation11 + $0xe8] sm:$0xff] }
  0xf5   :  { %731 = vmatpush1.bf16.msra.mxu0 %v7273_v43  ;;  %v8402_v43 = vsub.s32 1, %v8396_v35 }
  0xf6   :  { %732 = vmatprep.subr.bf16.mxu0 %v7278_v44  ;;  %v900_v44 = vld [vmem:[#allocation11 + $0x340] sm:$0xff] }
  0xf9   :  { %733 = vmatpush1.bf16.msra.mxu0 %v7276_v45  ;;  %v904_v45 = vld [vmem:[#allocation11 + $0x360] sm:$0xff] }
  0xfa   :  { %734 = vmatprep.subr.bf16.mxu0 %v7281_v46  ;;  %v6441_v46 = vcombine.high %v900_v44, %v904_v45 }
  0xfc   :  { %2400 = vmatprep.subr.bf16.mxu1 %v6441_v46  ;;  %v833_v46 = vld [vmem:[#allocation11 + $0x128] sm:$0xff] }
  0xfd   :  { %735 = vmatpush1.bf16.msra.mxu0 %v7279_v47  ;;  %v168_v47 = vrot.slane %v163_v42, %v8399_v40 }
  0xfe   :  { %736 = vmatprep.subr.bf16.mxu0 %v7284_v48  ;;  %v6440_v48 = vcombine.low %v900_v44, %v904_v45  ;;  %v6363_v44 = vcombine.high %v821_v39, %v825_v41  ;;  %v829_v45 = vld [vmem:[#allocation11 + $0x108] sm:$0xff] }
 0x100   :  { %2401 = vmatpush1.bf16.msra.mxu1 %v6440_v48  ;;  %v6371_v48 = vcombine.high %v829_v45, %v833_v46 }
 0x101   :  { %737 = vmatpush1.bf16.msra.mxu0 %v7282_v49  ;;  %v172_v49 = vrot.slane %v163_v42, %v8402_v43  ;;  %v6354_v42 = vcombine.low %v813_v34, %v817_v36 }
 0x102   :  { %747 = vmatprep.subr.bf16.mxu0 %v7287_v50 }
 0x197   :  { %v289_v50 = vpop.f32.mrb[0].mxu0 }
 0x198   :  { %v290_v51 = vadd.f32 %v289_v50, %v168_v47  ;;  %v291_v52 = vpop.f32.mrb[1].mxu0  ;;  %v6362_v47 = vcombine.low %v821_v39, %v825_v41  ;;  %v841_v50 = vld [vmem:[#allocation11 + $0x168] sm:$0xff] }
 0x199   :  { %v292_v53 = vadd.f32 %v291_v52, %v172_v49  ;;  %v293_v54 = vpop.f32.mrb[2].mxu0  ;;  %v837_v49 = vld [vmem:[#allocation11 + $0x148] sm:$0xff] }
 0x19a   :  { %v296_v55 = vmax.f32 %v290_v51, 0.0  ;;  %v294_v56 = vpop.f32.mrb[3].mxu0  ;;  %v6370_v51 = vcombine.low %v829_v45, %v833_v46  ;;  %v6379_v52 = vcombine.high %v837_v49, %v841_v50  ;;  %v849_v54 = vld [vmem:[#allocation11 + $0x1a8] sm:$0xff] }
 0x19b   :  { %v297_v57 = vmax.f32 %v292_v53, 0.0  ;;  %v845_v53 = vld [vmem:[#allocation11 + $0x188] sm:$0xff]  ;;  %v908_v56 = vld [vmem:[#allocation11 + $0x380] sm:$0xff] }
 0x19c   :  { %v8406_v60 = vpack.c.bf16 %v296_v55, %v296_v55  ;;  %v6378_v55 = vcombine.low %v837_v49, %v841_v50  ;;  %v8426_v49 = vld [vmem:[#allocation10] sm:$0xf] }
 0x19d   :  { %v299_v58 = vpack.c.bf16 %v297_v57, %v297_v57  ;;  %v912_v57 = vld [vmem:[#allocation11 + $0x3a0] sm:$0xff]  ;;  %v369_v50 = vrot.slane %v8426_v49, %v8399_v40 }
 0x19f   :  { %738 = vmatprep.mubr.bf16.mxu0 %v299_v58 }
 0x1a0   :  { %739 = vmatmul.mubr.bf16.vlgmr.msra.gmra.mrb[4].mxu0 %v8406_v60 }
 0x1a1   :  { %748 = vmatpush1.bf16.msra.mxu0 %v7285_v59  ;;  %779 = vmatprep.mubr.bf16.mxu0 %v299_v58  ;;  %v6387_v58 = vcombine.high %v845_v53, %v849_v54  ;;  %v6449_v59 = vcombine.high %v908_v56, %v912_v57 }
 0x1a2   :  { %749 = vmatprep.subr.bf16.mxu0 %v7290_v61  ;;  %v857_v61 = vld [vmem:[#allocation11 + $0x1e8] sm:$0xff] }
 0x1a3   :  { %2402 = vmatprep.subr.bf16.mxu1 %v6449_v59  ;;  %v932_v59 = vld [vmem:[#allocation11 + $0x440] sm:$0xff] }
 0x1a5   :  { %750 = vmatpush1.bf16.msra.mxu0 %v7288_v62  ;;  %v6448_v62 = vcombine.low %v908_v56, %v912_v57 }
 0x1a6   :  { %751 = vmatprep.subr.bf16.mxu0 %v7293_v63  ;;  %v6386_v63 = vcombine.low %v845_v53, %v849_v54 }
 0x1a7   :  { %2403 = vmatpush1.bf16.msra.mxu1 %v6448_v62  ;;  %v933_v62 = vld [vmem:[#allocation11 + $0x448] sm:$0xff] }
 0x1a9   :  { %752 = vmatpush1.bf16.msra.mxu0 %v7291_v0  ;;  %v916_v0 = vld [vmem:[#allocation11 + $0x3c0] sm:$0xff] }
 0x1aa   :  { %753 = vmatprep.subr.bf16.mxu0 %v7296_v1  ;;  %v920_v1 = vld [vmem:[#allocation11 + $0x3e0] sm:$0xff] }
 0x1ad   :  { %754 = vmatpush1.bf16.msra.mxu0 %v7294_v2 }
 0x1ae   :  { %755 = vmatprep.subr.bf16.mxu0 %v7299_v3  ;;  %v6457_v3 = vcombine.high %v916_v0, %v920_v1 }
 0x1b0   :  { %2404 = vmatprep.subr.bf16.mxu1 %v6457_v3 }
 0x1b1   :  { %756 = vmatpush1.bf16.msra.mxu0 %v7297_v4  ;;  %v861_v4 = vld [vmem:[#allocation11 + $0x208] sm:$0xff] }
 0x1b2   :  { %757 = vmatprep.subr.bf16.mxu0 %v7302_v5  ;;  %v865_v5 = vld [vmem:[#allocation11 + $0x228] sm:$0xff] }
 0x1b5   :  { %758 = vmatpush1.bf16.msra.mxu0 %v7300_v6  ;;  %v6456_v6 = vcombine.low %v916_v0, %v920_v1 }
 0x1b6   :  { %759 = vmatprep.subr.bf16.mxu0 %v7305_v7 }
 0x1b7   :  { %2405 = vmatpush1.bf16.msra.mxu1 %v6456_v6  ;;  %v941_v6 = vld [vmem:[#allocation11 + $0x488] sm:$0xff] }
 0x1b9   :  { %760 = vmatpush1.bf16.msra.mxu0 %v7303_v8  ;;  %v8410_v8 = vld [vmem:[#allocation11 + $0x400] sm:$0xff] }
 0x1ba   :  { %761 = vmatprep.subr.bf16.mxu0 %v7308_v9  ;;  %v8412_v9 = vld [vmem:[#allocation11 + $0x420] sm:$0xff] }
 0x1bd   :  { %762 = vmatpush1.bf16.msra.mxu0 %v7306_v10  ;;  %v8414_v10 = vld [vmem:[#allocation11 + $0x408] sm:$0xff] }
 0x1be   :  { %763 = vmatprep.subr.bf16.mxu0 %v7311_v11  ;;  %v6403_v11 = vcombine.high %v861_v4, %v865_v5 }
 0x1c1   :  { %764 = vmatpush1.bf16.msra.mxu0 %v7309_v12  ;;  %v6465_v12 = vcombine.high %v8410_v8, %v8412_v9 }
 0x1c2   :  { %765 = vmatprep.subr.bf16.mxu0 %v7314_v13  ;;  %v8418_v13 = vld [vmem:[#allocation11 + $0x428] sm:$0xff] }
 0x1c3   :  { %2415 = vmatprep.subr.bf16.mxu1 %v6465_v12 }
 0x1c5   :  { %766 = vmatpush1.bf16.msra.mxu0 %v7312_v14  ;;  %v869_v14 = vld [vmem:[#allocation11 + $0x248] sm:$0xff] }
 0x1c6   :  { %767 = vmatprep.subr.bf16.mxu0 %v7317_v15  ;;  %v873_v15 = vld [vmem:[#allocation11 + $0x268] sm:$0xff] }
 0x1c9   :  { %768 = vmatpush1.bf16.msra.mxu0 %v7315_v16  ;;  %v6464_v16 = vcombine.low %v8410_v8, %v8412_v9 }
 0x1ca   :  { %769 = vmatprep.subr.bf16.mxu0 %v7320_v17  ;;  %v6466_v17 = vcombine.low %v8414_v10, %v8418_v13 }
 0x1cd   :  { %770 = vmatpush1.bf16.msra.mxu0 %v7318_v18  ;;  %v6402_v18 = vcombine.low %v861_v4, %v865_v5  ;;  %v940_v4 = vld [vmem:[#allocation11 + $0x480] sm:$0xff] }
 0x1ce   :  { %771 = vmatprep.subr.bf16.mxu0 %v7323_v19  ;;  %v6411_v19 = vcombine.high %v869_v14, %v873_v15  ;;  %v944_v5 = vld [vmem:[#allocation11 + $0x4a0] sm:$0xff] }
 0x1d1   :  { %772 = vmatpush1.bf16.msra.mxu0 %v7321_v20  ;;  %v877_v20 = vld [vmem:[#allocation11 + $0x288] sm:$0xff] }
 0x1d2   :  { %773 = vmatprep.subr.bf16.mxu0 %v7326_v21  ;;  %v881_v21 = vld [vmem:[#allocation11 + $0x2a8] sm:$0xff] }
 0x1d3   :  { %v6418_v26 = vcombine.low %v877_v20, %v881_v21 }
 0x1d5   :  { %774 = vmatpush1.bf16.msra.mxu0 %v7324_v22  ;;  %v6410_v22 = vcombine.low %v869_v14, %v873_v15  ;;  %v6481_v14 = vcombine.high %v940_v4, %v944_v5 }
 0x1d6   :  { %775 = vmatprep.subr.bf16.mxu0 %v7329_v23  ;;  %v6419_v23 = vcombine.high %v877_v20, %v881_v21  ;;  %v949_v20 = vld [vmem:[#allocation11 + $0x4c8] sm:$0xff] }
 0x1d7   :  { %v953_v21 = vld [vmem:[#allocation11 + $0x4e8] sm:$0xff] }
 0x1d8   :  { %v6491_v9 = vcombine.high %v949_v20, %v953_v21 }
 0x1d9   :  { %776 = vmatpush1.bf16.msra.mxu0 %v7327_v24  ;;  %v885_v24 = vld [vmem:[#allocation11 + $0x2c8] sm:$0xff] }
 0x1da   :  { %777 = vmatprep.subr.bf16.mxu0 %v7332_v25  ;;  %v889_v25 = vld [vmem:[#allocation11 + $0x2e8] sm:$0xff] }
 0x1db   :  { %v6427_v27 = vcombine.high %v885_v24, %v889_v25  ;;  %v6426_v30 = vcombine.low %v885_v24, %v889_v25  ;;  %v6490_v25 = vcombine.low %v949_v20, %v953_v21 }
 0x1dd   :  { %778 = vmatpush1.bf16.msra.mxu0 %v7330_v28  ;;  %v893_v28 = vld [vmem:[#allocation11 + $0x308] sm:$0xff] }
 0x1de   :  { %2456 = vmatprep.subr.bf16.mxu0 %v6339_v29  ;;  %v897_v29 = vld [vmem:[#allocation11 + $0x328] sm:$0xff] }
 0x1df   :  { %v6435_v31 = vcombine.high %v893_v28, %v897_v29  ;;  %v6434_v34 = vcombine.low %v893_v28, %v897_v29  ;;  %v964_v28 = vld [vmem:[#allocation11 + $0x540] sm:$0xff] }
 0x1e0   :  { %780 = vmatmul.mubr.bf16.vlgmr.msra.gmra.mrb[8].mxu0 %v8406_v60  ;;  %v853_v60 = vld [vmem:[#allocation11 + $0x1c8] sm:$0xff]  ;;  %v968_v29 = vld [vmem:[#allocation11 + $0x560] sm:$0xff] }
 0x1e1   :  { %2457 = vmatpush1.bf16.msra.mxu0 %v6338_v32  ;;  %v6395_v2 = vcombine.high %v853_v60, %v857_v61  ;;  %v6394_v7 = vcombine.low %v853_v60, %v857_v61  ;;  %v901_v32 = vld [vmem:[#allocation11 + $0x348] sm:$0xff]  ;;  %v936_v61 = vld [vmem:[#allocation11 + $0x460] sm:$0xff] }
 0x1e2   :  { %2458 = vmatprep.subr.bf16.mxu0 %v6347_v33  ;;  %v905_v33 = vld [vmem:[#allocation11 + $0x368] sm:$0xff] }
 0x1e3   :  { %v6443_v36 = vcombine.high %v901_v32, %v905_v33  ;;  %v6442_v39 = vcombine.low %v901_v32, %v905_v33 }
 0x1e5   :  { %2459 = vmatpush1.bf16.msra.mxu0 %v6346_v37  ;;  %v909_v37 = vld [vmem:[#allocation11 + $0x388] sm:$0xff] }
 0x1e6   :  { %2460 = vmatprep.subr.bf16.mxu0 %v6355_v38  ;;  %v913_v38 = vld [vmem:[#allocation11 + $0x3a8] sm:$0xff] }
 0x1e7   :  { %v6451_v41 = vcombine.high %v909_v37, %v913_v38  ;;  %v6450_v45 = vcombine.low %v909_v37, %v913_v38  ;;  %v972_v37 = vld [vmem:[#allocation11 + $0x580] sm:$0xff] }
 0x1e8   :  { %v976_v38 = vld [vmem:[#allocation11 + $0x5a0] sm:$0xff] }
 0x1e9   :  { %2461 = vmatpush1.bf16.msra.mxu0 %v6354_v42  ;;  %v917_v42 = vld [vmem:[#allocation11 + $0x3c8] sm:$0xff] }
 0x1ea   :  { %2462 = vmatprep.subr.bf16.mxu0 %v6363_v44  ;;  %v921_v44 = vld [vmem:[#allocation11 + $0x3e8] sm:$0xff] }
 0x1eb   :  { %v6459_v46 = vcombine.high %v917_v42, %v921_v44 }
 0x1ed   :  { %2463 = vmatpush1.bf16.msra.mxu0 %v6362_v47  ;;  %v6458_v47 = vcombine.low %v917_v42, %v921_v44  ;;  %v6504_v42 = vcombine.low %v964_v28, %v968_v29 }
 0x1ee   :  { %2464 = vmatprep.subr.bf16.mxu0 %v6371_v48  ;;  %v6467_v48 = vcombine.high %v8414_v10, %v8418_v13  ;;  %v956_v10 = vld [vmem:[#allocation11 + $0x500] sm:$0xff] }
 0x1ef   :  { %v960_v13 = vld [vmem:[#allocation11 + $0x520] sm:$0xff] }
 0x1f0   :  { %v6496_v32 = vcombine.low %v956_v10, %v960_v13 }
 0x1f1   :  { %2465 = vmatpush1.bf16.msra.mxu0 %v6370_v51  ;;  %v373_v51 = vrot.slane %v8426_v49, %v8402_v43 }
 0x1f2   :  { %2466 = vmatprep.subr.bf16.mxu0 %v6379_v52 }
 0x1f5   :  { %2467 = vmatpush1.bf16.msra.mxu0 %v6378_v55 }
 0x1f6   :  { %2468 = vmatprep.subr.bf16.mxu0 %v6387_v58 }
 0x1f9   :  { %2469 = vmatpush1.bf16.msra.mxu0 %v6386_v63  ;;  %v937_v63 = vld [vmem:[#allocation11 + $0x468] sm:$0xff] }
 0x1fa   :  { %2470 = vmatprep.subr.bf16.mxu0 %v6395_v2  ;;  %v6473_v2 = vcombine.high %v932_v59, %v936_v61  ;;  %v6475_v3 = vcombine.high %v933_v62, %v937_v63  ;;  %v6474_v12 = vcombine.low %v933_v62, %v937_v63 }
 0x1fd   :  { %2471 = vmatpush1.bf16.msra.mxu0 %v6394_v7  ;;  %v945_v7 = vld [vmem:[#allocation11 + $0x4a8] sm:$0xff] }
 0x1fe   :  { %2472 = vmatprep.subr.bf16.mxu0 %v6403_v11  ;;  %v6472_v11 = vcombine.low %v932_v59, %v936_v61  ;;  %v6483_v15 = vcombine.high %v941_v6, %v945_v7  ;;  %v993_v59 = vld [vmem:[#allocation11 + $0x628] sm:$0xff] }
 0x201   :  { %2473 = vmatpush1.bf16.msra.mxu0 %v6402_v18  ;;  %v948_v18 = vld [vmem:[#allocation11 + $0x4c0] sm:$0xff] }
 0x202   :  { %2474 = vmatprep.subr.bf16.mxu0 %v6411_v19  ;;  %v952_v19 = vld [vmem:[#allocation11 + $0x4e0] sm:$0xff] }
 0x203   :  { %v6489_v8 = vcombine.high %v948_v18, %v952_v19  ;;  %v6488_v24 = vcombine.low %v948_v18, %v952_v19  ;;  %v1005_v18 = vld [vmem:[#allocation11 + $0x688] sm:$0xff] }
 0x204   :  { %v1009_v19 = vld [vmem:[#allocation11 + $0x6a8] sm:$0xff] }
 0x205   :  { %2475 = vmatpush1.bf16.msra.mxu0 %v6410_v22  ;;  %v6480_v22 = vcombine.low %v940_v4, %v944_v5  ;;  %v997_v4 = vld [vmem:[#allocation11 + $0x648] sm:$0xff] }
 0x206   :  { %2476 = vmatprep.subr.bf16.mxu0 %v6419_v23  ;;  %v6482_v23 = vcombine.low %v941_v6, %v945_v7  ;;  %v1001_v5 = vld [vmem:[#allocation11 + $0x668] sm:$0xff] }
 0x207   :  { %v6538_v21 = vcombine.low %v997_v4, %v1001_v5 }
 0x209   :  { %2477 = vmatpush1.bf16.msra.mxu0 %v6418_v26  ;;  %v6497_v26 = vcombine.high %v956_v10, %v960_v13  ;;  %v1013_v10 = vld [vmem:[#allocation11 + $0x6c8] sm:$0xff] }
 0x20a   :  { %2478 = vmatprep.subr.bf16.mxu0 %v6427_v27  ;;  %v1017_v13 = vld [vmem:[#allocation11 + $0x6e8] sm:$0xff] }
 0x20d   :  { %2479 = vmatpush1.bf16.msra.mxu0 %v6426_v30  ;;  %v965_v30 = vld [vmem:[#allocation11 + $0x548] sm:$0xff] }
 0x20e   :  { %2480 = vmatprep.subr.bf16.mxu0 %v6435_v31  ;;  %v969_v31 = vld [vmem:[#allocation11 + $0x568] sm:$0xff] }
 0x20f   :  { %v6506_v44 = vcombine.low %v965_v30, %v969_v31 }
 0x211   :  { %2481 = vmatpush1.bf16.msra.mxu0 %v6434_v34  ;;  %v6505_v34 = vcombine.high %v964_v28, %v968_v29  ;;  %v1021_v28 = vld [vmem:[#allocation11 + $0x708] sm:$0xff] }
 0x212   :  { %2482 = vmatprep.subr.bf16.mxu0 %v6443_v36  ;;  %v6507_v36 = vcombine.high %v965_v30, %v969_v31  ;;  %v1025_v29 = vld [vmem:[#allocation11 + $0x728] sm:$0xff]  ;;  %v6554_v31 = vcombine.low %v1013_v10, %v1017_v13 }
 0x215   :  { %2483 = vmatpush1.bf16.msra.mxu0 %v6442_v39  ;;  %v973_v39 = vld [vmem:[#allocation11 + $0x588] sm:$0xff] }
 0x216   :  { %2484 = vmatprep.subr.bf16.mxu0 %v6451_v41  ;;  %v977_v41 = vld [vmem:[#allocation11 + $0x5a8] sm:$0xff] }
 0x219   :  { %2485 = vmatpush1.bf16.msra.mxu0 %v6450_v45  ;;  %v6513_v45 = vcombine.high %v972_v37, %v976_v38 }
 0x21a   :  { %2486 = vmatprep.subr.bf16.mxu0 %v6459_v46  ;;  %v6515_v46 = vcombine.high %v973_v39, %v977_v41 }
 0x21d   :  { %2487 = vmatpush1.bf16.msra.mxu0 %v6458_v47  ;;  %v980_v47 = vld [vmem:[#allocation11 + $0x5c0] sm:$0xff] }
 0x21e   :  { %2497 = vmatprep.subr.bf16.mxu0 %v6467_v48  ;;  %v984_v48 = vld [vmem:[#allocation11 + $0x5e0] sm:$0xff] }
 0x273   :  { %v740_v52 = vpop.f32.mrb[4].mxu0 }
 0x274   :  { %v741_v53 = vadd.f32 %v740_v52, %v369_v50  ;;  %v742_v54 = vpop.f32.mrb[5].mxu0  ;;  %v981_v50 = vld [vmem:[#allocation11 + $0x5c8] sm:$0xff]  ;;  %v6512_v52 = vcombine.low %v972_v37, %v976_v38 }
 0x275   :  { %v743_v55 = vadd.f32 %v742_v54, %v373_v51  ;;  %v744_v56 = vpop.f32.mrb[6].mxu0  ;;  %v985_v51 = vld [vmem:[#allocation11 + $0x5e8] sm:$0xff]  ;;  %v6521_v54 = vcombine.high %v980_v47, %v984_v48 }
 0x276   :  { %v788_v57 = vmax.f32 %v741_v53, 0.0  ;;  %v745_v58 = vpop.f32.mrb[7].mxu0  ;;  %v6514_v53 = vcombine.low %v973_v39, %v977_v41  ;;  %v988_v56 = vld [vmem:[#allocation11 + $0x600] sm:$0xff]  ;;  %v6522_v61 = vcombine.low %v981_v50, %v985_v51  ;;  %v1029_v37 = vld [vmem:[#allocation11 + $0x748] sm:$0xff]  ;;  %v6562_v41 = vcombine.low %v1021_v28, %v1025_v29 }
 0x277   :  { %v789_v60 = vmax.f32 %v743_v55, 0.0  ;;  %v6523_v55 = vcombine.high %v981_v50, %v985_v51  ;;  %v989_v58 = vld [vmem:[#allocation11 + $0x608] sm:$0xff]  ;;  %v8447_v50 = vsub.s32 2, %v8396_v35 }
 0x278   :  { %v8434_v1 = vpack.c.bf16 %v788_v57, %v788_v57  ;;  %v992_v57 = vld [vmem:[#allocation11 + $0x620] sm:$0xff]  ;;  %v6531_v63 = vcombine.high %v989_v58, %v993_v59  ;;  %v6530_v7 = vcombine.low %v989_v58, %v993_v59  ;;  %v1033_v38 = vld [vmem:[#allocation11 + $0x768] sm:$0xff] }
 0x279   :  { %v8432_v0 = vpack.c.bf16 %v789_v60, %v789_v60  ;;  %v6520_v60 = vcombine.low %v980_v47, %v984_v48  ;;  %v6529_v62 = vcombine.high %v988_v56, %v992_v57  ;;  %v6528_v6 = vcombine.low %v988_v56, %v992_v57  ;;  %v1037_v47 = vld [vmem:[#allocation11 + $0x788] sm:$0xff]  ;;  %v1044_v56 = vld [vmem:[#allocation11 + $0x7c0] sm:$0xff] }
 0x27a   :  { %v1041_v48 = vld [vmem:[#allocation11 + $0x7a8] sm:$0xff]  ;;  %v1048_v57 = vld [vmem:[#allocation11 + $0x7e0] sm:$0xff] }
 0x27b   :  { %2406 = vmatprep.mubr.bf16.mxu1 %v8432_v0  ;;  %2488 = vmatprep.mubr.bf16.mxu0 %v8432_v0  ;;  %v1045_v58 = vld [vmem:[#allocation11 + $0x7c8] sm:$0xff] }
 0x27c   :  { %2407 = vmatmul.mubr.bf16.vlgmr.msra.gmra.mrb[0].mxu1 %v8434_v1  ;;  %2489 = vmatmul.mubr.bf16.vlgmr.msra.gmra.mrb[12].mxu0 %v8434_v1  ;;  %v1049_v59 = vld [vmem:[#allocation11 + $0x7e8] sm:$0xff] }
 0x27d   :  { %2416 = vmatpush1.bf16.msra.mxu1 %v6464_v16  ;;  %2498 = vmatpush1.bf16.msra.mxu0 %v6466_v17  ;;  %v957_v16 = vld [vmem:[#allocation11 + $0x508] sm:$0xff] }
 0x27e   :  { %2417 = vmatprep.subr.bf16.mxu1 %v6473_v2  ;;  %2499 = vmatprep.subr.bf16.mxu0 %v6475_v3  ;;  %v961_v17 = vld [vmem:[#allocation11 + $0x528] sm:$0xff]  ;;  %v996_v2 = vld [vmem:[#allocation11 + $0x640] sm:$0xff] }
 0x27f   :  { %v6499_v27 = vcombine.high %v957_v16, %v961_v17  ;;  %v6498_v33 = vcombine.low %v957_v16, %v961_v17  ;;  %v1000_v3 = vld [vmem:[#allocation11 + $0x660] sm:$0xff]  ;;  %v6546_v17 = vcombine.low %v1005_v18, %v1009_v19 }
 0x280   :  { %v6536_v20 = vcombine.low %v996_v2, %v1000_v3 }
 0x281   :  { %2418 = vmatpush1.bf16.msra.mxu1 %v6472_v11  ;;  %2500 = vmatpush1.bf16.msra.mxu0 %v6474_v12  ;;  %v6537_v11 = vcombine.high %v996_v2, %v1000_v3  ;;  %v6539_v12 = vcombine.high %v997_v4, %v1001_v5  ;;  %v6585_v2 = vcombine.high %v1044_v56, %v1048_v57  ;;  %v798_v4 = vld [vmem:[#allocation11 + $0x10] sm:$0xff] }
 0x282   :  { %2419 = vmatprep.subr.bf16.mxu1 %v6481_v14  ;;  %2501 = vmatprep.subr.bf16.mxu0 %v6483_v15  ;;  %v1004_v14 = vld [vmem:[#allocation11 + $0x680] sm:$0xff]  ;;  %v6587_v3 = vcombine.high %v1045_v58, %v1049_v59 }
 0x283   :  { %v1008_v15 = vld [vmem:[#allocation11 + $0x6a0] sm:$0xff] }
 0x284   :  { %v6544_v16 = vcombine.low %v1004_v14, %v1008_v15 }
 0x285   :  { %2420 = vmatpush1.bf16.msra.mxu1 %v6480_v22  ;;  %2502 = vmatpush1.bf16.msra.mxu0 %v6482_v23  ;;  %v6545_v22 = vcombine.high %v1004_v14, %v1008_v15  ;;  %v6547_v23 = vcombine.high %v1005_v18, %v1009_v19  ;;  %v6584_v19 = vcombine.low %v1044_v56, %v1048_v57 }
 0x286   :  { %2421 = vmatprep.subr.bf16.mxu1 %v6489_v8  ;;  %2503 = vmatprep.subr.bf16.mxu0 %v6491_v9  ;;  %v1012_v8 = vld [vmem:[#allocation11 + $0x6c0] sm:$0xff] }
 0x287   :  { %v1016_v9 = vld [vmem:[#allocation11 + $0x6e0] sm:$0xff] }
 0x288   :  { %v6552_v30 = vcombine.low %v1012_v8, %v1016_v9 }
 0x289   :  { %2422 = vmatpush1.bf16.msra.mxu1 %v6488_v24  ;;  %2504 = vmatpush1.bf16.msra.mxu0 %v6490_v25  ;;  %v6553_v24 = vcombine.high %v1012_v8, %v1016_v9  ;;  %v6555_v25 = vcombine.high %v1013_v10, %v1017_v13  ;;  %v806_v9 = vld [vmem:[#allocation11 + $0x50] sm:$0xff]  ;;  %v807_v13 = vld [vmem:[#allocation11 + $0x58] sm:$0xff] }
 0x28a   :  { %2423 = vmatprep.subr.bf16.mxu1 %v6497_v26  ;;  %2505 = vmatprep.subr.bf16.mxu0 %v6499_v27  ;;  %v1020_v26 = vld [vmem:[#allocation11 + $0x700] sm:$0xff]  ;;  %v810_v10 = vld [vmem:[#allocation11 + $0x70] sm:$0xff] }
 0x28b   :  { %v1024_v27 = vld [vmem:[#allocation11 + $0x720] sm:$0xff] }
 0x28c   :  { %v6560_v39 = vcombine.low %v1020_v26, %v1024_v27 }
 0x28d   :  { %2424 = vmatpush1.bf16.msra.mxu1 %v6496_v32  ;;  %2506 = vmatpush1.bf16.msra.mxu0 %v6498_v33  ;;  %v6561_v32 = vcombine.high %v1020_v26, %v1024_v27  ;;  %v6563_v33 = vcombine.high %v1021_v28, %v1025_v29  ;;  %v6349_v27 = vcombine.high %v806_v9, %v810_v10  ;;  %v814_v29 = vld [vmem:[#allocation11 + $0x90] sm:$0xff] }
 0x28e   :  { %2425 = vmatprep.subr.bf16.mxu1 %v6505_v34  ;;  %2507 = vmatprep.subr.bf16.mxu0 %v6507_v36  ;;  %v1028_v34 = vld [vmem:[#allocation11 + $0x740] sm:$0xff] }
 0x28f   :  { %v1032_v36 = vld [vmem:[#allocation11 + $0x760] sm:$0xff] }
 0x290   :  { %v6568_v51 = vcombine.low %v1028_v34, %v1032_v36 }
 0x291   :  { %2426 = vmatpush1.bf16.msra.mxu1 %v6504_v42  ;;  %2508 = vmatpush1.bf16.msra.mxu0 %v6506_v44  ;;  %v6569_v42 = vcombine.high %v1028_v34, %v1032_v36  ;;  %v6571_v44 = vcombine.high %v1029_v37, %v1033_v38 }
 0x292   :  { %2427 = vmatprep.subr.bf16.mxu1 %v6513_v45  ;;  %2509 = vmatprep.subr.bf16.mxu0 %v6515_v46  ;;  %v1036_v45 = vld [vmem:[#allocation11 + $0x780] sm:$0xff] }
 0x293   :  { %v1040_v46 = vld [vmem:[#allocation11 + $0x7a0] sm:$0xff] }
 0x295   :  { %2428 = vmatpush1.bf16.msra.mxu1 %v6512_v52  ;;  %2510 = vmatpush1.bf16.msra.mxu0 %v6514_v53  ;;  %v6570_v52 = vcombine.low %v1029_v37, %v1033_v38  ;;  %v8450_v53 = vsub.s32 3, %v8396_v35  ;;  %v822_v38 = vld [vmem:[#allocation11 + $0xd0] sm:$0xff] }
 0x296   :  { %2429 = vmatprep.subr.bf16.mxu1 %v6521_v54  ;;  %2511 = vmatprep.subr.bf16.mxu0 %v6523_v55  ;;  %v6577_v54 = vcombine.high %v1036_v45, %v1040_v46  ;;  %v6579_v55 = vcombine.high %v1037_v47, %v1041_v48 }
 0x299   :  { %2430 = vmatpush1.bf16.msra.mxu1 %v6520_v60  ;;  %2512 = vmatpush1.bf16.msra.mxu0 %v6522_v61  ;;  %v377_v60 = vrot.slane %v8426_v49, %v8447_v50  ;;  %v381_v61 = vrot.slane %v8426_v49, %v8450_v53 }
 0x29a   :  { %2431 = vmatprep.subr.bf16.mxu1 %v6529_v62  ;;  %2513 = vmatprep.subr.bf16.mxu0 %v6531_v63  ;;  %v6576_v62 = vcombine.low %v1036_v45, %v1040_v46  ;;  %v6578_v63 = vcombine.low %v1037_v47, %v1041_v48  ;;  %v830_v48 = vld [vmem:[#allocation11 + $0x110] sm:$0xff] }
 0x29d   :  { %2432 = vmatpush1.bf16.msra.mxu1 %v6528_v6  ;;  %2514 = vmatpush1.bf16.msra.mxu0 %v6530_v7  ;;  %v802_v6 = vld [vmem:[#allocation11 + $0x30] sm:$0xff]  ;;  %v799_v7 = vld [vmem:[#allocation11 + $0x18] sm:$0xff] }
 0x29e   :  { %2433 = vmatprep.subr.bf16.mxu1 %v6537_v11  ;;  %2515 = vmatprep.subr.bf16.mxu0 %v6539_v12  ;;  %v803_v11 = vld [vmem:[#allocation11 + $0x38] sm:$0xff] }
 0x29f   :  { %v6342_v26 = vcombine.low %v799_v7, %v803_v11 }
 0x2a1   :  { %2434 = vmatpush1.bf16.msra.mxu1 %v6536_v20  ;;  %2516 = vmatpush1.bf16.msra.mxu0 %v6538_v21  ;;  %v6586_v20 = vcombine.low %v1045_v58, %v1049_v59  ;;  %v838_v58 = vld [vmem:[#allocation11 + $0x150] sm:$0xff] }
 0x2a2   :  { %2435 = vmatprep.subr.bf16.mxu1 %v6545_v22  ;;  %2517 = vmatprep.subr.bf16.mxu0 %v6547_v23  ;;  %v6341_v22 = vcombine.high %v798_v4, %v802_v6  ;;  %v6343_v23 = vcombine.high %v799_v7, %v803_v11  ;;  %v842_v59 = vld [vmem:[#allocation11 + $0x170] sm:$0xff]  ;;  %v851_v7 = vld [vmem:[#allocation11 + $0x1b8] sm:$0xff] }
 0x2a3   :  { %v6380_v11 = vcombine.low %v838_v58, %v842_v59 }
 0x2a5   :  { %2436 = vmatpush1.bf16.msra.mxu1 %v6544_v16  ;;  %2518 = vmatpush1.bf16.msra.mxu0 %v6546_v17  ;;  %v811_v16 = vld [vmem:[#allocation11 + $0x78] sm:$0xff] }
 0x2a6   :  { %2437 = vmatprep.subr.bf16.mxu1 %v6553_v24  ;;  %2519 = vmatprep.subr.bf16.mxu0 %v6555_v25  ;;  %v6340_v24 = vcombine.low %v798_v4, %v802_v6  ;;  %v6351_v28 = vcombine.high %v807_v13, %v811_v16  ;;  %v6350_v34 = vcombine.low %v807_v13, %v811_v16  ;;  %v846_v4 = vld [vmem:[#allocation11 + $0x190] sm:$0xff]  ;;  %v847_v6 = vld [vmem:[#allocation11 + $0x198] sm:$0xff] }
 0x2a7   :  { %v863_v13 = vld [vmem:[#allocation11 + $0x218] sm:$0xff] }
 0x2a8   :  { %v867_v16 = vld [vmem:[#allocation11 + $0x238] sm:$0xff] }
 0x2a9   :  { %2438 = vmatpush1.bf16.msra.mxu1 %v6552_v30  ;;  %2520 = vmatpush1.bf16.msra.mxu0 %v6554_v31  ;;  %v818_v30 = vld [vmem:[#allocation11 + $0xb0] sm:$0xff]  ;;  %v815_v31 = vld [vmem:[#allocation11 + $0x98] sm:$0xff] }
 0x2aa   :  { %2439 = vmatprep.subr.bf16.mxu1 %v6561_v32  ;;  %2521 = vmatprep.subr.bf16.mxu0 %v6563_v33  ;;  %v819_v32 = vld [vmem:[#allocation11 + $0xb8] sm:$0xff]  ;;  %v6348_v33 = vcombine.low %v806_v9, %v810_v10  ;;  %v6357_v36 = vcombine.high %v814_v29, %v818_v30  ;;  %v862_v9 = vld [vmem:[#allocation11 + $0x210] sm:$0xff] }
 0x2ab   :  { %v6359_v37 = vcombine.high %v815_v31, %v819_v32  ;;  %v6358_v45 = vcombine.low %v815_v31, %v819_v32  ;;  %v866_v10 = vld [vmem:[#allocation11 + $0x230] sm:$0xff]  ;;  %v871_v31 = vld [vmem:[#allocation11 + $0x258] sm:$0xff] }
 0x2ac   :  { %v875_v32 = vld [vmem:[#allocation11 + $0x278] sm:$0xff] }
 0x2ad   :  { %2440 = vmatpush1.bf16.msra.mxu1 %v6560_v39  ;;  %2522 = vmatpush1.bf16.msra.mxu0 %v6562_v41  ;;  %v826_v39 = vld [vmem:[#allocation11 + $0xf0] sm:$0xff]  ;;  %v823_v41 = vld [vmem:[#allocation11 + $0xd8] sm:$0xff] }
 0x2ae   :  { %2441 = vmatprep.subr.bf16.mxu1 %v6569_v42  ;;  %2523 = vmatprep.subr.bf16.mxu0 %v6571_v44  ;;  %v827_v42 = vld [vmem:[#allocation11 + $0xf8] sm:$0xff]  ;;  %v6356_v44 = vcombine.low %v814_v29, %v818_v30  ;;  %v6365_v46 = vcombine.high %v822_v38, %v826_v39  ;;  %v870_v29 = vld [vmem:[#allocation11 + $0x250] sm:$0xff] }
 0x2af   :  { %v6367_v47 = vcombine.high %v823_v41, %v827_v42  ;;  %v874_v30 = vld [vmem:[#allocation11 + $0x270] sm:$0xff] }
 0x2b1   :  { %2442 = vmatpush1.bf16.msra.mxu1 %v6568_v51  ;;  %2524 = vmatpush1.bf16.msra.mxu0 %v6570_v52  ;;  %v834_v51 = vld [vmem:[#allocation11 + $0x130] sm:$0xff]  ;;  %v835_v52 = vld [vmem:[#allocation11 + $0x138] sm:$0xff] }
 0x2b2   :  { %2443 = vmatprep.subr.bf16.mxu1 %v6577_v54  ;;  %2525 = vmatprep.subr.bf16.mxu0 %v6579_v55  ;;  %v6364_v54 = vcombine.low %v822_v38, %v826_v39  ;;  %v6366_v55 = vcombine.low %v823_v41, %v827_v42  ;;  %v6373_v56 = vcombine.high %v830_v48, %v834_v51  ;;  %v878_v38 = vld [vmem:[#allocation11 + $0x290] sm:$0xff]  ;;  %v879_v41 = vld [vmem:[#allocation11 + $0x298] sm:$0xff] }
 0x2b3   :  { %v781_v5 = vpop.f32.mrb[8].mxu0  ;;  %v882_v39 = vld [vmem:[#allocation11 + $0x2b0] sm:$0xff]  ;;  %v883_v42 = vld [vmem:[#allocation11 + $0x2b8] sm:$0xff] }
 0x2b4   :  { %v782_v12 = vadd.f32 %v781_v5, %v377_v60  ;;  %v783_v14 = vpop.f32.mrb[9].mxu0  ;;  %v839_v60 = vld [vmem:[#allocation11 + $0x158] sm:$0xff]  ;;  %v850_v5 = vld [vmem:[#allocation11 + $0x1b0] sm:$0xff] }
 0x2b5   :  { %v784_v15 = vadd.f32 %v783_v14, %v381_v61  ;;  %v785_v18 = vpop.f32.mrb[10].mxu0  ;;  %2444 = vmatpush1.bf16.msra.mxu1 %v6576_v62  ;;  %2526 = vmatpush1.bf16.msra.mxu0 %v6578_v63  ;;  %v843_v61 = vld [vmem:[#allocation11 + $0x178] sm:$0xff]  ;;  %v6372_v62 = vcombine.low %v830_v48, %v834_v51  ;;  %v6389_v14 = vcombine.high %v846_v4, %v850_v5  ;;  %v886_v48 = vld [vmem:[#allocation11 + $0x2d0] sm:$0xff] }
 0x2b6   :  { %v790_v49 = vmax.f32 %v782_v12, 0.0  ;;  %v786_v21 = vpop.f32.mrb[11].mxu0  ;;  %2445 = vmatprep.subr.bf16.mxu1 %v6585_v2  ;;  %2527 = vmatprep.subr.bf16.mxu0 %v6587_v3  ;;  %v6381_v2 = vcombine.high %v838_v58, %v842_v59  ;;  %v6383_v3 = vcombine.high %v839_v60, %v843_v61  ;;  %v6382_v12 = vcombine.low %v839_v60, %v843_v61  ;;  %v854_v18 = vld [vmem:[#allocation11 + $0x1d0] sm:$0xff]  ;;  %v895_v60 = vld [vmem:[#allocation11 + $0x318] sm:$0xff] }
 0x2b7   :  { %v791_v8 = vmax.f32 %v784_v15, 0.0  ;;  %v6391_v15 = vcombine.high %v847_v6, %v851_v7  ;;  %v6388_v21 = vcombine.low %v846_v4, %v850_v5  ;;  %v890_v51 = vld [vmem:[#allocation11 + $0x2f0] sm:$0xff]  ;;  %v899_v61 = vld [vmem:[#allocation11 + $0x338] sm:$0xff] }
 0x2b8   :  { %v8458_v25 = vpack.c.bf16 %v790_v49, %v790_v49  ;;  %v859_v49 = vld [vmem:[#allocation11 + $0x1f8] sm:$0xff]  ;;  %v894_v58 = vld [vmem:[#allocation11 + $0x310] sm:$0xff] }
 0x2b9   :  { %v8456_v17 = vpack.c.bf16 %v791_v8, %v791_v8  ;;  %2446 = vmatpush1.bf16.msra.mxu1 %v6584_v19  ;;  %2528 = vmatpush1.bf16.msra.mxu0 %v6586_v20  ;;  %v858_v19 = vld [vmem:[#allocation11 + $0x1f0] sm:$0xff]  ;;  %v855_v20 = vld [vmem:[#allocation11 + $0x1d8] sm:$0xff] }
 0x2ba   :  { %2538 = vmatprep.subr.bf16.mxu1 %v6341_v22  ;;  %2620 = vmatprep.subr.bf16.mxu0 %v6343_v23  ;;  %v6390_v22 = vcombine.low %v847_v6, %v851_v7  ;;  %v6397_v23 = vcombine.high %v854_v18, %v858_v19  ;;  %v6399_v8 = vcombine.high %v855_v20, %v859_v49  ;;  %v898_v59 = vld [vmem:[#allocation11 + $0x330] sm:$0xff]  ;;  %v903_v6 = vld [vmem:[#allocation11 + $0x358] sm:$0xff] }
 0x2bb   :  { %2447 = vmatprep.mubr.bf16.mxu1 %v8456_v17  ;;  %2529 = vmatprep.mubr.bf16.mxu0 %v8456_v17  ;;  %v902_v4 = vld [vmem:[#allocation11 + $0x350] sm:$0xff]  ;;  %v907_v7 = vld [vmem:[#allocation11 + $0x378] sm:$0xff] }
 0x2bc   :  { %2448 = vmatmul.mubr.bf16.vlgmr.msra.gmra.mrb[0].mxu1 %v8458_v25  ;;  %2530 = vmatmul.mubr.bf16.vlgmr.msra.gmra.mrb[12].mxu0 %v8458_v25  ;;  %v906_v5 = vld [vmem:[#allocation11 + $0x370] sm:$0xff] }
 0x2bd   :  { %2539 = vmatpush1.bf16.msra.mxu1 %v6340_v24  ;;  %2570 = vmatprep.mubr.bf16.mxu1 %v8432_v0  ;;  %v6396_v24 = vcombine.low %v854_v18, %v858_v19  ;;  %v910_v18 = vld [vmem:[#allocation11 + $0x390] sm:$0xff] }
 0x2be   :  { %2621 = vmatpush1.bf16.msra.mxu0 %v6342_v26  ;;  %2652 = vmatprep.mubr.bf16.mxu0 %v8432_v0  ;;  %v831_v0 = vld [vmem:[#allocation11 + $0x118] sm:$0xff]  ;;  %v6398_v26 = vcombine.low %v855_v20, %v859_v49  ;;  %v914_v19 = vld [vmem:[#allocation11 + $0x3b0] sm:$0xff] }
 0x2bf   :  { %2540 = vmatprep.subr.bf16.mxu1 %v6349_v27  ;;  %2622 = vmatprep.subr.bf16.mxu0 %v6351_v28  ;;  %v6375_v57 = vcombine.high %v831_v0, %v835_v52  ;;  %v6374_v63 = vcombine.low %v831_v0, %v835_v52  ;;  %v6405_v27 = vcombine.high %v862_v9, %v866_v10  ;;  %v887_v0 = vld [vmem:[#allocation11 + $0x2d8] sm:$0xff] }
 0x2c0   :  { %v6407_v28 = vcombine.high %v863_v13, %v867_v16  ;;  %v891_v52 = vld [vmem:[#allocation11 + $0x2f8] sm:$0xff] }
 0x2c1   :  { %2541 = vmatpush1.bf16.msra.mxu1 %v6348_v33  ;;  %v6404_v33 = vcombine.low %v862_v9, %v866_v10  ;;  %v911_v20 = vld [vmem:[#allocation11 + $0x398] sm:$0xff]  ;;  %v918_v9 = vld [vmem:[#allocation11 + $0x3d0] sm:$0xff] }
 0x2c2   :  { %2623 = vmatpush1.bf16.msra.mxu0 %v6350_v34  ;;  %2542 = vmatprep.subr.bf16.mxu1 %v6357_v36  ;;  %v6406_v34 = vcombine.low %v863_v13, %v867_v16  ;;  %v6413_v36 = vcombine.high %v870_v29, %v874_v30  ;;  %v915_v49 = vld [vmem:[#allocation11 + $0x3b8] sm:$0xff]  ;;  %v922_v10 = vld [vmem:[#allocation11 + $0x3f0] sm:$0xff] }
 0x2c3   :  { %2624 = vmatprep.subr.bf16.mxu0 %v6359_v37  ;;  %v6415_v37 = vcombine.high %v871_v31, %v875_v32  ;;  %v919_v13 = vld [vmem:[#allocation11 + $0x3d8] sm:$0xff] }
 0x2c4   :  { %v923_v16 = vld [vmem:[#allocation11 + $0x3f8] sm:$0xff] }
 0x2c5   :  { %2543 = vmatpush1.bf16.msra.mxu1 %v6356_v44  ;;  %v6412_v44 = vcombine.low %v870_v29, %v874_v30  ;;  %v926_v29 = vld [vmem:[#allocation11 + $0x410] sm:$0xff] }
 0x2c6   :  { %2625 = vmatpush1.bf16.msra.mxu0 %v6358_v45  ;;  %2544 = vmatprep.subr.bf16.mxu1 %v6365_v46  ;;  %v6414_v45 = vcombine.low %v871_v31, %v875_v32  ;;  %v6421_v46 = vcombine.high %v878_v38, %v882_v39  ;;  %v930_v30 = vld [vmem:[#allocation11 + $0x430] sm:$0xff]  ;;  %v927_v31 = vld [vmem:[#allocation11 + $0x418] sm:$0xff] }
 0x2c7   :  { %2626 = vmatprep.subr.bf16.mxu0 %v6367_v47  ;;  %v6423_v47 = vcombine.high %v879_v41, %v883_v42  ;;  %v931_v32 = vld [vmem:[#allocation11 + $0x438] sm:$0xff] }
 0x2c9   :  { %2545 = vmatpush1.bf16.msra.mxu1 %v6364_v54  ;;  %v6420_v54 = vcombine.low %v878_v38, %v882_v39  ;;  %v934_v38 = vld [vmem:[#allocation11 + $0x450] sm:$0xff] }
 0x2ca   :  { %2627 = vmatpush1.bf16.msra.mxu0 %v6366_v55  ;;  %2546 = vmatprep.subr.bf16.mxu1 %v6373_v56  ;;  %v6422_v55 = vcombine.low %v879_v41, %v883_v42  ;;  %v6429_v56 = vcombine.high %v886_v48, %v890_v51  ;;  %v938_v39 = vld [vmem:[#allocation11 + $0x470] sm:$0xff]  ;;  %v6468_v41 = vcombine.low %v926_v29, %v930_v30  ;;  %v935_v42 = vld [vmem:[#allocation11 + $0x458] sm:$0xff] }
 0x2cb   :  { %2628 = vmatprep.subr.bf16.mxu0 %v6375_v57  ;;  %v6431_v57 = vcombine.high %v887_v0, %v891_v52 }
 0x2cd   :  { %2547 = vmatpush1.bf16.msra.mxu1 %v6372_v62  ;;  %v6428_v62 = vcombine.low %v886_v48, %v890_v51  ;;  %v946_v48 = vld [vmem:[#allocation11 + $0x4b0] sm:$0xff] }
 0x2ce   :  { %2629 = vmatpush1.bf16.msra.mxu0 %v6374_v63  ;;  %2548 = vmatprep.subr.bf16.mxu1 %v6381_v2  ;;  %v6430_v63 = vcombine.low %v887_v0, %v891_v52  ;;  %v6437_v2 = vcombine.high %v894_v58, %v898_v59  ;;  %v943_v0 = vld [vmem:[#allocation11 + $0x498] sm:$0xff] }
 0x2cf   :  { %2630 = vmatprep.subr.bf16.mxu0 %v6383_v3  ;;  %v6439_v3 = vcombine.high %v895_v60, %v899_v61  ;;  %v947_v52 = vld [vmem:[#allocation11 + $0x4b8] sm:$0xff] }
 0x2d1   :  { %2549 = vmatpush1.bf16.msra.mxu1 %v6380_v11  ;;  %v6436_v11 = vcombine.low %v894_v58, %v898_v59  ;;  %v950_v58 = vld [vmem:[#allocation11 + $0x4d0] sm:$0xff] }
 0x2d2   :  { %2631 = vmatpush1.bf16.msra.mxu0 %v6382_v12  ;;  %2550 = vmatprep.subr.bf16.mxu1 %v6389_v14  ;;  %v6438_v12 = vcombine.low %v895_v60, %v899_v61  ;;  %v6445_v14 = vcombine.high %v902_v4, %v906_v5  ;;  %v954_v59 = vld [vmem:[#allocation11 + $0x4f0] sm:$0xff]  ;;  %v951_v60 = vld [vmem:[#allocation11 + $0x4d8] sm:$0xff] }
 0x2d3   :  { %2632 = vmatprep.subr.bf16.mxu0 %v6391_v15  ;;  %v6447_v15 = vcombine.high %v903_v6, %v907_v7  ;;  %v955_v61 = vld [vmem:[#allocation11 + $0x4f8] sm:$0xff] }
 0x2d5   :  { %2551 = vmatpush1.bf16.msra.mxu1 %v6388_v21  ;;  %v6444_v21 = vcombine.low %v902_v4, %v906_v5  ;;  %v962_v4 = vld [vmem:[#allocation11 + $0x530] sm:$0xff]  ;;  %v959_v5 = vld [vmem:[#allocation11 + $0x518] sm:$0xff] }
 0x2d6   :  { %2633 = vmatpush1.bf16.msra.mxu0 %v6390_v22  ;;  %2552 = vmatprep.subr.bf16.mxu1 %v6397_v23  ;;  %v6446_v22 = vcombine.low %v903_v6, %v907_v7  ;;  %v6453_v23 = vcombine.high %v910_v18, %v914_v19  ;;  %v963_v6 = vld [vmem:[#allocation11 + $0x538] sm:$0xff]  ;;  %v6494_v7 = vcombine.low %v951_v60, %v955_v61 }
 0x2d7   :  { %2634 = vmatprep.subr.bf16.mxu0 %v6399_v8  ;;  %v6455_v8 = vcombine.high %v911_v20, %v915_v49 }
 0x2d9   :  { %2553 = vmatpush1.bf16.msra.mxu1 %v6396_v24  ;;  %v6452_v24 = vcombine.low %v910_v18, %v914_v19  ;;  %v967_v18 = vld [vmem:[#allocation11 + $0x558] sm:$0xff] }
 0x2da   :  { %2635 = vmatpush1.bf16.msra.mxu0 %v6398_v26  ;;  %2554 = vmatprep.subr.bf16.mxu1 %v6405_v27  ;;  %v6454_v26 = vcombine.low %v911_v20, %v915_v49  ;;  %v6461_v27 = vcombine.high %v918_v9, %v922_v10  ;;  %v971_v19 = vld [vmem:[#allocation11 + $0x578] sm:$0xff]  ;;  %v6502_v49 = vcombine.low %v959_v5, %v963_v6 }
 0x2db   :  { %2636 = vmatprep.subr.bf16.mxu0 %v6407_v28  ;;  %v6463_v28 = vcombine.high %v919_v13, %v923_v16 }
 0x2dd   :  { %2555 = vmatpush1.bf16.msra.mxu1 %v6404_v33  ;;  %v6460_v33 = vcombine.low %v918_v9, %v922_v10  ;;  %v975_v9 = vld [vmem:[#allocation11 + $0x598] sm:$0xff] }
 0x2de   :  { %2637 = vmatpush1.bf16.msra.mxu0 %v6406_v34  ;;  %2556 = vmatprep.subr.bf16.mxu1 %v6413_v36  ;;  %v6462_v34 = vcombine.low %v919_v13, %v923_v16  ;;  %v6469_v36 = vcombine.high %v926_v29, %v930_v30  ;;  %v979_v10 = vld [vmem:[#allocation11 + $0x5b8] sm:$0xff]  ;;  %v6510_v16 = vcombine.low %v967_v18, %v971_v19 }
 0x2df   :  { %2638 = vmatprep.subr.bf16.mxu0 %v6415_v37  ;;  %v6471_v37 = vcombine.high %v927_v31, %v931_v32  ;;  %v983_v29 = vld [vmem:[#allocation11 + $0x5d8] sm:$0xff] }
 0x2e0   :  { %v987_v30 = vld [vmem:[#allocation11 + $0x5f8] sm:$0xff] }
 0x2e1   :  { %2557 = vmatpush1.bf16.msra.mxu1 %v6412_v44  ;;  %v939_v44 = vld [vmem:[#allocation11 + $0x478] sm:$0xff] }
 0x2e2   :  { %2639 = vmatpush1.bf16.msra.mxu0 %v6414_v45  ;;  %2558 = vmatprep.subr.bf16.mxu1 %v6421_v46  ;;  %v6470_v45 = vcombine.low %v927_v31, %v931_v32  ;;  %v6477_v46 = vcombine.high %v934_v38, %v938_v39  ;;  %v6479_v51 = vcombine.high %v935_v42, %v939_v44 }
 0x2e3   :  { %2640 = vmatprep.subr.bf16.mxu0 %v6423_v47  ;;  %v942_v47 = vld [vmem:[#allocation11 + $0x490] sm:$0xff]  ;;  %v6518_v32 = vcombine.low %v975_v9, %v979_v10 }
 0x2e5   :  { %2559 = vmatpush1.bf16.msra.mxu1 %v6420_v54  ;;  %v6476_v54 = vcombine.low %v934_v38, %v938_v39  ;;  %v991_v38 = vld [vmem:[#allocation11 + $0x618] sm:$0xff] }
 0x2e6   :  { %2641 = vmatpush1.bf16.msra.mxu0 %v6422_v55  ;;  %2560 = vmatprep.subr.bf16.mxu1 %v6429_v56  ;;  %v6478_v55 = vcombine.low %v935_v42, %v939_v44  ;;  %v6485_v56 = vcombine.high %v942_v47, %v946_v48  ;;  %v995_v39 = vld [vmem:[#allocation11 + $0x638] sm:$0xff]  ;;  %v6526_v42 = vcombine.low %v983_v29, %v987_v30 }
 0x2e7   :  { %2642 = vmatprep.subr.bf16.mxu0 %v6431_v57  ;;  %v6487_v57 = vcombine.high %v943_v0, %v947_v52 }
 0x2e9   :  { %2561 = vmatpush1.bf16.msra.mxu1 %v6428_v62  ;;  %v6484_v62 = vcombine.low %v942_v47, %v946_v48  ;;  %v1002_v47 = vld [vmem:[#allocation11 + $0x670] sm:$0xff]  ;;  %v999_v48 = vld [vmem:[#allocation11 + $0x658] sm:$0xff] }
 0x2ea   :  { %2643 = vmatpush1.bf16.msra.mxu0 %v6430_v63  ;;  %2562 = vmatprep.subr.bf16.mxu1 %v6437_v2  ;;  %v6493_v63 = vcombine.high %v950_v58, %v954_v59  ;;  %v6495_v2 = vcombine.high %v951_v60, %v955_v61 }
 0x2eb   :  { %2644 = vmatprep.subr.bf16.mxu0 %v6439_v3  ;;  %v958_v3 = vld [vmem:[#allocation11 + $0x510] sm:$0xff] }
 0x2ec   :  { %v6500_v20 = vcombine.low %v958_v3, %v962_v4 }
 0x2ed   :  { %2563 = vmatpush1.bf16.msra.mxu1 %v6436_v11  ;;  %v6501_v11 = vcombine.high %v958_v3, %v962_v4  ;;  %v1015_v3 = vld [vmem:[#allocation11 + $0x6d8] sm:$0xff] }
 0x2ee   :  { %2645 = vmatpush1.bf16.msra.mxu0 %v6438_v12  ;;  %2564 = vmatprep.subr.bf16.mxu1 %v6445_v14  ;;  %v6503_v12 = vcombine.high %v959_v5, %v963_v6  ;;  %v966_v14 = vld [vmem:[#allocation11 + $0x550] sm:$0xff]  ;;  %v1019_v4 = vld [vmem:[#allocation11 + $0x6f8] sm:$0xff] }
 0x2ef   :  { %2646 = vmatprep.subr.bf16.mxu0 %v6447_v15  ;;  %v970_v15 = vld [vmem:[#allocation11 + $0x570] sm:$0xff] }
 0x2f0   :  { %v6508_v13 = vcombine.low %v966_v14, %v970_v15 }
 0x2f1   :  { %2565 = vmatpush1.bf16.msra.mxu1 %v6444_v21  ;;  %v6509_v21 = vcombine.high %v966_v14, %v970_v15  ;;  %v1023_v14 = vld [vmem:[#allocation11 + $0x718] sm:$0xff] }
 0x2f2   :  { %2647 = vmatpush1.bf16.msra.mxu0 %v6446_v22  ;;  %2566 = vmatprep.subr.bf16.mxu1 %v6453_v23  ;;  %v6511_v22 = vcombine.high %v967_v18, %v971_v19  ;;  %v974_v23 = vld [vmem:[#allocation11 + $0x590] sm:$0xff]  ;;  %v1027_v15 = vld [vmem:[#allocation11 + $0x738] sm:$0xff]  ;;  %v6558_v19 = vcombine.low %v1015_v3, %v1019_v4 }
 0x2f3   :  { %2648 = vmatprep.subr.bf16.mxu0 %v6455_v8  ;;  %v978_v8 = vld [vmem:[#allocation11 + $0x5b0] sm:$0xff] }
 0x2f4   :  { %v6516_v31 = vcombine.low %v974_v23, %v978_v8 }
 0x2f5   :  { %2567 = vmatpush1.bf16.msra.mxu1 %v6452_v24  ;;  %v6517_v24 = vcombine.high %v974_v23, %v978_v8  ;;  %v1031_v23 = vld [vmem:[#allocation11 + $0x758] sm:$0xff] }
 0x2f6   :  { %2649 = vmatpush1.bf16.msra.mxu0 %v6454_v26  ;;  %2568 = vmatprep.subr.bf16.mxu1 %v6461_v27  ;;  %v6519_v26 = vcombine.high %v975_v9, %v979_v10  ;;  %v982_v27 = vld [vmem:[#allocation11 + $0x5d0] sm:$0xff]  ;;  %v1035_v8 = vld [vmem:[#allocation11 + $0x778] sm:$0xff]  ;;  %v6566_v10 = vcombine.low %v1023_v14, %v1027_v15 }
 0x2f7   :  { %2650 = vmatprep.subr.bf16.mxu0 %v6463_v28  ;;  %v986_v28 = vld [vmem:[#allocation11 + $0x5f0] sm:$0xff] }
 0x2f9   :  { %2569 = vmatpush1.bf16.msra.mxu1 %v6460_v33  ;;  %v6525_v33 = vcombine.high %v982_v27, %v986_v28 }
 0x2fa   :  { %2651 = vmatpush1.bf16.msra.mxu0 %v6462_v34  ;;  %2579 = vmatprep.subr.bf16.mxu1 %v6469_v36  ;;  %v6527_v34 = vcombine.high %v983_v29, %v987_v30  ;;  %v990_v36 = vld [vmem:[#allocation11 + $0x610] sm:$0xff]  ;;  %v6574_v30 = vcombine.low %v1031_v23, %v1035_v8 }
 0x2fb   :  { %2661 = vmatprep.subr.bf16.mxu0 %v6471_v37  ;;  %v994_v37 = vld [vmem:[#allocation11 + $0x630] sm:$0xff] }
 0x2fc   :  { %2571 = vmatmul.mubr.bf16.vlgmr.msra.gmra.mrb[4].mxu1 %v8434_v1  ;;  %v6533_v44 = vcombine.high %v990_v36, %v994_v37 }
 0x2fd   :  { %2653 = vmatmul.mubr.bf16.vlgmr.msra.gmra.mrb[16].mxu0 %v8434_v1  ;;  %2580 = vmatpush1.bf16.msra.mxu1 %v6468_v41  ;;  %v6486_v1 = vcombine.low %v943_v0, %v947_v52  ;;  %v6524_v41 = vcombine.low %v982_v27, %v986_v28  ;;  %v6532_v0 = vcombine.low %v990_v36, %v994_v37  ;;  %v1039_v27 = vld [vmem:[#allocation11 + $0x798] sm:$0xff] }
 0x2fe   :  { %2611 = vmatprep.mubr.bf16.mxu1 %v8456_v17  ;;  %2662 = vmatpush1.bf16.msra.mxu0 %v6470_v45  ;;  %v6535_v45 = vcombine.high %v991_v38, %v995_v39  ;;  %v6534_v52 = vcombine.low %v991_v38, %v995_v39  ;;  %v1043_v28 = vld [vmem:[#allocation11 + $0x7b8] sm:$0xff] }
 0x2ff   :  { %2693 = vmatprep.mubr.bf16.mxu0 %v8456_v17  ;;  %2581 = vmatprep.subr.bf16.mxu1 %v6477_v46  ;;  %v6492_v17 = vcombine.low %v950_v58, %v954_v59  ;;  %v998_v46 = vld [vmem:[#allocation11 + $0x650] sm:$0xff]  ;;  %v1007_v58 = vld [vmem:[#allocation11 + $0x698] sm:$0xff]  ;;  %v6582_v39 = vcombine.low %v1039_v27, %v1043_v28 }
 0x300   :  { %2663 = vmatprep.subr.bf16.mxu0 %v6479_v51  ;;  %v1003_v51 = vld [vmem:[#allocation11 + $0x678] sm:$0xff]  ;;  %v6540_v60 = vcombine.low %v998_v46, %v1002_v47 }
 0x301   :  { %2582 = vmatpush1.bf16.msra.mxu1 %v6476_v54  ;;  %v6541_v54 = vcombine.high %v998_v46, %v1002_v47  ;;  %v1011_v59 = vld [vmem:[#allocation11 + $0x6b8] sm:$0xff]  ;;  %v6542_v61 = vcombine.low %v999_v48, %v1003_v51  ;;  %v7335_v46 = vld [vmem:[#allocation14 + $0x4] ss:$28 sps:$4 sm:$0xff]   ;;  %v7338_v47 = vld [vmem:[#allocation14 + $0xc] ss:$28 sps:$4 sm:$0xff]  }
 0x302   :  { %2664 = vmatpush1.bf16.msra.mxu0 %v6478_v55  ;;  %2583 = vmatprep.subr.bf16.mxu1 %v6485_v56  ;;  %v6543_v55 = vcombine.high %v999_v48, %v1003_v51  ;;  %v1006_v56 = vld [vmem:[#allocation11 + $0x690] sm:$0xff]  ;;  %v6550_v6 = vcombine.low %v1007_v58, %v1011_v59  ;;  %v1047_v36 = vld [vmem:[#allocation11 + $0x7d8] sm:$0xff]  ;;  %v7333_v48 = vld [vmem:[#allocation14] ss:$28 sps:$4 sm:$0xff]  }
 0x303   :  { %2665 = vmatprep.subr.bf16.mxu0 %v6487_v57  ;;  %v1010_v57 = vld [vmem:[#allocation11 + $0x6b0] sm:$0xff]  ;;  %v1051_v37 = vld [vmem:[#allocation11 + $0x7f8] sm:$0xff] }
 0x304   :  { %v6548_v5 = vcombine.low %v1006_v56, %v1010_v57  ;;  %v7336_v51 = vld [vmem:[#allocation14 + $0x8] ss:$28 sps:$4 sm:$0xff]  }
 0x305   :  { %2584 = vmatpush1.bf16.msra.mxu1 %v6484_v62  ;;  %v6549_v62 = vcombine.high %v1006_v56, %v1010_v57  ;;  %v7347_v56 = vld [vmem:[#allocation14 + $0x74] ss:$28 sps:$4 sm:$0xff]   ;;  %v7350_v57 = vld [vmem:[#allocation14 + $0x7c] ss:$28 sps:$4 sm:$0xff]  }
 0x306   :  { %2666 = vmatpush1.bf16.msra.mxu0 %v6486_v1  ;;  %2585 = vmatprep.subr.bf16.mxu1 %v6493_v63  ;;  %v6551_v1 = vcombine.high %v1007_v58, %v1011_v59  ;;  %v1014_v63 = vld [vmem:[#allocation11 + $0x6d0] sm:$0xff]  ;;  %v7348_v59 = vld [vmem:[#allocation14 + $0x78] ss:$28 sps:$4 sm:$0xff]  }
 0x307   :  { %2667 = vmatprep.subr.bf16.mxu0 %v6495_v2  ;;  %v1018_v2 = vld [vmem:[#allocation11 + $0x6f0] sm:$0xff] }
 0x308   :  { %v6556_v18 = vcombine.low %v1014_v63, %v1018_v2  ;;  %v7345_v58 = vld [vmem:[#allocation14 + $0x70] ss:$28 sps:$4 sm:$0xff]  }
 0x309   :  { %2586 = vmatpush1.bf16.msra.mxu1 %v6492_v17  ;;  %v6557_v17 = vcombine.high %v1014_v63, %v1018_v2  ;;  %v7362_v63 = vld [vmem:[#allocation14 + $0xec] ss:$28 sps:$4 sm:$0xff]   ;;  %v7357_v2 = vld [vmem:[#allocation14 + $0xe0] ss:$28 sps:$4 sm:$0xff]  }
 0x30a   :  { %2668 = vmatpush1.bf16.msra.mxu0 %v6494_v7  ;;  %2587 = vmatprep.subr.bf16.mxu1 %v6501_v11  ;;  %v6559_v7 = vcombine.high %v1015_v3, %v1019_v4  ;;  %v1022_v11 = vld [vmem:[#allocation11 + $0x710] sm:$0xff]  ;;  %v7365_v4 = vld [vmem:[#allocation14 + $0x11c] ss:$28 sps:$4 sm:$0xff]  }
 0x30b   :  { %2669 = vmatprep.subr.bf16.mxu0 %v6503_v12  ;;  %v1026_v12 = vld [vmem:[#allocation11 + $0x730] sm:$0xff] }
 0x30c   :  { %v6564_v9 = vcombine.low %v1022_v11, %v1026_v12  ;;  %v7360_v3 = vld [vmem:[#allocation14 + $0xe8] ss:$28 sps:$4 sm:$0xff]  }
 0x30d   :  { %2588 = vmatpush1.bf16.msra.mxu1 %v6500_v20  ;;  %v6565_v20 = vcombine.high %v1022_v11, %v1026_v12  ;;  %v7374_v11 = vld [vmem:[#allocation14 + $0x15c] ss:$28 sps:$4 sm:$0xff]   ;;  %v7369_v12 = vld [vmem:[#allocation14 + $0x150] ss:$28 sps:$4 sm:$0xff]  }
 0x30e   :  { %2670 = vmatpush1.bf16.msra.mxu0 %v6502_v49  ;;  %2589 = vmatprep.subr.bf16.mxu1 %v6509_v21  ;;  %v6567_v49 = vcombine.high %v1023_v14, %v1027_v15  ;;  %v1030_v21 = vld [vmem:[#allocation11 + $0x750] sm:$0xff]  ;;  %v7372_v14 = vld [vmem:[#allocation14 + $0x158] ss:$28 sps:$4 sm:$0xff]  }
 0x30f   :  { %2671 = vmatprep.subr.bf16.mxu0 %v6511_v22  ;;  %v1034_v22 = vld [vmem:[#allocation11 + $0x770] sm:$0xff] }
 0x310   :  { %v6572_v29 = vcombine.low %v1030_v21, %v1034_v22  ;;  %v7377_v15 = vld [vmem:[#allocation14 + $0x18c] ss:$28 sps:$4 sm:$0xff]  }
 0x311   :  { %2590 = vmatpush1.bf16.msra.mxu1 %v6508_v13  ;;  %v6573_v13 = vcombine.high %v1030_v21, %v1034_v22  ;;  %v7386_v21 = vld [vmem:[#allocation14 + $0x1cc] ss:$28 sps:$4 sm:$0xff]   ;;  %v7381_v22 = vld [vmem:[#allocation14 + $0x1c0] ss:$28 sps:$4 sm:$0xff]  }
 0x312   :  { %2672 = vmatpush1.bf16.msra.mxu0 %v6510_v16  ;;  %2591 = vmatprep.subr.bf16.mxu1 %v6517_v24  ;;  %v6575_v16 = vcombine.high %v1031_v23, %v1035_v8  ;;  %v1038_v24 = vld [vmem:[#allocation11 + $0x790] sm:$0xff]  ;;  %v7389_v8 = vld [vmem:[#allocation14 + $0x1fc] ss:$28 sps:$4 sm:$0xff]  }
 0x313   :  { %2673 = vmatprep.subr.bf16.mxu0 %v6519_v26  ;;  %v1042_v26 = vld [vmem:[#allocation11 + $0x7b0] sm:$0xff] }
 0x314   :  { %v6580_v38 = vcombine.low %v1038_v24, %v1042_v26  ;;  %v7384_v23 = vld [vmem:[#allocation14 + $0x1c8] ss:$28 sps:$4 sm:$0xff]  }
 0x315   :  { %2592 = vmatpush1.bf16.msra.mxu1 %v6516_v31  ;;  %v6581_v31 = vcombine.high %v1038_v24, %v1042_v26  ;;  %v7398_v24 = vld [vmem:[#allocation14 + $0x23c] ss:$28 sps:$4 sm:$0xff]   ;;  %v7393_v26 = vld [vmem:[#allocation14 + $0x230] ss:$28 sps:$4 sm:$0xff]  }
 0x316   :  { %2674 = vmatpush1.bf16.msra.mxu0 %v6518_v32  ;;  %2593 = vmatprep.subr.bf16.mxu1 %v6525_v33  ;;  %v6583_v32 = vcombine.high %v1039_v27, %v1043_v28  ;;  %v1046_v33 = vld [vmem:[#allocation11 + $0x7d0] sm:$0xff]  ;;  %v7396_v27 = vld [vmem:[#allocation14 + $0x238] ss:$28 sps:$4 sm:$0xff]  }
 0x317   :  { %2675 = vmatprep.subr.bf16.mxu0 %v6527_v34  ;;  %v1050_v34 = vld [vmem:[#allocation11 + $0x7f0] sm:$0xff] }
 0x318   :  { %v7401_v28 = vld [vmem:[#allocation14 + $0x26c] ss:$28 sps:$4 sm:$0xff]  }
 0x319   :  { %2594 = vmatpush1.bf16.msra.mxu1 %v6524_v41  ;;  %v6589_v41 = vcombine.high %v1046_v33, %v1050_v34 }
 0x31a   :  { %2676 = vmatpush1.bf16.msra.mxu0 %v6526_v42  ;;  %2595 = vmatprep.subr.bf16.mxu1 %v6533_v44  ;;  %v6591_v42 = vcombine.high %v1047_v36, %v1051_v37  ;;  %v6588_v44 = vcombine.low %v1046_v33, %v1050_v34  ;;  %v7410_v33 = vld [vmem:[#allocation14 + $0x2ac] ss:$28 sps:$4 sm:$0xff]   ;;  %v7405_v34 = vld [vmem:[#allocation14 + $0x2a0] ss:$28 sps:$4 sm:$0xff]  }
 0x31b   :  { %2677 = vmatprep.subr.bf16.mxu0 %v6535_v45  ;;  %v6590_v45 = vcombine.low %v1047_v36, %v1051_v37  ;;  %v7408_v36 = vld [vmem:[#allocation14 + $0x2a8] ss:$28 sps:$4 sm:$0xff]   ;;  %v7413_v37 = vld [vmem:[#allocation14 + $0x2dc] ss:$28 sps:$4 sm:$0xff]  }
 0x31d   :  { %2596 = vmatpush1.bf16.msra.mxu1 %v6532_v0  ;;  %v7341_v0 = vld [vmem:[#allocation14 + $0x3c] ss:$28 sps:$4 sm:$0xff]  }
 0x31e   :  { %2678 = vmatpush1.bf16.msra.mxu0 %v6534_v52  ;;  %2597 = vmatprep.subr.bf16.mxu1 %v6541_v54  ;;  %v7344_v52 = vld [vmem:[#allocation14 + $0x44] ss:$28 sps:$4 sm:$0xff]   ;;  %v7339_v54 = vld [vmem:[#allocation14 + $0x38] ss:$28 sps:$4 sm:$0xff]  }
 0x31f   :  { %2679 = vmatprep.subr.bf16.mxu0 %v6543_v55  ;;  %v7342_v55 = vld [vmem:[#allocation14 + $0x40] ss:$28 sps:$4 sm:$0xff]  }
 0x321   :  { %2598 = vmatpush1.bf16.msra.mxu1 %v6540_v60  ;;  %v7353_v60 = vld [vmem:[#allocation14 + $0xac] ss:$28 sps:$4 sm:$0xff]  }
 0x322   :  { %2680 = vmatpush1.bf16.msra.mxu0 %v6542_v61  ;;  %2599 = vmatprep.subr.bf16.mxu1 %v6549_v62  ;;  %v7356_v61 = vld [vmem:[#allocation14 + $0xb4] ss:$28 sps:$4 sm:$0xff]   ;;  %v7351_v62 = vld [vmem:[#allocation14 + $0xa8] ss:$28 sps:$4 sm:$0xff]  }
 0x323   :  { %2681 = vmatprep.subr.bf16.mxu0 %v6551_v1  ;;  %v7359_v1 = vld [vmem:[#allocation14 + $0xe4] ss:$28 sps:$4 sm:$0xff]  }
 0x325   :  { %2600 = vmatpush1.bf16.msra.mxu1 %v6548_v5  ;;  %v7368_v5 = vld [vmem:[#allocation14 + $0x124] ss:$28 sps:$4 sm:$0xff]  }
 0x326   :  { %2682 = vmatpush1.bf16.msra.mxu0 %v6550_v6  ;;  %2601 = vmatprep.subr.bf16.mxu1 %v6557_v17  ;;  %v7363_v6 = vld [vmem:[#allocation14 + $0x118] ss:$28 sps:$4 sm:$0xff]   ;;  %v7366_v17 = vld [vmem:[#allocation14 + $0x120] ss:$28 sps:$4 sm:$0xff]  }
 0x327   :  { %2683 = vmatprep.subr.bf16.mxu0 %v6559_v7  ;;  %v7371_v7 = vld [vmem:[#allocation14 + $0x154] ss:$28 sps:$4 sm:$0xff]  }
 0x329   :  { %2602 = vmatpush1.bf16.msra.mxu1 %v6556_v18  ;;  %v7380_v18 = vld [vmem:[#allocation14 + $0x194] ss:$28 sps:$4 sm:$0xff]  }
 0x32a   :  { %2684 = vmatpush1.bf16.msra.mxu0 %v6558_v19  ;;  %2603 = vmatprep.subr.bf16.mxu1 %v6565_v20  ;;  %v7375_v19 = vld [vmem:[#allocation14 + $0x188] ss:$28 sps:$4 sm:$0xff]   ;;  %v7378_v20 = vld [vmem:[#allocation14 + $0x190] ss:$28 sps:$4 sm:$0xff]  }
 0x32b   :  { %2685 = vmatprep.subr.bf16.mxu0 %v6567_v49  ;;  %v7383_v49 = vld [vmem:[#allocation14 + $0x1c4] ss:$28 sps:$4 sm:$0xff]  }
 0x32d   :  { %2604 = vmatpush1.bf16.msra.mxu1 %v6564_v9  ;;  %v7392_v9 = vld [vmem:[#allocation14 + $0x204] ss:$28 sps:$4 sm:$0xff]  }
 0x32e   :  { %2686 = vmatpush1.bf16.msra.mxu0 %v6566_v10  ;;  %2605 = vmatprep.subr.bf16.mxu1 %v6573_v13  ;;  %v7387_v10 = vld [vmem:[#allocation14 + $0x1f8] ss:$28 sps:$4 sm:$0xff]   ;;  %v7390_v13 = vld [vmem:[#allocation14 + $0x200] ss:$28 sps:$4 sm:$0xff]  }
 0x32f   :  { %2687 = vmatprep.subr.bf16.mxu0 %v6575_v16  ;;  %v7395_v16 = vld [vmem:[#allocation14 + $0x234] ss:$28 sps:$4 sm:$0xff]  }
 0x331   :  { %2606 = vmatpush1.bf16.msra.mxu1 %v6572_v29  ;;  %v7404_v29 = vld [vmem:[#allocation14 + $0x274] ss:$28 sps:$4 sm:$0xff]  }
 0x332   :  { %2688 = vmatpush1.bf16.msra.mxu0 %v6574_v30  ;;  %2607 = vmatprep.subr.bf16.mxu1 %v6581_v31  ;;  %v7399_v30 = vld [vmem:[#allocation14 + $0x268] ss:$28 sps:$4 sm:$0xff]   ;;  %v7402_v31 = vld [vmem:[#allocation14 + $0x270] ss:$28 sps:$4 sm:$0xff]  }
 0x333   :  { %2689 = vmatprep.subr.bf16.mxu0 %v6583_v32  ;;  %v7407_v32 = vld [vmem:[#allocation14 + $0x2a4] ss:$28 sps:$4 sm:$0xff]  }
 0x335   :  { %2608 = vmatpush1.bf16.msra.mxu1 %v6580_v38  ;;  %v7416_v38 = vld [vmem:[#allocation14 + $0x2e4] ss:$28 sps:$4 sm:$0xff]  }
 0x336   :  { %2690 = vmatpush1.bf16.msra.mxu0 %v6582_v39  ;;  %2609 = vmatprep.subr.bf16.mxu1 %v6589_v41  ;;  %v7411_v39 = vld [vmem:[#allocation14 + $0x2d8] ss:$28 sps:$4 sm:$0xff]   ;;  %v7414_v41 = vld [vmem:[#allocation14 + $0x2e0] ss:$28 sps:$4 sm:$0xff]  }
 0x337   :  { %2691 = vmatprep.subr.bf16.mxu0 %v6591_v42  ;;  %v7419_v42 = vld [vmem:[#allocation14 + $0x314] ss:$28 sps:$4 sm:$0xff]  }
 0x339   :  { %2610 = vmatpush1.bf16.msra.mxu1 %v6588_v44  ;;  %v7422_v44 = vld [vmem:[#allocation14 + $0x31c] ss:$28 sps:$4 sm:$0xff]  }
 0x33a   :  { %2692 = vmatpush1.bf16.msra.mxu0 %v6590_v45  ;;  %5571 = vmatprep.subr.bf16.mxu1 %v7335_v46  ;;  %v7417_v45 = vld [vmem:[#allocation14 + $0x310] ss:$28 sps:$4 sm:$0xff]   ;;  %v7420_v46 = vld [vmem:[#allocation14 + $0x318] ss:$28 sps:$4 sm:$0xff]  }
 0x33b   :  { %5735 = vmatprep.subr.bf16.mxu0 %v7338_v47  ;;  %v7425_v47 = vld [vmem:[#allocation14 + $0x34c] ss:$28 sps:$4 sm:$0xff]  }
 0x33c   :  { %2612 = vmatmul.mubr.bf16.vlgmr.msra.gmra.mrb[4].mxu1 %v8458_v25 }
 0x33d   :  { %2694 = vmatmul.mubr.bf16.vlgmr.msra.gmra.mrb[16].mxu0 %v8458_v25  ;;  %5572 = vmatpush1.bf16.msra.mxu1 %v7333_v48  ;;  %v7354_v25 = vld [vmem:[#allocation14 + $0xb0] ss:$28 sps:$4 sm:$0xff]  }
 0x33e   :  { %5736 = vmatpush1.bf16.msra.mxu0 %v7336_v51  ;;  %5573 = vmatprep.subr.bf16.mxu1 %v7341_v0  ;;  %v7428_v48 = vld [vmem:[#allocation14 + $0x354] ss:$28 sps:$4 sm:$0xff]   ;;  %v7423_v51 = vld [vmem:[#allocation14 + $0x348] ss:$28 sps:$4 sm:$0xff]  }
 0x33f   :  { %5737 = vmatprep.subr.bf16.mxu0 %v7344_v52  ;;  %v7426_v0 = vld [vmem:[#allocation14 + $0x350] ss:$28 sps:$4 sm:$0xff]   ;;  %v7431_v52 = vld [vmem:[#allocation14 + $0x384] ss:$28 sps:$4 sm:$0xff]  }
 0x341   :  { %5574 = vmatpush1.bf16.msra.mxu1 %v7339_v54  ;;  %v7434_v54 = vld [vmem:[#allocation14 + $0x38c] ss:$28 sps:$4 sm:$0xff]  }
 0x342   :  { %5738 = vmatpush1.bf16.msra.mxu0 %v7342_v55  ;;  %5575 = vmatprep.subr.bf16.mxu1 %v7347_v56  ;;  %v8472_v55 = vld [vmem:[#allocation13] sm:$0xff] }
 0x343   :  { %5739 = vmatprep.subr.bf16.mxu0 %v7350_v57  ;;  %v1057_v56 = vrot.slane %v8472_v55, %v8399_v40  ;;  %v1061_v57 = vrot.slane %v8472_v55, %v8402_v43 }
 0x345   :  { %5576 = vmatpush1.bf16.msra.mxu1 %v7345_v58  ;;  %v1069_v58 = vrot.slane %v8472_v55, %v8450_v53 }
 0x346   :  { %5740 = vmatpush1.bf16.msra.mxu0 %v7348_v59  ;;  %5577 = vmatprep.subr.bf16.mxu1 %v7353_v60 }
 0x347   :  { %5741 = vmatprep.subr.bf16.mxu0 %v7356_v61 }
 0x349   :  { %5578 = vmatpush1.bf16.msra.mxu1 %v7351_v62 }
 0x34a   :  { %5742 = vmatpush1.bf16.msra.mxu0 %v7354_v25  ;;  %5579 = vmatprep.subr.bf16.mxu1 %v7359_v1 }
 0x34b   :  { %5743 = vmatprep.subr.bf16.mxu0 %v7362_v63 }
 0x34d   :  { %5580 = vmatpush1.bf16.msra.mxu1 %v7357_v2 }
 0x34e   :  { %5744 = vmatpush1.bf16.msra.mxu0 %v7360_v3  ;;  %5581 = vmatprep.subr.bf16.mxu1 %v7365_v4 }
 0x34f   :  { %5745 = vmatprep.subr.bf16.mxu0 %v7368_v5 }
 0x351   :  { %5582 = vmatpush1.bf16.msra.mxu1 %v7363_v6 }
 0x352   :  { %5746 = vmatpush1.bf16.msra.mxu0 %v7366_v17  ;;  %5583 = vmatprep.subr.bf16.mxu1 %v7371_v7 }
 0x353   :  { %5747 = vmatprep.subr.bf16.mxu0 %v7374_v11 }
 0x355   :  { %5584 = vmatpush1.bf16.msra.mxu1 %v7369_v12  ;;  %v7429_v12 = vld [vmem:[#allocation14 + $0x380] ss:$28 sps:$4 sm:$0xff]  }
 0x356   :  { %5748 = vmatpush1.bf16.msra.mxu0 %v7372_v14  ;;  %5585 = vmatprep.subr.bf16.mxu1 %v7377_v15  ;;  %v7432_v14 = vld [vmem:[#allocation14 + $0x388] ss:$28 sps:$4 sm:$0xff]  }
 0x357   :  { %5749 = vmatprep.subr.bf16.mxu0 %v7380_v18  ;;  %v7437_v18 = vld [vmem:[#allocation14 + $0x3bc] ss:$28 sps:$4 sm:$0xff]  }
 0x359   :  { %5586 = vmatpush1.bf16.msra.mxu1 %v7375_v19  ;;  %v7440_v19 = vld [vmem:[#allocation14 + $0x3c4] ss:$28 sps:$4 sm:$0xff]  }
 0x35a   :  { %5750 = vmatpush1.bf16.msra.mxu0 %v7378_v20  ;;  %5587 = vmatprep.subr.bf16.mxu1 %v7383_v49  ;;  %v7435_v49 = vld [vmem:[#allocation14 + $0x3b8] ss:$28 sps:$4 sm:$0xff]  }
 0x35b   :  { %5751 = vmatprep.subr.bf16.mxu0 %v7386_v21  ;;  %v7438_v21 = vld [vmem:[#allocation14 + $0x3c0] ss:$28 sps:$4 sm:$0xff]  }
 0x35d   :  { %5588 = vmatpush1.bf16.msra.mxu1 %v7381_v22  ;;  %v7443_v22 = vld [vmem:[#allocation14 + $0x3f4] ss:$28 sps:$4 sm:$0xff]  }
 0x35e   :  { %5752 = vmatpush1.bf16.msra.mxu0 %v7384_v23  ;;  %5589 = vmatprep.subr.bf16.mxu1 %v7389_v8  ;;  %v7446_v23 = vld [vmem:[#allocation14 + $0x3fc] ss:$28 sps:$4 sm:$0xff]   ;;  %v7441_v8 = vld [vmem:[#allocation14 + $0x3f0] ss:$28 sps:$4 sm:$0xff]  }
 0x35f   :  { %5753 = vmatprep.subr.bf16.mxu0 %v7392_v9  ;;  %v7444_v9 = vld [vmem:[#allocation14 + $0x3f8] ss:$28 sps:$4 sm:$0xff]  }
 0x361   :  { %5590 = vmatpush1.bf16.msra.mxu1 %v7387_v10  ;;  %v7449_v10 = vld [vmem:[#allocation14 + $0x42c] ss:$28 sps:$4 sm:$0xff]  }
 0x362   :  { %5754 = vmatpush1.bf16.msra.mxu0 %v7390_v13  ;;  %5591 = vmatprep.subr.bf16.mxu1 %v7395_v16  ;;  %v7452_v13 = vld [vmem:[#allocation14 + $0x434] ss:$28 sps:$4 sm:$0xff]   ;;  %v7447_v16 = vld [vmem:[#allocation14 + $0x428] ss:$28 sps:$4 sm:$0xff]  }
 0x363   :  { %5755 = vmatprep.subr.bf16.mxu0 %v7398_v24  ;;  %v7450_v24 = vld [vmem:[#allocation14 + $0x430] ss:$28 sps:$4 sm:$0xff]  }
 0x365   :  { %5592 = vmatpush1.bf16.msra.mxu1 %v7393_v26  ;;  %v7455_v26 = vld [vmem:[#allocation14 + $0x464] ss:$28 sps:$4 sm:$0xff]  }
 0x366   :  { %5756 = vmatpush1.bf16.msra.mxu0 %v7396_v27  ;;  %5593 = vmatprep.subr.bf16.mxu1 %v7401_v28  ;;  %v7458_v27 = vld [vmem:[#allocation14 + $0x46c] ss:$28 sps:$4 sm:$0xff]   ;;  %v7453_v28 = vld [vmem:[#allocation14 + $0x460] ss:$28 sps:$4 sm:$0xff]  }
 0x367   :  { %5757 = vmatprep.subr.bf16.mxu0 %v7404_v29  ;;  %v7456_v29 = vld [vmem:[#allocation14 + $0x468] ss:$28 sps:$4 sm:$0xff]  }
 0x369   :  { %5594 = vmatpush1.bf16.msra.mxu1 %v7399_v30  ;;  %v7461_v30 = vld [vmem:[#allocation14 + $0x49c] ss:$28 sps:$4 sm:$0xff]  }
 0x36a   :  { %5758 = vmatpush1.bf16.msra.mxu0 %v7402_v31  ;;  %5595 = vmatprep.subr.bf16.mxu1 %v7407_v32  ;;  %v7464_v31 = vld [vmem:[#allocation14 + $0x4a4] ss:$28 sps:$4 sm:$0xff]   ;;  %v7459_v32 = vld [vmem:[#allocation14 + $0x498] ss:$28 sps:$4 sm:$0xff]  }
 0x36b   :  { %5759 = vmatprep.subr.bf16.mxu0 %v7410_v33  ;;  %v7462_v33 = vld [vmem:[#allocation14 + $0x4a0] ss:$28 sps:$4 sm:$0xff]  }
 0x36d   :  { %5596 = vmatpush1.bf16.msra.mxu1 %v7405_v34  ;;  %v7467_v34 = vld [vmem:[#allocation14 + $0x4d4] ss:$28 sps:$4 sm:$0xff]  }
 0x36e   :  { %5760 = vmatpush1.bf16.msra.mxu0 %v7408_v36  ;;  %5597 = vmatprep.subr.bf16.mxu1 %v7413_v37  ;;  %v7470_v36 = vld [vmem:[#allocation14 + $0x4dc] ss:$28 sps:$4 sm:$0xff]   ;;  %v7465_v37 = vld [vmem:[#allocation14 + $0x4d0] ss:$28 sps:$4 sm:$0xff]  }
 0x36f   :  { %5761 = vmatprep.subr.bf16.mxu0 %v7416_v38  ;;  %v7468_v38 = vld [vmem:[#allocation14 + $0x4d8] ss:$28 sps:$4 sm:$0xff]  }
 0x371   :  { %5598 = vmatpush1.bf16.msra.mxu1 %v7411_v39  ;;  %v7473_v39 = vld [vmem:[#allocation14 + $0x50c] ss:$28 sps:$4 sm:$0xff]  }
 0x372   :  { %5762 = vmatpush1.bf16.msra.mxu0 %v7414_v41  ;;  %5599 = vmatprep.subr.bf16.mxu1 %v7419_v42  ;;  %v7476_v41 = vld [vmem:[#allocation14 + $0x514] ss:$28 sps:$4 sm:$0xff]   ;;  %v7471_v42 = vld [vmem:[#allocation14 + $0x508] ss:$28 sps:$4 sm:$0xff]  }
 0x373   :  { %5763 = vmatprep.subr.bf16.mxu0 %v7422_v44  ;;  %v7474_v44 = vld [vmem:[#allocation14 + $0x510] ss:$28 sps:$4 sm:$0xff]  }
 0x375   :  { %5600 = vmatpush1.bf16.msra.mxu1 %v7417_v45  ;;  %v7479_v45 = vld [vmem:[#allocation14 + $0x544] ss:$28 sps:$4 sm:$0xff]  }
 0x376   :  { %5764 = vmatpush1.bf16.msra.mxu0 %v7420_v46  ;;  %5601 = vmatprep.subr.bf16.mxu1 %v7425_v47  ;;  %v7482_v46 = vld [vmem:[#allocation14 + $0x54c] ss:$28 sps:$4 sm:$0xff]   ;;  %v7477_v47 = vld [vmem:[#allocation14 + $0x540] ss:$28 sps:$4 sm:$0xff]  }
 0x377   :  { %5765 = vmatprep.subr.bf16.mxu0 %v7428_v48  ;;  %v7480_v48 = vld [vmem:[#allocation14 + $0x548] ss:$28 sps:$4 sm:$0xff]  }
 0x379   :  { %5602 = vmatpush1.bf16.msra.mxu1 %v7423_v51  ;;  %v7485_v51 = vld [vmem:[#allocation14 + $0x57c] ss:$28 sps:$4 sm:$0xff]  }
 0x37a   :  { %5766 = vmatpush1.bf16.msra.mxu0 %v7426_v0  ;;  %5612 = vmatprep.subr.bf16.mxu1 %v7431_v52  ;;  %v7488_v0 = vld [vmem:[#allocation14 + $0x584] ss:$28 sps:$4 sm:$0xff]   ;;  %v7483_v52 = vld [vmem:[#allocation14 + $0x578] ss:$28 sps:$4 sm:$0xff]  }
 0x37b   :  { %5776 = vmatprep.subr.bf16.mxu0 %v7434_v54  ;;  %v7486_v54 = vld [vmem:[#allocation14 + $0x580] ss:$28 sps:$4 sm:$0xff]  }
 0x38f   :  { %v2449_v59 = vpop.f32.mrb[0].mxu1  ;;  %v8480_v60 = vpop.f32.mrb[12].mxu0 }
 0x390   :  { %v7128_v61 = vadd.f32 %v2449_v59, %v1057_v56  ;;  %v2451_v62 = vpop.f32.mrb[1].mxu1  ;;  %v2533_v25 = vpop.f32.mrb[13].mxu0  ;;  %v7491_v56 = vld [vmem:[#allocation14 + $0x5b4] ss:$28 sps:$4 sm:$0xff]  }
 0x391   :  { %v7129_v1 = vadd.f32 %v2451_v62, %v1061_v57  ;;  %v7131_v63 = vadd.f32 %v2533_v25, %v1069_v58  ;;  %v2453_v2 = vpop.f32.mrb[2].mxu1  ;;  %v2535_v3 = vpop.f32.mrb[14].mxu0  ;;  %v7494_v57 = vld [vmem:[#allocation14 + $0x5bc] ss:$28 sps:$4 sm:$0xff]   ;;  %v7489_v58 = vld [vmem:[#allocation14 + $0x5b0] ss:$28 sps:$4 sm:$0xff]  }
 0x392   :  { %v2702_v4 = vmax.f32 %v7128_v61, 0.0  ;;  %v2454_v5 = vpop.f32.mrb[3].mxu1  ;;  %v2536_v6 = vpop.f32.mrb[15].mxu0  ;;  %v7492_v59 = vld [vmem:[#allocation14 + $0x5b8] ss:$28 sps:$4 sm:$0xff]  }
 0x393   :  { %v2703_v17 = vmax.f32 %v7129_v1, 0.0  ;;  %v2705_v7 = vmax.f32 %v7131_v63, 0.0  ;;  %v7497_v61 = vld [vmem:[#allocation14 + $0x5ec] ss:$28 sps:$4 sm:$0xff]   ;;  %v7500_v62 = vld [vmem:[#allocation14 + $0x5f4] ss:$28 sps:$4 sm:$0xff]  }
 0x394   :  { %v8484_v15 = vpack.c.bf16 %v2702_v4, %v2702_v4  ;;  %v7495_v25 = vld [vmem:[#allocation14 + $0x5e8] ss:$28 sps:$4 sm:$0xff]   ;;  %v7498_v1 = vld [vmem:[#allocation14 + $0x5f0] ss:$28 sps:$4 sm:$0xff]   ;;  %v7501_v3 = vld [vmem:[#allocation14 + $0x620] ss:$28 sps:$4 sm:$0xff]  }
 0x395   :  { %v8482_v11 = vpack.c.bf16 %v2703_v17, %v2703_v17  ;;  %v8488_v20 = vpack.c.bf16 %v2705_v7, %v2705_v7  ;;  %v7503_v63 = vld [vmem:[#allocation14 + $0x624] ss:$28 sps:$4 sm:$0xff]   ;;  %v7506_v2 = vld [vmem:[#allocation14 + $0x62c] ss:$28 sps:$4 sm:$0xff]   ;;  %v7509_v5 = vld [vmem:[#allocation14 + $0x65c] ss:$28 sps:$4 sm:$0xff]  }
 0x396   :  { %v7504_v4 = vld [vmem:[#allocation14 + $0x628] ss:$28 sps:$4 sm:$0xff]   ;;  %v7507_v17 = vld [vmem:[#allocation14 + $0x658] ss:$28 sps:$4 sm:$0xff]   ;;  %v7510_v7 = vld [vmem:[#allocation14 + $0x660] ss:$28 sps:$4 sm:$0xff]  }
 0x397   :  { %5603 = vmatprep.mubr.bf16.mxu1 %v8482_v11  ;;  %5767 = vmatprep.mubr.bf16.mxu0 %v8482_v11  ;;  %v7512_v6 = vld [vmem:[#allocation14 + $0x664] ss:$28 sps:$4 sm:$0xff]  }
 0x398   :  { %5604 = vmatmul.mubr.bf16.vlgmr.msra.gmra.mrb[8].mxu1 %v8484_v15  ;;  %5768 = vmatmul.mubr.bf16.vlgmr.msra.gmra.mrb[20].mxu0 %v8484_v15 }
 0x399   :  { %5613 = vmatpush1.bf16.msra.mxu1 %v7429_v12  ;;  %5777 = vmatpush1.bf16.msra.mxu0 %v7432_v14  ;;  %v1065_v12 = vrot.slane %v8472_v55, %v8447_v50  ;;  %v7515_v14 = vld [vmem:[#allocation14 + $0x694] ss:$28 sps:$4 sm:$0xff]  }
 0x39a   :  { %5644 = vmatprep.mubr.bf16.mxu1 %v8488_v20  ;;  %5808 = vmatprep.mubr.bf16.mxu0 %v8488_v20 }
 0x39b   :  { %5614 = vmatprep.subr.bf16.mxu1 %v7437_v18  ;;  %5778 = vmatprep.subr.bf16.mxu0 %v7440_v19  ;;  %v7518_v18 = vld [vmem:[#allocation14 + $0x69c] ss:$28 sps:$4 sm:$0xff]   ;;  %v7513_v19 = vld [vmem:[#allocation14 + $0x690] ss:$28 sps:$4 sm:$0xff]  }
 0x39d   :  { %5615 = vmatpush1.bf16.msra.mxu1 %v7435_v49  ;;  %5779 = vmatpush1.bf16.msra.mxu0 %v7438_v21  ;;  %v7516_v49 = vld [vmem:[#allocation14 + $0x698] ss:$28 sps:$4 sm:$0xff]   ;;  %v7130_v21 = vadd.f32 %v8480_v60, %v1065_v12 }
 0x39e   :  { %5616 = vmatprep.subr.bf16.mxu1 %v7443_v22  ;;  %5780 = vmatprep.subr.bf16.mxu0 %v7446_v23  ;;  %v7521_v22 = vld [vmem:[#allocation14 + $0x6cc] ss:$28 sps:$4 sm:$0xff]   ;;  %v7524_v23 = vld [vmem:[#allocation14 + $0x6d4] ss:$28 sps:$4 sm:$0xff]   ;;  %v7533_v60 = vld [vmem:[#allocation14 + $0x73c] ss:$28 sps:$4 sm:$0xff]  }
 0x39f   :  { %v7588_v12 = vld [vmem:[#allocation14 + $0x938] ss:$28 sps:$4 sm:$0xff]  }
 0x3a1   :  { %5617 = vmatpush1.bf16.msra.mxu1 %v7441_v8  ;;  %5781 = vmatpush1.bf16.msra.mxu0 %v7444_v9  ;;  %v7519_v8 = vld [vmem:[#allocation14 + $0x6c8] ss:$28 sps:$4 sm:$0xff]   ;;  %v7522_v9 = vld [vmem:[#allocation14 + $0x6d0] ss:$28 sps:$4 sm:$0xff]  }
 0x3a2   :  { %5618 = vmatprep.subr.bf16.mxu1 %v7449_v10  ;;  %5782 = vmatprep.subr.bf16.mxu0 %v7452_v13  ;;  %v2704_v10 = vmax.f32 %v7130_v21, 0.0  ;;  %v7527_v13 = vld [vmem:[#allocation14 + $0x704] ss:$28 sps:$4 sm:$0xff]  }
 0x3a3   :  { %v7599_v21 = vld [vmem:[#allocation14 + $0x9a4] ss:$28 sps:$4 sm:$0xff]  }
 0x3a5   :  { %5619 = vmatpush1.bf16.msra.mxu1 %v7447_v16  ;;  %5783 = vmatpush1.bf16.msra.mxu0 %v7450_v24  ;;  %v7530_v16 = vld [vmem:[#allocation14 + $0x70c] ss:$28 sps:$4 sm:$0xff]   ;;  %v7525_v24 = vld [vmem:[#allocation14 + $0x700] ss:$28 sps:$4 sm:$0xff]  }
 0x3a6   :  { %5620 = vmatprep.subr.bf16.mxu1 %v7455_v26  ;;  %5784 = vmatprep.subr.bf16.mxu0 %v7458_v27  ;;  %v7528_v26 = vld [vmem:[#allocation14 + $0x708] ss:$28 sps:$4 sm:$0xff]   ;;  %v8497_v27 = vpack.c.bf16 %v2704_v10, %v2704_v10 }
 0x3a7   :  { %v7608_v10 = vld [vmem:[#allocation14 + $0x9e4] ss:$28 sps:$4 sm:$0xff]  }
 0x3a9   :  { %5621 = vmatpush1.bf16.msra.mxu1 %v7453_v28  ;;  %5785 = vmatpush1.bf16.msra.mxu0 %v7456_v29  ;;  %v7536_v28 = vld [vmem:[#allocation14 + $0x744] ss:$28 sps:$4 sm:$0xff]   ;;  %v7531_v29 = vld [vmem:[#allocation14 + $0x738] ss:$28 sps:$4 sm:$0xff]  }
 0x3aa   :  { %5622 = vmatprep.subr.bf16.mxu1 %v7461_v30  ;;  %5786 = vmatprep.subr.bf16.mxu0 %v7464_v31  ;;  %v7534_v30 = vld [vmem:[#allocation14 + $0x740] ss:$28 sps:$4 sm:$0xff]   ;;  %v7539_v31 = vld [vmem:[#allocation14 + $0x774] ss:$28 sps:$4 sm:$0xff]  }
 0x3ad   :  { %5623 = vmatpush1.bf16.msra.mxu1 %v7459_v32  ;;  %5787 = vmatpush1.bf16.msra.mxu0 %v7462_v33  ;;  %v7542_v32 = vld [vmem:[#allocation14 + $0x77c] ss:$28 sps:$4 sm:$0xff]   ;;  %v7537_v33 = vld [vmem:[#allocation14 + $0x770] ss:$28 sps:$4 sm:$0xff]  }
 0x3ae   :  { %5624 = vmatprep.subr.bf16.mxu1 %v7467_v34  ;;  %5788 = vmatprep.subr.bf16.mxu0 %v7470_v36  ;;  %v7540_v34 = vld [vmem:[#allocation14 + $0x778] ss:$28 sps:$4 sm:$0xff]   ;;  %v7545_v36 = vld [vmem:[#allocation14 + $0x7ac] ss:$28 sps:$4 sm:$0xff]  }
 0x3b1   :  { %5625 = vmatpush1.bf16.msra.mxu1 %v7465_v37  ;;  %5789 = vmatpush1.bf16.msra.mxu0 %v7468_v38  ;;  %v7548_v37 = vld [vmem:[#allocation14 + $0x7b4] ss:$28 sps:$4 sm:$0xff]   ;;  %v7543_v38 = vld [vmem:[#allocation14 + $0x7a8] ss:$28 sps:$4 sm:$0xff]  }
 0x3b2   :  { %5626 = vmatprep.subr.bf16.mxu1 %v7473_v39  ;;  %5790 = vmatprep.subr.bf16.mxu0 %v7476_v41  ;;  %v7546_v39 = vld [vmem:[#allocation14 + $0x7b0] ss:$28 sps:$4 sm:$0xff]   ;;  %v7551_v41 = vld [vmem:[#allocation14 + $0x7e4] ss:$28 sps:$4 sm:$0xff]  }
 0x3b5   :  { %5627 = vmatpush1.bf16.msra.mxu1 %v7471_v42  ;;  %5791 = vmatpush1.bf16.msra.mxu0 %v7474_v44  ;;  %v7554_v42 = vld [vmem:[#allocation14 + $0x7ec] ss:$28 sps:$4 sm:$0xff]   ;;  %v7549_v44 = vld [vmem:[#allocation14 + $0x7e0] ss:$28 sps:$4 sm:$0xff]  }
 0x3b6   :  { %5628 = vmatprep.subr.bf16.mxu1 %v7479_v45  ;;  %5792 = vmatprep.subr.bf16.mxu0 %v7482_v46  ;;  %v7552_v45 = vld [vmem:[#allocation14 + $0x7e8] ss:$28 sps:$4 sm:$0xff]   ;;  %v7557_v46 = vld [vmem:[#allocation14 + $0x81c] ss:$28 sps:$4 sm:$0xff]  }
 0x3b9   :  { %5629 = vmatpush1.bf16.msra.mxu1 %v7477_v47  ;;  %5793 = vmatpush1.bf16.msra.mxu0 %v7480_v48  ;;  %v7560_v47 = vld [vmem:[#allocation14 + $0x824] ss:$28 sps:$4 sm:$0xff]   ;;  %v7555_v48 = vld [vmem:[#allocation14 + $0x818] ss:$28 sps:$4 sm:$0xff]  }
 0x3ba   :  { %5630 = vmatprep.subr.bf16.mxu1 %v7485_v51  ;;  %5794 = vmatprep.subr.bf16.mxu0 %v7488_v0  ;;  %v7558_v51 = vld [vmem:[#allocation14 + $0x820] ss:$28 sps:$4 sm:$0xff]   ;;  %v7563_v0 = vld [vmem:[#allocation14 + $0x854] ss:$28 sps:$4 sm:$0xff]  }
 0x3bd   :  { %5631 = vmatpush1.bf16.msra.mxu1 %v7483_v52  ;;  %5795 = vmatpush1.bf16.msra.mxu0 %v7486_v54  ;;  %v7566_v52 = vld [vmem:[#allocation14 + $0x85c] ss:$28 sps:$4 sm:$0xff]   ;;  %v7561_v54 = vld [vmem:[#allocation14 + $0x850] ss:$28 sps:$4 sm:$0xff]  }
 0x3be   :  { %5632 = vmatprep.subr.bf16.mxu1 %v7491_v56  ;;  %5796 = vmatprep.subr.bf16.mxu0 %v7494_v57  ;;  %v7564_v56 = vld [vmem:[#allocation14 + $0x858] ss:$28 sps:$4 sm:$0xff]   ;;  %v7569_v57 = vld [vmem:[#allocation14 + $0x88c] ss:$28 sps:$4 sm:$0xff]  }
 0x3c1   :  { %5633 = vmatpush1.bf16.msra.mxu1 %v7489_v58  ;;  %5797 = vmatpush1.bf16.msra.mxu0 %v7492_v59  ;;  %v7572_v58 = vld [vmem:[#allocation14 + $0x894] ss:$28 sps:$4 sm:$0xff]   ;;  %v7567_v59 = vld [vmem:[#allocation14 + $0x888] ss:$28 sps:$4 sm:$0xff]  }
 0x3c2   :  { %5634 = vmatprep.subr.bf16.mxu1 %v7497_v61  ;;  %5798 = vmatprep.subr.bf16.mxu0 %v7500_v62  ;;  %v7570_v61 = vld [vmem:[#allocation14 + $0x890] ss:$28 sps:$4 sm:$0xff]   ;;  %v7575_v62 = vld [vmem:[#allocation14 + $0x8c4] ss:$28 sps:$4 sm:$0xff]  }
 0x3c5   :  { %5635 = vmatpush1.bf16.msra.mxu1 %v7495_v25  ;;  %5799 = vmatpush1.bf16.msra.mxu0 %v7498_v1  ;;  %v7578_v25 = vld [vmem:[#allocation14 + $0x8cc] ss:$28 sps:$4 sm:$0xff]   ;;  %v7573_v1 = vld [vmem:[#allocation14 + $0x8c0] ss:$28 sps:$4 sm:$0xff]  }
 0x3c6   :  { %5636 = vmatprep.subr.bf16.mxu1 %v7503_v63  ;;  %5800 = vmatprep.subr.bf16.mxu0 %v7506_v2  ;;  %v7576_v63 = vld [vmem:[#allocation14 + $0x8c8] ss:$28 sps:$4 sm:$0xff]   ;;  %v7581_v2 = vld [vmem:[#allocation14 + $0x8fc] ss:$28 sps:$4 sm:$0xff]  }
 0x3c9   :  { %5637 = vmatpush1.bf16.msra.mxu1 %v7501_v3  ;;  %5801 = vmatpush1.bf16.msra.mxu0 %v7504_v4  ;;  %v7584_v3 = vld [vmem:[#allocation14 + $0x904] ss:$28 sps:$4 sm:$0xff]   ;;  %v7579_v4 = vld [vmem:[#allocation14 + $0x8f8] ss:$28 sps:$4 sm:$0xff]  }
 0x3ca   :  { %5638 = vmatprep.subr.bf16.mxu1 %v7509_v5  ;;  %5802 = vmatprep.subr.bf16.mxu0 %v7512_v6  ;;  %v7582_v5 = vld [vmem:[#allocation14 + $0x900] ss:$28 sps:$4 sm:$0xff]   ;;  %v7587_v6 = vld [vmem:[#allocation14 + $0x934] ss:$28 sps:$4 sm:$0xff]  }
 0x3cd   :  { %5639 = vmatpush1.bf16.msra.mxu1 %v7507_v17  ;;  %5803 = vmatpush1.bf16.msra.mxu0 %v7510_v7  ;;  %v7590_v17 = vld [vmem:[#allocation14 + $0x93c] ss:$28 sps:$4 sm:$0xff]   ;;  %v7585_v7 = vld [vmem:[#allocation14 + $0x930] ss:$28 sps:$4 sm:$0xff]  }
 0x3ce   :  { %5640 = vmatprep.subr.bf16.mxu1 %v7515_v14  ;;  %5804 = vmatprep.subr.bf16.mxu0 %v7518_v18  ;;  %v7593_v14 = vld [vmem:[#allocation14 + $0x96c] ss:$28 sps:$4 sm:$0xff]   ;;  %v7596_v18 = vld [vmem:[#allocation14 + $0x974] ss:$28 sps:$4 sm:$0xff]  }
 0x3d1   :  { %5641 = vmatpush1.bf16.msra.mxu1 %v7513_v19  ;;  %5805 = vmatpush1.bf16.msra.mxu0 %v7516_v49  ;;  %v7591_v19 = vld [vmem:[#allocation14 + $0x968] ss:$28 sps:$4 sm:$0xff]   ;;  %v7594_v49 = vld [vmem:[#allocation14 + $0x970] ss:$28 sps:$4 sm:$0xff]  }
 0x3d2   :  { %5642 = vmatprep.subr.bf16.mxu1 %v7521_v22  ;;  %5806 = vmatprep.subr.bf16.mxu0 %v7524_v23  ;;  %v7602_v22 = vld [vmem:[#allocation14 + $0x9ac] ss:$28 sps:$4 sm:$0xff]   ;;  %v7597_v23 = vld [vmem:[#allocation14 + $0x9a0] ss:$28 sps:$4 sm:$0xff]  }
 0x3d5   :  { %5643 = vmatpush1.bf16.msra.mxu1 %v7519_v8  ;;  %5807 = vmatpush1.bf16.msra.mxu0 %v7522_v9  ;;  %v7600_v8 = vld [vmem:[#allocation14 + $0x9a8] ss:$28 sps:$4 sm:$0xff]   ;;  %v7605_v9 = vld [vmem:[#allocation14 + $0x9dc] ss:$28 sps:$4 sm:$0xff]  }
 0x3d6   :  { %5653 = vmatprep.subr.bf16.mxu1 %v7527_v13  ;;  %5817 = vmatprep.subr.bf16.mxu0 %v7530_v16  ;;  %v1072_v13 = vsub.s32 4, %v8396_v35  ;;  %v7603_v16 = vld [vmem:[#allocation14 + $0x9d8] ss:$28 sps:$4 sm:$0xff]  }
 0x3d8   :  { %5645 = vmatmul.mubr.bf16.vlgmr.msra.gmra.mrb[8].mxu1 %v8497_v27  ;;  %5809 = vmatmul.mubr.bf16.vlgmr.msra.gmra.mrb[20].mxu0 %v8497_v27 }
 0x3d9   :  { %5654 = vmatpush1.bf16.msra.mxu1 %v7525_v24  ;;  %5818 = vmatpush1.bf16.msra.mxu0 %v7528_v26  ;;  %v7606_v24 = vld [vmem:[#allocation14 + $0x9e0] ss:$28 sps:$4 sm:$0xff]   ;;  %v1076_v26 = vsub.s32 5, %v8396_v35 }
 0x3da   :  { %5655 = vmatprep.subr.bf16.mxu1 %v7533_v60  ;;  %5819 = vmatprep.subr.bf16.mxu0 %v7536_v28  ;;  %v7611_v60 = vld [vmem:[#allocation14 + $0xa14] ss:$28 sps:$4 sm:$0xff]   ;;  %v7614_v28 = vld [vmem:[#allocation14 + $0xa1c] ss:$28 sps:$4 sm:$0xff]  }
 0x3dd   :  { %5656 = vmatpush1.bf16.msra.mxu1 %v7531_v29  ;;  %5820 = vmatpush1.bf16.msra.mxu0 %v7534_v30  ;;  %v1084_v29 = vsub.s32 7, %v8396_v35  ;;  %v1073_v30 = vrot.slane %v8472_v55, %v1072_v13 }
 0x3de   :  { %5657 = vmatprep.subr.bf16.mxu1 %v7539_v31  ;;  %5821 = vmatprep.subr.bf16.mxu0 %v7542_v32  ;;  %v7609_v31 = vld [vmem:[#allocation14 + $0xa10] ss:$28 sps:$4 sm:$0xff]   ;;  %v7612_v32 = vld [vmem:[#allocation14 + $0xa18] ss:$28 sps:$4 sm:$0xff]  }
 0x3e1   :  { %5658 = vmatpush1.bf16.msra.mxu1 %v7537_v33  ;;  %5822 = vmatpush1.bf16.msra.mxu0 %v7540_v34  ;;  %v1077_v33 = vrot.slane %v8472_v55, %v1076_v26  ;;  %v1085_v34 = vrot.slane %v8472_v55, %v1084_v29  ;;  %v7662_v29 = vld [vmem:[#allocation14 + $0xbdc] ss:$28 sps:$4 sm:$0xff]  }
 0x3e2   :  { %5659 = vmatprep.subr.bf16.mxu1 %v7545_v36  ;;  %5823 = vmatprep.subr.bf16.mxu0 %v7548_v37  ;;  %v7617_v36 = vld [vmem:[#allocation14 + $0xa4c] ss:$28 sps:$4 sm:$0xff]   ;;  %v7620_v37 = vld [vmem:[#allocation14 + $0xa54] ss:$28 sps:$4 sm:$0xff]  }
 0x3e5   :  { %5660 = vmatpush1.bf16.msra.mxu1 %v7543_v38  ;;  %5824 = vmatpush1.bf16.msra.mxu0 %v7546_v39 }
 0x3e6   :  { %5661 = vmatprep.subr.bf16.mxu1 %v7551_v41  ;;  %5825 = vmatprep.subr.bf16.mxu0 %v7554_v42 }
 0x3e9   :  { %5662 = vmatpush1.bf16.msra.mxu1 %v7549_v44  ;;  %5826 = vmatpush1.bf16.msra.mxu0 %v7552_v45  ;;  %v7615_v44 = vld [vmem:[#allocation14 + $0xa48] ss:$28 sps:$4 sm:$0xff]  }
 0x3ea   :  { %5663 = vmatprep.subr.bf16.mxu1 %v7557_v46  ;;  %5827 = vmatprep.subr.bf16.mxu0 %v7560_v47 }
 0x3ed   :  { %5664 = vmatpush1.bf16.msra.mxu1 %v7555_v48  ;;  %5828 = vmatpush1.bf16.msra.mxu0 %v7558_v51  ;;  %v7618_v48 = vld [vmem:[#allocation14 + $0xa50] ss:$28 sps:$4 sm:$0xff]   ;;  %v7623_v51 = vld [vmem:[#allocation14 + $0xa84] ss:$28 sps:$4 sm:$0xff]  }
 0x3ee   :  { %5665 = vmatprep.subr.bf16.mxu1 %v7563_v0  ;;  %5829 = vmatprep.subr.bf16.mxu0 %v7566_v52 }
 0x3f1   :  { %5666 = vmatpush1.bf16.msra.mxu1 %v7561_v54  ;;  %5830 = vmatpush1.bf16.msra.mxu0 %v7564_v56 }
 0x3f2   :  { %5667 = vmatprep.subr.bf16.mxu1 %v7569_v57  ;;  %5831 = vmatprep.subr.bf16.mxu0 %v7572_v58  ;;  %v7626_v57 = vld [vmem:[#allocation14 + $0xa8c] ss:$28 sps:$4 sm:$0xff]  }
 0x3f5   :  { %5668 = vmatpush1.bf16.msra.mxu1 %v7567_v59  ;;  %5832 = vmatpush1.bf16.msra.mxu0 %v7570_v61 }
 0x3f6   :  { %5669 = vmatprep.subr.bf16.mxu1 %v7575_v62  ;;  %5833 = vmatprep.subr.bf16.mxu0 %v7578_v25  ;;  %v7621_v25 = vld [vmem:[#allocation14 + $0xa80] ss:$28 sps:$4 sm:$0xff]  }
 0x3f9   :  { %5670 = vmatpush1.bf16.msra.mxu1 %v7573_v1  ;;  %5834 = vmatpush1.bf16.msra.mxu0 %v7576_v63  ;;  %v7624_v1 = vld [vmem:[#allocation14 + $0xa88] ss:$28 sps:$4 sm:$0xff]  }
 0x3fa   :  { %5671 = vmatprep.subr.bf16.mxu1 %v7581_v2  ;;  %5835 = vmatprep.subr.bf16.mxu0 %v7584_v3  ;;  %v7629_v2 = vld [vmem:[#allocation14 + $0xabc] ss:$28 sps:$4 sm:$0xff]   ;;  %v7632_v3 = vld [vmem:[#allocation14 + $0xac4] ss:$28 sps:$4 sm:$0xff]  }
 0x3fd   :  { %5672 = vmatpush1.bf16.msra.mxu1 %v7579_v4  ;;  %5836 = vmatpush1.bf16.msra.mxu0 %v7582_v5  ;;  %v7627_v5 = vld [vmem:[#allocation14 + $0xab8] ss:$28 sps:$4 sm:$0xff]  }
 0x3fe   :  { %5673 = vmatprep.subr.bf16.mxu1 %v7587_v6  ;;  %5837 = vmatprep.subr.bf16.mxu0 %v7590_v17  ;;  %v7630_v6 = vld [vmem:[#allocation14 + $0xac0] ss:$28 sps:$4 sm:$0xff]   ;;  %v7635_v17 = vld [vmem:[#allocation14 + $0xaf4] ss:$28 sps:$4 sm:$0xff]  }
 0x401   :  { %5674 = vmatpush1.bf16.msra.mxu1 %v7585_v7  ;;  %5838 = vmatpush1.bf16.msra.mxu0 %v7588_v12  ;;  %v7638_v7 = vld [vmem:[#allocation14 + $0xafc] ss:$28 sps:$4 sm:$0xff]   ;;  %v7633_v12 = vld [vmem:[#allocation14 + $0xaf0] ss:$28 sps:$4 sm:$0xff]  }
 0x402   :  { %5675 = vmatprep.subr.bf16.mxu1 %v7593_v14  ;;  %5839 = vmatprep.subr.bf16.mxu0 %v7596_v18  ;;  %v7636_v14 = vld [vmem:[#allocation14 + $0xaf8] ss:$28 sps:$4 sm:$0xff]   ;;  %v7641_v18 = vld [vmem:[#allocation14 + $0xb2c] ss:$28 sps:$4 sm:$0xff]  }
 0x405   :  { %5676 = vmatpush1.bf16.msra.mxu1 %v7591_v19  ;;  %5840 = vmatpush1.bf16.msra.mxu0 %v7594_v49  ;;  %v7644_v19 = vld [vmem:[#allocation14 + $0xb34] ss:$28 sps:$4 sm:$0xff]   ;;  %v7639_v49 = vld [vmem:[#allocation14 + $0xb28] ss:$28 sps:$4 sm:$0xff]  }
 0x406   :  { %5677 = vmatprep.subr.bf16.mxu1 %v7599_v21  ;;  %5841 = vmatprep.subr.bf16.mxu0 %v7602_v22  ;;  %v7642_v21 = vld [vmem:[#allocation14 + $0xb30] ss:$28 sps:$4 sm:$0xff]   ;;  %v7647_v22 = vld [vmem:[#allocation14 + $0xb64] ss:$28 sps:$4 sm:$0xff]  }
 0x409   :  { %5678 = vmatpush1.bf16.msra.mxu1 %v7597_v23  ;;  %5842 = vmatpush1.bf16.msra.mxu0 %v7600_v8  ;;  %v7650_v23 = vld [vmem:[#allocation14 + $0xb6c] ss:$28 sps:$4 sm:$0xff]   ;;  %v7645_v8 = vld [vmem:[#allocation14 + $0xb60] ss:$28 sps:$4 sm:$0xff]  }
 0x40a   :  { %5679 = vmatprep.subr.bf16.mxu1 %v7605_v9  ;;  %5843 = vmatprep.subr.bf16.mxu0 %v7608_v10  ;;  %v7648_v9 = vld [vmem:[#allocation14 + $0xb68] ss:$28 sps:$4 sm:$0xff]   ;;  %v7653_v10 = vld [vmem:[#allocation14 + $0xb9c] ss:$28 sps:$4 sm:$0xff]  }
 0x40d   :  { %5680 = vmatpush1.bf16.msra.mxu1 %v7603_v16  ;;  %5844 = vmatpush1.bf16.msra.mxu0 %v7606_v24  ;;  %v7656_v16 = vld [vmem:[#allocation14 + $0xba4] ss:$28 sps:$4 sm:$0xff]   ;;  %v7651_v24 = vld [vmem:[#allocation14 + $0xb98] ss:$28 sps:$4 sm:$0xff]  }
 0x40e   :  { %5681 = vmatprep.subr.bf16.mxu1 %v7611_v60  ;;  %5845 = vmatprep.subr.bf16.mxu0 %v7614_v28  ;;  %v7654_v60 = vld [vmem:[#allocation14 + $0xba0] ss:$28 sps:$4 sm:$0xff]   ;;  %v7659_v28 = vld [vmem:[#allocation14 + $0xbd4] ss:$28 sps:$4 sm:$0xff]  }
 0x40f   :  { %v2613_v38 = vpop.f32.mrb[4].mxu1 }
 0x410   :  { %v7132_v39 = vadd.f32 %v2613_v38, %v1073_v30  ;;  %v8511_v41 = vpop.f32.mrb[16].mxu0  ;;  %v2615_v42 = vpop.f32.mrb[5].mxu1  ;;  %v7657_v30 = vld [vmem:[#allocation14 + $0xbd0] ss:$28 sps:$4 sm:$0xff]  }
 0x411   :  { %v7133_v45 = vadd.f32 %v2615_v42, %v1077_v33  ;;  %v2697_v46 = vpop.f32.mrb[17].mxu0  ;;  %5682 = vmatpush1.bf16.msra.mxu1 %v7609_v31  ;;  %5846 = vmatpush1.bf16.msra.mxu0 %v7612_v32  ;;  %v2617_v47 = vpop.f32.mrb[6].mxu1  ;;  %v7660_v31 = vld [vmem:[#allocation14 + $0xbd8] ss:$28 sps:$4 sm:$0xff]   ;;  %v7665_v32 = vld [vmem:[#allocation14 + $0xc0c] ss:$28 sps:$4 sm:$0xff]  }
 0x412   :  { %v2706_v0 = vmax.f32 %v7132_v39, 0.0  ;;  %v7135_v52 = vadd.f32 %v2697_v46, %v1085_v34  ;;  %v2699_v54 = vpop.f32.mrb[18].mxu0  ;;  %v2618_v56 = vpop.f32.mrb[7].mxu1  ;;  %5683 = vmatprep.subr.bf16.mxu1 %v7617_v36  ;;  %5847 = vmatprep.subr.bf16.mxu0 %v7620_v37  ;;  %v7668_v33 = vld [vmem:[#allocation14 + $0xc14] ss:$28 sps:$4 sm:$0xff]  }
 0x413   :  { %v2707_v58 = vmax.f32 %v7133_v45, 0.0  ;;  %v2700_v59 = vpop.f32.mrb[19].mxu0  ;;  %v7663_v34 = vld [vmem:[#allocation14 + $0xc08] ss:$28 sps:$4 sm:$0xff]   ;;  %v7666_v36 = vld [vmem:[#allocation14 + $0xc10] ss:$28 sps:$4 sm:$0xff]  }
 0x414   :  { %v2709_v61 = vmax.f32 %v7135_v52, 0.0  ;;  %v8515_v63 = vpack.c.bf16 %v2706_v0, %v2706_v0  ;;  %v7671_v37 = vld [vmem:[#allocation14 + $0xc44] ss:$28 sps:$4 sm:$0xff]   ;;  %v7674_v38 = vld [vmem:[#allocation14 + $0xc4c] ss:$28 sps:$4 sm:$0xff]  }
 0x415   :  { %v8513_v62 = vpack.c.bf16 %v2707_v58, %v2707_v58  ;;  %5684 = vmatpush1.bf16.msra.mxu1 %v7615_v44  ;;  %5848 = vmatpush1.bf16.msra.mxu0 %v7618_v48  ;;  %v7669_v39 = vld [vmem:[#allocation14 + $0xc40] ss:$28 sps:$4 sm:$0xff]   ;;  %v7672_v42 = vld [vmem:[#allocation14 + $0xc48] ss:$28 sps:$4 sm:$0xff]   ;;  %v7675_v46 = vld [vmem:[#allocation14 + $0xc78] ss:$28 sps:$4 sm:$0xff]  }
 0x416   :  { %5694 = vmatprep.subr.bf16.mxu1 %v7623_v51  ;;  %5858 = vmatprep.subr.bf16.mxu0 %v7626_v57  ;;  %v8519_v4 = vpack.c.bf16 %v2709_v61, %v2709_v61  ;;  %v7677_v44 = vld [vmem:[#allocation14 + $0xc7c] ss:$28 sps:$4 sm:$0xff]   ;;  %v7680_v45 = vld [vmem:[#allocation14 + $0xc84] ss:$28 sps:$4 sm:$0xff]   ;;  %v7683_v48 = vld [vmem:[#allocation14 + $0xcb4] ss:$28 sps:$4 sm:$0xff]  }
 0x417   :  { %5685 = vmatprep.mubr.bf16.mxu1 %v8513_v62  ;;  %5849 = vmatprep.mubr.bf16.mxu0 %v8513_v62  ;;  %v7678_v47 = vld [vmem:[#allocation14 + $0xc80] ss:$28 sps:$4 sm:$0xff]   ;;  %v7681_v0 = vld [vmem:[#allocation14 + $0xcb0] ss:$28 sps:$4 sm:$0xff]   ;;  %v7684_v52 = vld [vmem:[#allocation14 + $0xcb8] ss:$28 sps:$4 sm:$0xff]  }
 0x418   :  { %5686 = vmatmul.mubr.bf16.vlgmr.msra.gmra.mrb[8].mxu1 %v8515_v63  ;;  %5850 = vmatmul.mubr.bf16.vlgmr.msra.gmra.mrb[20].mxu0 %v8515_v63  ;;  %v7686_v51 = vld [vmem:[#allocation14 + $0xcbc] ss:$28 sps:$4 sm:$0xff]   ;;  %v7689_v54 = vld [vmem:[#allocation14 + $0xcec] ss:$28 sps:$4 sm:$0xff]   ;;  %v7692_v56 = vld [vmem:[#allocation14 + $0xcf4] ss:$28 sps:$4 sm:$0xff]  }
 0x419   :  { %5695 = vmatpush1.bf16.msra.mxu1 %v7621_v25  ;;  %5859 = vmatpush1.bf16.msra.mxu0 %v7624_v1  ;;  %v7687_v57 = vld [vmem:[#allocation14 + $0xce8] ss:$28 sps:$4 sm:$0xff]   ;;  %v7690_v58 = vld [vmem:[#allocation14 + $0xcf0] ss:$28 sps:$4 sm:$0xff]   ;;  %v7693_v25 = vld [vmem:[#allocation14 + $0xd20] ss:$28 sps:$4 sm:$0xff]  }
 0x41a   :  { %5726 = vmatprep.mubr.bf16.mxu1 %v8519_v4  ;;  %5890 = vmatprep.mubr.bf16.mxu0 %v8519_v4  ;;  %v7695_v59 = vld [vmem:[#allocation14 + $0xd24] ss:$28 sps:$4 sm:$0xff]   ;;  %v7698_v61 = vld [vmem:[#allocation14 + $0xd2c] ss:$28 sps:$4 sm:$0xff]  }
 0x41b   :  { %5696 = vmatprep.subr.bf16.mxu1 %v7629_v2  ;;  %5860 = vmatprep.subr.bf16.mxu0 %v7632_v3  ;;  %v7696_v1 = vld [vmem:[#allocation14 + $0xd28] ss:$28 sps:$4 sm:$0xff]   ;;  %v1080_v2 = vsub.s32 6, %v8396_v35  ;;  %v7701_v3 = vld [vmem:[#allocation14 + $0xd5c] ss:$28 sps:$4 sm:$0xff]  }
 0x41d   :  { %5697 = vmatpush1.bf16.msra.mxu1 %v7627_v5  ;;  %5861 = vmatpush1.bf16.msra.mxu0 %v7630_v6  ;;  %v7704_v5 = vld [vmem:[#allocation14 + $0xd64] ss:$28 sps:$4 sm:$0xff]   ;;  %v7699_v6 = vld [vmem:[#allocation14 + $0xd58] ss:$28 sps:$4 sm:$0xff]  }
 0x41e   :  { %5698 = vmatprep.subr.bf16.mxu1 %v7635_v17  ;;  %5862 = vmatprep.subr.bf16.mxu0 %v7638_v7  ;;  %v7702_v17 = vld [vmem:[#allocation14 + $0xd60] ss:$28 sps:$4 sm:$0xff]   ;;  %v1081_v7 = vrot.slane %v8472_v55, %v1080_v2  ;;  %v7719_v55 = vld [vmem:[#allocation14 + $0x14] ss:$28 sps:$4 sm:$0xff]  }
 0x421   :  { %5699 = vmatpush1.bf16.msra.mxu1 %v7633_v12  ;;  %5863 = vmatpush1.bf16.msra.mxu0 %v7636_v14  ;;  %v7707_v12 = vld [vmem:[#allocation14 + $0xd94] ss:$28 sps:$4 sm:$0xff]   ;;  %v7710_v14 = vld [vmem:[#allocation14 + $0xd9c] ss:$28 sps:$4 sm:$0xff]  }
 0x422   :  { %5700 = vmatprep.subr.bf16.mxu1 %v7641_v18  ;;  %5864 = vmatprep.subr.bf16.mxu0 %v7644_v19  ;;  %v7705_v18 = vld [vmem:[#allocation14 + $0xd90] ss:$28 sps:$4 sm:$0xff]   ;;  %v7708_v19 = vld [vmem:[#allocation14 + $0xd98] ss:$28 sps:$4 sm:$0xff]  }
 0x425   :  { %5701 = vmatpush1.bf16.msra.mxu1 %v7639_v49  ;;  %5865 = vmatpush1.bf16.msra.mxu0 %v7642_v21  ;;  %v7134_v49 = vadd.f32 %v8511_v41, %v1081_v7  ;;  %v7713_v21 = vld [vmem:[#allocation14 + $0xdcc] ss:$28 sps:$4 sm:$0xff]   ;;  %v7721_v41 = vld [vmem:[#allocation14 + $0x18] ss:$28 sps:$4 sm:$0xff]  }
 0x426   :  { %5702 = vmatprep.subr.bf16.mxu1 %v7647_v22  ;;  %5866 = vmatprep.subr.bf16.mxu0 %v7650_v23  ;;  %v7716_v22 = vld [vmem:[#allocation14 + $0xdd4] ss:$28 sps:$4 sm:$0xff]   ;;  %v7711_v23 = vld [vmem:[#allocation14 + $0xdc8] ss:$28 sps:$4 sm:$0xff]  }
 0x427   :  { %v7762_v7 = vld [vmem:[#allocation14 + $0x208] ss:$28 sps:$4 sm:$0xff]  }
 0x429   :  { %5703 = vmatpush1.bf16.msra.mxu1 %v7645_v8  ;;  %5867 = vmatpush1.bf16.msra.mxu0 %v7648_v9  ;;  %v7714_v8 = vld [vmem:[#allocation14 + $0xdd0] ss:$28 sps:$4 sm:$0xff]   ;;  %v2708_v9 = vmax.f32 %v7134_v49, 0.0  ;;  %v7771_v49 = vld [vmem:[#allocation14 + $0x408] ss:$28 sps:$4 sm:$0xff]  }
 0x42a   :  { %5704 = vmatprep.subr.bf16.mxu1 %v7653_v10  ;;  %5868 = vmatprep.subr.bf16.mxu0 %v7656_v16  ;;  %v7720_v10 = vld [vmem:[#allocation14 + $0x1d8] ss:$28 sps:$4 sm:$0xff]   ;;  %v7717_v16 = vld [vmem:[#allocation14 + $0x10] ss:$28 sps:$4 sm:$0xff]  }
 0x42d   :  { %5705 = vmatpush1.bf16.msra.mxu1 %v7651_v24  ;;  %5869 = vmatpush1.bf16.msra.mxu0 %v7654_v60  ;;  %v8530_v24 = vpack.c.bf16 %v2708_v9, %v2708_v9  ;;  %v7724_v60 = vld [vmem:[#allocation14 + $0x4c] ss:$28 sps:$4 sm:$0xff]   ;;  %v7779_v9 = vld [vmem:[#allocation14 + $0x2b4] ss:$28 sps:$4 sm:$0xff]  }
 0x42e   :  { %5706 = vmatprep.subr.bf16.mxu1 %v7659_v28  ;;  %5870 = vmatprep.subr.bf16.mxu0 %v7662_v29  ;;  %v7725_v28 = vld [vmem:[#allocation14 + $0x210] ss:$28 sps:$4 sm:$0xff]   ;;  %v7722_v29 = vld [vmem:[#allocation14 + $0x48] ss:$28 sps:$4 sm:$0xff]  }
 0x431   :  { %5707 = vmatpush1.bf16.msra.mxu1 %v7657_v30  ;;  %5871 = vmatpush1.bf16.msra.mxu0 %v7660_v31  ;;  %v7726_v30 = vld [vmem:[#allocation14 + $0x50] ss:$28 sps:$4 sm:$0xff]   ;;  %v7729_v31 = vld [vmem:[#allocation14 + $0x84] ss:$28 sps:$4 sm:$0xff]  }
 0x432   :  { %5708 = vmatprep.subr.bf16.mxu1 %v7665_v32  ;;  %5872 = vmatprep.subr.bf16.mxu0 %v7668_v33  ;;  %v7730_v32 = vld [vmem:[#allocation14 + $0x248] ss:$28 sps:$4 sm:$0xff]   ;;  %v7727_v33 = vld [vmem:[#allocation14 + $0x80] ss:$28 sps:$4 sm:$0xff]  }
 0x435   :  { %5709 = vmatpush1.bf16.msra.mxu1 %v7663_v34  ;;  %5873 = vmatpush1.bf16.msra.mxu0 %v7666_v36  ;;  %v7731_v34 = vld [vmem:[#allocation14 + $0x88] ss:$28 sps:$4 sm:$0xff]   ;;  %v7734_v36 = vld [vmem:[#allocation14 + $0xbc] ss:$28 sps:$4 sm:$0xff]  }
 0x436   :  { %5710 = vmatprep.subr.bf16.mxu1 %v7671_v37  ;;  %5874 = vmatprep.subr.bf16.mxu0 %v7674_v38  ;;  %v7735_v37 = vld [vmem:[#allocation14 + $0x280] ss:$28 sps:$4 sm:$0xff]   ;;  %v7732_v38 = vld [vmem:[#allocation14 + $0xb8] ss:$28 sps:$4 sm:$0xff]  }
 0x439   :  { %5711 = vmatpush1.bf16.msra.mxu1 %v7669_v39  ;;  %5875 = vmatpush1.bf16.msra.mxu0 %v7672_v42  ;;  %v7736_v39 = vld [vmem:[#allocation14 + $0xc0] ss:$28 sps:$4 sm:$0xff]   ;;  %v7739_v42 = vld [vmem:[#allocation14 + $0xf4] ss:$28 sps:$4 sm:$0xff]  }
 0x43a   :  { %5712 = vmatprep.subr.bf16.mxu1 %v7677_v44  ;;  %5876 = vmatprep.subr.bf16.mxu0 %v7680_v45  ;;  %v7737_v44 = vld [vmem:[#allocation14 + $0xf0] ss:$28 sps:$4 sm:$0xff]   ;;  %v7741_v45 = vld [vmem:[#allocation14 + $0xf8] ss:$28 sps:$4 sm:$0xff]  }
 0x43d   :  { %5713 = vmatpush1.bf16.msra.mxu1 %v7675_v46  ;;  %5877 = vmatpush1.bf16.msra.mxu0 %v7678_v47  ;;  %v7744_v46 = vld [vmem:[#allocation14 + $0x12c] ss:$28 sps:$4 sm:$0xff]  }
 0x43e   :  { %5714 = vmatprep.subr.bf16.mxu1 %v7683_v48  ;;  %5878 = vmatprep.subr.bf16.mxu0 %v7686_v51  ;;  %v7745_v47 = vld [vmem:[#allocation14 + $0x2f0] ss:$28 sps:$4 sm:$0xff]   ;;  %v7742_v48 = vld [vmem:[#allocation14 + $0x128] ss:$28 sps:$4 sm:$0xff]  }
 0x43f   :  { %v7746_v51 = vld [vmem:[#allocation14 + $0x130] ss:$28 sps:$4 sm:$0xff]  }
 0x441   :  { %5715 = vmatpush1.bf16.msra.mxu1 %v7681_v0  ;;  %5879 = vmatpush1.bf16.msra.mxu0 %v7684_v52  ;;  %v7749_v0 = vld [vmem:[#allocation14 + $0x164] ss:$28 sps:$4 sm:$0xff]  }
 0x442   :  { %5716 = vmatprep.subr.bf16.mxu1 %v7689_v54  ;;  %5880 = vmatprep.subr.bf16.mxu0 %v7692_v56  ;;  %v7750_v52 = vld [vmem:[#allocation14 + $0x328] ss:$28 sps:$4 sm:$0xff]   ;;  %v7747_v54 = vld [vmem:[#allocation14 + $0x160] ss:$28 sps:$4 sm:$0xff]  }
 0x443   :  { %v7751_v56 = vld [vmem:[#allocation14 + $0x168] ss:$28 sps:$4 sm:$0xff]  }
 0x445   :  { %5717 = vmatpush1.bf16.msra.mxu1 %v7687_v57  ;;  %5881 = vmatpush1.bf16.msra.mxu0 %v7690_v58  ;;  %v7754_v57 = vld [vmem:[#allocation14 + $0x19c] ss:$28 sps:$4 sm:$0xff]  }
 0x446   :  { %5718 = vmatprep.subr.bf16.mxu1 %v7695_v59  ;;  %5882 = vmatprep.subr.bf16.mxu0 %v7698_v61  ;;  %v7755_v58 = vld [vmem:[#allocation14 + $0x360] ss:$28 sps:$4 sm:$0xff]   ;;  %v7752_v59 = vld [vmem:[#allocation14 + $0x198] ss:$28 sps:$4 sm:$0xff]  }
 0x447   :  { %v7756_v61 = vld [vmem:[#allocation14 + $0x1a0] ss:$28 sps:$4 sm:$0xff]  }
 0x449   :  { %5719 = vmatpush1.bf16.msra.mxu1 %v7693_v25  ;;  %5883 = vmatpush1.bf16.msra.mxu0 %v7696_v1  ;;  %v7759_v25 = vld [vmem:[#allocation14 + $0x1d4] ss:$28 sps:$4 sm:$0xff]  }
 0x44a   :  { %5720 = vmatprep.subr.bf16.mxu1 %v7701_v3  ;;  %5884 = vmatprep.subr.bf16.mxu0 %v7704_v5  ;;  %v7760_v1 = vld [vmem:[#allocation14 + $0x558] ss:$28 sps:$4 sm:$0xff]   ;;  %v7757_v3 = vld [vmem:[#allocation14 + $0x1d0] ss:$28 sps:$4 sm:$0xff]  }
 0x44b   :  { %v7761_v5 = vld [vmem:[#allocation14 + $0x398] ss:$28 sps:$4 sm:$0xff]  }
 0x44d   :  { %5721 = vmatpush1.bf16.msra.mxu1 %v7699_v6  ;;  %5885 = vmatpush1.bf16.msra.mxu0 %v7702_v17  ;;  %v7764_v6 = vld [vmem:[#allocation14 + $0x20c] ss:$28 sps:$4 sm:$0xff]  }
 0x44e   :  { %5722 = vmatprep.subr.bf16.mxu1 %v7707_v12  ;;  %5886 = vmatprep.subr.bf16.mxu0 %v7710_v14  ;;  %v7765_v17 = vld [vmem:[#allocation14 + $0x590] ss:$28 sps:$4 sm:$0xff]   ;;  %v7769_v14 = vld [vmem:[#allocation14 + $0x244] ss:$28 sps:$4 sm:$0xff]  }
 0x44f   :  { %v7766_v12 = vld [vmem:[#allocation14 + $0x3d0] ss:$28 sps:$4 sm:$0xff]  }
 0x451   :  { %5723 = vmatpush1.bf16.msra.mxu1 %v7705_v18  ;;  %5887 = vmatpush1.bf16.msra.mxu0 %v7708_v19  ;;  %v7770_v18 = vld [vmem:[#allocation14 + $0x5c8] ss:$28 sps:$4 sm:$0xff]   ;;  %v7767_v19 = vld [vmem:[#allocation14 + $0x240] ss:$28 sps:$4 sm:$0xff]  }
 0x452   :  { %5724 = vmatprep.subr.bf16.mxu1 %v7713_v21  ;;  %5888 = vmatprep.subr.bf16.mxu0 %v7716_v22  ;;  %v7774_v21 = vld [vmem:[#allocation14 + $0x27c] ss:$28 sps:$4 sm:$0xff]  }
 0x453   :  { %v7775_v22 = vld [vmem:[#allocation14 + $0x600] ss:$28 sps:$4 sm:$0xff]  }
 0x455   :  { %5725 = vmatpush1.bf16.msra.mxu1 %v7711_v23  ;;  %5889 = vmatpush1.bf16.msra.mxu0 %v7714_v8  ;;  %v7772_v23 = vld [vmem:[#allocation14 + $0x278] ss:$28 sps:$4 sm:$0xff]   ;;  %v7776_v8 = vld [vmem:[#allocation14 + $0x440] ss:$28 sps:$4 sm:$0xff]  }
 0x456   :  { %5899 = vmatprep.subr.bf16.mxu1 %v7719_v55  ;;  %7040 = vmatprep.subr.bf16.mxu0 %v7720_v10  ;;  %v7780_v55 = vld [vmem:[#allocation14 + $0x638] ss:$28 sps:$4 sm:$0xff]   ;;  %v7777_v10 = vld [vmem:[#allocation14 + $0x2b0] ss:$28 sps:$4 sm:$0xff]  }
 0x458   :  { %5727 = vmatmul.mubr.bf16.vlgmr.msra.gmra.mrb[8].mxu1 %v8530_v24  ;;  %5891 = vmatmul.mubr.bf16.vlgmr.msra.gmra.mrb[20].mxu0 %v8530_v24 }
 0x459   :  { %5900 = vmatpush1.bf16.msra.mxu1 %v7717_v16  ;;  %5931 = vmatprep.mubr.bf16.mxu1 %v8482_v11  ;;  %v7781_v16 = vld [vmem:[#allocation14 + $0x478] ss:$28 sps:$4 sm:$0xff]  }
 0x45a   :  { %7041 = vmatpush3.bf16.msra.mxu0 %v7721_v41  ;;  %6095 = vmatprep.mubr.bf16.mxu0 %v8482_v11  ;;  %v7740_v11 = vld [vmem:[#allocation14 + $0x2b8] ss:$28 sps:$4 sm:$0xff]   ;;  %v7784_v41 = vld [vmem:[#allocation14 + $0x2ec] ss:$28 sps:$4 sm:$0xff]  }
 0x45b   :  { %5901 = vmatprep.subr.bf16.mxu1 %v7724_v60  ;;  %7042 = vmatprep.subr.bf16.mxu0 %v7725_v28  ;;  %v7785_v60 = vld [vmem:[#allocation14 + $0x670] ss:$28 sps:$4 sm:$0xff]   ;;  %v7782_v28 = vld [vmem:[#allocation14 + $0x2e8] ss:$28 sps:$4 sm:$0xff]  }
 0x45d   :  { %5902 = vmatpush1.bf16.msra.mxu1 %v7722_v29  ;;  %v7786_v29 = vld [vmem:[#allocation14 + $0x4b0] ss:$28 sps:$4 sm:$0xff]  }
 0x45e   :  { %7043 = vmatpush3.bf16.msra.mxu0 %v7726_v30  ;;  %5903 = vmatprep.subr.bf16.mxu1 %v7729_v31  ;;  %v7789_v30 = vld [vmem:[#allocation14 + $0x324] ss:$28 sps:$4 sm:$0xff]  }
 0x45f   :  { %7044 = vmatprep.subr.bf16.mxu0 %v7730_v32  ;;  %v7790_v31 = vld [vmem:[#allocation14 + $0x6a8] ss:$28 sps:$4 sm:$0xff]   ;;  %v7787_v32 = vld [vmem:[#allocation14 + $0x320] ss:$28 sps:$4 sm:$0xff]  }
 0x461   :  { %5904 = vmatpush1.bf16.msra.mxu1 %v7727_v33  ;;  %v7791_v33 = vld [vmem:[#allocation14 + $0x4e8] ss:$28 sps:$4 sm:$0xff]  }
 0x462   :  { %7045 = vmatpush3.bf16.msra.mxu0 %v7731_v34  ;;  %5905 = vmatprep.subr.bf16.mxu1 %v7734_v36  ;;  %v7794_v34 = vld [vmem:[#allocation14 + $0x35c] ss:$28 sps:$4 sm:$0xff]  }
 0x463   :  { %7046 = vmatprep.subr.bf16.mxu0 %v7735_v37  ;;  %v7795_v36 = vld [vmem:[#allocation14 + $0x6e0] ss:$28 sps:$4 sm:$0xff]   ;;  %v7792_v37 = vld [vmem:[#allocation14 + $0x358] ss:$28 sps:$4 sm:$0xff]  }
 0x465   :  { %5906 = vmatpush1.bf16.msra.mxu1 %v7732_v38  ;;  %v7796_v38 = vld [vmem:[#allocation14 + $0x520] ss:$28 sps:$4 sm:$0xff]  }
 0x466   :  { %7047 = vmatpush3.bf16.msra.mxu0 %v7736_v39  ;;  %5907 = vmatprep.subr.bf16.mxu1 %v7739_v42  ;;  %v7799_v39 = vld [vmem:[#allocation14 + $0x394] ss:$28 sps:$4 sm:$0xff]  }
 0x467   :  { %7048 = vmatprep.subr.bf16.mxu0 %v7740_v11  ;;  %v7800_v42 = vld [vmem:[#allocation14 + $0x8d8] ss:$28 sps:$4 sm:$0xff]   ;;  %v7797_v11 = vld [vmem:[#allocation14 + $0x390] ss:$28 sps:$4 sm:$0xff]  }
 0x469   :  { %5908 = vmatpush1.bf16.msra.mxu1 %v7737_v44  ;;  %v7801_v44 = vld [vmem:[#allocation14 + $0x718] ss:$28 sps:$4 sm:$0xff]  }
 0x46a   :  { %7049 = vmatpush3.bf16.msra.mxu0 %v7741_v45  ;;  %5909 = vmatprep.subr.bf16.mxu1 %v7744_v46  ;;  %v7804_v45 = vld [vmem:[#allocation14 + $0x3cc] ss:$28 sps:$4 sm:$0xff]  }
 0x46b   :  { %7050 = vmatprep.subr.bf16.mxu0 %v7745_v47  ;;  %v7805_v46 = vld [vmem:[#allocation14 + $0x910] ss:$28 sps:$4 sm:$0xff]   ;;  %v7802_v47 = vld [vmem:[#allocation14 + $0x3c8] ss:$28 sps:$4 sm:$0xff]  }
 0x46d   :  { %5910 = vmatpush1.bf16.msra.mxu1 %v7742_v48  ;;  %v7806_v48 = vld [vmem:[#allocation14 + $0x750] ss:$28 sps:$4 sm:$0xff]  }
 0x46e   :  { %7051 = vmatpush3.bf16.msra.mxu0 %v7746_v51  ;;  %5911 = vmatprep.subr.bf16.mxu1 %v7749_v0  ;;  %v7809_v51 = vld [vmem:[#allocation14 + $0x404] ss:$28 sps:$4 sm:$0xff]  }
 0x46f   :  { %7052 = vmatprep.subr.bf16.mxu0 %v7750_v52  ;;  %v7810_v0 = vld [vmem:[#allocation14 + $0x948] ss:$28 sps:$4 sm:$0xff]   ;;  %v7807_v52 = vld [vmem:[#allocation14 + $0x400] ss:$28 sps:$4 sm:$0xff]  }
 0x471   :  { %5912 = vmatpush1.bf16.msra.mxu1 %v7747_v54  ;;  %v7814_v54 = vld [vmem:[#allocation14 + $0x43c] ss:$28 sps:$4 sm:$0xff]  }
 0x472   :  { %7053 = vmatpush3.bf16.msra.mxu0 %v7751_v56  ;;  %5913 = vmatprep.subr.bf16.mxu1 %v7754_v57  ;;  %v7815_v56 = vld [vmem:[#allocation14 + $0x980] ss:$28 sps:$4 sm:$0xff]   ;;  %v7812_v57 = vld [vmem:[#allocation14 + $0x438] ss:$28 sps:$4 sm:$0xff]  }
 0x473   :  { %7054 = vmatprep.subr.bf16.mxu0 %v7755_v58  ;;  %v7819_v58 = vld [vmem:[#allocation14 + $0x474] ss:$28 sps:$4 sm:$0xff]  }
 0x475   :  { %5914 = vmatpush1.bf16.msra.mxu1 %v7752_v59  ;;  %v7820_v59 = vld [vmem:[#allocation14 + $0x9b8] ss:$28 sps:$4 sm:$0xff]  }
 0x476   :  { %7055 = vmatpush3.bf16.msra.mxu0 %v7756_v61  ;;  %5915 = vmatprep.subr.bf16.mxu1 %v7759_v25  ;;  %v7817_v61 = vld [vmem:[#allocation14 + $0x470] ss:$28 sps:$4 sm:$0xff]   ;;  %v7821_v25 = vld [vmem:[#allocation14 + $0x7f8] ss:$28 sps:$4 sm:$0xff]  }
 0x477   :  { %7062 = vmatprep.subr.bf16.mxu0 %v7760_v1  ;;  %v7824_v1 = vld [vmem:[#allocation14 + $0x4ac] ss:$28 sps:$4 sm:$0xff]  }
 0x479   :  { %6096 = vmatmul.mubr.bf16.vlgmr.msra.gmra.mrb[24].mxu0 %v8484_v15  ;;  %5916 = vmatpush1.bf16.msra.mxu1 %v7757_v3  ;;  %v7825_v3 = vld [vmem:[#allocation14 + $0x9f0] ss:$28 sps:$4 sm:$0xff]  }
 0x47a   :  { %7063 = vmatpush3.bf16.msra.mxu0 %v7761_v5  ;;  %6135 = vmatprep.mubr.bf16.mxu0 %v8488_v20  ;;  %v7822_v5 = vld [vmem:[#allocation14 + $0x4a8] ss:$28 sps:$4 sm:$0xff]  }
 0x47b   :  { %5917 = vmatprep.subr.bf16.mxu1 %v7764_v6  ;;  %7064 = vmatprep.subr.bf16.mxu0 %v7765_v17  ;;  %v7826_v6 = vld [vmem:[#allocation14 + $0x830] ss:$28 sps:$4 sm:$0xff]   ;;  %v7829_v17 = vld [vmem:[#allocation14 + $0x4e4] ss:$28 sps:$4 sm:$0xff]  }
 0x47d   :  { %5918 = vmatpush1.bf16.msra.mxu1 %v7762_v7  ;;  %v7830_v7 = vld [vmem:[#allocation14 + $0xa28] ss:$28 sps:$4 sm:$0xff]  }
 0x47e   :  { %7065 = vmatpush3.bf16.msra.mxu0 %v7766_v12  ;;  %5919 = vmatprep.subr.bf16.mxu1 %v7769_v14  ;;  %v7827_v12 = vld [vmem:[#allocation14 + $0x4e0] ss:$28 sps:$4 sm:$0xff]   ;;  %v7831_v14 = vld [vmem:[#allocation14 + $0x868] ss:$28 sps:$4 sm:$0xff]  }
 0x47f   :  { %7066 = vmatprep.subr.bf16.mxu0 %v7770_v18  ;;  %v7834_v18 = vld [vmem:[#allocation14 + $0x51c] ss:$28 sps:$4 sm:$0xff]  }
 0x481   :  { %5920 = vmatpush1.bf16.msra.mxu1 %v7767_v19  ;;  %v7835_v19 = vld [vmem:[#allocation14 + $0xa60] ss:$28 sps:$4 sm:$0xff]  }
 0x482   :  { %7067 = vmatpush3.bf16.msra.mxu0 %v7771_v49  ;;  %5921 = vmatprep.subr.bf16.mxu1 %v7774_v21  ;;  %v7832_v49 = vld [vmem:[#allocation14 + $0x518] ss:$28 sps:$4 sm:$0xff]   ;;  %v7836_v21 = vld [vmem:[#allocation14 + $0x8a0] ss:$28 sps:$4 sm:$0xff]  }
 0x483   :  { %7068 = vmatprep.subr.bf16.mxu0 %v7775_v22  ;;  %v7839_v22 = vld [vmem:[#allocation14 + $0x554] ss:$28 sps:$4 sm:$0xff]  }
 0x485   :  { %5922 = vmatpush1.bf16.msra.mxu1 %v7772_v23  ;;  %v7840_v23 = vld [vmem:[#allocation14 + $0xc58] ss:$28 sps:$4 sm:$0xff]  }
 0x486   :  { %7069 = vmatpush3.bf16.msra.mxu0 %v7776_v8  ;;  %5923 = vmatprep.subr.bf16.mxu1 %v7779_v9  ;;  %v7837_v8 = vld [vmem:[#allocation14 + $0x550] ss:$28 sps:$4 sm:$0xff]   ;;  %v7841_v9 = vld [vmem:[#allocation14 + $0xa98] ss:$28 sps:$4 sm:$0xff]  }
 0x487   :  { %7070 = vmatprep.subr.bf16.mxu0 %v7780_v55  ;;  %v7844_v55 = vld [vmem:[#allocation14 + $0x58c] ss:$28 sps:$4 sm:$0xff]  }
 0x489   :  { %5924 = vmatpush1.bf16.msra.mxu1 %v7777_v10  ;;  %v7845_v10 = vld [vmem:[#allocation14 + $0xc90] ss:$28 sps:$4 sm:$0xff]  }
 0x48a   :  { %7071 = vmatpush3.bf16.msra.mxu0 %v7781_v16  ;;  %5925 = vmatprep.subr.bf16.mxu1 %v7784_v41  ;;  %v7842_v16 = vld [vmem:[#allocation14 + $0x588] ss:$28 sps:$4 sm:$0xff]   ;;  %v7846_v41 = vld [vmem:[#allocation14 + $0xad0] ss:$28 sps:$4 sm:$0xff]  }
 0x48b   :  { %7072 = vmatprep.subr.bf16.mxu0 %v7785_v60  ;;  %v7849_v60 = vld [vmem:[#allocation14 + $0x5c4] ss:$28 sps:$4 sm:$0xff]  }
 0x48d   :  { %5926 = vmatpush1.bf16.msra.mxu1 %v7782_v28  ;;  %v7850_v28 = vld [vmem:[#allocation14 + $0xcc8] ss:$28 sps:$4 sm:$0xff]  }
 0x48e   :  { %7073 = vmatpush3.bf16.msra.mxu0 %v7786_v29  ;;  %5927 = vmatprep.subr.bf16.mxu1 %v7789_v30  ;;  %v7847_v29 = vld [vmem:[#allocation14 + $0x5c0] ss:$28 sps:$4 sm:$0xff]   ;;  %v7851_v30 = vld [vmem:[#allocation14 + $0xb08] ss:$28 sps:$4 sm:$0xff]  }
 0x48f   :  { %7074 = vmatprep.subr.bf16.mxu0 %v7790_v31  ;;  %v7854_v31 = vld [vmem:[#allocation14 + $0x5fc] ss:$28 sps:$4 sm:$0xff]  }
 0x491   :  { %5928 = vmatpush1.bf16.msra.mxu1 %v7787_v32  ;;  %v7855_v32 = vld [vmem:[#allocation14 + $0xd00] ss:$28 sps:$4 sm:$0xff]  }
 0x492   :  { %7075 = vmatpush3.bf16.msra.mxu0 %v7791_v33  ;;  %5929 = vmatprep.subr.bf16.mxu1 %v7794_v34  ;;  %v7852_v33 = vld [vmem:[#allocation14 + $0x5f8] ss:$28 sps:$4 sm:$0xff]   ;;  %v7856_v34 = vld [vmem:[#allocation14 + $0xb40] ss:$28 sps:$4 sm:$0xff]  }
 0x493   :  { %7076 = vmatprep.subr.bf16.mxu0 %v7795_v36  ;;  %v7859_v36 = vld [vmem:[#allocation14 + $0x634] ss:$28 sps:$4 sm:$0xff]  }
 0x495   :  { %5930 = vmatpush1.bf16.msra.mxu1 %v7792_v37  ;;  %v7860_v37 = vld [vmem:[#allocation14 + $0xd38] ss:$28 sps:$4 sm:$0xff]  }
 0x496   :  { %7077 = vmatpush3.bf16.msra.mxu0 %v7796_v38  ;;  %5940 = vmatprep.subr.bf16.mxu1 %v7799_v39  ;;  %v7857_v38 = vld [vmem:[#allocation14 + $0x630] ss:$28 sps:$4 sm:$0xff]   ;;  %v7861_v39 = vld [vmem:[#allocation14 + $0xb78] ss:$28 sps:$4 sm:$0xff]  }
 0x497   :  { %7084 = vmatprep.subr.bf16.mxu0 %v7800_v42  ;;  %v7864_v42 = vld [vmem:[#allocation14 + $0x66c] ss:$28 sps:$4 sm:$0xff]  }
 0x498   :  { %5932 = vmatmul.mubr.bf16.vlgmr.msra.gmra.mrb[12].mxu1 %v8484_v15  ;;  %v7811_v15 = vld [vmem:[#allocation14 + $0x788] ss:$28 sps:$4 sm:$0xff]  }
 0x499   :  { %6136 = vmatmul.mubr.bf16.vlgmr.msra.gmra.mrb[28].mxu0 %v8497_v27  ;;  %5941 = vmatpush1.bf16.msra.mxu1 %v7797_v11  ;;  %v7865_v11 = vld [vmem:[#allocation14 + $0xd70] ss:$28 sps:$4 sm:$0xff]  }
 0x49a   :  { %5972 = vmatprep.mubr.bf16.mxu1 %v8488_v20  ;;  %7085 = vmatpush3.bf16.msra.mxu0 %v7801_v44  ;;  %v7816_v20 = vld [vmem:[#allocation14 + $0x7c0] ss:$28 sps:$4 sm:$0xff]   ;;  %v7862_v44 = vld [vmem:[#allocation14 + $0x668] ss:$28 sps:$4 sm:$0xff]  }
 0x49b   :  { %6175 = vmatprep.mubr.bf16.mxu0 %v8513_v62  ;;  %5942 = vmatprep.subr.bf16.mxu1 %v7804_v45  ;;  %v7866_v45 = vld [vmem:[#allocation14 + $0xbb0] ss:$28 sps:$4 sm:$0xff]  }
 0x49c   :  { %7086 = vmatprep.subr.bf16.mxu0 %v7805_v46  ;;  %v7869_v46 = vld [vmem:[#allocation14 + $0x6a4] ss:$28 sps:$4 sm:$0xff]  }
 0x49d   :  { %5943 = vmatpush1.bf16.msra.mxu1 %v7802_v47  ;;  %v7870_v47 = vld [vmem:[#allocation14 + $0xda8] ss:$28 sps:$4 sm:$0xff]  }
 0x49e   :  { %7087 = vmatpush3.bf16.msra.mxu0 %v7806_v48  ;;  %5944 = vmatprep.subr.bf16.mxu1 %v7809_v51  ;;  %v7867_v48 = vld [vmem:[#allocation14 + $0x6a0] ss:$28 sps:$4 sm:$0xff]   ;;  %v7871_v51 = vld [vmem:[#allocation14 + $0xbe8] ss:$28 sps:$4 sm:$0xff]  }
 0x49f   :  { %7088 = vmatprep.subr.bf16.mxu0 %v7810_v0  ;;  %v7874_v0 = vld [vmem:[#allocation14 + $0x6dc] ss:$28 sps:$4 sm:$0xff]  }
 0x4a1   :  { %5945 = vmatpush1.bf16.msra.mxu1 %v7807_v52  ;;  %v7875_v52 = vld [vmem:[#allocation14 + $0xde0] ss:$28 sps:$4 sm:$0xff]  }
 0x4a2   :  { %7089 = vmatpush3.bf16.msra.mxu0 %v7811_v15  ;;  %5946 = vmatprep.subr.bf16.mxu1 %v7814_v54  ;;  %v7872_v15 = vld [vmem:[#allocation14 + $0x6d8] ss:$28 sps:$4 sm:$0xff]   ;;  %v7876_v54 = vld [vmem:[#allocation14 + $0xc20] ss:$28 sps:$4 sm:$0xff]  }
 0x4a3   :  { %7090 = vmatprep.subr.bf16.mxu0 %v7815_v56  ;;  %v7879_v56 = vld [vmem:[#allocation14 + $0x714] ss:$28 sps:$4 sm:$0xff]  }
 0x4a5   :  { %5947 = vmatpush1.bf16.msra.mxu1 %v7812_v57  ;;  %v7877_v57 = vld [vmem:[#allocation14 + $0x710] ss:$28 sps:$4 sm:$0xff]  }
 0x4a6   :  { %7091 = vmatpush3.bf16.msra.mxu0 %v7816_v20  ;;  %5948 = vmatprep.subr.bf16.mxu1 %v7819_v58  ;;  %v7882_v20 = vld [vmem:[#allocation14 + $0x74c] ss:$28 sps:$4 sm:$0xff]  }
 0x4a7   :  { %7092 = vmatprep.subr.bf16.mxu0 %v7820_v59  ;;  %v7880_v58 = vld [vmem:[#allocation14 + $0x748] ss:$28 sps:$4 sm:$0xff]  }
 0x4a8   :  { %v7885_v59 = vld [vmem:[#allocation14 + $0x784] ss:$28 sps:$4 sm:$0xff]  }
 0x4a9   :  { %5949 = vmatpush1.bf16.msra.mxu1 %v7817_v61  ;;  %v7883_v61 = vld [vmem:[#allocation14 + $0x780] ss:$28 sps:$4 sm:$0xff]  }
 0x4aa   :  { %7093 = vmatpush3.bf16.msra.mxu0 %v7821_v25  ;;  %5950 = vmatprep.subr.bf16.mxu1 %v7824_v1  ;;  %v7888_v25 = vld [vmem:[#allocation14 + $0x7bc] ss:$28 sps:$4 sm:$0xff]  }
 0x4ab   :  { %7094 = vmatprep.subr.bf16.mxu0 %v7825_v3  ;;  %v7886_v1 = vld [vmem:[#allocation14 + $0x7b8] ss:$28 sps:$4 sm:$0xff]  }
 0x4ac   :  { %v7891_v3 = vld [vmem:[#allocation14 + $0x7f4] ss:$28 sps:$4 sm:$0xff]  }
 0x4ad   :  { %5951 = vmatpush1.bf16.msra.mxu1 %v7822_v5  ;;  %v7889_v5 = vld [vmem:[#allocation14 + $0x7f0] ss:$28 sps:$4 sm:$0xff]  }
 0x4ae   :  { %7095 = vmatpush3.bf16.msra.mxu0 %v7826_v6  ;;  %5952 = vmatprep.subr.bf16.mxu1 %v7829_v17  ;;  %v7892_v6 = vld [vmem:[#allocation14 + $0x828] ss:$28 sps:$4 sm:$0xff]  }
 0x4af   :  { %7096 = vmatprep.subr.bf16.mxu0 %v7830_v7  ;;  %v7897_v17 = vld [vmem:[#allocation14 + $0x864] ss:$28 sps:$4 sm:$0xff]   ;;  %v7900_v7 = vld [vmem:[#allocation14 + $0x89c] ss:$28 sps:$4 sm:$0xff]  }
 0x4b1   :  { %5953 = vmatpush1.bf16.msra.mxu1 %v7827_v12  ;;  %v7898_v12 = vld [vmem:[#allocation14 + $0x898] ss:$28 sps:$4 sm:$0xff]  }
 0x4b2   :  { %7097 = vmatpush3.bf16.msra.mxu0 %v7831_v14  ;;  %5954 = vmatprep.subr.bf16.mxu1 %v7834_v18  ;;  %v7903_v14 = vld [vmem:[#allocation14 + $0x8d4] ss:$28 sps:$4 sm:$0xff]  }
 0x4b3   :  { %7098 = vmatprep.subr.bf16.mxu0 %v7835_v19  ;;  %v7901_v18 = vld [vmem:[#allocation14 + $0x8d0] ss:$28 sps:$4 sm:$0xff]  }
 0x4b4   :  { %v7906_v19 = vld [vmem:[#allocation14 + $0x90c] ss:$28 sps:$4 sm:$0xff]  }
 0x4b5   :  { %5955 = vmatpush1.bf16.msra.mxu1 %v7832_v49  ;;  %v7904_v49 = vld [vmem:[#allocation14 + $0x908] ss:$28 sps:$4 sm:$0xff]  }
 0x4b6   :  { %7099 = vmatpush3.bf16.msra.mxu0 %v7836_v21  ;;  %5956 = vmatprep.subr.bf16.mxu1 %v7839_v22  ;;  %v7909_v21 = vld [vmem:[#allocation14 + $0x944] ss:$28 sps:$4 sm:$0xff]  }
 0x4b7   :  { %7106 = vmatprep.subr.bf16.mxu0 %v7840_v23  ;;  %v7907_v22 = vld [vmem:[#allocation14 + $0x940] ss:$28 sps:$4 sm:$0xff]  }
 0x4b8   :  { %v7912_v23 = vld [vmem:[#allocation14 + $0x97c] ss:$28 sps:$4 sm:$0xff]  }
 0x4b9   :  { %6176 = vmatmul.mubr.bf16.vlgmr.msra.gmra.mrb[32].mxu0 %v8515_v63  ;;  %5957 = vmatpush1.bf16.msra.mxu1 %v7837_v8  ;;  %v7910_v8 = vld [vmem:[#allocation14 + $0x978] ss:$28 sps:$4 sm:$0xff]  }
 0x4ba   :  { %7107 = vmatpush3.bf16.msra.mxu0 %v7841_v9  ;;  %6215 = vmatprep.mubr.bf16.mxu0 %v8519_v4  ;;  %v7915_v9 = vld [vmem:[#allocation14 + $0x9b4] ss:$28 sps:$4 sm:$0xff]  }
 0x4bb   :  { %5958 = vmatprep.subr.bf16.mxu1 %v7844_v55  ;;  %7108 = vmatprep.subr.bf16.mxu0 %v7845_v10  ;;  %v7913_v55 = vld [vmem:[#allocation14 + $0x9b0] ss:$28 sps:$4 sm:$0xff]  }
 0x4bc   :  { %v7918_v10 = vld [vmem:[#allocation14 + $0x9ec] ss:$28 sps:$4 sm:$0xff]  }
 0x4bd   :  { %5959 = vmatpush1.bf16.msra.mxu1 %v7842_v16  ;;  %v7916_v16 = vld [vmem:[#allocation14 + $0x9e8] ss:$28 sps:$4 sm:$0xff]  }
 0x4be   :  { %7109 = vmatpush3.bf16.msra.mxu0 %v7846_v41  ;;  %5960 = vmatprep.subr.bf16.mxu1 %v7849_v60  ;;  %v7921_v41 = vld [vmem:[#allocation14 + $0xa24] ss:$28 sps:$4 sm:$0xff]  }
 0x4bf   :  { %7110 = vmatprep.subr.bf16.mxu0 %v7850_v28  ;;  %v7919_v60 = vld [vmem:[#allocation14 + $0xa20] ss:$28 sps:$4 sm:$0xff]  }
 0x4c0   :  { %v7924_v28 = vld [vmem:[#allocation14 + $0xa5c] ss:$28 sps:$4 sm:$0xff]  }
 0x4c1   :  { %5961 = vmatpush1.bf16.msra.mxu1 %v7847_v29  ;;  %v7922_v29 = vld [vmem:[#allocation14 + $0xa58] ss:$28 sps:$4 sm:$0xff]  }
 0x4c2   :  { %7111 = vmatpush3.bf16.msra.mxu0 %v7851_v30  ;;  %5962 = vmatprep.subr.bf16.mxu1 %v7854_v31  ;;  %v7927_v30 = vld [vmem:[#allocation14 + $0xa94] ss:$28 sps:$4 sm:$0xff]  }
 0x4c3   :  { %7112 = vmatprep.subr.bf16.mxu0 %v7855_v32  ;;  %v7925_v31 = vld [vmem:[#allocation14 + $0xa90] ss:$28 sps:$4 sm:$0xff]  }
 0x4c4   :  { %v7930_v32 = vld [vmem:[#allocation14 + $0xacc] ss:$28 sps:$4 sm:$0xff]  }
 0x4c5   :  { %5963 = vmatpush1.bf16.msra.mxu1 %v7852_v33  ;;  %v7928_v33 = vld [vmem:[#allocation14 + $0xac8] ss:$28 sps:$4 sm:$0xff]  }
 0x4c6   :  { %7113 = vmatpush3.bf16.msra.mxu0 %v7856_v34  ;;  %5964 = vmatprep.subr.bf16.mxu1 %v7859_v36  ;;  %v7933_v34 = vld [vmem:[#allocation14 + $0xb04] ss:$28 sps:$4 sm:$0xff]  }
 0x4c7   :  { %7114 = vmatprep.subr.bf16.mxu0 %v7860_v37  ;;  %v7931_v36 = vld [vmem:[#allocation14 + $0xb00] ss:$28 sps:$4 sm:$0xff]  }
 0x4c8   :  { %v7936_v37 = vld [vmem:[#allocation14 + $0xb3c] ss:$28 sps:$4 sm:$0xff]  }
 0x4c9   :  { %5965 = vmatpush1.bf16.msra.mxu1 %v7857_v38  ;;  %v7934_v38 = vld [vmem:[#allocation14 + $0xb38] ss:$28 sps:$4 sm:$0xff]  }
 0x4ca   :  { %7115 = vmatpush3.bf16.msra.mxu0 %v7861_v39  ;;  %5966 = vmatprep.subr.bf16.mxu1 %v7864_v42  ;;  %v7939_v39 = vld [vmem:[#allocation14 + $0xb74] ss:$28 sps:$4 sm:$0xff]  }
 0x4cb   :  { %7116 = vmatprep.subr.bf16.mxu0 %v7865_v11  ;;  %v7937_v42 = vld [vmem:[#allocation14 + $0xb70] ss:$28 sps:$4 sm:$0xff]   ;;  %v8549_v11 = vld [vmem:[#allocation16] sm:$0xff] }
 0x4cd   :  { %5967 = vmatpush1.bf16.msra.mxu1 %v7862_v44  ;;  %v3243_v44 = vrot.slane %v8549_v11, %v8447_v50 }
 0x4ce   :  { %7117 = vmatpush3.bf16.msra.mxu0 %v7866_v45  ;;  %5968 = vmatprep.subr.bf16.mxu1 %v7869_v46  ;;  %v3239_v45 = vrot.slane %v8549_v11, %v8402_v43  ;;  %v3247_v46 = vrot.slane %v8549_v11, %v8450_v53  ;;  %v7948_v53 = vld [vmem:[#allocation14 + $0xc1c] ss:$28 sps:$4 sm:$0xff]  }
 0x4cf   :  { %7118 = vmatprep.subr.bf16.mxu0 %v7870_v47  ;;  %v7940_v47 = vld [vmem:[#allocation14 + $0xba8] ss:$28 sps:$4 sm:$0xff]  }
 0x4d1   :  { %5969 = vmatpush1.bf16.msra.mxu1 %v7867_v48  ;;  %v7945_v48 = vld [vmem:[#allocation14 + $0xbe4] ss:$28 sps:$4 sm:$0xff]  }
 0x4d2   :  { %7119 = vmatpush3.bf16.msra.mxu0 %v7871_v51  ;;  %5970 = vmatprep.subr.bf16.mxu1 %v7874_v0 }
 0x4d3   :  { %7120 = vmatprep.subr.bf16.mxu0 %v7875_v52 }
 0x4d5   :  { %5971 = vmatpush1.bf16.msra.mxu1 %v7872_v15 }
 0x4d6   :  { %7121 = vmatpush3.bf16.msra.mxu0 %v7876_v54  ;;  %5981 = vmatprep.subr.bf16.mxu1 %v7879_v56 }
 0x4d8   :  { %5973 = vmatmul.mubr.bf16.vlgmr.msra.gmra.mrb[12].mxu1 %v8497_v27  ;;  %v7894_v27 = vld [vmem:[#allocation14 + $0x82c] ss:$28 sps:$4 sm:$0xff]  }
 0x4d9   :  { %6216 = vmatmul.mubr.bf16.vlgmr.msra.gmra.mrb[36].mxu0 %v8530_v24  ;;  %5982 = vmatpush1.bf16.msra.mxu1 %v7877_v57 }
 0x4da   :  { %6013 = vmatprep.mubr.bf16.mxu1 %v8513_v62  ;;  %5983 = vmatprep.subr.bf16.mxu1 %v7882_v20  ;;  %v7895_v62 = vld [vmem:[#allocation14 + $0x860] ss:$28 sps:$4 sm:$0xff]  }
 0x4dd   :  { %5984 = vmatpush1.bf16.msra.mxu1 %v7880_v58  ;;  %v7943_v58 = vld [vmem:[#allocation14 + $0xbe0] ss:$28 sps:$4 sm:$0xff]  }
 0x4de   :  { %5985 = vmatprep.subr.bf16.mxu1 %v7885_v59 }
 0x4e1   :  { %5986 = vmatpush1.bf16.msra.mxu1 %v7883_v61  ;;  %v7946_v61 = vld [vmem:[#allocation14 + $0xc18] ss:$28 sps:$4 sm:$0xff]  }
 0x4e2   :  { %5987 = vmatprep.subr.bf16.mxu1 %v7888_v25  ;;  %v7951_v25 = vld [vmem:[#allocation14 + $0xc54] ss:$28 sps:$4 sm:$0xff]  }
 0x4e5   :  { %5988 = vmatpush1.bf16.msra.mxu1 %v7886_v1  ;;  %v7949_v1 = vld [vmem:[#allocation14 + $0xc50] ss:$28 sps:$4 sm:$0xff]  }
 0x4e6   :  { %5989 = vmatprep.subr.bf16.mxu1 %v7891_v3  ;;  %v7954_v3 = vld [vmem:[#allocation14 + $0xc8c] ss:$28 sps:$4 sm:$0xff]  }
 0x4e9   :  { %5990 = vmatpush1.bf16.msra.mxu1 %v7889_v5 }
 0x4ea   :  { %5991 = vmatprep.subr.bf16.mxu1 %v7894_v27 }
 0x4ed   :  { %5992 = vmatpush1.bf16.msra.mxu1 %v7892_v6  ;;  %v7952_v6 = vld [vmem:[#allocation14 + $0xc88] ss:$28 sps:$4 sm:$0xff]  }
 0x4ee   :  { %5993 = vmatprep.subr.bf16.mxu1 %v7897_v17 }
 0x4f1   :  { %5994 = vmatpush1.bf16.msra.mxu1 %v7895_v62  ;;  %v7957_v62 = vld [vmem:[#allocation14 + $0xcc4] ss:$28 sps:$4 sm:$0xff]  }
 0x4f2   :  { %5995 = vmatprep.subr.bf16.mxu1 %v7900_v7 }
 0x4f5   :  { %5996 = vmatpush1.bf16.msra.mxu1 %v7898_v12  ;;  %v7955_v12 = vld [vmem:[#allocation14 + $0xcc0] ss:$28 sps:$4 sm:$0xff]  }
 0x4f6   :  { %5997 = vmatprep.subr.bf16.mxu1 %v7903_v14  ;;  %v7960_v14 = vld [vmem:[#allocation14 + $0xcfc] ss:$28 sps:$4 sm:$0xff]  }
 0x4f9   :  { %5998 = vmatpush1.bf16.msra.mxu1 %v7901_v18  ;;  %v7958_v18 = vld [vmem:[#allocation14 + $0xcf8] ss:$28 sps:$4 sm:$0xff]  }
 0x4fa   :  { %5999 = vmatprep.subr.bf16.mxu1 %v7906_v19  ;;  %v7963_v19 = vld [vmem:[#allocation14 + $0xd34] ss:$28 sps:$4 sm:$0xff]  }
 0x4fd   :  { %6000 = vmatpush1.bf16.msra.mxu1 %v7904_v49  ;;  %v7961_v49 = vld [vmem:[#allocation14 + $0xd30] ss:$28 sps:$4 sm:$0xff]  }
 0x4fe   :  { %6001 = vmatprep.subr.bf16.mxu1 %v7909_v21  ;;  %v7966_v21 = vld [vmem:[#allocation14 + $0xd6c] ss:$28 sps:$4 sm:$0xff]  }
 0x501   :  { %6002 = vmatpush1.bf16.msra.mxu1 %v7907_v22  ;;  %v7964_v22 = vld [vmem:[#allocation14 + $0xd68] ss:$28 sps:$4 sm:$0xff]  }
 0x502   :  { %6003 = vmatprep.subr.bf16.mxu1 %v7912_v23  ;;  %v7969_v23 = vld [vmem:[#allocation14 + $0xda4] ss:$28 sps:$4 sm:$0xff]  }
 0x505   :  { %6004 = vmatpush1.bf16.msra.mxu1 %v7910_v8 }
 0x506   :  { %6005 = vmatprep.subr.bf16.mxu1 %v7915_v9 }
 0x509   :  { %6006 = vmatpush1.bf16.msra.mxu1 %v7913_v55  ;;  %v7967_v55 = vld [vmem:[#allocation14 + $0xda0] ss:$28 sps:$4 sm:$0xff]  }
 0x50a   :  { %6007 = vmatprep.subr.bf16.mxu1 %v7918_v10 }
 0x50d   :  { %6008 = vmatpush1.bf16.msra.mxu1 %v7916_v16 }
 0x50e   :  { %6009 = vmatprep.subr.bf16.mxu1 %v7921_v41  ;;  %v7972_v41 = vld [vmem:[#allocation14 + $0xddc] ss:$28 sps:$4 sm:$0xff]  }
 0x511   :  { %6010 = vmatpush1.bf16.msra.mxu1 %v7919_v60 }
 0x512   :  { %6011 = vmatprep.subr.bf16.mxu1 %v7924_v28  ;;  %v7970_v28 = vld [vmem:[#allocation14 + $0xdd8] ss:$28 sps:$4 sm:$0xff]  }
 0x515   :  { %6012 = vmatpush1.bf16.msra.mxu1 %v7922_v29  ;;  %v3259_v29 = vrot.slane %v8549_v11, %v1080_v2 }
 0x516   :  { %6022 = vmatprep.subr.bf16.mxu1 %v7927_v30 }
 0x518   :  { %6014 = vmatmul.mubr.bf16.vlgmr.msra.gmra.mrb[12].mxu1 %v8515_v63  ;;  %v7942_v63 = vld [vmem:[#allocation14 + $0xbac] ss:$28 sps:$4 sm:$0xff]  }
 0x519   :  { %6023 = vmatpush1.bf16.msra.mxu1 %v7925_v31  ;;  %6054 = vmatprep.mubr.bf16.mxu1 %v8519_v4  ;;  %v3235_v4 = vrot.slane %v8549_v11, %v8399_v40 }
 0x51a   :  { %6024 = vmatprep.subr.bf16.mxu1 %v7930_v32 }
 0x51d   :  { %6025 = vmatpush1.bf16.msra.mxu1 %v7928_v33 }
 0x51e   :  { %6026 = vmatprep.subr.bf16.mxu1 %v7933_v34 }
 0x521   :  { %6027 = vmatpush1.bf16.msra.mxu1 %v7931_v36 }
 0x522   :  { %6028 = vmatprep.subr.bf16.mxu1 %v7936_v37 }
 0x525   :  { %6029 = vmatpush1.bf16.msra.mxu1 %v7934_v38 }
 0x526   :  { %6030 = vmatprep.subr.bf16.mxu1 %v7939_v39 }
 0x529   :  { %6031 = vmatpush1.bf16.msra.mxu1 %v7937_v42 }
 0x52a   :  { %6032 = vmatprep.subr.bf16.mxu1 %v7942_v63 }
 0x52b   :  { %v5728_v51 = vpop.f32.mrb[8].mxu1  ;;  %v5892_v0 = vpop.f32.mrb[20].mxu0 }
 0x52c   :  { %v7136_v52 = vadd.f32 %v5728_v51, %v3235_v4  ;;  %v7138_v15 = vadd.f32 %v5892_v0, %v3243_v44  ;;  %v5730_v54 = vpop.f32.mrb[9].mxu1  ;;  %v5894_v56 = vpop.f32.mrb[21].mxu0  ;;  %v3251_v0 = vrot.slane %v8549_v11, %v1072_v13 }
 0x52d   :  { %v7137_v40 = vadd.f32 %v5730_v54, %v3239_v45  ;;  %v7139_v57 = vadd.f32 %v5894_v56, %v3247_v46  ;;  %v5732_v20 = vpop.f32.mrb[10].mxu1  ;;  %v5896_v50 = vpop.f32.mrb[22].mxu0  ;;  %6033 = vmatpush1.bf16.msra.mxu1 %v7940_v47 }
 0x52e   :  { %7973 = vtanh.f32 %v7136_v52  ;;  %v5733_v43 = vpop.f32.mrb[11].mxu1  ;;  %v5897_v59 = vpop.f32.mrb[23].mxu0  ;;  %6034 = vmatprep.subr.bf16.mxu1 %v7945_v48  ;;  %v3255_v52 = vrot.slane %v8549_v11, %v1076_v26 }
 0x52f   :  { %7975 = vtanh.f32 %v7138_v15 }
 0x530   :  { %7977 = vtanh.f32 %v7137_v40 }
 0x531   :  { %7979 = vtanh.f32 %v7139_v57  ;;  %6035 = vmatpush1.bf16.msra.mxu1 %v7943_v58 }
 0x532   :  { %6036 = vmatprep.subr.bf16.mxu1 %v7948_v53 }
 0x535   :  { %6037 = vmatpush1.bf16.msra.mxu1 %v7946_v61 }
 0x536   :  { %6038 = vmatprep.subr.bf16.mxu1 %v7951_v25 }
 0x538   :  { %v7974_v5 = vpop.eup %7973 }
 0x539   :  { %v7976_v27 = vpop.eup %7975  ;;  %6230 = vst [vmem:[#allocation17] sm:$0xff] %v7974_v5  ;;  %6039 = vmatpush1.bf16.msra.mxu1 %v7949_v1 }
 0x53a   :  { %v7978_v17 = vpop.eup %7977  ;;  %6232 = vst [vmem:[#allocation17 + $0x10] sm:$0xff] %v7976_v27  ;;  %6040 = vmatprep.subr.bf16.mxu1 %v7954_v3 }
 0x53b   :  { %v7980_v7 = vpop.eup %7979  ;;  %6231 = vst [vmem:[#allocation17 + $0x8] sm:$0xff] %v7978_v17 }
 0x53c   :  { %6233 = vst [vmem:[#allocation17 + $0x18] sm:$0xff] %v7980_v7 }
 0x53d   :  { %6041 = vmatpush1.bf16.msra.mxu1 %v7952_v6 }
 0x53e   :  { %6042 = vmatprep.subr.bf16.mxu1 %v7957_v62 }
 0x541   :  { %6043 = vmatpush1.bf16.msra.mxu1 %v7955_v12 }
 0x542   :  { %6044 = vmatprep.subr.bf16.mxu1 %v7960_v14 }
 0x545   :  { %6045 = vmatpush1.bf16.msra.mxu1 %v7958_v18 }
 0x546   :  { %6046 = vmatprep.subr.bf16.mxu1 %v7963_v19 }
 0x549   :  { %6047 = vmatpush1.bf16.msra.mxu1 %v7961_v49 }
 0x54a   :  { %6048 = vmatprep.subr.bf16.mxu1 %v7966_v21 }
 0x54c   :  { %v7056_v8 = vpop.f32.mrb[24].mxu0 }
 0x54d   :  { %v7057_v9 = vpop.f32.mrb[25].mxu0  ;;  %6049 = vmatpush1.bf16.msra.mxu1 %v7964_v22 }
 0x54e   :  { %v7058_v10 = vadd.f32 %v7057_v9, %v7056_v8  ;;  %v7059_v16 = vpop.f32.mrb[26].mxu0  ;;  %6050 = vmatprep.subr.bf16.mxu1 %v7969_v23 }
 0x54f   :  { %v7060_v60 = vpop.f32.mrb[27].mxu0 }
 0x550   :  { %v6098_v32 = vadd.f32 %v7058_v10, %v3259_v29 }
 0x551   :  { %6051 = vmatpush1.bf16.msra.mxu1 %v7967_v55 }
 0x552   :  { %6052 = vmatprep.subr.bf16.mxu1 %v7972_v41 }
 0x555   :  { %6053 = vmatpush1.bf16.msra.mxu1 %v7970_v28 }
 0x558   :  { %6055 = vmatmul.mubr.bf16.vlgmr.msra.gmra.mrb[12].mxu1 %v8530_v24 }
 0x56c   :  { %v7078_v30 = vpop.f32.mrb[28].mxu0 }
 0x56d   :  { %v7079_v31 = vpop.f32.mrb[29].mxu0 }
 0x56e   :  { %v7080_v33 = vadd.f32 %v7079_v31, %v7078_v30  ;;  %v7081_v34 = vpop.f32.mrb[30].mxu0 }
 0x56f   :  { %v7082_v36 = vpop.f32.mrb[31].mxu0 }
 0x570   :  { %v6138_v37 = vadd.f32 %v7080_v33, %v6098_v32 }
 0x58c   :  { %v7100_v38 = vpop.f32.mrb[32].mxu0 }
 0x58d   :  { %v7101_v39 = vpop.f32.mrb[33].mxu0 }
 0x58e   :  { %v7102_v42 = vadd.f32 %v7101_v39, %v7100_v38  ;;  %v7103_v63 = vpop.f32.mrb[34].mxu0 }
 0x58f   :  { %v7104_v4 = vpop.f32.mrb[35].mxu0 }
 0x590   :  { %v6178_v44 = vadd.f32 %v7102_v42, %v6138_v37 }
 0x5ac   :  { %v7122_v45 = vpop.f32.mrb[36].mxu0 }
 0x5ad   :  { %v7123_v46 = vpop.f32.mrb[37].mxu0 }
 0x5ae   :  { %v7124_v24 = vadd.f32 %v7123_v46, %v7122_v45  ;;  %v7125_v47 = vpop.f32.mrb[38].mxu0 }
 0x5af   :  { %v7126_v48 = vpop.f32.mrb[39].mxu0 }
 0x5b0   :  { %v6218_v51 = vadd.f32 %v7124_v24, %v6178_v44 }
 0x5b2   :  { %7981 = vtanh.f32 %v6218_v51 }
 0x5bc   :  { %v7982_v2 = vpop.eup %7981 }
 0x5bd   :  { %6236 = vst [vmem:[#allocation17 + $0x30] sm:$0xff] %v7982_v2 }
 0x62b   :  { %v6056_v15 = vpop.f32.mrb[12].mxu1 }
 0x62c   :  { %v7140_v54 = vadd.f32 %v6056_v15, %v3251_v0  ;;  %v6058_v56 = vpop.f32.mrb[13].mxu1 }
 0x62d   :  { %v7141_v40 = vadd.f32 %v6058_v56, %v3255_v52  ;;  %v6060_v57 = vpop.f32.mrb[14].mxu1 }
 0x62e   :  { %7983 = vtanh.f32 %v7140_v54  ;;  %v6061_v20 = vpop.f32.mrb[15].mxu1 }
 0x62f   :  { %7985 = vtanh.f32 %v7141_v40 }
 0x638   :  { %v7984_v50 = vpop.eup %7983 }
 0x639   :  { %v7986_v58 = vpop.eup %7985  ;;  %6234 = vst [vmem:[#allocation17 + $0x20] sm:$0xff] %v7984_v50 }
 0x63a   :  { %6235 = vst [vmem:[#allocation17 + $0x28] sm:$0xff] %v7986_v58 }
 0x63b   :  { %8196 = shalt.err (!%p8193_p6)
}
 0x63c   :  { %s8197_s22 = scalar_lea.hbm %s8590_s9, 896 }
 0x63d   :  { %p8198_p7 = scmp.ne.s32.totalorder %s8590_s9, %s8197_s22  ;;  %p8201_p8 = scmp.lt.u32.totalorder %s8197_s22, %s8590_s9 }
 0x63f   :  { %p8203_p9 = pnand %p8201_p8, %p8198_p7 }
 0x641   :  { %8206 = shalt.err (!%p8203_p9)
}
 0x642   :  { %6246 = dma.vmem_to_hbm [thread:$0]  %s6244_s24, 896, %s8590_s9, [#allocation4]  }
 0x643   :  { %8217 = dma.done.wait [#allocation4], 896  }
 0x644   :  { %8218 = vsyncadd [#allocation4], 4294966400 }
 0x645   :  { %6250 = vsyncpa [#allocation3], 1 }
 0x646   :  { %6251 = vsyncpa [#allocation6], 1 }
 0x647   :  { %6252 = vsyncpa [#allocation9], 1 }
 0x648   :  { %6253 = vsyncpa [#allocation12], 1 }
 0x649   :  { %6254 = vsyncpa [#allocation15], 1 }
 0x64a   :  { %6255 = vsyncpa [#allocation4], 1 }

</bundles_post_ra>
